<compile_context>
chip_gen: v6e
topology: v6e:2x2x1
jax: 0.10.0
libtpu: 0.0.40
codegen_flags: <defaults>
</compile_context>

<pallas_src>
import functools

import jax
import jax.numpy as jnp
from jax.experimental import pallas as pl
from jax.experimental.pallas import tpu as pltpu


# ------------------------------- configuration ------------------------------ #

VOCAB_SIZE = 1000
HIDDEN = 128            # lane-dense (multiple of 128)
NUM_LAYERS = 2
NUM_HEADS = 4
HEAD_DIM = HIDDEN // NUM_HEADS
INTERMEDIATE = 512
MAX_POS = 128
TYPE_VOCAB = 2
NUM_LABELS = 2
BATCH = 2
SEQ = 128

LOGIT_LANES = 128              # classifier output padded to a lane-dense 128-wide slab
WEIGHT_DTYPE = jnp.bfloat16    # MXU-native operand dtype on v5e/v6e/v7x
LN_EPS = 1e-12

# Scoped VMEM budget: 32 MiB is safe on every generation (v5e/v6e physical 128 MiB,
# v7x physical 64 MiB).  Per-grid-step footprint here is < 2 MiB.
VMEM_LIMIT = 32 * 1024 * 1024


# ------------------------------ in-kernel helpers --------------------------- #

def _gelu(x):
    # TODO(synk): reference BERT uses erf-based GELU; tanh approximation kept for Mosaic
    # portability across TPU generations.
    return 0.5 * x * (1.0 + jnp.tanh(0.7978845608028654 * (x + 0.044715 * x * x * x)))


def _layernorm(x, g, b, eps):
    mean = jnp.mean(x, axis=-1, keepdims=True)
    xc = x - mean
    var = jnp.mean(xc * xc, axis=-1, keepdims=True)
    return xc * jax.lax.rsqrt(var + eps) * g + b


# ----------------------------- fused encoder kernel -------------------------- #

def _encoder_kernel(x_emb_ref, mask_ref, emb_g_ref, emb_b_ref,
                    qkv_w_ref, qkv_b_ref, o_w_ref, o_b_ref,
                    ln1_g_ref, ln1_b_ref,
                    i_w_ref, i_b_ref, f_w_ref, f_b_ref,
                    ln2_g_ref, ln2_b_ref,
                    pool_w_ref, pool_b_ref, cls_w_ref, cls_b_ref,
                    logits_ref, x_sc,
                    *, hidden, num_heads, head_dim, scale, eps):
    """One grid step = one (batch element, layer).  Activations carried in x_sc (f32 VMEM)."""
    layer = pl.program_id(1)

    # ---- layer-0 prologue: embedding LayerNorm straight into the carried activation.
    @pl.when(layer == 0)
    def _():
        x_sc[...] = _layernorm(x_emb_ref[...].astype(jnp.float32),
                               emb_g_ref[...], emb_b_ref[...], eps)

    x = x_sc[...]                                   # (S, H) f32, post previous LN
    x_bf = x.astype(jnp.bfloat16)

    # ---- fused QKV projection: one (S, H) @ (H, 3H) matmul, full 384-lane output.
    qkv = jnp.dot(x_bf, qkv_w_ref[...], preferred_element_type=jnp.float32)
    qkv = qkv + qkv_b_ref[...]                      # (S, 3H) f32
    qkv_bf = qkv.astype(jnp.bfloat16)

    mask = mask_ref[...]                            # (1, S) additive f32 (key padding mask)

    # ---- multi-head self-attention; heads sliced statically along lanes (no transposes).
    ctx_heads = []
    for h in range(num_heads):
        lo = h * head_dim
        q_h = qkv_bf[:, lo:lo + head_dim]                               # (S, Dh)
        k_h = qkv_bf[:, hidden + lo:hidden + lo + head_dim]             # (S, Dh)
        v_h = qkv_bf[:, 2 * hidden + lo:2 * hidden + lo + head_dim]     # (S, Dh)
        s = jax.lax.dot_general(q_h, k_h, (((1,), (1,)), ((), ())),
                                preferred_element_type=jnp.float32) * scale
        s = s + mask
        s = s - jnp.max(s, axis=-1, keepdims=True)
        p = jnp.exp(s)
        p = p / jnp.sum(p, axis=-1, keepdims=True)                      # exact divide (f32)
        ctx_heads.append(jnp.dot(p.astype(jnp.bfloat16), v_h,
                                 preferred_element_type=jnp.float32))   # (S, Dh) f32
    ctx = jnp.concatenate(ctx_heads, axis=-1)       # (S, H) f32, heads merged in-kernel

    # ---- output projection + residual + LayerNorm (fused).
    attn_out = jnp.dot(ctx.astype(jnp.bfloat16), o_w_ref[...],
                       preferred_element_type=jnp.float32) + o_b_ref[...]
    x = _layernorm(x + attn_out, ln1_g_ref[...], ln1_b_ref[...], eps)

    # ---- feed-forward pair fused; (S, I) intermediate never leaves VMEM.
    inter = jnp.dot(x.astype(jnp.bfloat16), i_w_ref[...],
                    preferred_element_type=jnp.float32) + i_b_ref[...]
    inter = _gelu(inter)                            # f32 math
    ffn = jnp.dot(inter.astype(jnp.bfloat16), f_w_ref[...],
                  preferred_element_type=jnp.float32) + f_b_ref[...]
    x_new = _layernorm(x + ffn, ln2_g_ref[...], ln2_b_ref[...], eps)
    x_sc[...] = x_new

    # ---- last-layer epilogue: pooler (dense+tanh on [CLS]) + dropout(id) + classifier.
    @pl.when(layer == pl.num_programs(1) - 1)
    def _():
        rows = x_new[0:8, :].astype(jnp.bfloat16)   # row 0 is [CLS]; 8 rows for (8,128) tiling
        pooled = jnp.tanh(jnp.dot(rows, pool_w_ref[...],
                                  preferred_element_type=jnp.float32) + pool_b_ref[...])
        logits = jnp.dot(pooled.astype(jnp.bfloat16), cls_w_ref[...],
                         preferred_element_type=jnp.float32) + cls_b_ref[...]
        logits_ref[...] = logits                    # (8, 128) lane-dense, unmasked store


def bert_encoder(x_emb, ext_mask, p):
    """x_emb: (B, S, H) f32 embedding sum; ext_mask: (B, 1, S) additive f32 mask."""
    B, S, H = x_emb.shape
    L = p["qkv_w"].shape[0]
    kernel = functools.partial(
        _encoder_kernel, hidden=H, num_heads=NUM_HEADS, head_dim=HEAD_DIM,
        scale=1.0 / (HEAD_DIM ** 0.5), eps=LN_EPS)

    def per_batch(b, l):
        return (b, 0, 0)

    def per_layer(b, l):
        return (l, 0, 0)

    def const(b, l):
        return (0, 0)

    in_specs = [
        pl.BlockSpec((None, S, H), per_batch),                 # x_emb (word+pos+type sum)
        pl.BlockSpec((None, 1, S), per_batch),                 # additive attention mask
        pl.BlockSpec((1, H), const), pl.BlockSpec((1, H), const),  # embedding LN gamma/beta
        pl.BlockSpec((None, H, 3 * H), per_layer),             # qkv_w
        pl.BlockSpec((None, 1, 3 * H), per_layer),             # qkv_b
        pl.BlockSpec((None, H, H), per_layer),                 # o_w
        pl.BlockSpec((None, 1, H), per_layer),                 # o_b
        pl.BlockSpec((None, 1, H), per_layer),                 # ln1_g
        pl.BlockSpec((None, 1, H), per_layer),                 # ln1_b
        pl.BlockSpec((None, H, INTERMEDIATE), per_layer),      # i_w
        pl.BlockSpec((None, 1, INTERMEDIATE), per_layer),      # i_b
        pl.BlockSpec((None, INTERMEDIATE, H), per_layer),      # f_w
        pl.BlockSpec((None, 1, H), per_layer),                 # f_b
        pl.BlockSpec((None, 1, H), per_layer),                 # ln2_g
        pl.BlockSpec((None, 1, H), per_layer),                 # ln2_b
        pl.BlockSpec((H, H), const),                           # pooler w
        pl.BlockSpec((1, H), const),                           # pooler b
        pl.BlockSpec((H, LOGIT_LANES), const),                 # classifier w (lane-padded)
        pl.BlockSpec((1, LOGIT_LANES), const),                 # classifier b (lane-padded)
    ]

    return pl.pallas_call(
        kernel,
        out_shape=jax.ShapeDtypeStruct((B, 8, LOGIT_LANES), jnp.float32),
        grid=(B, L),
        in_specs=in_specs,
        out_specs=pl.BlockSpec((None, 8, LOGIT_LANES), per_batch),
        scratch_shapes=[pltpu.VMEM((S, H), jnp.float32)],      # activation carry across layers
        compiler_params=pltpu.CompilerParams(
            dimension_semantics=("parallel", "arbitrary"),     # batch across TCs on v7x
            vmem_limit_bytes=VMEM_LIMIT),
    )(x_emb, ext_mask,
      p["emb_ln_g"], p["emb_ln_b"],
      p["qkv_w"], p["qkv_b"], p["o_w"], p["o_b"],
      p["ln1_g"], p["ln1_b"], p["i_w"], p["i_b"], p["f_w"], p["f_b"],
      p["ln2_g"], p["ln2_b"],
      p["pool_w"], p["pool_b"], p["cls_w"], p["cls_b"])


# ------------------------------ model definition ---------------------------- #

def init_params(key):
    def normal(k, shape, std=0.02):
        return std * jax.random.normal(k, shape, dtype=jnp.float32)

    n_keys = 3 + NUM_LAYERS * 6 + 2
    keys = iter(jax.random.split(key, n_keys))

    params = {
        "word_emb": normal(next(keys), (VOCAB_SIZE, HIDDEN)),
        "pos_emb": normal(next(keys), (MAX_POS, HIDDEN)),
        "type_emb": normal(next(keys), (TYPE_VOCAB, HIDDEN)),
        "emb_ln_g": jnp.ones((1, HIDDEN), jnp.float32),
        "emb_ln_b": jnp.zeros((1, HIDDEN), jnp.float32),
    }

    qkv_w, o_w, i_w, f_w = [], [], [], []
    for _ in range(NUM_LAYERS):
        q = normal(next(keys), (HIDDEN, HIDDEN))
        k = normal(next(keys), (HIDDEN, HIDDEN))
        v = normal(next(keys), (HIDDEN, HIDDEN))
        qkv_w.append(jnp.concatenate([q, k, v], axis=1))       # fused (H, 3H)
        o_w.append(normal(next(keys), (HIDDEN, HIDDEN)))
        i_w.append(normal(next(keys), (HIDDEN, INTERMEDIATE)))
        f_w.append(normal(next(keys), (INTERMEDIATE, HIDDEN)))

    L = NUM_LAYERS
    params.update({
        "qkv_w": jnp.stack(qkv_w).astype(WEIGHT_DTYPE),        # (L, H, 3H)
        "qkv_b": jnp.zeros((L, 1, 3 * HIDDEN), jnp.float32),
        "o_w": jnp.stack(o_w).astype(WEIGHT_DTYPE),            # (L, H, H)
        "o_b": jnp.zeros((L, 1, HIDDEN), jnp.float32),
        "ln1_g": jnp.ones((L, 1, HIDDEN), jnp.float32),
        "ln1_b": jnp.zeros((L, 1, HIDDEN), jnp.float32),
        "i_w": jnp.stack(i_w).astype(WEIGHT_DTYPE),            # (L, H, I)
        "i_b": jnp.zeros((L, 1, INTERMEDIATE), jnp.float32),
        "f_w": jnp.stack(f_w).astype(WEIGHT_DTYPE),            # (L, I, H)
        "f_b": jnp.zeros((L, 1, HIDDEN), jnp.float32),
        "ln2_g": jnp.ones((L, 1, HIDDEN), jnp.float32),
        "ln2_b": jnp.zeros((L, 1, HIDDEN), jnp.float32),
    })

    params["pool_w"] = normal(next(keys), (HIDDEN, HIDDEN)).astype(WEIGHT_DTYPE)
    params["pool_b"] = jnp.zeros((1, HIDDEN), jnp.float32)

    # classifier: xavier normal init (nn.init.xavier_normal_), padded to 128 output lanes
    # so the in-kernel logits store is lane-dense; extra lanes are zero and sliced away.
    xavier_std = (2.0 / (HIDDEN + NUM_LABELS)) ** 0.5
    cls_w = normal(next(keys), (HIDDEN, NUM_LABELS), std=xavier_std)
    cls_w_pad = jnp.zeros((HIDDEN, LOGIT_LANES), jnp.float32).at[:, :NUM_LABELS].set(cls_w)
    params["cls_w"] = cls_w_pad.astype(WEIGHT_DTYPE)
    params["cls_b"] = jnp.zeros((1, LOGIT_LANES), jnp.float32)
    return params


def bert_classification_forward(params, input_ids, token_type_ids, attention_mask):
    B, S = input_ids.shape
    # Embedding gathers + 3-way sum stay as XLA glue (fused into one pass by XLA);
    # everything downstream runs inside the single fused Pallas kernel.
    word = jnp.take(params["word_emb"], input_ids, axis=0)          # (B, S, H)
    pos = jnp.take(params["pos_emb"], jnp.arange(S), axis=0)[None]  # (1, S, H)
    typ = jnp.take(params["type_emb"], token_type_ids, axis=0)      # (B, S, H)
    x_emb = word + pos + typ                                        # (B, S, H) f32

    # additive attention mask: 0 for valid tokens, -10000 for padding
    ext_mask = ((1.0 - attention_mask.astype(jnp.float32)) * -10000.0)[:, None, :]  # (B,1,S)

    logits_pad = bert_encoder(x_emb, ext_mask, params)              # (B, 8, 128)
    # row 0 holds the [CLS] pooler/classifier result; lanes >= NUM_LABELS are zero padding.
    return logits_pad[:, 0, :NUM_LABELS]                            # (B, num_labels)


# ---------------------------------- main ------------------------------------ #

if __name__ == "__main__":
    root = jax.random.PRNGKey(0)
    k_params, k_ids = jax.random.split(root)

    params = init_params(k_params)

    input_ids = jax.random.randint(k_ids, (BATCH, SEQ), 0, VOCAB_SIZE, dtype=jnp.int32)
    token_type_ids = jnp.zeros((BATCH, SEQ), dtype=jnp.int32)
    attention_mask = jnp.ones((BATCH, SEQ), dtype=jnp.int32)
    attention_mask = attention_mask.at[1, SEQ - 16:].set(0)  # simulate padding in batch 1

    fwd = jax.jit(bert_classification_forward)
    logits = jax.block_until_ready(fwd(params, input_ids, token_type_ids, attention_mask))

    assert logits.shape == (BATCH, NUM_LABELS)
    assert bool(jnp.all(jnp.isfinite(logits)))
    print("KERNEL_OK")
</pallas_src>

<mosaic_0001>
module attributes {stable_mosaic.version = 11 : i64} {
  func.func @_encoder_kernel(%arg0: i32, %arg1: i32, %arg2: memref<1x128x128xf32, #tpu.memory_space<vmem>>, %arg3: memref<1x1x128xf32, #tpu.memory_space<vmem>>, %arg4: memref<1x128xf32, #tpu.memory_space<vmem>>, %arg5: memref<1x128xf32, #tpu.memory_space<vmem>>, %arg6: memref<1x128x384xbf16, #tpu.memory_space<vmem>>, %arg7: memref<1x1x384xf32, #tpu.memory_space<vmem>>, %arg8: memref<1x128x128xbf16, #tpu.memory_space<vmem>>, %arg9: memref<1x1x128xf32, #tpu.memory_space<vmem>>, %arg10: memref<1x1x128xf32, #tpu.memory_space<vmem>>, %arg11: memref<1x1x128xf32, #tpu.memory_space<vmem>>, %arg12: memref<1x128x512xbf16, #tpu.memory_space<vmem>>, %arg13: memref<1x1x512xf32, #tpu.memory_space<vmem>>, %arg14: memref<1x512x128xbf16, #tpu.memory_space<vmem>>, %arg15: memref<1x1x128xf32, #tpu.memory_space<vmem>>, %arg16: memref<1x1x128xf32, #tpu.memory_space<vmem>>, %arg17: memref<1x1x128xf32, #tpu.memory_space<vmem>>, %arg18: memref<128x128xbf16, #tpu.memory_space<vmem>>, %arg19: memref<1x128xf32, #tpu.memory_space<vmem>>, %arg20: memref<128x128xbf16, #tpu.memory_space<vmem>>, %arg21: memref<1x128xf32, #tpu.memory_space<vmem>>, %arg22: memref<1x8x128xf32, #tpu.memory_space<vmem>>, %arg23: memref<128x128xf32, #tpu.memory_space<vmem>>) attributes {dimension_semantics = [#tpu.dimension_semantics<parallel>, #tpu.dimension_semantics<arbitrary>], iteration_bounds = array<i64: 2, 2>, scalar_prefetch = 0 : i64, scratch_operands = 1 : i64, tpu.core_type = #tpu.core_type<tc>, window_params = [{transform_indices = @transform_0, window_bounds = array<i64: 1, 128, 128>}, {transform_indices = @transform_1, window_bounds = array<i64: 1, 1, 128>}, {pipeline_mode = #tpu.pipeline_mode<synchronous>, transform_indices = @transform_2, window_bounds = array<i64: 1, 128>}, {pipeline_mode = #tpu.pipeline_mode<synchronous>, transform_indices = @transform_3, window_bounds = array<i64: 1, 128>}, {transform_indices = @transform_4, window_bounds = array<i64: 1, 128, 384>}, {transform_indices = @transform_5, window_bounds = array<i64: 1, 1, 384>}, {transform_indices = @transform_6, window_bounds = array<i64: 1, 128, 128>}, {transform_indices = @transform_7, window_bounds = array<i64: 1, 1, 128>}, {transform_indices = @transform_8, window_bounds = array<i64: 1, 1, 128>}, {transform_indices = @transform_9, window_bounds = array<i64: 1, 1, 128>}, {transform_indices = @transform_10, window_bounds = array<i64: 1, 128, 512>}, {transform_indices = @transform_11, window_bounds = array<i64: 1, 1, 512>}, {transform_indices = @transform_12, window_bounds = array<i64: 1, 512, 128>}, {transform_indices = @transform_13, window_bounds = array<i64: 1, 1, 128>}, {transform_indices = @transform_14, window_bounds = array<i64: 1, 1, 128>}, {transform_indices = @transform_15, window_bounds = array<i64: 1, 1, 128>}, {pipeline_mode = #tpu.pipeline_mode<synchronous>, transform_indices = @transform_16, window_bounds = array<i64: 128, 128>}, {pipeline_mode = #tpu.pipeline_mode<synchronous>, transform_indices = @transform_17, window_bounds = array<i64: 1, 128>}, {pipeline_mode = #tpu.pipeline_mode<synchronous>, transform_indices = @transform_18, window_bounds = array<i64: 128, 128>}, {pipeline_mode = #tpu.pipeline_mode<synchronous>, transform_indices = @transform_19, window_bounds = array<i64: 1, 128>}, {transform_indices = @transform_20, window_bounds = array<i64: 1, 8, 128>}]} {
    %c0_i32 = arith.constant 0 : i32
    %0 = arith.cmpi eq, %arg1, %c0_i32 : i32
    %1 = arith.extui %0 : i1 to i32
    %c0_i32_0 = arith.constant 0 : i32
    %2 = arith.cmpi ne, %1, %c0_i32_0 : i32
    scf.if %2 {
      %c0_81 = arith.constant 0 : index
      %c0_82 = arith.constant 0 : index
      %c0_83 = arith.constant 0 : index
      %183 = vector.load %arg2[%c0_81, %c0_82, %c0_83] : memref<1x128x128xf32, #tpu.memory_space<vmem>>, vector<1x128x128xf32>
      %184 = vector.shape_cast %183 : vector<1x128x128xf32> to vector<128x128xf32>
      %c0_84 = arith.constant 0 : index
      %c0_85 = arith.constant 0 : index
      %185 = vector.load %arg4[%c0_84, %c0_85] : memref<1x128xf32, #tpu.memory_space<vmem>>, vector<1x128xf32>
      %c0_86 = arith.constant 0 : index
      %c0_87 = arith.constant 0 : index
      %186 = vector.load %arg5[%c0_86, %c0_87] : memref<1x128xf32, #tpu.memory_space<vmem>>, vector<1x128xf32>
      %cst_88 = arith.constant dense<0.000000e+00> : vector<128xf32>
      %187 = vector.multi_reduction <add>, %184, %cst_88 [1] : vector<128x128xf32> to vector<128xf32>
      %188 = vector.shape_cast %187 : vector<128xf32> to vector<128x1xf32>
      %cst_89 = arith.constant 1.280000e+02 : f32
      %189 = vector.broadcast %cst_89 : f32 to vector<128x1xf32>
      %190 = arith.divf %188, %189 : vector<128x1xf32>
      %191 = vector.broadcast %190 : vector<128x1xf32> to vector<128x128xf32>
      %192 = arith.subf %184, %191 : vector<128x128xf32>
      %193 = arith.mulf %192, %192 : vector<128x128xf32>
      %cst_90 = arith.constant dense<0.000000e+00> : vector<128xf32>
      %194 = vector.multi_reduction <add>, %193, %cst_90 [1] : vector<128x128xf32> to vector<128xf32>
      %195 = vector.shape_cast %194 : vector<128xf32> to vector<128x1xf32>
      %cst_91 = arith.constant 1.280000e+02 : f32
      %196 = vector.broadcast %cst_91 : f32 to vector<128x1xf32>
      %197 = arith.divf %195, %196 : vector<128x1xf32>
      %cst_92 = arith.constant 9.99999996E-13 : f32
      %198 = vector.broadcast %cst_92 : f32 to vector<128x1xf32>
      %199 = arith.addf %197, %198 : vector<128x1xf32>
      %200 = math.rsqrt %199 : vector<128x1xf32>
      %201 = vector.broadcast %200 : vector<128x1xf32> to vector<128x128xf32>
      %202 = arith.mulf %192, %201 : vector<128x128xf32>
      %203 = vector.broadcast %185 : vector<1x128xf32> to vector<128x128xf32>
      %204 = arith.mulf %202, %203 : vector<128x128xf32>
      %205 = vector.broadcast %186 : vector<1x128xf32> to vector<128x128xf32>
      %206 = arith.addf %204, %205 : vector<128x128xf32>
      %c0_93 = arith.constant 0 : index
      %c0_94 = arith.constant 0 : index
      %207 = vector.load %arg23[%c0_93, %c0_94] : memref<128x128xf32, #tpu.memory_space<vmem>>, vector<128x128xf32>
      tpu.vector_store %arg23[%c0_93, %c0_94], %206 {strides = array<i32>} : memref<128x128xf32, #tpu.memory_space<vmem>>, vector<128x128xf32>,
    } else {
    }
    %c0 = arith.constant 0 : index
    %c0_1 = arith.constant 0 : index
    %3 = vector.load %arg23[%c0, %c0_1] : memref<128x128xf32, #tpu.memory_space<vmem>>, vector<128x128xf32>
    %4 = arith.truncf %3 : vector<128x128xf32> to vector<128x128xbf16>
    %c0_2 = arith.constant 0 : index
    %c0_3 = arith.constant 0 : index
    %c0_4 = arith.constant 0 : index
    %5 = vector.load %arg6[%c0_2, %c0_3, %c0_4] : memref<1x128x384xbf16, #tpu.memory_space<vmem>>, vector<1x128x384xbf16>
    %6 = vector.shape_cast %5 : vector<1x128x384xbf16> to vector<128x384xbf16>
    %cst = arith.constant dense<0.000000e+00> : vector<128x384xf32>
    %7 = tpu.matmul %4, %6, %cst {dimension_numbers = #tpu.dot_dimension_numbers<[1], [0], [0], [1], [0, 0, 1, 1], [], []>} : vector<128x128xbf16>, vector<128x384xbf16>, vector<128x384xf32> -> vector<128x384xf32>
    %c0_5 = arith.constant 0 : index
    %c0_6 = arith.constant 0 : index
    %c0_7 = arith.constant 0 : index
    %8 = vector.load %arg7[%c0_5, %c0_6, %c0_7] : memref<1x1x384xf32, #tpu.memory_space<vmem>>, vector<1x1x384xf32>
    %9 = vector.shape_cast %8 : vector<1x1x384xf32> to vector<1x384xf32>
    %10 = vector.broadcast %9 : vector<1x384xf32> to vector<128x384xf32>
    %11 = arith.addf %7, %10 : vector<128x384xf32>
    %12 = arith.truncf %11 : vector<128x384xf32> to vector<128x384xbf16>
    %c0_8 = arith.constant 0 : index
    %c0_9 = arith.constant 0 : index
    %c0_10 = arith.constant 0 : index
    %13 = vector.load %arg3[%c0_8, %c0_9, %c0_10] : memref<1x1x128xf32, #tpu.memory_space<vmem>>, vector<1x1x128xf32>
    %14 = vector.shape_cast %13 : vector<1x1x128xf32> to vector<1x128xf32>
    %15 = vector.extract_strided_slice %12 {offsets = [0, 0], sizes = [128, 32], strides = [1, 1]} : vector<128x384xbf16> to vector<128x32xbf16>
    %16 = vector.extract_strided_slice %12 {offsets = [0, 128], sizes = [128, 32], strides = [1, 1]} : vector<128x384xbf16> to vector<128x32xbf16>
    %17 = vector.extract_strided_slice %12 {offsets = [0, 256], sizes = [128, 32], strides = [1, 1]} : vector<128x384xbf16> to vector<128x32xbf16>
    %cst_11 = arith.constant dense<0.000000e+00> : vector<128x128xf32>
    %18 = tpu.matmul %15, %16, %cst_11 {dimension_numbers = #tpu.dot_dimension_numbers<[1], [1], [0], [0], [0, 0, 1, 0], [], []>} : vector<128x32xbf16>, vector<128x32xbf16>, vector<128x128xf32> -> vector<128x128xf32>
    %cst_12 = arith.constant 0.176776692 : f32
    %19 = vector.broadcast %cst_12 : f32 to vector<128x128xf32>
    %20 = arith.mulf %18, %19 : vector<128x128xf32>
    %21 = vector.broadcast %14 : vector<1x128xf32> to vector<128x128xf32>
    %22 = arith.addf %20, %21 : vector<128x128xf32>
    %cst_13 = arith.constant dense<0xFF800000> : vector<128xf32>
    %23 = vector.multi_reduction <maximumf>, %22, %cst_13 [1] : vector<128x128xf32> to vector<128xf32>
    %24 = vector.shape_cast %23 : vector<128xf32> to vector<128x1xf32>
    %25 = vector.broadcast %24 : vector<128x1xf32> to vector<128x128xf32>
    %26 = arith.subf %22, %25 : vector<128x128xf32>
    %27 = math.exp %26 : vector<128x128xf32>
    %cst_14 = arith.constant dense<0.000000e+00> : vector<128xf32>
    %28 = vector.multi_reduction <add>, %27, %cst_14 [1] : vector<128x128xf32> to vector<128xf32>
    %29 = vector.shape_cast %28 : vector<128xf32> to vector<128x1xf32>
    %30 = vector.broadcast %29 : vector<128x1xf32> to vector<128x128xf32>
    %31 = arith.divf %27, %30 : vector<128x128xf32>
    %32 = arith.truncf %31 : vector<128x128xf32> to vector<128x128xbf16>
    %cst_15 = arith.constant dense<0.000000e+00> : vector<128x32xf32>
    %33 = tpu.matmul %32, %17, %cst_15 {dimension_numbers = #tpu.dot_dimension_numbers<[1], [0], [0], [1], [0, 0, 1, 1], [], []>} : vector<128x128xbf16>, vector<128x32xbf16>, vector<128x32xf32> -> vector<128x32xf32>
    %34 = vector.extract_strided_slice %12 {offsets = [0, 32], sizes = [128, 32], strides = [1, 1]} : vector<128x384xbf16> to vector<128x32xbf16>
    %35 = vector.extract_strided_slice %12 {offsets = [0, 160], sizes = [128, 32], strides = [1, 1]} : vector<128x384xbf16> to vector<128x32xbf16>
    %36 = vector.extract_strided_slice %12 {offsets = [0, 288], sizes = [128, 32], strides = [1, 1]} : vector<128x384xbf16> to vector<128x32xbf16>
    %cst_16 = arith.constant dense<0.000000e+00> : vector<128x128xf32>
    %37 = tpu.matmul %34, %35, %cst_16 {dimension_numbers = #tpu.dot_dimension_numbers<[1], [1], [0], [0], [0, 0, 1, 0], [], []>} : vector<128x32xbf16>, vector<128x32xbf16>, vector<128x128xf32> -> vector<128x128xf32>
    %cst_17 = arith.constant 0.176776692 : f32
    %38 = vector.broadcast %cst_17 : f32 to vector<128x128xf32>
    %39 = arith.mulf %37, %38 : vector<128x128xf32>
    %40 = vector.broadcast %14 : vector<1x128xf32> to vector<128x128xf32>
    %41 = arith.addf %39, %40 : vector<128x128xf32>
    %cst_18 = arith.constant dense<0xFF800000> : vector<128xf32>
    %42 = vector.multi_reduction <maximumf>, %41, %cst_18 [1] : vector<128x128xf32> to vector<128xf32>
    %43 = vector.shape_cast %42 : vector<128xf32> to vector<128x1xf32>
    %44 = vector.broadcast %43 : vector<128x1xf32> to vector<128x128xf32>
    %45 = arith.subf %41, %44 : vector<128x128xf32>
    %46 = math.exp %45 : vector<128x128xf32>
    %cst_19 = arith.constant dense<0.000000e+00> : vector<128xf32>
    %47 = vector.multi_reduction <add>, %46, %cst_19 [1] : vector<128x128xf32> to vector<128xf32>
    %48 = vector.shape_cast %47 : vector<128xf32> to vector<128x1xf32>
    %49 = vector.broadcast %48 : vector<128x1xf32> to vector<128x128xf32>
    %50 = arith.divf %46, %49 : vector<128x128xf32>
    %51 = arith.truncf %50 : vector<128x128xf32> to vector<128x128xbf16>
    %cst_20 = arith.constant dense<0.000000e+00> : vector<128x32xf32>
    %52 = tpu.matmul %51, %36, %cst_20 {dimension_numbers = #tpu.dot_dimension_numbers<[1], [0], [0], [1], [0, 0, 1, 1], [], []>} : vector<128x128xbf16>, vector<128x32xbf16>, vector<128x32xf32> -> vector<128x32xf32>
    %53 = vector.extract_strided_slice %12 {offsets = [0, 64], sizes = [128, 32], strides = [1, 1]} : vector<128x384xbf16> to vector<128x32xbf16>
    %54 = vector.extract_strided_slice %12 {offsets = [0, 192], sizes = [128, 32], strides = [1, 1]} : vector<128x384xbf16> to vector<128x32xbf16>
    %55 = vector.extract_strided_slice %12 {offsets = [0, 320], sizes = [128, 32], strides = [1, 1]} : vector<128x384xbf16> to vector<128x32xbf16>
    %cst_21 = arith.constant dense<0.000000e+00> : vector<128x128xf32>
    %56 = tpu.matmul %53, %54, %cst_21 {dimension_numbers = #tpu.dot_dimension_numbers<[1], [1], [0], [0], [0, 0, 1, 0], [], []>} : vector<128x32xbf16>, vector<128x32xbf16>, vector<128x128xf32> -> vector<128x128xf32>
    %cst_22 = arith.constant 0.176776692 : f32
    %57 = vector.broadcast %cst_22 : f32 to vector<128x128xf32>
    %58 = arith.mulf %56, %57 : vector<128x128xf32>
    %59 = vector.broadcast %14 : vector<1x128xf32> to vector<128x128xf32>
    %60 = arith.addf %58, %59 : vector<128x128xf32>
    %cst_23 = arith.constant dense<0xFF800000> : vector<128xf32>
    %61 = vector.multi_reduction <maximumf>, %60, %cst_23 [1] : vector<128x128xf32> to vector<128xf32>
    %62 = vector.shape_cast %61 : vector<128xf32> to vector<128x1xf32>
    %63 = vector.broadcast %62 : vector<128x1xf32> to vector<128x128xf32>
    %64 = arith.subf %60, %63 : vector<128x128xf32>
    %65 = math.exp %64 : vector<128x128xf32>
    %cst_24 = arith.constant dense<0.000000e+00> : vector<128xf32>
    %66 = vector.multi_reduction <add>, %65, %cst_24 [1] : vector<128x128xf32> to vector<128xf32>
    %67 = vector.shape_cast %66 : vector<128xf32> to vector<128x1xf32>
    %68 = vector.broadcast %67 : vector<128x1xf32> to vector<128x128xf32>
    %69 = arith.divf %65, %68 : vector<128x128xf32>
    %70 = arith.truncf %69 : vector<128x128xf32> to vector<128x128xbf16>
    %cst_25 = arith.constant dense<0.000000e+00> : vector<128x32xf32>
    %71 = tpu.matmul %70, %55, %cst_25 {dimension_numbers = #tpu.dot_dimension_numbers<[1], [0], [0], [1], [0, 0, 1, 1], [], []>} : vector<128x128xbf16>, vector<128x32xbf16>, vector<128x32xf32> -> vector<128x32xf32>
    %72 = vector.extract_strided_slice %12 {offsets = [0, 96], sizes = [128, 32], strides = [1, 1]} : vector<128x384xbf16> to vector<128x32xbf16>
    %73 = vector.extract_strided_slice %12 {offsets = [0, 224], sizes = [128, 32], strides = [1, 1]} : vector<128x384xbf16> to vector<128x32xbf16>
    %74 = vector.extract_strided_slice %12 {offsets = [0, 352], sizes = [128, 32], strides = [1, 1]} : vector<128x384xbf16> to vector<128x32xbf16>
    %cst_26 = arith.constant dense<0.000000e+00> : vector<128x128xf32>
    %75 = tpu.matmul %72, %73, %cst_26 {dimension_numbers = #tpu.dot_dimension_numbers<[1], [1], [0], [0], [0, 0, 1, 0], [], []>} : vector<128x32xbf16>, vector<128x32xbf16>, vector<128x128xf32> -> vector<128x128xf32>
    %cst_27 = arith.constant 0.176776692 : f32
    %76 = vector.broadcast %cst_27 : f32 to vector<128x128xf32>
    %77 = arith.mulf %75, %76 : vector<128x128xf32>
    %78 = vector.broadcast %14 : vector<1x128xf32> to vector<128x128xf32>
    %79 = arith.addf %77, %78 : vector<128x128xf32>
    %cst_28 = arith.constant dense<0xFF800000> : vector<128xf32>
    %80 = vector.multi_reduction <maximumf>, %79, %cst_28 [1] : vector<128x128xf32> to vector<128xf32>
    %81 = vector.shape_cast %80 : vector<128xf32> to vector<128x1xf32>
    %82 = vector.broadcast %81 : vector<128x1xf32> to vector<128x128xf32>
    %83 = arith.subf %79, %82 : vector<128x128xf32>
    %84 = math.exp %83 : vector<128x128xf32>
    %cst_29 = arith.constant dense<0.000000e+00> : vector<128xf32>
    %85 = vector.multi_reduction <add>, %84, %cst_29 [1] : vector<128x128xf32> to vector<128xf32>
    %86 = vector.shape_cast %85 : vector<128xf32> to vector<128x1xf32>
    %87 = vector.broadcast %86 : vector<128x1xf32> to vector<128x128xf32>
    %88 = arith.divf %84, %87 : vector<128x128xf32>
    %89 = arith.truncf %88 : vector<128x128xf32> to vector<128x128xbf16>
    %cst_30 = arith.constant dense<0.000000e+00> : vector<128x32xf32>
    %90 = tpu.matmul %89, %74, %cst_30 {dimension_numbers = #tpu.dot_dimension_numbers<[1], [0], [0], [1], [0, 0, 1, 1], [], []>} : vector<128x128xbf16>, vector<128x32xbf16>, vector<128x32xf32> -> vector<128x32xf32>
    %91 = tpu.concatenate %33, %52, %71, %90 in 1 : vector<128x32xf32>, vector<128x32xf32>, vector<128x32xf32>, vector<128x32xf32> -> vector<128x128xf32>
    %92 = arith.truncf %91 : vector<128x128xf32> to vector<128x128xbf16>
    %c0_31 = arith.constant 0 : index
    %c0_32 = arith.constant 0 : index
    %c0_33 = arith.constant 0 : index
    %93 = vector.load %arg8[%c0_31, %c0_32, %c0_33] : memref<1x128x128xbf16, #tpu.memory_space<vmem>>, vector<1x128x128xbf16>
    %94 = vector.shape_cast %93 : vector<1x128x128xbf16> to vector<128x128xbf16>
    %cst_34 = arith.constant dense<0.000000e+00> : vector<128x128xf32>
    %95 = tpu.matmul %92, %94, %cst_34 {dimension_numbers = #tpu.dot_dimension_numbers<[1], [0], [0], [1], [0, 0, 1, 1], [], []>} : vector<128x128xbf16>, vector<128x128xbf16>, vector<128x128xf32> -> vector<128x128xf32>
    %c0_35 = arith.constant 0 : index
    %c0_36 = arith.constant 0 : index
    %c0_37 = arith.constant 0 : index
    %96 = vector.load %arg9[%c0_35, %c0_36, %c0_37] : memref<1x1x128xf32, #tpu.memory_space<vmem>>, vector<1x1x128xf32>
    %97 = vector.shape_cast %96 : vector<1x1x128xf32> to vector<1x128xf32>
    %98 = vector.broadcast %97 : vector<1x128xf32> to vector<128x128xf32>
    %99 = arith.addf %95, %98 : vector<128x128xf32>
    %100 = arith.addf %3, %99 : vector<128x128xf32>
    %c0_38 = arith.constant 0 : index
    %c0_39 = arith.constant 0 : index
    %c0_40 = arith.constant 0 : index
    %101 = vector.load %arg10[%c0_38, %c0_39, %c0_40] : memref<1x1x128xf32, #tpu.memory_space<vmem>>, vector<1x1x128xf32>
    %102 = vector.shape_cast %101 : vector<1x1x128xf32> to vector<1x128xf32>
    %c0_41 = arith.constant 0 : index
    %c0_42 = arith.constant 0 : index
    %c0_43 = arith.constant 0 : index
    %103 = vector.load %arg11[%c0_41, %c0_42, %c0_43] : memref<1x1x128xf32, #tpu.memory_space<vmem>>, vector<1x1x128xf32>
    %104 = vector.shape_cast %103 : vector<1x1x128xf32> to vector<1x128xf32>
    %cst_44 = arith.constant dense<0.000000e+00> : vector<128xf32>
    %105 = vector.multi_reduction <add>, %100, %cst_44 [1] : vector<128x128xf32> to vector<128xf32>
    %106 = vector.shape_cast %105 : vector<128xf32> to vector<128x1xf32>
    %cst_45 = arith.constant 1.280000e+02 : f32
    %107 = vector.broadcast %cst_45 : f32 to vector<128x1xf32>
    %108 = arith.divf %106, %107 : vector<128x1xf32>
    %109 = vector.broadcast %108 : vector<128x1xf32> to vector<128x128xf32>
    %110 = arith.subf %100, %109 : vector<128x128xf32>
    %111 = arith.mulf %110, %110 : vector<128x128xf32>
    %cst_46 = arith.constant dense<0.000000e+00> : vector<128xf32>
    %112 = vector.multi_reduction <add>, %111, %cst_46 [1] : vector<128x128xf32> to vector<128xf32>
    %113 = vector.shape_cast %112 : vector<128xf32> to vector<128x1xf32>
    %cst_47 = arith.constant 1.280000e+02 : f32
    %114 = vector.broadcast %cst_47 : f32 to vector<128x1xf32>
    %115 = arith.divf %113, %114 : vector<128x1xf32>
    %cst_48 = arith.constant 9.99999996E-13 : f32
    %116 = vector.broadcast %cst_48 : f32 to vector<128x1xf32>
    %117 = arith.addf %115, %116 : vector<128x1xf32>
    %118 = math.rsqrt %117 : vector<128x1xf32>
    %119 = vector.broadcast %118 : vector<128x1xf32> to vector<128x128xf32>
    %120 = arith.mulf %110, %119 : vector<128x128xf32>
    %121 = vector.broadcast %102 : vector<1x128xf32> to vector<128x128xf32>
    %122 = arith.mulf %120, %121 : vector<128x128xf32>
    %123 = vector.broadcast %104 : vector<1x128xf32> to vector<128x128xf32>
    %124 = arith.addf %122, %123 : vector<128x128xf32>
    %125 = arith.truncf %124 : vector<128x128xf32> to vector<128x128xbf16>
    %c0_49 = arith.constant 0 : index
    %c0_50 = arith.constant 0 : index
    %c0_51 = arith.constant 0 : index
    %126 = vector.load %arg12[%c0_49, %c0_50, %c0_51] : memref<1x128x512xbf16, #tpu.memory_space<vmem>>, vector<1x128x512xbf16>
    %127 = vector.shape_cast %126 : vector<1x128x512xbf16> to vector<128x512xbf16>
    %cst_52 = arith.constant dense<0.000000e+00> : vector<128x512xf32>
    %128 = tpu.matmul %125, %127, %cst_52 {dimension_numbers = #tpu.dot_dimension_numbers<[1], [0], [0], [1], [0, 0, 1, 1], [], []>} : vector<128x128xbf16>, vector<128x512xbf16>, vector<128x512xf32> -> vector<128x512xf32>
    %c0_53 = arith.constant 0 : index
    %c0_54 = arith.constant 0 : index
    %c0_55 = arith.constant 0 : index
    %129 = vector.load %arg13[%c0_53, %c0_54, %c0_55] : memref<1x1x512xf32, #tpu.memory_space<vmem>>, vector<1x1x512xf32>
    %130 = vector.shape_cast %129 : vector<1x1x512xf32> to vector<1x512xf32>
    %131 = vector.broadcast %130 : vector<1x512xf32> to vector<128x512xf32>
    %132 = arith.addf %128, %131 : vector<128x512xf32>
    %cst_56 = arith.constant 5.000000e-01 : f32
    %133 = vector.broadcast %cst_56 : f32 to vector<128x512xf32>
    %134 = arith.mulf %133, %132 : vector<128x512xf32>
    %cst_57 = arith.constant 4.471500e-02 : f32
    %135 = vector.broadcast %cst_57 : f32 to vector<128x512xf32>
    %136 = arith.mulf %135, %132 : vector<128x512xf32>
    %137 = arith.mulf %136, %132 : vector<128x512xf32>
    %138 = arith.mulf %137, %132 : vector<128x512xf32>
    %139 = arith.addf %132, %138 : vector<128x512xf32>
    %cst_58 = arith.constant 0.797884583 : f32
    %140 = vector.broadcast %cst_58 : f32 to vector<128x512xf32>
    %141 = arith.mulf %140, %139 : vector<128x512xf32>
    %142 = math.tanh %141 : vector<128x512xf32>
    %cst_59 = arith.constant 1.000000e+00 : f32
    %143 = vector.broadcast %cst_59 : f32 to vector<128x512xf32>
    %144 = arith.addf %143, %142 : vector<128x512xf32>
    %145 = arith.mulf %134, %144 : vector<128x512xf32>
    %146 = arith.truncf %145 : vector<128x512xf32> to vector<128x512xbf16>
    %c0_60 = arith.constant 0 : index
    %c0_61 = arith.constant 0 : index
    %c0_62 = arith.constant 0 : index
    %147 = vector.load %arg14[%c0_60, %c0_61, %c0_62] : memref<1x512x128xbf16, #tpu.memory_space<vmem>>, vector<1x512x128xbf16>
    %148 = vector.shape_cast %147 : vector<1x512x128xbf16> to vector<512x128xbf16>
    %cst_63 = arith.constant dense<0.000000e+00> : vector<128x128xf32>
    %149 = tpu.matmul %146, %148, %cst_63 {dimension_numbers = #tpu.dot_dimension_numbers<[1], [0], [0], [1], [0, 0, 1, 1], [], []>} : vector<128x512xbf16>, vector<512x128xbf16>, vector<128x128xf32> -> vector<128x128xf32>
    %c0_64 = arith.constant 0 : index
    %c0_65 = arith.constant 0 : index
    %c0_66 = arith.constant 0 : index
    %150 = vector.load %arg15[%c0_64, %c0_65, %c0_66] : memref<1x1x128xf32, #tpu.memory_space<vmem>>, vector<1x1x128xf32>
    %151 = vector.shape_cast %150 : vector<1x1x128xf32> to vector<1x128xf32>
    %152 = vector.broadcast %151 : vector<1x128xf32> to vector<128x128xf32>
    %153 = arith.addf %149, %152 : vector<128x128xf32>
    %154 = arith.addf %124, %153 : vector<128x128xf32>
    %c0_67 = arith.constant 0 : index
    %c0_68 = arith.constant 0 : index
    %c0_69 = arith.constant 0 : index
    %155 = vector.load %arg16[%c0_67, %c0_68, %c0_69] : memref<1x1x128xf32, #tpu.memory_space<vmem>>, vector<1x1x128xf32>
    %156 = vector.shape_cast %155 : vector<1x1x128xf32> to vector<1x128xf32>
    %c0_70 = arith.constant 0 : index
    %c0_71 = arith.constant 0 : index
    %c0_72 = arith.constant 0 : index
    %157 = vector.load %arg17[%c0_70, %c0_71, %c0_72] : memref<1x1x128xf32, #tpu.memory_space<vmem>>, vector<1x1x128xf32>
    %158 = vector.shape_cast %157 : vector<1x1x128xf32> to vector<1x128xf32>
    %cst_73 = arith.constant dense<0.000000e+00> : vector<128xf32>
    %159 = vector.multi_reduction <add>, %154, %cst_73 [1] : vector<128x128xf32> to vector<128xf32>
    %160 = vector.shape_cast %159 : vector<128xf32> to vector<128x1xf32>
    %cst_74 = arith.constant 1.280000e+02 : f32
    %161 = vector.broadcast %cst_74 : f32 to vector<128x1xf32>
    %162 = arith.divf %160, %161 : vector<128x1xf32>
    %163 = vector.broadcast %162 : vector<128x1xf32> to vector<128x128xf32>
    %164 = arith.subf %154, %163 : vector<128x128xf32>
    %165 = arith.mulf %164, %164 : vector<128x128xf32>
    %cst_75 = arith.constant dense<0.000000e+00> : vector<128xf32>
    %166 = vector.multi_reduction <add>, %165, %cst_75 [1] : vector<128x128xf32> to vector<128xf32>
    %167 = vector.shape_cast %166 : vector<128xf32> to vector<128x1xf32>
    %cst_76 = arith.constant 1.280000e+02 : f32
    %168 = vector.broadcast %cst_76 : f32 to vector<128x1xf32>
    %169 = arith.divf %167, %168 : vector<128x1xf32>
    %cst_77 = arith.constant 9.99999996E-13 : f32
    %170 = vector.broadcast %cst_77 : f32 to vector<128x1xf32>
    %171 = arith.addf %169, %170 : vector<128x1xf32>
    %172 = math.rsqrt %171 : vector<128x1xf32>
    %173 = vector.broadcast %172 : vector<128x1xf32> to vector<128x128xf32>
    %174 = arith.mulf %164, %173 : vector<128x128xf32>
    %175 = vector.broadcast %156 : vector<1x128xf32> to vector<128x128xf32>
    %176 = arith.mulf %174, %175 : vector<128x128xf32>
    %177 = vector.broadcast %158 : vector<1x128xf32> to vector<128x128xf32>
    %178 = arith.addf %176, %177 : vector<128x128xf32>
    %c0_78 = arith.constant 0 : index
    %c0_79 = arith.constant 0 : index
    %179 = vector.load %arg23[%c0_78, %c0_79] : memref<128x128xf32, #tpu.memory_space<vmem>>, vector<128x128xf32>
    tpu.vector_store %arg23[%c0_78, %c0_79], %178 {strides = array<i32>} : memref<128x128xf32, #tpu.memory_space<vmem>>, vector<128x128xf32>,
    %c1_i32 = arith.constant 1 : i32
    %180 = arith.cmpi eq, %arg1, %c1_i32 : i32
    %181 = arith.extui %180 : i1 to i32
    %c0_i32_80 = arith.constant 0 : i32
    %182 = arith.cmpi ne, %181, %c0_i32_80 : i32
    scf.if %182 {
      %183 = vector.extract_strided_slice %178 {offsets = [0, 0], sizes = [8, 128], strides = [1, 1]} : vector<128x128xf32> to vector<8x128xf32>
      %184 = arith.truncf %183 : vector<8x128xf32> to vector<8x128xbf16>
      %c0_81 = arith.constant 0 : index
      %c0_82 = arith.constant 0 : index
      %185 = vector.load %arg18[%c0_81, %c0_82] : memref<128x128xbf16, #tpu.memory_space<vmem>>, vector<128x128xbf16>
      %cst_83 = arith.constant dense<0.000000e+00> : vector<8x128xf32>
      %186 = tpu.matmul %184, %185, %cst_83 {dimension_numbers = #tpu.dot_dimension_numbers<[1], [0], [0], [1], [0, 0, 1, 1], [], []>} : vector<8x128xbf16>, vector<128x128xbf16>, vector<8x128xf32> -> vector<8x128xf32>
      %c0_84 = arith.constant 0 : index
      %c0_85 = arith.constant 0 : index
      %187 = vector.load %arg19[%c0_84, %c0_85] : memref<1x128xf32, #tpu.memory_space<vmem>>, vector<1x128xf32>
      %188 = vector.broadcast %187 : vector<1x128xf32> to vector<8x128xf32>
      %189 = arith.addf %186, %188 : vector<8x128xf32>
      %190 = math.tanh %189 : vector<8x128xf32>
      %191 = arith.truncf %190 : vector<8x128xf32> to vector<8x128xbf16>
      %c0_86 = arith.constant 0 : index
      %c0_87 = arith.constant 0 : index
      %192 = vector.load %arg20[%c0_86, %c0_87] : memref<128x128xbf16, #tpu.memory_space<vmem>>, vector<128x128xbf16>
      %cst_88 = arith.constant dense<0.000000e+00> : vector<8x128xf32>
      %193 = tpu.matmul %191, %192, %cst_88 {dimension_numbers = #tpu.dot_dimension_numbers<[1], [0], [0], [1], [0, 0, 1, 1], [], []>} : vector<8x128xbf16>, vector<128x128xbf16>, vector<8x128xf32> -> vector<8x128xf32>
      %c0_89 = arith.constant 0 : index
      %c0_90 = arith.constant 0 : index
      %194 = vector.load %arg21[%c0_89, %c0_90] : memref<1x128xf32, #tpu.memory_space<vmem>>, vector<1x128xf32>
      %195 = vector.broadcast %194 : vector<1x128xf32> to vector<8x128xf32>
      %196 = arith.addf %193, %195 : vector<8x128xf32>
      %c0_91 = arith.constant 0 : index
      %c0_92 = arith.constant 0 : index
      %c0_93 = arith.constant 0 : index
      %197 = vector.load %arg22[%c0_91, %c0_92, %c0_93] : memref<1x8x128xf32, #tpu.memory_space<vmem>>, vector<1x8x128xf32>
      %198 = vector.shape_cast %197 : vector<1x8x128xf32> to vector<8x128xf32>
      %199 = vector.shape_cast %196 : vector<8x128xf32> to vector<1x8x128xf32>
      tpu.vector_store %arg22[%c0_91, %c0_92, %c0_93], %199 {strides = array<i32>} : memref<1x8x128xf32, #tpu.memory_space<vmem>>, vector<1x8x128xf32>,
    } else {
    }
    return
  }
  func.func @transform_0(%arg0: i32, %arg1: i32) -> (i32, i32, i32) {
    %c0_i32 = arith.constant 0 : i32
    %c0_i32_0 = arith.constant 0 : i32
    %c0_i32_1 = arith.constant 0 : i32
    return %arg0, %c0_i32, %c0_i32_0 : i32, i32, i32
  }
  func.func @transform_1(%arg0: i32, %arg1: i32) -> (i32, i32, i32) {
    %c0_i32 = arith.constant 0 : i32
    %c0_i32_0 = arith.constant 0 : i32
    %c0_i32_1 = arith.constant 0 : i32
    return %arg0, %c0_i32, %c0_i32_0 : i32, i32, i32
  }
  func.func @transform_2(%arg0: i32, %arg1: i32) -> (i32, i32) {
    %c0_i32 = arith.constant 0 : i32
    %c0_i32_0 = arith.constant 0 : i32
    %c0_i32_1 = arith.constant 0 : i32
    return %c0_i32, %c0_i32_0 : i32, i32
  }
  func.func @transform_3(%arg0: i32, %arg1: i32) -> (i32, i32) {
    %c0_i32 = arith.constant 0 : i32
    %c0_i32_0 = arith.constant 0 : i32
    %c0_i32_1 = arith.constant 0 : i32
    return %c0_i32, %c0_i32_0 : i32, i32
  }
  func.func @transform_4(%arg0: i32, %arg1: i32) -> (i32, i32, i32) {
    %c0_i32 = arith.constant 0 : i32
    %c0_i32_0 = arith.constant 0 : i32
    %c0_i32_1 = arith.constant 0 : i32
    return %arg1, %c0_i32, %c0_i32_0 : i32, i32, i32
  }
  func.func @transform_5(%arg0: i32, %arg1: i32) -> (i32, i32, i32) {
    %c0_i32 = arith.constant 0 : i32
    %c0_i32_0 = arith.constant 0 : i32
    %c0_i32_1 = arith.constant 0 : i32
    return %arg1, %c0_i32, %c0_i32_0 : i32, i32, i32
  }
  func.func @transform_6(%arg0: i32, %arg1: i32) -> (i32, i32, i32) {
    %c0_i32 = arith.constant 0 : i32
    %c0_i32_0 = arith.constant 0 : i32
    %c0_i32_1 = arith.constant 0 : i32
    return %arg1, %c0_i32, %c0_i32_0 : i32, i32, i32
  }
  func.func @transform_7(%arg0: i32, %arg1: i32) -> (i32, i32, i32) {
    %c0_i32 = arith.constant 0 : i32
    %c0_i32_0 = arith.constant 0 : i32
    %c0_i32_1 = arith.constant 0 : i32
    return %arg1, %c0_i32, %c0_i32_0 : i32, i32, i32
  }
  func.func @transform_8(%arg0: i32, %arg1: i32) -> (i32, i32, i32) {
    %c0_i32 = arith.constant 0 : i32
    %c0_i32_0 = arith.constant 0 : i32
    %c0_i32_1 = arith.constant 0 : i32
    return %arg1, %c0_i32, %c0_i32_0 : i32, i32, i32
  }
  func.func @transform_9(%arg0: i32, %arg1: i32) -> (i32, i32, i32) {
    %c0_i32 = arith.constant 0 : i32
    %c0_i32_0 = arith.constant 0 : i32
    %c0_i32_1 = arith.constant 0 : i32
    return %arg1, %c0_i32, %c0_i32_0 : i32, i32, i32
  }
  func.func @transform_10(%arg0: i32, %arg1: i32) -> (i32, i32, i32) {
    %c0_i32 = arith.constant 0 : i32
    %c0_i32_0 = arith.constant 0 : i32
    %c0_i32_1 = arith.constant 0 : i32
    return %arg1, %c0_i32, %c0_i32_0 : i32, i32, i32
  }
  func.func @transform_11(%arg0: i32, %arg1: i32) -> (i32, i32, i32) {
    %c0_i32 = arith.constant 0 : i32
    %c0_i32_0 = arith.constant 0 : i32
    %c0_i32_1 = arith.constant 0 : i32
    return %arg1, %c0_i32, %c0_i32_0 : i32, i32, i32
  }
  func.func @transform_12(%arg0: i32, %arg1: i32) -> (i32, i32, i32) {
    %c0_i32 = arith.constant 0 : i32
    %c0_i32_0 = arith.constant 0 : i32
    %c0_i32_1 = arith.constant 0 : i32
    return %arg1, %c0_i32, %c0_i32_0 : i32, i32, i32
  }
  func.func @transform_13(%arg0: i32, %arg1: i32) -> (i32, i32, i32) {
    %c0_i32 = arith.constant 0 : i32
    %c0_i32_0 = arith.constant 0 : i32
    %c0_i32_1 = arith.constant 0 : i32
    return %arg1, %c0_i32, %c0_i32_0 : i32, i32, i32
  }
  func.func @transform_14(%arg0: i32, %arg1: i32) -> (i32, i32, i32) {
    %c0_i32 = arith.constant 0 : i32
    %c0_i32_0 = arith.constant 0 : i32
    %c0_i32_1 = arith.constant 0 : i32
    return %arg1, %c0_i32, %c0_i32_0 : i32, i32, i32
  }
  func.func @transform_15(%arg0: i32, %arg1: i32) -> (i32, i32, i32) {
    %c0_i32 = arith.constant 0 : i32
    %c0_i32_0 = arith.constant 0 : i32
    %c0_i32_1 = arith.constant 0 : i32
    return %arg1, %c0_i32, %c0_i32_0 : i32, i32, i32
  }
  func.func @transform_16(%arg0: i32, %arg1: i32) -> (i32, i32) {
    %c0_i32 = arith.constant 0 : i32
    %c0_i32_0 = arith.constant 0 : i32
    %c0_i32_1 = arith.constant 0 : i32
    return %c0_i32, %c0_i32_0 : i32, i32
  }
  func.func @transform_17(%arg0: i32, %arg1: i32) -> (i32, i32) {
    %c0_i32 = arith.constant 0 : i32
    %c0_i32_0 = arith.constant 0 : i32
    %c0_i32_1 = arith.constant 0 : i32
    return %c0_i32, %c0_i32_0 : i32, i32
  }
  func.func @transform_18(%arg0: i32, %arg1: i32) -> (i32, i32) {
    %c0_i32 = arith.constant 0 : i32
    %c0_i32_0 = arith.constant 0 : i32
    %c0_i32_1 = arith.constant 0 : i32
    return %c0_i32, %c0_i32_0 : i32, i32
  }
  func.func @transform_19(%arg0: i32, %arg1: i32) -> (i32, i32) {
    %c0_i32 = arith.constant 0 : i32
    %c0_i32_0 = arith.constant 0 : i32
    %c0_i32_1 = arith.constant 0 : i32
    return %c0_i32, %c0_i32_0 : i32, i32
  }
  func.func @transform_20(%arg0: i32, %arg1: i32) -> (i32, i32, i32) {
    %c0_i32 = arith.constant 0 : i32
    %c0_i32_0 = arith.constant 0 : i32
    %c0_i32_1 = arith.constant 0 : i32
    return %arg0, %c0_i32, %c0_i32_0 : i32, i32, i32
  }
}

</mosaic_0001>

<bundles_post_ra>
// kernel: bert_classification_forward.1
= control target key start
LH: loop header
LB: loop body
LE: loop exit
PB: predicated region body
PF: predicated region fallthrough
CT: control target
= control target key end

     0   :  { %s8153_s22 = smov 0   ;;  %s8155_s23 = smov 0   ;;  %s11273_s0 = inlined_call_operand.vmem [shape: f32[2,128,128], index: 0, kind: input, shape index: {}]   ;;  %s11274_s1 = inlined_call_operand.vmem [shape: f32[2,1,128], index: 1, kind: input, shape index: {}]   ;;  %s11275_s2 = inlined_call_operand.vmem [shape: f32[1,128], index: 2, kind: input, shape index: {}]   ;;  %s11276_s3 = inlined_call_operand.vmem [shape: f32[1,128], index: 3, kind: input, shape index: {}]   ;;  %s11277_s4 = inlined_call_operand.vmem [shape: bf16[2,128,384], index: 4, kind: input, shape index: {}]   ;;  %s11278_s5 = inlined_call_operand.vmem [shape: f32[2,1,384], index: 5, kind: input, shape index: {}]   ;;  %s11279_s6 = inlined_call_operand.vmem [shape: bf16[2,128,128], index: 6, kind: input, shape index: {}]   ;;  %s11280_s7 = inlined_call_operand.vmem [shape: f32[2,1,128], index: 7, kind: input, shape index: {}]   ;;  %s11281_s8 = inlined_call_operand.vmem [shape: f32[2,1,128], index: 8, kind: input, shape index: {}]   ;;  %s11282_s9 = inlined_call_operand.vmem [shape: f32[2,1,128], index: 9, kind: input, shape index: {}]   ;;  %s11283_s10 = inlined_call_operand.vmem [shape: bf16[2,128,512], index: 10, kind: input, shape index: {}]   ;;  %s11284_s11 = inlined_call_operand.vmem [shape: f32[2,1,512], index: 11, kind: input, shape index: {}]   ;;  %s11285_s12 = inlined_call_operand.vmem [shape: bf16[2,512,128], index: 12, kind: input, shape index: {}]   ;;  %s11286_s13 = inlined_call_operand.vmem [shape: f32[2,1,128], index: 13, kind: input, shape index: {}]   ;;  %s11287_s14 = inlined_call_operand.vmem [shape: f32[2,1,128], index: 14, kind: input, shape index: {}]   ;;  %s11288_s15 = inlined_call_operand.vmem [shape: f32[2,1,128], index: 15, kind: input, shape index: {}]   ;;  %s11289_s16 = inlined_call_operand.vmem [shape: bf16[128,128], index: 16, kind: input, shape index: {}]   ;;  %s11290_s17 = inlined_call_operand.vmem [shape: f32[1,128], index: 17, kind: input, shape index: {}]   ;;  %s11291_s18 = inlined_call_operand.vmem [shape: bf16[128,128], index: 18, kind: input, shape index: {}]   ;;  %s11292_s19 = inlined_call_operand.vmem [shape: f32[1,128], index: 19, kind: input, shape index: {}]   ;;  %s11293_s20 = inlined_call_operand.vmem [shape: f32[2,8,128], index: 20, kind: output, shape index: {}]  }
   0x1   :  { %11353 = sst [smem:[#allocation48_spill]] %s11273_s0  ;;  %s8157_s24 = smov 0  }
   0x2   :  { %11354 = sst [smem:[#allocation49_spill]] %s11274_s1  ;;  %s8151_s1 = smov 0  }
   0x3   :  { %11355 = sst [smem:[#allocation50_spill]] %s11275_s2  ;;  %s8159_s2 = smov 0  }
   0x4   :  { %11356 = sst [smem:[#allocation51_spill]] %s11276_s3 }
   0x5   :  { %11357 = sst [smem:[#allocation52_spill]] %s11277_s4 }
   0x6   :  { %11358 = sst [smem:[#allocation53_spill]] %s11278_s5 }
   0x7   :  { %11359 = sst [smem:[#allocation54_spill]] %s11279_s6 }
   0x8   :  { %11360 = sst [smem:[#allocation55_spill]] %s11283_s10 }
   0x9   :  { %11361 = sst [smem:[#allocation56_spill]] %s11284_s11 }
   0xa   :  { %11362 = sst [smem:[#allocation57_spill]] %s11289_s16 }
   0xb   :  { %11363 = sst [smem:[#allocation58_spill]] %s11290_s17 }
   0xc   :  { %11364 = sst [smem:[#allocation59_spill]] %s11291_s18 }
   0xd   :  { %11365 = sst [smem:[#allocation60_spill]] %s11292_s19 }
   0xe   :  { %11366 = sst [smem:[#allocation61_spill]] %s11293_s20 }
   0xf LB: > { %11367 = sst [smem:[#allocation3_spill]] %s8022_s1  ;;  %s39_s25 = sadd.s32 1, %s8030_s23  ;;  %s8038_s2 = sphi %s8159_s2, %s30_s2   ;;  %s8034_s24 = sphi %s8157_s24, %s11542_s24   ;;  %s8030_s23 = sphi %s8155_s23, %s11541_s23   ;;  %s8026_s22 = sphi %s8153_s22, %s11540_s22   ;;  %s8022_s1 = sphi %s8151_s1, %s11539_s1  }
  0x10   : > { %11368 = sst [smem:[#allocation4_spill]] %s8030_s23  ;;  %s42_s3 = sadd.s32 1, %s8034_s24 }
  0x11   : > { %11369 = sst [smem:[#allocation5_spill]] %s8034_s24  ;;  %p40_p0 = scmp.ge.s32.totalorder %s39_s25, 2 }
  0x12   : > { %11370 = sst [smem:[#allocation6_spill]] %s8038_s2  ;;  %p6308_p1 = scmp.ge.s32.totalorder %s8038_s2, 1 }
  0x13   : > { %p688_p2 = scmp.lt.s32.totalorder %s8038_s2, 5  ;;  %s11544_s25 = smov (%p40_p0, %s39_s25), 0 }
  0x14   : > { %11371 = sst [smem:[#allocation7_spill]] %s11544_s25  ;;  %s11546_s3 = smov (!%p40_p0, %s42_s3), %s8034_s24 }
  0x15   : > { %p689_p3 = pnand %p6308_p1, %p688_p2  ;;  %p44_p4 = scmp.ge.s32.totalorder %s11546_s3, 2 }
  0x17   : > { %s11548_s3 = smov (%p44_p4, %s11546_s3), 0  ;;  %692 = sbr.rel (%p689_p3) target bundleno = 5268 (0x1494), region = 100 }
  0x18   : > { %11372 = sst [smem:[#allocation8_spill]] %s11548_s3 }
  0x1c   : > { %p794_p5 = scmp.lt.s32.totalorder %s8026_s22, 1  ;;  %p802_p6 = scmp.lt.s32.totalorder %s8022_s1, 1 }
  0x1d   : > { %s11373_s29 = sld [smem:[#allocation49_spill]] }
  0x1e   : > { %s11550_s22 = smov (!%p794_p5, %s8026_s22), 1  ;;  %s11375_s3 = sld [smem:[#allocation48_spill]] }
  0x1f   : > { %s8185_s26 = scalar_select %p802_p6, %s8022_s1, 1 }
  0x20   : > { %s6479_s27 = sshll.u32 %s11550_s22, 7  ;;  %s11377_s18 = sld [smem:[#allocation52_spill]] }
  0x21   : > { %s7197_s24 = smul.u32 192, %s8185_s26  ;;  %s6480_s2 = sshll.u32 %s8185_s26, 6 }
  0x22   : > { %s7198_s23 = smul.u32 3, %s8185_s26  ;;  %s11378_s6 = sld [smem:[#allocation54_spill]] }
  0x23   : > { %s8190_s30 = scalar_lea.vmem %s11373_s29, %s11550_s22  ;;  %s11379_s5 = sld [smem:[#allocation53_spill]] }
  0x24   : > { %11374 = sst [smem:[#allocation9_spill]] %s8190_s30  ;;  %s8195_s25 = scalar_lea.vmem %s11375_s3, %s6479_s27 }
  0x25   : > { %11376 = sst [smem:[#allocation10_spill]] %s8195_s25  ;;  %s6481_s1 = sshll.u32 %s8185_s26, 8 }
  0x26   : > { %s8203_s16 = scalar_lea.vmem %s11377_s18, %s7197_s24  ;;  %s11380_s10 = sld [smem:[#allocation55_spill]] }
  0x27   : > { %s11381_s11 = sld [smem:[#allocation56_spill]]  ;;  %s8242_s20 = scalar_lea.vmem %s11285_s12, %s6481_s1 }
  0x28   : > { %s8208_s4 = scalar_lea.vmem %s11378_s6, %s6480_s2  ;;  %s6316_s2 = sshll.u32 %s8185_s26, 2 }
  0x29   : > { %s8213_s3 = scalar_lea.vmem %s11379_s5, %s7198_s23  ;;  %s841_s19 = scalar_lea.vmem %s11286_s13, %s8185_s26 }
  0x2a   : > { %s844_s6 = scalar_lea.vmem %s11287_s14, %s8185_s26  ;;  %s6319_s23 = sshll.u32 %s11550_s22, 3 }
  0x2b   : > { %s11384_s30 = sld [smem:[#allocation3_spill]] }
  0x2c   : > { %s8232_s29 = scalar_lea.vmem %s11380_s10, %s6481_s1  ;;  %s847_s10 = scalar_lea.vmem %s11288_s15, %s8185_s26 }
  0x2d   : > { %s8237_s27 = scalar_lea.vmem %s11381_s11, %s6316_s2  ;;  %s11383_s11 = sld [smem:[#allocation61_spill]] }
  0x2e   : > { %11382 = sst [smem:[#allocation11_spill]] %s8237_s27 }
  0x31   : > { %p6320_p7 = scmp.ne.s32.totalorder %s11384_s30, 0 }
  0x32   : > { %s11385_s1 = sld [smem:[#allocation10_spill]] (!%p6320_p7) }
  0x33   : > { %s8259_s27 = scalar_lea.vmem %s11383_s11, %s6319_s23  ;;  %856 = sbr.rel (%p6320_p7) target bundleno = 396 (0x18c), region = 104 }
  0x34   : > { %s11386_s22 = sld [smem:[#allocation50_spill]] (!%p6320_p7) }
  0x35   : > { %s11387_s21 = sld [smem:[#allocation51_spill]] (!%p6320_p7) }
  0x38   : > { %v857_v0 = vld [vmem:[%s11385_s1] sm:$0xff]  ;;  %v859_v1 = vld [vmem:[%s11385_s1 + $0x10] sm:$0xff]  ;;  %v858_v2 = vld [vmem:[%s11385_s1 + $0x8] sm:$0xff] }
  0x39   : > { %875 = vadd.xlane.f32.xlu0 %v857_v0  ;;  %879 = vadd.xlane.f32.xlu1 %v859_v1  ;;  %v860_v3 = vld [vmem:[%s11385_s1 + $0x18] sm:$0xff]  ;;  %v861_v4 = vld [vmem:[%s11385_s1 + $0x20] sm:$0xff]  ;;  %v862_v5 = vld [vmem:[%s11385_s1 + $0x28] sm:$0xff] }
  0x3a   : > { %v863_v6 = vld [vmem:[%s11385_s1 + $0x30] sm:$0xff]  ;;  %v864_v7 = vld [vmem:[%s11385_s1 + $0x38] sm:$0xff]  ;;  %v865_v8 = vld [vmem:[%s11385_s1 + $0x40] sm:$0xff] }
  0x3b   : > { %v866_v9 = vld [vmem:[%s11385_s1 + $0x48] sm:$0xff]  ;;  %v867_v10 = vld [vmem:[%s11385_s1 + $0x50] sm:$0xff]  ;;  %v8274_v11 = vld [vmem:[%s11385_s1 + $0x58] sm:$0xff] }
  0x3c   : > { %v8278_v12 = vld [vmem:[%s11385_s1 + $0x60] sm:$0xff]  ;;  %v8281_v13 = vld [vmem:[%s11385_s1 + $0x68] sm:$0xff]  ;;  %v8286_v14 = vld [vmem:[%s11385_s1 + $0x70] sm:$0xff] }
  0x3d   : > { %877 = vadd.xlane.f32.xlu0 %v858_v2  ;;  %881 = vadd.xlane.f32.xlu1 %v860_v3  ;;  %v8289_v15 = vld [vmem:[%s11385_s1 + $0x78] sm:$0xff] }
  0x41   : > { %883 = vadd.xlane.f32.xlu0 %v861_v4  ;;  %885 = vadd.xlane.f32.xlu1 %v862_v5 }
  0x45   : > { %887 = vadd.xlane.f32.xlu0 %v863_v6  ;;  %889 = vadd.xlane.f32.xlu1 %v864_v7 }
  0x49   : > { %891 = vadd.xlane.f32.xlu0 %v865_v8  ;;  %893 = vadd.xlane.f32.xlu1 %v866_v9 }
  0x4d   : > { %895 = vadd.xlane.f32.xlu0 %v867_v10  ;;  %897 = vadd.xlane.f32.xlu1 %v8274_v11 }
  0x51   : > { %899 = vadd.xlane.f32.xlu0 %v8278_v12  ;;  %901 = vadd.xlane.f32.xlu1 %v8281_v13 }
  0x55   : > { %903 = vadd.xlane.f32.xlu0 %v8286_v14  ;;  %905 = vadd.xlane.f32.xlu1 %v8289_v15 }
  0xc2   : > { %v876_v16 = vpop.xlane.xlu0 %875  ;;  %v880_v17 = vpop.xlane.xlu1 %879 }
  0xc3   : > { %v908_v18 = vmul.f32 0.0078125, %v876_v16  ;;  %v910_v19 = vmul.f32 0.0078125, %v880_v17 }
  0xc5   : > { %v8293_v20 = vsub.f32 %v857_v0, %v908_v18  ;;  %v8295_v21 = vsub.f32 %v859_v1, %v910_v19 }
  0xc6   : > { %v878_v22 = vpop.xlane.xlu0 %877  ;;  %v882_v23 = vpop.xlane.xlu1 %881 }
  0xc7   : > { %v909_v24 = vmul.f32 0.0078125, %v878_v22  ;;  %v940_v25 = vmul.f32 %v8293_v20, %v8293_v20  ;;  %v911_v26 = vmul.f32 0.0078125, %v882_v23  ;;  %v942_v29 = vmul.f32 %v8295_v21, %v8295_v21 }
  0xc9   : > { %v8299_v27 = vsub.f32 %v858_v2, %v909_v24  ;;  %956 = vadd.xlane.f32.xlu0 %v940_v25  ;;  %v8301_v28 = vsub.f32 %v860_v3, %v911_v26 }
  0xca   : > { %v884_v30 = vpop.xlane.xlu0 %883  ;;  %v886_v31 = vpop.xlane.xlu1 %885 }
  0xcb   : > { %v912_v32 = vmul.f32 0.0078125, %v884_v30  ;;  %v941_v33 = vmul.f32 %v8299_v27, %v8299_v27  ;;  %v913_v34 = vmul.f32 0.0078125, %v886_v31  ;;  %v943_v37 = vmul.f32 %v8301_v28, %v8301_v28 }
  0xcd   : > { %v8307_v35 = vsub.f32 %v861_v4, %v912_v32  ;;  %960 = vadd.xlane.f32.xlu0 %v942_v29  ;;  %958 = vadd.xlane.f32.xlu1 %v941_v33  ;;  %v8309_v36 = vsub.f32 %v862_v5, %v913_v34 }
  0xce   : > { %v888_v38 = vpop.xlane.xlu0 %887  ;;  %v890_v39 = vpop.xlane.xlu1 %889 }
  0xcf   : > { %v914_v40 = vmul.f32 0.0078125, %v888_v38  ;;  %v944_v41 = vmul.f32 %v8307_v35, %v8307_v35  ;;  %v915_v42 = vmul.f32 0.0078125, %v890_v39  ;;  %v945_v45 = vmul.f32 %v8309_v36, %v8309_v36 }
  0xd1   : > { %v8315_v43 = vsub.f32 %v863_v6, %v914_v40  ;;  %962 = vadd.xlane.f32.xlu1 %v943_v37  ;;  %964 = vadd.xlane.f32.xlu0 %v944_v41  ;;  %v8317_v44 = vsub.f32 %v864_v7, %v915_v42 }
  0xd2   : > { %v892_v46 = vpop.xlane.xlu0 %891  ;;  %v894_v47 = vpop.xlane.xlu1 %893 }
  0xd3   : > { %v916_v48 = vmul.f32 0.0078125, %v892_v46  ;;  %v946_v49 = vmul.f32 %v8315_v43, %v8315_v43  ;;  %v917_v50 = vmul.f32 0.0078125, %v894_v47  ;;  %v947_v53 = vmul.f32 %v8317_v44, %v8317_v44 }
  0xd5   : > { %v8323_v51 = vsub.f32 %v865_v8, %v916_v48  ;;  %966 = vadd.xlane.f32.xlu1 %v945_v45  ;;  %968 = vadd.xlane.f32.xlu0 %v946_v49  ;;  %v8325_v52 = vsub.f32 %v866_v9, %v917_v50  ;;  %v8365_v50 = vld [vmem:[%s11386_s22] ss:$0 sm:$0xff] }
  0xd6   : > { %v896_v54 = vpop.xlane.xlu0 %895  ;;  %v898_v55 = vpop.xlane.xlu1 %897 }
  0xd7   : > { %v918_v56 = vmul.f32 0.0078125, %v896_v54  ;;  %v948_v57 = vmul.f32 %v8323_v51, %v8323_v51  ;;  %v919_v58 = vmul.f32 0.0078125, %v898_v55  ;;  %v949_v61 = vmul.f32 %v8325_v52, %v8325_v52 }
  0xd9   : > { %v8331_v59 = vsub.f32 %v867_v10, %v918_v56  ;;  %970 = vadd.xlane.f32.xlu1 %v947_v53  ;;  %972 = vadd.xlane.f32.xlu0 %v948_v57  ;;  %v8334_v60 = vsub.f32 %v8274_v11, %v919_v58  ;;  %v8371_v56 = vld [vmem:[%s11387_s21] ss:$0 sm:$0xff] }
  0xda   : > { %v900_v62 = vpop.xlane.xlu0 %899  ;;  %v902_v63 = vpop.xlane.xlu1 %901 }
  0xdb   : > { %v920_v0 = vmul.f32 0.0078125, %v900_v62  ;;  %v950_v1 = vmul.f32 %v8331_v59, %v8331_v59  ;;  %v921_v2 = vmul.f32 0.0078125, %v902_v63  ;;  %v951_v5 = vmul.f32 %v8334_v60, %v8334_v60 }
  0xdd   : > { %v8341_v3 = vsub.f32 %v8278_v12, %v920_v0  ;;  %974 = vadd.xlane.f32.xlu1 %v949_v61  ;;  %976 = vadd.xlane.f32.xlu0 %v950_v1  ;;  %v8344_v4 = vsub.f32 %v8281_v13, %v921_v2 }
  0xde   : > { %v904_v6 = vpop.xlane.xlu0 %903  ;;  %v906_v7 = vpop.xlane.xlu1 %905 }
  0xdf   : > { %v922_v8 = vmul.f32 0.0078125, %v904_v6  ;;  %v952_v9 = vmul.f32 %v8341_v3, %v8341_v3  ;;  %v923_v10 = vmul.f32 0.0078125, %v906_v7  ;;  %v953_v13 = vmul.f32 %v8344_v4, %v8344_v4 }
  0xe1   : > { %v8351_v11 = vsub.f32 %v8286_v14, %v922_v8  ;;  %978 = vadd.xlane.f32.xlu1 %v951_v5  ;;  %980 = vadd.xlane.f32.xlu0 %v952_v9  ;;  %v8354_v12 = vsub.f32 %v8289_v15, %v923_v10 }
  0xe3   : > { %v954_v16 = vmul.f32 %v8351_v11, %v8351_v11  ;;  %v955_v17 = vmul.f32 %v8354_v12, %v8354_v12 }
  0xe5   : > { %982 = vadd.xlane.f32.xlu1 %v953_v13  ;;  %984 = vadd.xlane.f32.xlu0 %v954_v16 }
  0xe9   : > { %986 = vadd.xlane.f32.xlu1 %v955_v17 }
 0x152   : > { %v957_v18 = vpop.xlane.xlu0 %956 }
 0x153   : > { %v988_v14 = vmul.f32 0.0078125, %v957_v18 }
 0x155   : > { %v1004_v19 = vadd.f32 1e-12, %v988_v14 }
 0x156   : > { %v959_v22 = vpop.xlane.xlu1 %958  ;;  %v961_v23 = vpop.xlane.xlu0 %960 }
 0x157   : > { %7245 = vrsqrt.f32 %v1004_v19  ;;  %v989_v15 = vmul.f32 0.0078125, %v959_v22  ;;  %v990_v24 = vmul.f32 0.0078125, %v961_v23 }
 0x159   : > { %v1005_v25 = vadd.f32 1e-12, %v989_v15  ;;  %v1006_v26 = vadd.f32 1e-12, %v990_v24 }
 0x15a   : > { %v963_v29 = vpop.xlane.xlu1 %962  ;;  %v965_v30 = vpop.xlane.xlu0 %964 }
 0x15b   : > { %7247 = vrsqrt.f32 %v1005_v25  ;;  %v991_v31 = vmul.f32 0.0078125, %v963_v29  ;;  %v992_v32 = vmul.f32 0.0078125, %v965_v30 }
 0x15c   : > { %7249 = vrsqrt.f32 %v1006_v26 }
 0x15d   : > { %v1007_v33 = vadd.f32 1e-12, %v991_v31  ;;  %v1008_v34 = vadd.f32 1e-12, %v992_v32 }
 0x15e   : > { %v967_v37 = vpop.xlane.xlu1 %966  ;;  %v969_v38 = vpop.xlane.xlu0 %968 }
 0x15f   : > { %7251 = vrsqrt.f32 %v1007_v33  ;;  %v993_v39 = vmul.f32 0.0078125, %v967_v37  ;;  %v994_v40 = vmul.f32 0.0078125, %v969_v38 }
 0x160   : > { %7253 = vrsqrt.f32 %v1008_v34 }
 0x161   : > { %v1009_v41 = vadd.f32 1e-12, %v993_v39  ;;  %v1010_v42 = vadd.f32 1e-12, %v994_v40 }
 0x162   : > { %v971_v45 = vpop.xlane.xlu1 %970  ;;  %v973_v46 = vpop.xlane.xlu0 %972 }
 0x163   : > { %7255 = vrsqrt.f32 %v1009_v41  ;;  %v995_v47 = vmul.f32 0.0078125, %v971_v45  ;;  %v996_v48 = vmul.f32 0.0078125, %v973_v46 }
 0x164   : > { %v7246_v49 = vpop.eup %7245  ;;  %7257 = vrsqrt.f32 %v1010_v42 }
 0x165   : > { %v1036_v53 = vmul.f32 %v7246_v49, %v8293_v20  ;;  %v1011_v54 = vadd.f32 1e-12, %v995_v47  ;;  %v1012_v55 = vadd.f32 1e-12, %v996_v48 }
 0x166   : > { %v975_v57 = vpop.xlane.xlu1 %974  ;;  %v977_v58 = vpop.xlane.xlu0 %976 }
 0x167   : > { %v1058_v61 = vmul.f32 %v8365_v50, %v1036_v53  ;;  %7259 = vrsqrt.f32 %v1011_v54  ;;  %v997_v62 = vmul.f32 0.0078125, %v975_v57  ;;  %v998_v63 = vmul.f32 0.0078125, %v977_v58 }
 0x168   : > { %v7248_v0 = vpop.eup %7247  ;;  %7261 = vrsqrt.f32 %v1012_v55 }
 0x169   : > { %v7250_v1 = vpop.eup %7249  ;;  %v1080_v2 = vadd.f32 %v8371_v56, %v1058_v61  ;;  %v1037_v20 = vmul.f32 %v7248_v0, %v8299_v27  ;;  %v1013_v5 = vadd.f32 1e-12, %v997_v62  ;;  %v1014_v6 = vadd.f32 1e-12, %v998_v63 }
 0x16a   : > { %v1038_v7 = vmul.f32 %v7250_v1, %v8295_v21  ;;  %v979_v8 = vpop.xlane.xlu1 %978  ;;  %v981_v9 = vpop.xlane.xlu0 %980 }
 0x16b   : > { %1096 = vst [vmem:[#allocation2 + $0x30] sm:$0xff] %v1080_v2  ;;  %v1059_v10 = vmul.f32 %v8365_v50, %v1037_v20  ;;  %7263 = vrsqrt.f32 %v1013_v5  ;;  %v999_v13 = vmul.f32 0.0078125, %v979_v8  ;;  %v1000_v16 = vmul.f32 0.0078125, %v981_v9 }
 0x16c   : > { %v7252_v17 = vpop.eup %7251  ;;  %v1060_v18 = vmul.f32 %v8365_v50, %v1038_v7  ;;  %7265 = vrsqrt.f32 %v1014_v6 }
 0x16d   : > { %v7254_v14 = vpop.eup %7253  ;;  %v1081_v19 = vadd.f32 %v8371_v56, %v1059_v10  ;;  %v1039_v27 = vmul.f32 %v7252_v17, %v8301_v28  ;;  %v1015_v22 = vadd.f32 1e-12, %v999_v13  ;;  %v1016_v23 = vadd.f32 1e-12, %v1000_v16 }
 0x16e   : > { %v1082_v21 = vadd.f32 %v8371_v56, %v1060_v18  ;;  %v1040_v15 = vmul.f32 %v7254_v14, %v8307_v35  ;;  %v983_v24 = vpop.xlane.xlu1 %982  ;;  %v985_v25 = vpop.xlane.xlu0 %984 }
 0x16f   : > { %1097 = vst [vmem:[#allocation2] sm:$0xff] %v1081_v19  ;;  %v1061_v26 = vmul.f32 %v8365_v50, %v1039_v27  ;;  %7267 = vrsqrt.f32 %v1015_v22  ;;  %v1001_v29 = vmul.f32 0.0078125, %v983_v24  ;;  %v1002_v30 = vmul.f32 0.0078125, %v985_v25 }
 0x170   : > { %v7256_v31 = vpop.eup %7255  ;;  %1098 = vst [vmem:[#allocation2 + $0x58] sm:$0xff] %v1082_v21  ;;  %v1062_v32 = vmul.f32 %v8365_v50, %v1040_v15  ;;  %7269 = vrsqrt.f32 %v1016_v23 }
 0x171   : > { %v7258_v28 = vpop.eup %7257  ;;  %v1083_v33 = vadd.f32 %v8371_v56, %v1061_v26  ;;  %v1041_v34 = vmul.f32 %v7256_v31, %v8309_v36  ;;  %v1017_v37 = vadd.f32 1e-12, %v1001_v29  ;;  %v1018_v35 = vadd.f32 1e-12, %v1002_v30 }
 0x172   : > { %v1084_v38 = vadd.f32 %v8371_v56, %v1062_v32  ;;  %v1042_v39 = vmul.f32 %v7258_v28, %v8315_v43  ;;  %v987_v40 = vpop.xlane.xlu1 %986 }
 0x173   : > { %1099 = vst [vmem:[#allocation2 + $0x18] sm:$0xff] %v1083_v33  ;;  %v1063_v41 = vmul.f32 %v8365_v50, %v1041_v34  ;;  %7271 = vrsqrt.f32 %v1017_v37  ;;  %v1003_v42 = vmul.f32 0.0078125, %v987_v40 }
 0x174   : > { %v7260_v45 = vpop.eup %7259  ;;  %1100 = vst [vmem:[#allocation2 + $0x50] sm:$0xff] %v1084_v38  ;;  %v1064_v46 = vmul.f32 %v8365_v50, %v1042_v39  ;;  %7273 = vrsqrt.f32 %v1018_v35 }
 0x175   : > { %v7262_v47 = vpop.eup %7261  ;;  %v1085_v36 = vadd.f32 %v8371_v56, %v1063_v41  ;;  %v1043_v48 = vmul.f32 %v7260_v45, %v8317_v44  ;;  %v1019_v49 = vadd.f32 1e-12, %v1003_v42 }
 0x176   : > { %v1086_v53 = vadd.f32 %v8371_v56, %v1064_v46  ;;  %v1044_v43 = vmul.f32 %v7262_v47, %v8323_v51 }
 0x177   : > { %1101 = vst [vmem:[#allocation2 + $0x68] sm:$0xff] %v1085_v36  ;;  %v1065_v54 = vmul.f32 %v8365_v50, %v1043_v48  ;;  %7275 = vrsqrt.f32 %v1019_v49 }
 0x178   : > { %v7264_v55 = vpop.eup %7263  ;;  %1102 = vst [vmem:[#allocation2 + $0x8] sm:$0xff] %v1086_v53  ;;  %v1066_v57 = vmul.f32 %v8365_v50, %v1044_v43 }
 0x179   : > { %v7266_v58 = vpop.eup %7265  ;;  %v1087_v61 = vadd.f32 %v8371_v56, %v1065_v54  ;;  %v1045_v62 = vmul.f32 %v7264_v55, %v8325_v52 }
 0x17a   : > { %v1088_v44 = vadd.f32 %v8371_v56, %v1066_v57  ;;  %v1046_v63 = vmul.f32 %v7266_v58, %v8331_v59 }
 0x17b   : > { %1103 = vst [vmem:[#allocation2 + $0x48] sm:$0xff] %v1087_v61  ;;  %v1067_v51 = vmul.f32 %v8365_v50, %v1045_v62 }
 0x17c   : > { %v7268_v0 = vpop.eup %7267  ;;  %1104 = vst [vmem:[#allocation2 + $0x40] sm:$0xff] %v1088_v44  ;;  %v1068_v1 = vmul.f32 %v8365_v50, %v1046_v63 }
 0x17d   : > { %v7270_v2 = vpop.eup %7269  ;;  %v1089_v20 = vadd.f32 %v8371_v56, %v1067_v51  ;;  %v1047_v5 = vmul.f32 %v7268_v0, %v8334_v60 }
 0x17e   : > { %v1090_v6 = vadd.f32 %v8371_v56, %v1068_v1  ;;  %v1048_v52 = vmul.f32 %v7270_v2, %v8341_v3 }
 0x17f   : > { %1105 = vst [vmem:[#allocation2 + $0x20] sm:$0xff] %v1089_v20  ;;  %v1069_v7 = vmul.f32 %v8365_v50, %v1047_v5 }
 0x180   : > { %v7272_v59 = vpop.eup %7271  ;;  %1106 = vst [vmem:[#allocation2 + $0x10] sm:$0xff] %v1090_v6  ;;  %v1070_v8 = vmul.f32 %v8365_v50, %v1048_v52 }
 0x181   : > { %v7274_v9 = vpop.eup %7273  ;;  %v1091_v10 = vadd.f32 %v8371_v56, %v1069_v7  ;;  %v1049_v13 = vmul.f32 %v7272_v59, %v8344_v4 }
 0x182   : > { %v1092_v16 = vadd.f32 %v8371_v56, %v1070_v8  ;;  %v1050_v60 = vmul.f32 %v7274_v9, %v8351_v11 }
 0x183   : > { %1107 = vst [vmem:[#allocation2 + $0x38] sm:$0xff] %v1091_v10  ;;  %v1071_v17 = vmul.f32 %v8365_v50, %v1049_v13 }
 0x184   : > { %v7276_v3 = vpop.eup %7275  ;;  %1108 = vst [vmem:[#allocation2 + $0x60] sm:$0xff] %v1092_v16  ;;  %v1072_v18 = vmul.f32 %v8365_v50, %v1050_v60 }
 0x185   : > { %v1093_v14 = vadd.f32 %v8371_v56, %v1071_v17  ;;  %v1051_v19 = vmul.f32 %v7276_v3, %v8354_v12 }
 0x186   : > { %v1094_v27 = vadd.f32 %v8371_v56, %v1072_v18 }
 0x187   : > { %1109 = vst [vmem:[#allocation2 + $0x70] sm:$0xff] %v1093_v14  ;;  %v1073_v4 = vmul.f32 %v8365_v50, %v1051_v19 }
 0x188   : > { %1110 = vst [vmem:[#allocation2 + $0x78] sm:$0xff] %v1094_v27 }
 0x189   : > { %v1095_v22 = vadd.f32 %v8371_v56, %v1073_v4 }
 0x18b   : > { %1111 = vst [vmem:[#allocation2 + $0x28] sm:$0xff] %v1095_v22 }
 0x18c PF: > { %v7397_v11 = vld [vmem:[%s8203_s16 + $0xac] ss:$12 sps:$4 sm:$0xff]   ;;  %v7399_v12 = vld [vmem:[%s8203_s16 + $0xa8] ss:$12 sps:$4 sm:$0xff]   ;;  %v11305_v23 = vmov 0   ;;  %v1113_v29 = vld [vmem:[#allocation2] sm:$0xff]  ;;  %v1170_v59 = vlaneseq  ;;  %s11443_s23 = scalar_lea.vmem %s11280_s7, %s8185_s26  ;;  %s11444_s0 = scalar_lea.vmem %s11281_s8, %s8185_s26 }
 0x18d   : > { %1345 = vmatprep.mubr.bf16.mxu0 %v11305_v23  ;;  %1313 = vmatprep.subr.bf16.mxu0 %v7397_v11  ;;  %v7400_v50 = vld [vmem:[%s8203_s16 + $0x94] ss:$12 sps:$4 sm:$0xff]   ;;  %v7402_v56 = vld [vmem:[%s8203_s16 + $0x90] ss:$12 sps:$4 sm:$0xff]   ;;  %v7405_v15 = vld [vmem:[%s8203_s16 + $0x78] ss:$12 sps:$4 sm:$0xff]   ;;  %s11445_s5 = scalar_lea.vmem %s11282_s9, %s8185_s26 }
 0x18e   : > { %1314 = vmatpush1.bf16.msra.mxu0 %v7399_v12  ;;  %v7403_v21 = vld [vmem:[%s8203_s16 + $0x7c] ss:$12 sps:$4 sm:$0xff]   ;;  %v7406_v24 = vld [vmem:[%s8203_s16 + $0x64] ss:$12 sps:$4 sm:$0xff]   ;;  %v7408_v26 = vld [vmem:[%s8203_s16 + $0x60] ss:$12 sps:$4 sm:$0xff]  }
 0x18f   : > { %1315 = vmatprep.subr.bf16.mxu0 %v7400_v50  ;;  %v1112_v25 = vld [vmem:[#allocation2 + $0x30] sm:$0xff]  ;;  %v7409_v30 = vld [vmem:[%s8203_s16 + $0x4c] ss:$12 sps:$4 sm:$0xff]   ;;  %v7415_v35 = vld [vmem:[%s8203_s16 + $0x1c] ss:$12 sps:$4 sm:$0xff]   ;;  %v8452_v8 = vshrl.u32 %v1170_v59, 7 }
 0x190   : > { %v1128_v31 = vpack.c.bf16 %v1113_v29, %v1112_v25  ;;  %v7411_v32 = vld [vmem:[%s8203_s16 + $0x48] ss:$12 sps:$4 sm:$0xff]   ;;  %v7421_v33 = vld [vmem:[%s8203_s16 + $0xb0] ss:$12 sps:$4 sm:$0xff]   ;;  %v7422_v34 = vld [vmem:[%s8203_s16 + $0x98] ss:$12 sps:$4 sm:$0xff]  }
 0x191   : > { %v7412_v28 = vld [vmem:[%s8203_s16 + $0x34] ss:$12 sps:$4 sm:$0xff]   ;;  %v7414_v37 = vld [vmem:[%s8203_s16 + $0x30] ss:$12 sps:$4 sm:$0xff]   ;;  %6789 = vmatprep.subr.bf16.mxu1 %v7421_v33  ;;  %v7417_v39 = vld [vmem:[%s8203_s16 + $0x18] ss:$12 sps:$4 sm:$0xff]  }
 0x192   : > { %1316 = vmatpush1.bf16.msra.mxu0 %v7402_v56  ;;  %6805 = vmatprep.mubr.bf16.mxu1 %v1128_v31  ;;  %v7423_v38 = vld [vmem:[%s8203_s16 + $0x80] ss:$12 sps:$4 sm:$0xff]   ;;  %v7418_v40 = vld [vmem:[%s8203_s16 + $0x4] ss:$12 sps:$4 sm:$0xff]   ;;  %v7424_v41 = vld [vmem:[%s8203_s16 + $0x68] ss:$12 sps:$4 sm:$0xff]  }
 0x193   : > { %1317 = vmatprep.subr.bf16.mxu0 %v7403_v21  ;;  %6790 = vmatpush3.bf16.msra.mxu1 %v7421_v33  ;;  %v7420_v42 = vld [vmem:[%s8203_s16] ss:$12 sps:$4 sm:$0xff]   ;;  %v7425_v45 = vld [vmem:[%s8203_s16 + $0x50] ss:$12 sps:$4 sm:$0xff]   ;;  %v7426_v46 = vld [vmem:[%s8203_s16 + $0x38] ss:$12 sps:$4 sm:$0xff]  }
 0x194   : > { %6791 = vmatprep.subr.bf16.mxu1 %v7422_v34  ;;  %v1114_v47 = vld [vmem:[#allocation2 + $0x58] sm:$0xff]  ;;  %v7427_v48 = vld [vmem:[%s8203_s16 + $0x20] ss:$12 sps:$4 sm:$0xff]   ;;  %v7428_v53 = vld [vmem:[%s8203_s16 + $0x8] ss:$12 sps:$4 sm:$0xff]   ;;  %11388 = vst [vmem:[#allocation12_spill] sm:$0xff] %v8452_v8 }
 0x195   : > { %v1115_v36 = vld [vmem:[#allocation2 + $0x18] sm:$0xff]  ;;  %v1116_v43 = vld [vmem:[#allocation2 + $0x50] sm:$0xff]  ;;  %v1117_v54 = vld [vmem:[#allocation2 + $0x68] sm:$0xff]  ;;  %v11304_v9 = vsub.s32 0, %v8452_v8  ;;  %vm1548_vm0 = vcmask 261120   ;;  %s8041_s16 = smov 96  }
 0x196   : > { %1318 = vmatpush1.bf16.msra.mxu0 %v7405_v15  ;;  %v1129_v49 = vpack.c.bf16 %v1115_v36, %v1114_v47  ;;  %v1130_v55 = vpack.c.bf16 %v1117_v54, %v1116_v43  ;;  %v1118_v57 = vld [vmem:[#allocation2 + $0x8] sm:$0xff]  ;;  %v1120_v61 = vld [vmem:[#allocation2 + $0x40] sm:$0xff]  ;;  %v1122_v51 = vld [vmem:[#allocation2 + $0x10] sm:$0xff]  ;;  %v11303_v54 = vsub.s32 2, %v8452_v8  ;;  %s8042_s25 = smov 64   ;;  %s8043_s18 = smov 32  }
 0x197   : > { %1319 = vmatprep.subr.bf16.mxu0 %v7406_v24  ;;  %6792 = vmatpush3.bf16.msra.mxu1 %v7422_v34  ;;  %v1119_v58 = vld [vmem:[#allocation2 + $0x48] sm:$0xff]  ;;  %v1121_v62 = vld [vmem:[#allocation2 + $0x20] sm:$0xff]  ;;  %v1123_v0 = vld [vmem:[#allocation2 + $0x38] sm:$0xff]  ;;  %vm3659_vm1 = vcmask 523264   ;;  %vm3676_vm2 = vcmask 785408   ;;  %s11473_s11 = sld [smem:[#allocation11_spill]] }
 0x198   : > { %6793 = vmatprep.subr.bf16.mxu1 %v7423_v38  ;;  %v1131_v44 = vpack.c.bf16 %v1119_v58, %v1118_v57  ;;  %v1132_v63 = vpack.c.bf16 %v1121_v62, %v1120_v61  ;;  %v1124_v1 = vld [vmem:[#allocation2 + $0x60] sm:$0xff]  ;;  %v1125_v2 = vld [vmem:[#allocation2 + $0x70] sm:$0xff]  ;;  %v1133_v20 = vpack.c.bf16 %v1123_v0, %v1122_v51  ;;  %v1126_v6 = vld [vmem:[#allocation2 + $0x78] sm:$0xff] }
 0x199   : > { %v1134_v5 = vpack.c.bf16 %v1125_v2, %v1124_v1  ;;  %v1127_v52 = vld [vmem:[#allocation2 + $0x28] sm:$0xff]  ;;  %v8456_v10 = vld [vmem:[%s8213_s3] sm:$0x7]  ;;  %s11389_s3 = sld [smem:[#allocation9_spill]] }
 0x19a   : > { %1320 = vmatpush1.bf16.msra.mxu0 %v7408_v26  ;;  %v1135_v7 = vpack.c.bf16 %v1127_v52, %v1126_v6  ;;  %v8461_v16 = vrot.slane %v8456_v10, %v11304_v9 }
 0x19b   : > { %1321 = vmatprep.subr.bf16.mxu0 %v7409_v30  ;;  %6794 = vmatpush3.bf16.msra.mxu1 %v7423_v38 }
 0x19c   : > { %6795 = vmatprep.subr.bf16.mxu1 %v7424_v41 }
 0x19e   : > { %1322 = vmatpush1.bf16.msra.mxu0 %v7411_v32 }
 0x19f   : > { %1323 = vmatprep.subr.bf16.mxu0 %v7412_v28  ;;  %6796 = vmatpush3.bf16.msra.mxu1 %v7424_v41 }
 0x1a0   : > { %6797 = vmatprep.subr.bf16.mxu1 %v7425_v45 }
 0x1a2   : > { %1324 = vmatpush1.bf16.msra.mxu0 %v7414_v37 }
 0x1a3   : > { %1325 = vmatprep.subr.bf16.mxu0 %v7415_v35  ;;  %6798 = vmatpush3.bf16.msra.mxu1 %v7425_v45 }
 0x1a4   : > { %6799 = vmatprep.subr.bf16.mxu1 %v7426_v46 }
 0x1a6   : > { %1326 = vmatpush1.bf16.msra.mxu0 %v7417_v39 }
 0x1a7   : > { %1327 = vmatprep.subr.bf16.mxu0 %v7418_v40  ;;  %6800 = vmatpush3.bf16.msra.mxu1 %v7426_v46 }
 0x1a8   : > { %6801 = vmatprep.subr.bf16.mxu1 %v7427_v48 }
 0x1aa   : > { %1328 = vmatpush1.bf16.msra.mxu0 %v7420_v42 }
 0x1ab   : > { %6802 = vmatpush3.bf16.msra.mxu1 %v7427_v48 }
 0x1ac   : > { %6803 = vmatprep.subr.bf16.mxu1 %v7428_v53 }
 0x1ad   : > { %1346 = vmatmul.mubr.bf16.vlgmr.msra.gmra.mxu0 %v1128_v31 }
 0x1ae   : > { %1355 = vmatprep.mubr.bf16.mxu0 %v11305_v23 }
 0x1af   : > { %6804 = vmatpush3.bf16.msra.mxu1 %v7428_v53 }
 0x1b2   : > { %6806 = vmatmul.mubr.bf16.vlgmr.msra.gmra.mxu1 %v1129_v49 }
 0x1b3   : > { %6809 = vmatprep.mubr.bf16.mxu1 %v1130_v55 }
 0x1b5   : > { %1356 = vmatmul.mubr.bf16.gmra.mxu0 %v1129_v49 }
 0x1b6   : > { %1365 = vmatprep.mubr.bf16.mxu0 %v11305_v23 }
 0x1ba   : > { %6810 = vmatmul.mubr.bf16.gmra.mxu1 %v1131_v44 }
 0x1bb   : > { %6813 = vmatprep.mubr.bf16.mxu1 %v1132_v63 }
 0x1bd   : > { %1366 = vmatmul.mubr.bf16.gmra.mxu0 %v1130_v55 }
 0x1be   : > { %1375 = vmatprep.mubr.bf16.mxu0 %v11305_v23 }
 0x1c2   : > { %6814 = vmatmul.mubr.bf16.gmra.mxu1 %v1133_v20 }
 0x1c3   : > { %6817 = vmatprep.mubr.bf16.mxu1 %v1134_v5 }
 0x1c5   : > { %1376 = vmatmul.mubr.bf16.gmra.mxu0 %v1131_v44 }
 0x1c6   : > { %1385 = vmatprep.mubr.bf16.mxu0 %v11305_v23 }
 0x1ca   : > { %6818 = vmatmul.mubr.bf16.gmra.mxu1 %v1135_v7 }
 0x1cd   : > { %1386 = vmatmul.mubr.bf16.gmra.mxu0 %v1132_v63  ;;  %v8521_v63 = vrot.slane %v8456_v10, %v11303_v54 }
 0x1ce   : > { %1395 = vmatprep.mubr.bf16.mxu0 %v11305_v23 }
 0x1d5   : > { %1396 = vmatmul.mubr.bf16.gmra.mxu0 %v1133_v20 }
 0x1d6   : > { %1405 = vmatprep.mubr.bf16.mxu0 %v11305_v23 }
 0x1dd   : > { %1406 = vmatmul.mubr.bf16.gmra.mxu0 %v1134_v5 }
 0x1de   : > { %1415 = vmatprep.mubr.bf16.mxu0 %v11305_v23 }
 0x1e5   : > { %1416 = vmatmul.mubr.bf16.gmra.mxu0 %v1135_v7 }
 0x26d   : > { %v1347_v13 = vpop.f32.mrf.mxu0 }
 0x26e   : > { %v1348_v3 = vadd.f32 %v1347_v13, %v8461_v16 }
 0x26f   : > { %v8463_v60 = vpop.f32.mrf.mxu0 }
 0x271   : > { %v1351_v17 = vpop.f32.mrf.mxu0 }
 0x272   : > { %v1352_v18 = vadd.f32 %v1351_v17, %v8461_v16  ;;  %v8481_v15 = vpop.f32.mrf.mxu1 }
 0x273   : > { %v8467_v14 = vpop.f32.mrf.mxu0 }
 0x274   : > { %v8469_v19 = vpack.c.bf16 %v1352_v18, %v1348_v3  ;;  %v8486_v26 = vpop.f32.mrf.mxu1 }
 0x275   : > { %v1357_v27 = vpop.f32.mrf.mxu0 }
 0x276   : > { %v1358_v4 = vadd.f32 %v1357_v27, %v8461_v16  ;;  %6837 = vmatprep.mubr.msk.bf16.mxu0 %vm1548_vm0, %v8469_v19  ;;  %v8488_v30 = vpop.f32.mrf.mxu1 }
 0x277   : > { %v8474_v22 = vpop.f32.mrf.mxu0 }
 0x278   : > { %v8493_v28 = vpop.f32.mrf.mxu1 }
 0x279   : > { %v1361_v11 = vpop.f32.mrf.mxu0 }
 0x27a   : > { %v1362_v12 = vadd.f32 %v1361_v11, %v8461_v16  ;;  %v6811_v37 = vpop.f32.mrf.mxu1 }
 0x27b   : > { %v8477_v50 = vpop.f32.mrf.mxu0 }
 0x27c   : > { %v8479_v56 = vpack.c.bf16 %v1362_v12, %v1358_v4  ;;  %v8500_v39 = vpop.f32.mrf.mxu1 }
 0x27d   : > { %v1367_v21 = vpop.f32.mrf.mxu0 }
 0x27e   : > { %v1368_v24 = vadd.f32 %v1367_v21, %v8461_v16  ;;  %v6812_v41 = vpop.f32.mrf.mxu1 }
 0x27f   : > { %v8484_v25 = vpop.f32.mrf.mxu0 }
 0x280   : > { %v8505_v46 = vpop.f32.mrf.mxu1 }
 0x281   : > { %v1371_v29 = vpop.f32.mrf.mxu0 }
 0x282   : > { %v1372_v31 = vadd.f32 %v1371_v29, %v8461_v16  ;;  %v6815_v48 = vpop.f32.mrf.mxu1 }
 0x283   : > { %v8491_v32 = vpop.f32.mrf.mxu0  ;;  %v1501_v3 = vadd.f32 %v6815_v48, %v8521_v63 }
 0x284   : > { %v8495_v33 = vpack.c.bf16 %v1372_v31, %v1368_v24  ;;  %v1492_v43 = vpop.f32.mrf.mxu1  ;;  %v11302_v24 = vsub.s32 1, %v8452_v8 }
 0x285   : > { %v1377_v34 = vpop.f32.mrf.mxu0 }
 0x286   : > { %v1378_v35 = vadd.f32 %v1377_v34, %v8461_v16  ;;  %v6816_v57 = vpop.f32.mrf.mxu1  ;;  %v8553_v48 = vrot.slane %v8456_v10, %v11302_v24 }
 0x287   : > { %v8498_v38 = vpop.f32.mrf.mxu0  ;;  %v1504_v4 = vadd.f32 %v6816_v57, %v8521_v63  ;;  %v1485_v57 = vadd.f32 %v6811_v37, %v8521_v63 }
 0x288   : > { %v1495_v62 = vpop.f32.mrf.mxu1 }
 0x289   : > { %v1381_v40 = vpop.f32.mrf.mxu0 }
 0x28a   : > { %v1382_v42 = vadd.f32 %v1381_v40, %v8461_v16  ;;  %v6819_v0 = vpop.f32.mrf.mxu1  ;;  %v8546_v40 = vpack.c.bf16 %v1504_v4, %v1501_v3 }
 0x28b   : > { %v8503_v45 = vpop.f32.mrf.mxu0  ;;  %v1517_v5 = vadd.f32 %v6819_v0, %v8521_v63 }
 0x28c   : > { %v8507_v47 = vpack.c.bf16 %v1382_v42, %v1378_v35  ;;  %v1508_v20 = vpop.f32.mrf.mxu1  ;;  %v1493_v35 = vadd.f32 %v1492_v43, %v8521_v63  ;;  %v1496_v42 = vadd.f32 %v1495_v62, %v8521_v63 }
 0x28d   : > { %v1387_v36 = vpop.f32.mrf.mxu0  ;;  %v1509_v59 = vadd.f32 %v1508_v20, %v8521_v63 }
 0x28e   : > { %v1388_v49 = vadd.f32 %v1387_v36, %v8461_v16  ;;  %v6820_v52 = vpop.f32.mrf.mxu1  ;;  %v8563_v0 = vpack.c.bf16 %v1496_v42, %v1493_v35 }
 0x28f   : > { %v8510_v53 = vpop.f32.mrf.mxu0  ;;  %v1520_v13 = vadd.f32 %v6820_v52, %v8521_v63  ;;  %v1480_v52 = vadd.f32 %v8505_v46, %v8521_v63 }
 0x290   : > { %v1511_v18 = vpop.f32.mrf.mxu1 }
 0x291   : > { %v1391_v55 = vpop.f32.mrf.mxu0  ;;  %v8536_v11 = vpack.c.bf16 %v1520_v13, %v1517_v5  ;;  %v1512_v12 = vadd.f32 %v1511_v18, %v8521_v63  ;;  %v1469_v13 = vadd.f32 %v8481_v15, %v8521_v63 }
 0x292   : > { %v1392_v58 = vadd.f32 %v1391_v55, %v8461_v16 }
 0x293   : > { %v8514_v61 = vpop.f32.mrf.mxu0  ;;  %v8541_v31 = vpack.c.bf16 %v1512_v12, %v1509_v59  ;;  %6853 = vmatprep.subr.bf16.mxu1 %v8536_v11 }
 0x294   : > { %v8516_v44 = vpack.c.bf16 %v1392_v58, %v1388_v49  ;;  %6854 = vmatpush3.bf16.msra.mxu1 %v8536_v11  ;;  %v1488_v58 = vadd.f32 %v6812_v41, %v8521_v63 }
 0x295   : > { %v1397_v51 = vpop.f32.mrf.mxu0  ;;  %6855 = vmatprep.subr.bf16.mxu1 %v8541_v31 }
 0x296   : > { %v1398_v1 = vadd.f32 %v1397_v51, %v8461_v16  ;;  %v8572_v41 = vpack.c.bf16 %v1488_v58, %v1485_v57  ;;  %v1370_v57 = vadd.f32 %v8484_v25, %v8553_v48 }
 0x297   : > { %v8524_v2 = vpop.f32.mrf.mxu0 }
 0x298   : > { %6856 = vmatpush3.bf16.msra.mxu1 %v8541_v31 }
 0x299   : > { %v1401_v6 = vpop.f32.mrf.mxu0  ;;  %6857 = vmatprep.subr.bf16.mxu1 %v8546_v40 }
 0x29a   : > { %v1402_v7 = vadd.f32 %v1401_v6, %v8461_v16  ;;  %v1477_v6 = vadd.f32 %v8500_v39, %v8521_v63  ;;  %v1472_v39 = vadd.f32 %v8488_v30, %v8521_v63  ;;  %v1461_v30 = vadd.f32 %v8486_v26, %v8521_v63 }
 0x29b   : > { %v8530_v17 = vpop.f32.mrf.mxu0  ;;  %v1400_v26 = vadd.f32 %v8524_v2, %v8553_v48  ;;  %v1390_v2 = vadd.f32 %v8510_v53, %v8553_v48 }
 0x29c   : > { %v8533_v27 = vpack.c.bf16 %v1402_v7, %v1398_v1  ;;  %6858 = vmatpush3.bf16.msra.mxu1 %v8546_v40  ;;  %v8590_v46 = vpack.c.bf16 %v1480_v52, %v1477_v6  ;;  %v8603_v12 = vpack.c.bf16 %v1472_v39, %v1469_v13 }
 0x29d   : > { %v1407_v21 = vpop.f32.mrf.mxu0  ;;  %6859 = vmatprep.subr.bf16.mxu1 %v8563_v0 }
 0x29e   : > { %v1408_v29 = vadd.f32 %v1407_v21, %v8461_v16  ;;  %v1464_v21 = vadd.f32 %v8493_v28, %v8521_v63 }
 0x29f   : > { %v1409_v34 = vpop.f32.mrf.mxu0 }
 0x2a0   : > { %v1410_v43 = vadd.f32 %v1409_v34, %v8553_v48  ;;  %6860 = vmatpush3.bf16.msra.mxu1 %v8563_v0  ;;  %v8613_v34 = vpack.c.bf16 %v1464_v21, %v1461_v30 }
 0x2a1   : > { %v1411_v36 = vpop.f32.mrf.mxu0  ;;  %6861 = vmatprep.subr.bf16.mxu1 %v8572_v41 }
 0x2a2   : > { %v1412_v49 = vadd.f32 %v1411_v36, %v8461_v16  ;;  %v1384_v36 = vadd.f32 %v8503_v45, %v8553_v48  ;;  %v1364_v45 = vadd.f32 %v8477_v50, %v8553_v48 }
 0x2a3   : > { %v1413_v55 = vpop.f32.mrf.mxu0 }
 0x2a4   : > { %v8560_v62 = vpack.c.bf16 %v1412_v49, %v1408_v29  ;;  %v1414_v51 = vadd.f32 %v1413_v55, %v8553_v48  ;;  %6862 = vmatpush3.bf16.msra.mxu1 %v8572_v41  ;;  %v1404_v29 = vadd.f32 %v8530_v17, %v8553_v48  ;;  %v1394_v17 = vadd.f32 %v8514_v61, %v8553_v48 }
 0x2a5   : > { %v1417_v10 = vpop.f32.mrf.mxu0  ;;  %6863 = vmatprep.subr.bf16.mxu1 %v8590_v46  ;;  %v1380_v49 = vadd.f32 %v8498_v38, %v8553_v48  ;;  %v1374_v61 = vadd.f32 %v8491_v32, %v8553_v48  ;;  %v1354_v32 = vadd.f32 %v8467_v14, %v8553_v48 }
 0x2a6   : > { %v8566_v1 = vpack.c.bf16 %v1414_v51, %v1410_v43  ;;  %v1418_v20 = vadd.f32 %v1417_v10, %v8461_v16  ;;  %v8619_v28 = vpack.c.bf16 %v1404_v29, %v1400_v26  ;;  %v8631_v35 = vpack.c.bf16 %v1394_v17, %v1390_v2 }
 0x2a7   : > { %v1419_v37 = vpop.f32.mrf.mxu0  ;;  %v8641_v55 = vpack.c.bf16 %v1384_v36, %v1380_v49  ;;  %v8651_v58 = vpack.c.bf16 %v1374_v61, %v1370_v57  ;;  %v1360_v43 = vadd.f32 %v8474_v22, %v8553_v48  ;;  %v1350_v10 = vadd.f32 %v8463_v60, %v8553_v48 }
 0x2a8   : > { %2025 = vrot.lane.b32.xlu1 %v8566_v1, %s8041_s16  ;;  %v1420_v3 = vadd.f32 %v1419_v37, %v8553_v48  ;;  %6864 = vmatpush3.bf16.msra.mxu1 %v8590_v46  ;;  %v1592_v63 = vsel %vm1548_vm0, %v8566_v1, 0  ;;  %v1589_v42 = vsel %vm1548_vm0, %v8619_v28, 0  ;;  %v1586_v53 = vsel %vm1548_vm0, %v8631_v35, 0 }
 0x2a9   : > { %v1421_v5 = vpop.f32.mrf.mxu0  ;;  %6865 = vmatprep.subr.bf16.mxu1 %v8603_v12  ;;  %v1583_v38 = vsel %vm1548_vm0, %v8641_v55, 0  ;;  %v8661_v51 = vpack.c.bf16 %v1364_v45, %v1360_v43  ;;  %v1580_v25 = vsel %vm1548_vm0, %v8651_v58, 0 }
 0x2aa   : > { %v1422_v7 = vadd.f32 %v1421_v5, %v8461_v16 }
 0x2ab   : > { %v1423_v59 = vpop.f32.mrf.mxu0  ;;  %v1577_v22 = vsel %vm1548_vm0, %v8661_v51, 0 }
 0x2ac   : > { %v8584_v18 = vpack.c.bf16 %v1422_v7, %v1418_v20  ;;  %v1424_v4 = vadd.f32 %v1423_v59, %v8553_v48  ;;  %6866 = vmatpush3.bf16.msra.mxu1 %v8603_v12  ;;  %v8671_v20 = vpack.c.bf16 %v1354_v32, %v1350_v10  ;;  %v8698_v48 = vld [vmem:[%s11389_s3] ss:$0 sm:$0xff] }
 0x2ad   : > { %6867 = vmatprep.subr.bf16.mxu1 %v8613_v34 }
 0x2ae   : > { %v8592_v16 = vpack.c.bf16 %v1424_v4, %v1420_v3  ;;  %v1574_v50 = vsel %vm1548_vm0, %v8671_v20, 0 }
 0x2b0   : > { %2027 = vrot.lane.b32.xlu0 %v8592_v16, %s8041_s16  ;;  %7165 = vmatprep.subr.msk.bf16.mxu0 %vm1548_vm0, %v8592_v16  ;;  %v1595_v15 = vsel %vm1548_vm0, %v8592_v16, 0 }
 0x2b1   : > { %6822 = vmatpush3.bf16.xpose.msra.mxu0 %v1595_v15  ;;  %6868 = vmatpush3.bf16.msra.mxu1 %v8613_v34 }
 0x2b2   : > { %7166 = vmatprep.subr.msk.bf16.mxu0 %vm1548_vm0, %v8566_v1 }
 0x2b9   : > { %6824 = vmatpush3.bf16.xpose.msra.mxu0 %v1592_v63 }
 0x2ba   : > { %7167 = vmatprep.subr.msk.bf16.mxu0 %vm1548_vm0, %v8619_v28 }
 0x2c1   : > { %6826 = vmatpush3.bf16.xpose.msra.mxu0 %v1589_v42 }
 0x2c2   : > { %7168 = vmatprep.subr.msk.bf16.mxu0 %vm1548_vm0, %v8631_v35 }
 0x2c9   : > { %6828 = vmatpush3.bf16.xpose.msra.mxu0 %v1586_v53 }
 0x2ca   : > { %7169 = vmatprep.subr.msk.bf16.mxu0 %vm1548_vm0, %v8641_v55 }
 0x2d1   : > { %6830 = vmatpush3.bf16.xpose.msra.mxu0 %v1583_v38 }
 0x2d2   : > { %7170 = vmatprep.subr.msk.bf16.mxu0 %vm1548_vm0, %v8651_v58 }
 0x2d9   : > { %6832 = vmatpush3.bf16.xpose.msra.mxu0 %v1580_v25 }
 0x2da   : > { %7171 = vmatprep.subr.msk.bf16.mxu0 %vm1548_vm0, %v8661_v51 }
 0x2e1   : > { %6834 = vmatpush3.bf16.xpose.msra.mxu0 %v1577_v22 }
 0x2e2   : > { %7172 = vmatprep.subr.msk.bf16.mxu0 %vm1548_vm0, %v8671_v20 }
 0x2e9   : > { %6836 = vmatpush3.bf16.xpose.msra.mxu0 %v1574_v50 }
 0x2f0   : > { %6838 = vmatmul.mubr.msk.bf16.vlgmr.msra.gmra.mxu0 %vm1548_vm0, %v8479_v56 }
 0x2f1   : > { %6841 = vmatprep.mubr.msk.bf16.mxu0 %vm1548_vm0, %v8495_v33 }
 0x2f8   : > { %6842 = vmatmul.mubr.msk.bf16.gmra.mxu0 %vm1548_vm0, %v8507_v47 }
 0x2f9   : > { %6845 = vmatprep.mubr.msk.bf16.mxu0 %vm1548_vm0, %v8516_v44 }
 0x300   : > { %6846 = vmatmul.mubr.msk.bf16.gmra.mxu0 %vm1548_vm0, %v8533_v27 }
 0x301   : > { %6849 = vmatprep.mubr.msk.bf16.mxu0 %vm1548_vm0, %v8560_v62 }
 0x308   : > { %6850 = vmatmul.mubr.msk.bf16.gmra.mxu0 %vm1548_vm0, %v8584_v18 }
 0x322   : > { %v8693_v60 = vpop.permute.xlu0 %2027 }
 0x323   : > { %7173 = vmatprep.subr.msk.bf16.mxu1 %vm1548_vm0, %v8693_v60 }
 0x3b0   : > { %v6839_v14 = vpop.f32.mrf.mxu0 }
 0x3b1   : > { %v1696_v37 = vmul.f32 0.17677669, %v6839_v14 }
 0x3b2   : > { %v1631_v5 = vpop.f32.mrf.mxu0 }
 0x3b3   : > { %v1694_v6 = vmul.f32 0.17677669, %v1631_v5  ;;  %v8701_v52 = vadd.f32 %v8698_v48, %v1696_v37 }
 0x3b4   : > { %v6840_v7 = vpop.f32.mrf.mxu0 }
 0x3b5   : > { %v1697_v59 = vmul.f32 0.17677669, %v6840_v7  ;;  %1736 = vmax.xlane.f32.xlu1 %v8701_v52  ;;  %v8705_v13 = vadd.f32 %v8698_v48, %v1694_v6 }
 0x3b6   : > { %v1634_v3 = vpop.f32.mrf.mxu0 }
 0x3b7   : > { %v1695_v4 = vmul.f32 0.17677669, %v1634_v3  ;;  %1732 = vmax.xlane.f32.xlu0 %v8705_v13  ;;  %v8709_v39 = vadd.f32 %v8698_v48, %v1697_v59 }
 0x3b8   : > { %v6843_v15 = vpop.f32.mrf.mxu0 }
 0x3b9   : > { %v1700_v30 = vmul.f32 0.17677669, %v6843_v15  ;;  %1738 = vmax.xlane.f32.xlu1 %v8709_v39  ;;  %v8713_v21 = vadd.f32 %v8698_v48, %v1695_v4 }
 0x3ba   : > { %v1647_v29 = vpop.f32.mrf.mxu0 }
 0x3bb   : > { %1734 = vmax.xlane.f32.xlu0 %v8713_v21  ;;  %v1698_v63 = vmul.f32 0.17677669, %v1647_v29  ;;  %v8717_v2 = vadd.f32 %v8698_v48, %v1700_v30 }
 0x3bc   : > { %v6844_v26 = vpop.f32.mrf.mxu0 }
 0x3bd   : > { %v1701_v17 = vmul.f32 0.17677669, %v6844_v26  ;;  %v8725_v57 = vadd.f32 %v8698_v48, %v1698_v63 }
 0x3be   : > { %v1650_v42 = vpop.f32.mrf.mxu0 }
 0x3bf   : > { %v1699_v36 = vmul.f32 0.17677669, %v1650_v42  ;;  %1744 = vmax.xlane.f32.xlu0 %v8717_v2  ;;  %v8721_v49 = vadd.f32 %v8698_v48, %v1701_v17 }
 0x3c0   : > { %v6847_v53 = vpop.f32.mrf.mxu0 }
 0x3c1   : > { %v1704_v61 = vmul.f32 0.17677669, %v6847_v53  ;;  %1746 = vmax.xlane.f32.xlu1 %v8721_v49  ;;  %v8729_v45 = vadd.f32 %v8698_v48, %v1699_v36  ;;  %v8768_v36 = vpop.permute.xlu1 %2025 }
 0x3c2   : > { %v1663_v38 = vpop.f32.mrf.mxu0 }
 0x3c3   : > { %1740 = vmax.xlane.f32.xlu0 %v8725_v57  ;;  %v1702_v25 = vmul.f32 0.17677669, %v1663_v38  ;;  %v8733_v10 = vadd.f32 %v8698_v48, %v1704_v61 }
 0x3c4   : > { %v6848_v43 = vpop.f32.mrf.mxu0 }
 0x3c5   : > { %v1705_v32 = vmul.f32 0.17677669, %v6848_v43  ;;  %1742 = vmax.xlane.f32.xlu1 %v8729_v45  ;;  %v8741_v6 = vadd.f32 %v8698_v48, %v1702_v25 }
 0x3c6   : > { %v1666_v22 = vpop.f32.mrf.mxu0 }
 0x3c7   : > { %v1703_v50 = vmul.f32 0.17677669, %v1666_v22  ;;  %1752 = vmax.xlane.f32.xlu0 %v8733_v10  ;;  %v8737_v14 = vadd.f32 %v8698_v48, %v1705_v32 }
 0x3c8   : > { %v6851_v37 = vpop.f32.mrf.mxu0 }
 0x3c9   : > { %v1708_v5 = vmul.f32 0.17677669, %v6851_v37  ;;  %1754 = vmax.xlane.f32.xlu1 %v8737_v14  ;;  %v8745_v59 = vadd.f32 %v8698_v48, %v1703_v50 }
 0x3ca   : > { %v1679_v7 = vpop.f32.mrf.mxu0 }
 0x3cb   : > { %1748 = vmax.xlane.f32.xlu0 %v8741_v6  ;;  %v1706_v3 = vmul.f32 0.17677669, %v1679_v7  ;;  %v8749_v4 = vadd.f32 %v8698_v48, %v1708_v5 }
 0x3cc   : > { %v6852_v30 = vpop.f32.mrf.mxu0 }
 0x3cd   : > { %1750 = vmax.xlane.f32.xlu1 %v8745_v59  ;;  %v8753_v15 = vadd.f32 %v8698_v48, %v1706_v3  ;;  %v1709_v29 = vmul.f32 0.17677669, %v6852_v30 }
 0x3ce   : > { %v1682_v26 = vpop.f32.mrf.mxu0 }
 0x3cf   : > { %1760 = vmax.xlane.f32.xlu0 %v8749_v4  ;;  %v1707_v63 = vmul.f32 0.17677669, %v1682_v26  ;;  %v8761_v17 = vadd.f32 %v8698_v48, %v1709_v29 }
 0x3d1   : > { %v8765_v42 = vadd.f32 %v8698_v48, %v1707_v63 }
 0x3d3   : > { %1756 = vmax.xlane.f32.xlu0 %v8753_v15 }
 0x3de   : > { %2021 = vrot.lane.b32.xlu1 %v8631_v35, %s8041_s16 }
 0x3e9   : > { %2023 = vrot.lane.b32.xlu0 %v8619_v28, %s8041_s16 }
 0x402   : > { %1762 = vmax.xlane.f32.xlu1 %v8761_v17 }
 0x406   : > { %1758 = vmax.xlane.f32.xlu1 %v8765_v42 }
 0x43e   : > { %v1737_v53 = vpop.xlane.xlu1 %1736 }
 0x43f   : > { %v1766_v61 = vsub.f32 %v8701_v52, %v1737_v53 }
 0x440   : > { %v1733_v38 = vpop.xlane.xlu0 %1732 }
 0x441   : > { %v1784_v43 = vmul.f32 1.442695, %v1766_v61  ;;  %v1764_v25 = vsub.f32 %v8705_v13, %v1733_v38 }
 0x442   : > { %v1739_v32 = vpop.xlane.xlu1 %1738 }
 0x443   : > { %7517 = vpow2.f32 %v1784_v43  ;;  %v1780_v22 = vmul.f32 1.442695, %v1764_v25  ;;  %v1767_v50 = vsub.f32 %v8709_v39, %v1739_v32 }
 0x444   : > { %v1735_v37 = vpop.xlane.xlu0 %1734 }
 0x445   : > { %v1786_v5 = vmul.f32 1.442695, %v1767_v50  ;;  %v1765_v7 = vsub.f32 %v8713_v21, %v1735_v37  ;;  %7519 = vpow2.f32 %v1780_v22 }
 0x447   : > { %7521 = vpow2.f32 %v1786_v5  ;;  %v1782_v3 = vmul.f32 1.442695, %v1765_v7 }
 0x448   : > { %v1745_v21 = vpop.xlane.xlu0 %1744 }
 0x449   : > { %7523 = vpow2.f32 %v1782_v3  ;;  %v1770_v61 = vsub.f32 %v8717_v2, %v1745_v21 }
 0x44a   : > { %v1747_v63 = vpop.xlane.xlu1 %1746 }
 0x44b   : > { %v1792_v32 = vmul.f32 1.442695, %v1770_v61  ;;  %v1771_v50 = vsub.f32 %v8721_v49, %v1747_v63 }
 0x44c   : > { %v1741_v29 = vpop.xlane.xlu0 %1740 }
 0x44d   : > { %v1768_v43 = vsub.f32 %v8725_v57, %v1741_v29  ;;  %7525 = vpow2.f32 %v1792_v32  ;;  %v1794_v54 = vmul.f32 1.442695, %v1771_v50 }
 0x44e   : > { %v1743_v38 = vpop.xlane.xlu1 %1742 }
 0x44f   : > { %v1769_v22 = vsub.f32 %v8729_v45, %v1743_v38  ;;  %v1788_v37 = vmul.f32 1.442695, %v1768_v43 }
 0x450   : > { %v8774_v30 = vpop.eup %7517  ;;  %v1753_v26 = vpop.xlane.xlu0 %1752 }
 0x451   : > { %1816 = vadd.xlane.f32.xlu0 %v8774_v30  ;;  %v1790_v7 = vmul.f32 1.442695, %v1769_v22  ;;  %7527 = vpow2.f32 %v1788_v37  ;;  %v1774_v2 = vsub.f32 %v8733_v10, %v1753_v26 }
 0x452   : > { %v8777_v52 = vpop.eup %7519  ;;  %v1755_v5 = vpop.xlane.xlu1 %1754 }
 0x453   : > { %7529 = vpow2.f32 %v1790_v7  ;;  %v1800_v45 = vmul.f32 1.442695, %v1774_v2  ;;  %v1775_v61 = vsub.f32 %v8737_v14, %v1755_v5 }
 0x454   : > { %v8779_v13 = vpop.eup %7521  ;;  %v1749_v53 = vpop.xlane.xlu0 %1748  ;;  %7531 = vpow2.f32 %v1794_v54 }
 0x455   : > { %1812 = vadd.xlane.f32.xlu0 %v8777_v52  ;;  %1818 = vadd.xlane.f32.xlu1 %v8779_v13  ;;  %v1772_v49 = vsub.f32 %v8741_v6, %v1749_v53  ;;  %v1802_v10 = vmul.f32 1.442695, %v1775_v61 }
 0x456   : > { %v8783_v39 = vpop.eup %7523  ;;  %v1751_v29 = vpop.xlane.xlu1 %1750 }
 0x457   : > { %v1796_v38 = vmul.f32 1.442695, %v1772_v49  ;;  %v1773_v54 = vsub.f32 %v8745_v59, %v1751_v29 }
 0x458   : > { %v1761_v25 = vpop.xlane.xlu0 %1760 }
 0x459   : > { %1814 = vadd.xlane.f32.xlu1 %v8783_v39  ;;  %v1778_v3 = vsub.f32 %v8749_v4, %v1761_v25  ;;  %v1798_v32 = vmul.f32 1.442695, %v1773_v54 }
 0x45a   : > { %v8799_v4 = vpop.permute.xlu1 %2021  ;;  %v8801_v43 = vpop.eup %7525 }
 0x45b   : > { %v1808_v21 = vmul.f32 1.442695, %v1778_v3 }
 0x45c   : > { %v1757_v24 = vpop.xlane.xlu0 %1756 }
 0x45d   : > { %v1776_v57 = vsub.f32 %v8753_v15, %v1757_v24  ;;  %7533 = vpow2.f32 %v1808_v21 }
 0x45e   : > { %7535 = vpow2.f32 %v1800_v45  ;;  %v8804_v15 = vpop.eup %7527 }
 0x45f   : > { %v1804_v63 = vmul.f32 1.442695, %v1776_v57 }
 0x460   : > { %v8808_v26 = vpop.eup %7529  ;;  %v2024_v21 = vpop.permute.xlu0 %2023 }
 0x461   : > { %7537 = vpow2.f32 %v1804_v63  ;;  %v8812_v25 = vpop.eup %7531 }
 0x462   : > { %7539 = vpow2.f32 %v1796_v38 }
 0x463   : > { %7541 = vpow2.f32 %v1802_v10 }
 0x46a   : > { %2017 = vrot.lane.b32.xlu1 %v8651_v58, %s8041_s16  ;;  %v8815_v50 = vpop.eup %7533 }
 0x46b   : > { %2019 = vrot.lane.b32.xlu0 %v8641_v55, %s8041_s16  ;;  %v8819_v59 = vpop.eup %7535 }
 0x46e   : > { %v8821_v37 = vpop.eup %7537 }
 0x46f   : > { %v8825_v5 = vpop.eup %7539 }
 0x48a   : > { %1824 = vadd.xlane.f32.xlu0 %v8801_v43 }
 0x48b   : > { %v1763_v24 = vpop.xlane.xlu1 %1762 }
 0x48c   : > { %v1779_v6 = vsub.f32 %v8761_v17, %v1763_v24 }
 0x48e   : > { %v1810_v14 = vmul.f32 1.442695, %v1779_v6  ;;  %1822 = vadd.xlane.f32.xlu0 %v8808_v26  ;;  %1820 = vadd.xlane.f32.xlu1 %v8804_v15 }
 0x48f   : > { %v1759_v53 = vpop.xlane.xlu1 %1758 }
 0x490   : > { %7543 = vpow2.f32 %v1810_v14  ;;  %v1777_v22 = vsub.f32 %v8765_v42, %v1759_v53  ;;  %v8828_v42 = vpop.eup %7541 }
 0x491   : > { %7545 = vpow2.f32 %v1798_v32 }
 0x492   : > { %1840 = vadd.xlane.f32.xlu0 %v8815_v50  ;;  %1826 = vadd.xlane.f32.xlu1 %v8812_v25  ;;  %v1806_v17 = vmul.f32 1.442695, %v1777_v22  ;;  %v2075_v22 = vsel %vm1548_vm0, %v8693_v60, 0 }
 0x494   : > { %7547 = vpow2.f32 %v1806_v17 }
 0x496   : > { %1836 = vadd.xlane.f32.xlu0 %v8821_v37  ;;  %1832 = vadd.xlane.f32.xlu1 %v8819_v59 }
 0x49a   : > { %1828 = vadd.xlane.f32.xlu1 %v8825_v5 }
 0x49d   : > { %v8830_v7 = vpop.eup %7543 }
 0x49e   : > { %1842 = vadd.xlane.f32.xlu0 %v8830_v7  ;;  %1834 = vadd.xlane.f32.xlu1 %v8828_v42  ;;  %v8834_v3 = vpop.eup %7545 }
 0x4a1   : > { %v8837_v2 = vpop.eup %7547 }
 0x4a2   : > { %1830 = vadd.xlane.f32.xlu1 %v8834_v3 }
 0x4a6   : > { %1838 = vadd.xlane.f32.xlu1 %v8837_v2 }
 0x4b4   : > { %2015 = vrot.lane.b32.xlu0 %v8661_v51, %s8041_s16 }
 0x4b7   : > { %2013 = vrot.lane.b32.xlu1 %v8671_v20, %s8041_s16 }
 0x4b8   : > { %1989 = vrot.lane.b32.xlu0 %v8469_v19, %s8041_s16 }
 0x4bb   : > { %1991 = vrot.lane.b32.xlu1 %v8479_v56, %s8041_s16 }
 0x4bc   : > { %1993 = vrot.lane.b32.xlu0 %v8495_v33, %s8041_s16 }
 0x4bf   : > { %1995 = vrot.lane.b32.xlu1 %v8507_v47, %s8041_s16 }
 0x4c0   : > { %1997 = vrot.lane.b32.xlu0 %v8516_v44, %s8041_s16 }
 0x4c3   : > { %1999 = vrot.lane.b32.xlu1 %v8533_v27, %s8041_s16 }
 0x4c4   : > { %2001 = vrot.lane.b32.xlu0 %v8560_v62, %s8041_s16 }
 0x4c7   : > { %2003 = vrot.lane.b32.xlu1 %v8584_v18, %s8041_s16 }
 0x4c8   : > { %2380 = vrot.lane.b32.xlu0 %v8536_v11, %s8041_s16 }
 0x4cb   : > { %2378 = vrot.lane.b32.xlu1 %v8541_v31, %s8041_s16 }
 0x4cc   : > { %2376 = vrot.lane.b32.xlu0 %v8546_v40, %s8041_s16 }
 0x4cf   : > { %2370 = vrot.lane.b32.xlu1 %v8590_v46, %s8041_s16 }
 0x4d0   : > { %2374 = vrot.lane.b32.xlu0 %v8563_v0, %s8041_s16 }
 0x4d3   : > { %2366 = vrot.lane.b32.xlu1 %v8613_v34, %s8041_s16 }
 0x4d4   : > { %2372 = vrot.lane.b32.xlu0 %v8572_v41, %s8041_s16 }
 0x4da   : > { %v1817_v57 = vpop.xlane.xlu0 %1816 }
 0x4de   : > { %v1813_v29 = vpop.xlane.xlu0 %1812  ;;  %v1819_v45 = vpop.xlane.xlu1 %1818 }
 0x4df   : > { %7549 = vrcp.f32 %v1819_v45 }
 0x4e0   : > { %7551 = vrcp.f32 %v1813_v29 }
 0x4e1   : > { %7553 = vrcp.f32 %v1817_v57 }
 0x4e2   : > { %v1815_v49 = vpop.xlane.xlu1 %1814  ;;  %v2020_v60 = vpop.permute.xlu0 %2019 }
 0x4e3   : > { %7555 = vrcp.f32 %v1815_v49 }
 0x4ec   : > { %v7550_v63 = vpop.eup %7549 }
 0x4ed   : > { %v7552_v61 = vpop.eup %7551  ;;  %v1851_v24 = vmul.f32 %v7550_v63, %v8779_v13  ;;  %v2072_v13 = vsel %vm1548_vm0, %v8768_v36, 0 }
 0x4ee   : > { %v7554_v38 = vpop.eup %7553  ;;  %v1845_v54 = vmul.f32 %v7552_v61, %v8777_v52  ;;  %v2069_v52 = vsel %vm1548_vm0, %v2024_v21, 0 }
 0x4ef   : > { %v1849_v14 = vmul.f32 %v7554_v38, %v8774_v30  ;;  %v2066_v30 = vsel %vm1548_vm0, %v8799_v4, 0 }
 0x4f0   : > { %v7556_v10 = vpop.eup %7555 }
 0x4f1   : > { %v1847_v6 = vmul.f32 %v7556_v10, %v8783_v39  ;;  %v1877_v32 = vpack.c.bf16 %v1851_v24, %v1849_v14  ;;  %v2018_v39 = vpop.permute.xlu1 %2017 }
 0x4f3   : > { %v1876_v53 = vpack.c.bf16 %v1847_v6, %v1845_v54 }
 0x4f5   : > { %6869 = vmatprep.mubr.bf16.mxu1 %v1876_v53 }
 0x4f6   : > { %6870 = vmatmul.mubr.bf16.vlgmr.msra.gmra.mxu1 %v1877_v32 }
 0x4f7   : > { %6886 = vmatpush3.bf16.xpose.msra.mxu1 %v2075_v22 }
 0x4f8   : > { %7174 = vmatprep.subr.msk.bf16.mxu1 %vm1548_vm0, %v8768_v36  ;;  %v2063_v36 = vsel %vm1548_vm0, %v2020_v60, 0 }
 0x4ff   : > { %6888 = vmatpush3.bf16.xpose.msra.mxu1 %v2072_v13 }
 0x500   : > { %7175 = vmatprep.subr.msk.bf16.mxu1 %vm1548_vm0, %v2024_v21 }
 0x507   : > { %6890 = vmatpush3.bf16.xpose.msra.mxu1 %v2069_v52 }
 0x508   : > { %7176 = vmatprep.subr.msk.bf16.mxu1 %vm1548_vm0, %v8799_v4  ;;  %v2060_v4 = vsel %vm1548_vm0, %v2018_v39, 0 }
 0x50f   : > { %6892 = vmatpush3.bf16.xpose.msra.mxu1 %v2066_v30 }
 0x510   : > { %7177 = vmatprep.subr.msk.bf16.mxu1 %vm1548_vm0, %v2020_v60 }
 0x513   : > { %v1825_v17 = vpop.xlane.xlu0 %1824 }
 0x517   : > { %6894 = vmatpush3.bf16.xpose.msra.mxu1 %v2063_v36  ;;  %v1823_v57 = vpop.xlane.xlu0 %1822  ;;  %v1821_v29 = vpop.xlane.xlu1 %1820 }
 0x518   : > { %7557 = vrcp.f32 %v1823_v57  ;;  %7178 = vmatprep.subr.msk.bf16.mxu1 %vm1548_vm0, %v2018_v39 }
 0x519   : > { %7559 = vrcp.f32 %v1821_v29 }
 0x51a   : > { %7561 = vrcp.f32 %v1825_v17 }
 0x51b   : > { %v1827_v21 = vpop.xlane.xlu1 %1826  ;;  %v1841_v45 = vpop.xlane.xlu0 %1840 }
 0x51c   : > { %7563 = vrcp.f32 %v1827_v21 }
 0x51f   : > { %6896 = vmatpush3.bf16.xpose.msra.mxu1 %v2060_v4  ;;  %v1833_v49 = vpop.xlane.xlu1 %1832  ;;  %v1837_v63 = vpop.xlane.xlu0 %1836 }
 0x523   : > { %v1829_v61 = vpop.xlane.xlu1 %1828 }
 0x525   : > { %v7558_v38 = vpop.eup %7557 }
 0x526   : > { %v7560_v10 = vpop.eup %7559  ;;  %v1855_v24 = vmul.f32 %v7558_v38, %v8808_v26 }
 0x527   : > { %v1843_v54 = vpop.xlane.xlu0 %1842  ;;  %v1835_v6 = vpop.xlane.xlu1 %1834  ;;  %v1853_v14 = vmul.f32 %v7560_v10, %v8804_v15 }
 0x528   : > { %v7562_v53 = vpop.eup %7561  ;;  %7565 = vrcp.f32 %v1835_v6 }
 0x529   : > { %v1878_v32 = vpack.c.bf16 %v1855_v24, %v1853_v14  ;;  %v7564_v22 = vpop.eup %7563  ;;  %7567 = vrcp.f32 %v1829_v61  ;;  %v1857_v30 = vmul.f32 %v7562_v53, %v8801_v43 }
 0x52a   : > { %7569 = vrcp.f32 %v1833_v49  ;;  %v1859_v60 = vmul.f32 %v7564_v22, %v8812_v25 }
 0x52b   : > { %6873 = vmatprep.mubr.bf16.mxu1 %v1878_v32  ;;  %v2016_v13 = vpop.permute.xlu0 %2015  ;;  %v1831_v52 = vpop.xlane.xlu1 %1830 }
 0x52c   : > { %7571 = vrcp.f32 %v1831_v52  ;;  %7179 = vmatprep.subr.msk.bf16.mxu1 %vm1548_vm0, %v2016_v13  ;;  %v2057_v26 = vsel %vm1548_vm0, %v2016_v13, 0  ;;  %v1879_v15 = vpack.c.bf16 %v1859_v60, %v1857_v30 }
 0x52d   : > { %6898 = vmatpush3.bf16.xpose.msra.mxu1 %v2057_v26  ;;  %7573 = vrcp.f32 %v1837_v63 }
 0x52e   : > { %6874 = vmatmul.mubr.bf16.gmra.mxu1 %v1879_v15 }
 0x52f   : > { %v1990_v39 = vpop.permute.xlu0 %1989  ;;  %v1839_v17 = vpop.xlane.xlu1 %1838 }
 0x530   : > { %7575 = vrcp.f32 %v1839_v17 }
 0x531   : > { %7577 = vrcp.f32 %v1843_v54 }
 0x532   : > { %7579 = vrcp.f32 %v1841_v45 }
 0x533   : > { %v1994_v36 = vpop.permute.xlu0 %1993  ;;  %v2014_v57 = vpop.permute.xlu1 %2013 }
 0x534   : > { %7180 = vmatprep.subr.msk.bf16.mxu1 %vm1548_vm0, %v2014_v57  ;;  %v2054_v43 = vsel %vm1548_vm0, %v2014_v57, 0 }
 0x535   : > { %6900 = vmatpush3.bf16.xpose.msra.mxu1 %v2054_v43  ;;  %v7566_v25 = vpop.eup %7565 }
 0x536   : > { %v7568_v29 = vpop.eup %7567  ;;  %v1867_v63 = vmul.f32 %v7566_v25, %v8828_v42 }
 0x537   : > { %v1998_v21 = vpop.permute.xlu0 %1997  ;;  %v1992_v4 = vpop.permute.xlu1 %1991  ;;  %v1861_v38 = vmul.f32 %v7568_v29, %v8825_v5 }
 0x538   : > { %v7570_v49 = vpop.eup %7569 }
 0x539   : > { %v7572_v61 = vpop.eup %7571  ;;  %v1865_v6 = vmul.f32 %v7570_v49, %v8819_v59 }
 0x53a   : > { %v1863_v10 = vmul.f32 %v7572_v61, %v8834_v3  ;;  %v7574_v45 = vpop.eup %7573 }
 0x53b   : > { %v2002_v24 = vpop.permute.xlu0 %2001  ;;  %v1996_v54 = vpop.permute.xlu1 %1995  ;;  %v1881_v32 = vpack.c.bf16 %v1867_v63, %v1865_v6  ;;  %v1869_v13 = vmul.f32 %v7574_v45, %v8821_v37 }
 0x53c   : > { %v1880_v14 = vpack.c.bf16 %v1863_v10, %v1861_v38 }
 0x53d   : > { %v7576_v53 = vpop.eup %7575 }
 0x53e   : > { %v7578_v22 = vpop.eup %7577  ;;  %6877 = vmatprep.mubr.bf16.mxu1 %v1880_v14  ;;  %v1871_v52 = vmul.f32 %v7576_v53, %v8837_v2 }
 0x53f   : > { %6878 = vmatmul.mubr.bf16.gmra.mxu1 %v1881_v32  ;;  %v2000_v42 = vpop.permute.xlu1 %1999  ;;  %v2381_v30 = vpop.permute.xlu0 %2380  ;;  %v1875_v3 = vmul.f32 %v7578_v22, %v8830_v7 }
 0x540   : > { %v7580_v5 = vpop.eup %7579  ;;  %v1882_v60 = vpack.c.bf16 %v1871_v52, %v1869_v13  ;;  %6917 = vmatprep.subr.bf16.mxu0 %v2381_v30 }
 0x541   : > { %6918 = vmatpush3.bf16.msra.mxu0 %v2381_v30  ;;  %v1873_v26 = vmul.f32 %v7580_v5, %v8815_v50 }
 0x542   : > { %6881 = vmatprep.mubr.bf16.mxu1 %v1882_v60 }
 0x543   : > { %v2004_v59 = vpop.permute.xlu1 %2003  ;;  %v2377_v15 = vpop.permute.xlu0 %2376  ;;  %v1883_v17 = vpack.c.bf16 %v1875_v3, %v1873_v26 }
 0x547   : > { %6882 = vmatmul.mubr.bf16.gmra.mxu1 %v1883_v17  ;;  %v2379_v57 = vpop.permute.xlu1 %2378  ;;  %v2375_v37 = vpop.permute.xlu0 %2374 }
 0x548   : > { %6901 = vmatprep.mubr.msk.bf16.mxu1 %vm1548_vm0, %v1990_v39  ;;  %6919 = vmatprep.subr.bf16.mxu0 %v2379_v57 }
 0x549   : > { %6920 = vmatpush3.bf16.msra.mxu0 %v2379_v57 }
 0x54a   : > { %6921 = vmatprep.subr.bf16.mxu0 %v2377_v15 }
 0x54b   : > { %v2373_v7 = vpop.permute.xlu0 %2372  ;;  %v2371_v50 = vpop.permute.xlu1 %2370 }
 0x54d   : > { %6922 = vmatpush3.bf16.msra.mxu0 %v2377_v15 }
 0x54e   : > { %6923 = vmatprep.subr.bf16.mxu0 %v2375_v37 }
 0x54f   : > { %6902 = vmatmul.mubr.msk.bf16.vlgmr.msra.gmra.mxu1 %vm1548_vm0, %v1992_v4 }
 0x550   : > { %6905 = vmatprep.mubr.msk.bf16.mxu1 %vm1548_vm0, %v1994_v36 }
 0x551   : > { %6924 = vmatpush3.bf16.msra.mxu0 %v2375_v37 }
 0x552   : > { %6925 = vmatprep.subr.bf16.mxu0 %v2373_v7 }
 0x555   : > { %6926 = vmatpush3.bf16.msra.mxu0 %v2373_v7 }
 0x556   : > { %6927 = vmatprep.subr.bf16.mxu0 %v2371_v50 }
 0x557   : > { %6906 = vmatmul.mubr.msk.bf16.gmra.mxu1 %vm1548_vm0, %v1996_v54 }
 0x558   : > { %6909 = vmatprep.mubr.msk.bf16.mxu1 %vm1548_vm0, %v1998_v21 }
 0x559   : > { %6928 = vmatpush3.bf16.msra.mxu0 %v2371_v50 }
 0x55f   : > { %6910 = vmatmul.mubr.msk.bf16.gmra.mxu1 %vm1548_vm0, %v2000_v42 }
 0x560   : > { %6913 = vmatprep.mubr.msk.bf16.mxu1 %vm1548_vm0, %v2002_v24 }
 0x567   : > { %6914 = vmatmul.mubr.msk.bf16.gmra.mxu1 %vm1548_vm0, %v2004_v59 }
 0x5b6   : > { %v8918_v2 = vpop.f32.mrf.mxu1 }
 0x5b7   : > { %11390 = vst [vmem:[#allocation13_spill] sm:$0xff] %v8918_v2 }
 0x5b8   : > { %v8920_v39 = vpop.f32.mrf.mxu1 }
 0x5b9   : > { %11391 = vst [vmem:[#allocation14_spill] sm:$0xff] %v8920_v39 }
 0x5ba   : > { %v8922_v36 = vpop.f32.mrf.mxu1 }
 0x5bb   : > { %11392 = vst [vmem:[#allocation15_spill] sm:$0xff] %v8922_v36 }
 0x5bc   : > { %v8924_v43 = vpop.f32.mrf.mxu1 }
 0x5bd   : > { %11393 = vst [vmem:[#allocation16_spill] sm:$0xff] %v8924_v43 }
 0x5ee   : > { %v8926_v25 = vpop.f32.mrf.mxu1 }
 0x5ef   : > { %11394 = vst [vmem:[#allocation17_spill] sm:$0xff] %v8926_v25 }
 0x5f0   : > { %v8928_v29 = vpop.f32.mrf.mxu1 }
 0x5f1   : > { %11395 = vst [vmem:[#allocation18_spill] sm:$0xff] %v8928_v29 }
 0x5f2   : > { %v8930_v21 = vpop.f32.mrf.mxu1 }
 0x5f3   : > { %11396 = vst [vmem:[#allocation19_spill] sm:$0xff] %v8930_v21 }
 0x5f4   : > { %v8932_v4 = vpop.f32.mrf.mxu1 }
 0x5f5   : > { %11397 = vst [vmem:[#allocation20_spill] sm:$0xff] %v8932_v4 }
 0x5ff   : > { %v8934_v49 = vpop.f32.mrf.mxu1 }
 0x600   : > { %11398 = vst [vmem:[#allocation21_spill] sm:$0xff] %v8934_v49 }
 0x601   : > { %v8936_v61 = vpop.f32.mrf.mxu1 }
 0x602   : > { %11399 = vst [vmem:[#allocation22_spill] sm:$0xff] %v8936_v61 }
 0x603   : > { %v8938_v63 = vpop.f32.mrf.mxu1 }
 0x604   : > { %11400 = vst [vmem:[#allocation23_spill] sm:$0xff] %v8938_v63 }
 0x605   : > { %v8940_v38 = vpop.f32.mrf.mxu1 }
 0x606   : > { %11401 = vst [vmem:[#allocation24_spill] sm:$0xff] %v8940_v38 }
 0x607   : > { %v8942_v10 = vpop.f32.mrf.mxu1 }
 0x608   : > { %11402 = vst [vmem:[#allocation25_spill] sm:$0xff] %v8942_v10 }
 0x609   : > { %v8944_v45 = vpop.f32.mrf.mxu1 }
 0x60a   : > { %11403 = vst [vmem:[#allocation26_spill] sm:$0xff] %v8944_v45 }
 0x60b   : > { %v8946_v24 = vpop.f32.mrf.mxu1 }
 0x60c   : > { %11404 = vst [vmem:[#allocation27_spill] sm:$0xff] %v8946_v24 }
 0x60d   : > { %v8948_v54 = vpop.f32.mrf.mxu1 }
 0x60e   : > { %11405 = vst [vmem:[#allocation28_spill] sm:$0xff] %v8948_v54 }
 0x60f   : > { %v6903_v6 = vpop.f32.mrf.mxu1 }
 0x610   : > { %v2176_v14 = vmul.f32 0.17677669, %v6903_v6 }
 0x611   : > { %v2111_v53 = vpop.f32.mrf.mxu1 }
 0x612   : > { %v2174_v32 = vmul.f32 0.17677669, %v2111_v53  ;;  %v8951_v22 = vadd.f32 %v8698_v48, %v2176_v14 }
 0x613   : > { %v6904_v13 = vpop.f32.mrf.mxu1 }
 0x614   : > { %2210 = vmax.xlane.f32.xlu0 %v8951_v22  ;;  %v2177_v42 = vmul.f32 0.17677669, %v6904_v13  ;;  %v8955_v5 = vadd.f32 %v8698_v48, %v2174_v32 }
 0x615   : > { %v2114_v52 = vpop.f32.mrf.mxu1 }
 0x616   : > { %v2175_v30 = vmul.f32 0.17677669, %v2114_v52  ;;  %v8963_v26 = vadd.f32 %v8698_v48, %v2177_v42 }
 0x617   : > { %v6907_v60 = vpop.f32.mrf.mxu1 }
 0x618   : > { %2206 = vmax.xlane.f32.xlu0 %v8955_v5  ;;  %v8959_v3 = vadd.f32 %v8698_v48, %v2175_v30 }
 0x619   : > { %v2127_v59 = vpop.f32.mrf.mxu1 }
 0x61a   : > { %2208 = vmax.xlane.f32.xlu1 %v8959_v3 }
 0x61b   : > { %v6908_v15 = vpop.f32.mrf.mxu1 }
 0x61c   : > { %v2181_v17 = vmul.f32 0.17677669, %v6908_v15  ;;  %2212 = vmax.xlane.f32.xlu0 %v8963_v26  ;;  %v2180_v15 = vmul.f32 0.17677669, %v6907_v60 }
 0x61d   : > { %v2130_v57 = vpop.f32.mrf.mxu1 }
 0x61e   : > { %v2179_v37 = vmul.f32 0.17677669, %v2130_v57  ;;  %v8967_v7 = vadd.f32 %v8698_v48, %v2181_v17  ;;  %v2178_v17 = vmul.f32 0.17677669, %v2127_v59  ;;  %v8989_v57 = vadd.f32 %v8698_v48, %v2180_v15 }
 0x61f   : > { %v6911_v50 = vpop.f32.mrf.mxu1 }
 0x620   : > { %2220 = vmax.xlane.f32.xlu1 %v8967_v7  ;;  %v8971_v14 = vadd.f32 %v8698_v48, %v2179_v37  ;;  %v2184_v37 = vmul.f32 0.17677669, %v6911_v50 }
 0x621   : > { %v2143_v6 = vpop.f32.mrf.mxu1 }
 0x623   : > { %v6912_v53 = vpop.f32.mrf.mxu1 }
 0x624   : > { %v2185_v32 = vmul.f32 0.17677669, %v6912_v53  ;;  %2216 = vmax.xlane.f32.xlu1 %v8971_v14  ;;  %v8993_v53 = vadd.f32 %v8698_v48, %v2178_v17 }
 0x625   : > { %v2146_v13 = vpop.f32.mrf.mxu1 }
 0x626   : > { %v2183_v52 = vmul.f32 0.17677669, %v2146_v13  ;;  %v8975_v42 = vadd.f32 %v8698_v48, %v2185_v32  ;;  %v2182_v13 = vmul.f32 0.17677669, %v2143_v6 }
 0x627   : > { %v6915_v32 = vpop.f32.mrf.mxu1 }
 0x628   : > { %2228 = vmax.xlane.f32.xlu1 %v8975_v42  ;;  %v8979_v30 = vadd.f32 %v8698_v48, %v2183_v52  ;;  %v8997_v52 = vadd.f32 %v8698_v48, %v2184_v37  ;;  %v2188_v60 = vmul.f32 0.17677669, %v6915_v32  ;;  %v9001_v59 = vadd.f32 %v8698_v48, %v2182_v13 }
 0x629   : > { %v2159_v9 = vpop.f32.mrf.mxu1 }
 0x62a   : > { %v2186_v50 = vmul.f32 0.17677669, %v2159_v9  ;;  %v9005_v23 = vadd.f32 %v8698_v48, %v2188_v60  ;;  %v2367_v60 = vpop.permute.xlu1 %2366 }
 0x62b   : > { %v6916_v15 = vpop.f32.mrf.mxu1 }
 0x62c   : > { %2224 = vmax.xlane.f32.xlu1 %v8979_v30  ;;  %v2189_v17 = vmul.f32 0.17677669, %v6916_v15  ;;  %v9009_v37 = vadd.f32 %v8698_v48, %v2186_v50 }
 0x62d   : > { %v2162_v8 = vpop.f32.mrf.mxu1 }
 0x62e   : > { %v2187_v6 = vmul.f32 0.17677669, %v2162_v8  ;;  %v9012_v32 = vadd.f32 %v8698_v48, %v2189_v17 }
 0x630   : > { %v9017_v9 = vadd.f32 %v8698_v48, %v2187_v6 }
 0x632   : > { %2368 = vrot.lane.b32.xlu0 %v8603_v12, %s8041_s16 }
 0x63d   : > { %2515 = vrot.lane.b32.xlu1 %v8566_v1, %s8042_s25 }
 0x641   : > { %2511 = vrot.lane.b32.xlu1 %v8631_v35, %s8042_s25 }
 0x651   : > { %2218 = vmax.xlane.f32.xlu0 %v8989_v57 }
 0x655   : > { %2214 = vmax.xlane.f32.xlu0 %v8993_v53 }
 0x659   : > { %2226 = vmax.xlane.f32.xlu0 %v8997_v52 }
 0x65d   : > { %2222 = vmax.xlane.f32.xlu0 %v9001_v59 }
 0x661   : > { %2234 = vmax.xlane.f32.xlu0 %v9005_v23 }
 0x665   : > { %2230 = vmax.xlane.f32.xlu0 %v9009_v37  ;;  %2236 = vmax.xlane.f32.xlu1 %v9012_v32 }
 0x669   : > { %2232 = vmax.xlane.f32.xlu1 %v9017_v9 }
 0x67b   : > { %2517 = vrot.lane.b32.xlu0 %v8592_v16, %s8042_s25 }
 0x67f   : > { %2513 = vrot.lane.b32.xlu0 %v8619_v28, %s8042_s25 }
 0x683   : > { %2509 = vrot.lane.b32.xlu0 %v8641_v55, %s8042_s25 }
 0x69d   : > { %v2211_v8 = vpop.xlane.xlu0 %2210 }
 0x69e   : > { %v2240_v13 = vsub.f32 %v8951_v22, %v2211_v8 }
 0x6a0   : > { %v2258_v15 = vmul.f32 1.442695, %v2240_v13 }
 0x6a1   : > { %v2207_v50 = vpop.xlane.xlu0 %2206 }
 0x6a2   : > { %7581 = vpow2.f32 %v2258_v15  ;;  %v2238_v48 = vsub.f32 %v8955_v5, %v2207_v50 }
 0x6a3   : > { %v2209_v17 = vpop.xlane.xlu1 %2208 }
 0x6a4   : > { %v2254_v6 = vmul.f32 1.442695, %v2238_v48  ;;  %v2239_v54 = vsub.f32 %v8959_v3, %v2209_v17 }
 0x6a5   : > { %v2213_v45 = vpop.xlane.xlu0 %2212 }
 0x6a6   : > { %7583 = vpow2.f32 %v2254_v6  ;;  %v2241_v10 = vsub.f32 %v8963_v26, %v2213_v45  ;;  %v2256_v38 = vmul.f32 1.442695, %v2239_v54 }
 0x6a8   : > { %v2260_v24 = vmul.f32 1.442695, %v2241_v10 }
 0x6a9   : > { %v2369_v61 = vpop.permute.xlu0 %2368 }
 0x6aa   : > { %7585 = vpow2.f32 %v2260_v24  ;;  %6929 = vmatprep.subr.bf16.mxu0 %v2369_v61 }
 0x6ab   : > { %6930 = vmatpush3.bf16.msra.mxu0 %v2369_v61  ;;  %7587 = vpow2.f32 %v2256_v38  ;;  %v2221_v61 = vpop.xlane.xlu1 %2220 }
 0x6ac   : > { %6931 = vmatprep.subr.bf16.mxu0 %v2367_v60  ;;  %v2245_v13 = vsub.f32 %v8967_v7, %v2221_v61 }
 0x6ae   : > { %v2268_v6 = vmul.f32 1.442695, %v2245_v13 }
 0x6af   : > { %v9030_v22 = vpop.eup %7581  ;;  %6932 = vmatpush3.bf16.msra.mxu0 %v2367_v60  ;;  %v2217_v38 = vpop.xlane.xlu1 %2216 }
 0x6b0   : > { %2290 = vadd.xlane.f32.xlu1 %v9030_v22  ;;  %v2243_v24 = vsub.f32 %v8971_v14, %v2217_v38 }
 0x6b2   : > { %v2264_v60 = vmul.f32 1.442695, %v2243_v24 }
 0x6b3   : > { %v9033_v5 = vpop.eup %7583  ;;  %v2229_v45 = vpop.xlane.xlu1 %2228 }
 0x6b4   : > { %2286 = vadd.xlane.f32.xlu1 %v9033_v5 }
 0x6b7   : > { %v9036_v3 = vpop.eup %7585  ;;  %v2225_v15 = vpop.xlane.xlu1 %2224 }
 0x6b8   : > { %2292 = vadd.xlane.f32.xlu1 %v9036_v3  ;;  %v9039_v10 = vpop.eup %7587 }
 0x6bb   : > { %v9049_v14 = vpop.permute.xlu1 %2515 }
 0x6bc   : > { %2288 = vadd.xlane.f32.xlu1 %v9039_v10 }
 0x6cd   : > { %2507 = vrot.lane.b32.xlu1 %v8651_v58, %s8042_s25 }
 0x6da   : > { %v2219_v54 = vpop.xlane.xlu0 %2218 }
 0x6db   : > { %v2244_v26 = vsub.f32 %v8989_v57, %v2219_v54  ;;  %v2249_v57 = vsub.f32 %v8975_v42, %v2229_v45 }
 0x6dd   : > { %v2266_v8 = vmul.f32 1.442695, %v2244_v26  ;;  %v2276_v54 = vmul.f32 1.442695, %v2249_v57  ;;  %v9054_v26 = vpop.permute.xlu1 %2511 }
 0x6de   : > { %v2215_v50 = vpop.xlane.xlu0 %2214 }
 0x6df   : > { %7589 = vpow2.f32 %v2266_v8  ;;  %v2242_v48 = vsub.f32 %v8993_v53, %v2215_v50  ;;  %v2247_v53 = vsub.f32 %v8979_v30, %v2225_v15 }
 0x6e0   : > { %7591 = vpow2.f32 %v2264_v60 }
 0x6e1   : > { %v2262_v17 = vmul.f32 1.442695, %v2242_v48  ;;  %v2272_v42 = vmul.f32 1.442695, %v2247_v53 }
 0x6e2   : > { %v2227_v49 = vpop.xlane.xlu0 %2226 }
 0x6e3   : > { %7593 = vpow2.f32 %v2262_v17  ;;  %v2248_v63 = vsub.f32 %v8997_v52, %v2227_v49 }
 0x6e4   : > { %7595 = vpow2.f32 %v2268_v6 }
 0x6e5   : > { %v2274_v38 = vmul.f32 1.442695, %v2248_v63 }
 0x6e6   : > { %v2223_v7 = vpop.xlane.xlu0 %2222 }
 0x6e7   : > { %7597 = vpow2.f32 %v2274_v38  ;;  %v2246_v61 = vsub.f32 %v9001_v59, %v2223_v7 }
 0x6e9   : > { %v2270_v24 = vmul.f32 1.442695, %v2246_v61 }
 0x6ea   : > { %v2235_v8 = vpop.xlane.xlu0 %2234 }
 0x6eb   : > { %7599 = vpow2.f32 %v2270_v24  ;;  %v2252_v49 = vsub.f32 %v9005_v23, %v2235_v8 }
 0x6ec   : > { %v9057_v52 = vpop.eup %7589  ;;  %7601 = vpow2.f32 %v2276_v54 }
 0x6ed   : > { %v2282_v63 = vmul.f32 1.442695, %v2252_v49  ;;  %2298 = vadd.xlane.f32.xlu0 %v9057_v52  ;;  %v9060_v59 = vpop.eup %7591 }
 0x6ee   : > { %v2231_v45 = vpop.xlane.xlu0 %2230  ;;  %v2237_v13 = vpop.xlane.xlu1 %2236 }
 0x6ef   : > { %7603 = vpow2.f32 %v2282_v63  ;;  %v2250_v30 = vsub.f32 %v9009_v37, %v2231_v45  ;;  %v2253_v60 = vsub.f32 %v9012_v32, %v2237_v13 }
 0x6f0   : > { %v9064_v15 = vpop.eup %7593  ;;  %7605 = vpow2.f32 %v2272_v42 }
 0x6f1   : > { %v2278_v50 = vmul.f32 1.442695, %v2250_v30  ;;  %2294 = vadd.xlane.f32.xlu0 %v9064_v15  ;;  %2296 = vadd.xlane.f32.xlu1 %v9060_v59  ;;  %v2284_v23 = vmul.f32 1.442695, %v2253_v60  ;;  %v9070_v6 = vpop.eup %7595 }
 0x6f2   : > { %v9068_v48 = vpop.permute.xlu0 %2517  ;;  %v2233_v17 = vpop.xlane.xlu1 %2232 }
 0x6f3   : > { %7607 = vpow2.f32 %v2278_v50  ;;  %v2251_v38 = vsub.f32 %v9017_v9, %v2233_v17  ;;  %7181 = vmatprep.subr.msk.bf16.mxu0 %vm1548_vm0, %v9068_v48 }
 0x6f4   : > { %v9075_v37 = vpop.eup %7597  ;;  %7609 = vpow2.f32 %v2284_v23 }
 0x6f5   : > { %v2280_v32 = vmul.f32 1.442695, %v2251_v38  ;;  %2300 = vadd.xlane.f32.xlu0 %v9070_v6  ;;  %2306 = vadd.xlane.f32.xlu1 %v9075_v37 }
 0x6f7   : > { %7611 = vpow2.f32 %v2280_v32 }
 0x6f8   : > { %v9079_v57 = vpop.eup %7599 }
 0x6f9   : > { %2302 = vadd.xlane.f32.xlu1 %v9079_v57  ;;  %v9082_v7 = vpop.eup %7601 }
 0x6fc   : > { %v9084_v61 = vpop.eup %7603 }
 0x6fd   : > { %2314 = vadd.xlane.f32.xlu0 %v9084_v61  ;;  %2308 = vadd.xlane.f32.xlu1 %v9082_v7  ;;  %v9088_v9 = vpop.eup %7605 }
 0x700   : > { %v9090_v24 = vpop.eup %7607 }
 0x701   : > { %2310 = vadd.xlane.f32.xlu0 %v9090_v24  ;;  %2304 = vadd.xlane.f32.xlu1 %v9088_v9  ;;  %v9094_v54 = vpop.eup %7609 }
 0x704   : > { %v9096_v53 = vpop.eup %7611 }
 0x705   : > { %2316 = vadd.xlane.f32.xlu0 %v9094_v54  ;;  %2312 = vadd.xlane.f32.xlu1 %v9096_v53 }
 0x716   : > { %2503 = vrot.lane.b32.xlu1 %v8671_v20, %s8042_s25 }
 0x71a   : > { %2489 = vrot.lane.b32.xlu1 %v8479_v56, %s8042_s25 }
 0x71b   : > { %2505 = vrot.lane.b32.xlu0 %v8661_v51, %s8042_s25 }
 0x71e   : > { %2493 = vrot.lane.b32.xlu1 %v8507_v47, %s8042_s25 }
 0x71f   : > { %2487 = vrot.lane.b32.xlu0 %v8469_v19, %s8042_s25 }
 0x722   : > { %2497 = vrot.lane.b32.xlu1 %v8533_v27, %s8042_s25 }
 0x723   : > { %2491 = vrot.lane.b32.xlu0 %v8495_v33, %s8042_s25 }
 0x726   : > { %2501 = vrot.lane.b32.xlu1 %v8584_v18, %s8042_s25 }
 0x727   : > { %2495 = vrot.lane.b32.xlu0 %v8516_v44, %s8042_s25 }
 0x72a   : > { %2860 = vrot.lane.b32.xlu1 %v8541_v31, %s8042_s25 }
 0x72b   : > { %2499 = vrot.lane.b32.xlu0 %v8560_v62, %s8042_s25 }
 0x72e   : > { %2852 = vrot.lane.b32.xlu1 %v8590_v46, %s8042_s25 }
 0x72f   : > { %2862 = vrot.lane.b32.xlu0 %v8536_v11, %s8042_s25 }
 0x732   : > { %2848 = vrot.lane.b32.xlu1 %v8613_v34, %s8042_s25 }
 0x733   : > { %2858 = vrot.lane.b32.xlu0 %v8546_v40, %s8042_s25 }
 0x737   : > { %2856 = vrot.lane.b32.xlu0 %v8563_v0, %s8042_s25 }
 0x739   : > { %v2291_v8 = vpop.xlane.xlu1 %2290 }
 0x73b   : > { %2854 = vrot.lane.b32.xlu0 %v8572_v41, %s8042_s25 }
 0x73d   : > { %v2287_v49 = vpop.xlane.xlu1 %2286 }
 0x741   : > { %v2293_v63 = vpop.xlane.xlu1 %2292 }
 0x742   : > { %7613 = vrcp.f32 %v2293_v63 }
 0x743   : > { %7615 = vrcp.f32 %v2287_v49  ;;  %v2514_v49 = vpop.permute.xlu0 %2513 }
 0x744   : > { %7617 = vrcp.f32 %v2291_v8  ;;  %v2565_v8 = vsel %vm1548_vm0, %v9068_v48, 0 }
 0x745   : > { %v2289_v42 = vpop.xlane.xlu1 %2288 }
 0x746   : > { %7619 = vrcp.f32 %v2289_v42 }
 0x74f   : > { %v7614_v45 = vpop.eup %7613 }
 0x750   : > { %v7616_v13 = vpop.eup %7615  ;;  %v2325_v50 = vmul.f32 %v7614_v45, %v9036_v3  ;;  %v2562_v3 = vsel %vm1548_vm0, %v9049_v14, 0 }
 0x751   : > { %v7618_v30 = vpop.eup %7617  ;;  %v2319_v23 = vmul.f32 %v7616_v13, %v9033_v5  ;;  %v2510_v5 = vpop.permute.xlu0 %2509 }
 0x752   : > { %v2323_v38 = vmul.f32 %v7618_v30, %v9030_v22  ;;  %v2559_v22 = vsel %vm1548_vm0, %v2514_v49, 0 }
 0x753   : > { %v7620_v60 = vpop.eup %7619 }
 0x754   : > { %v2321_v17 = vmul.f32 %v7620_v60, %v9039_v10  ;;  %v2351_v29 = vpack.c.bf16 %v2325_v50, %v2323_v38  ;;  %v2508_v10 = vpop.permute.xlu1 %2507 }
 0x756   : > { %v2350_v32 = vpack.c.bf16 %v2321_v17, %v2319_v23 }
 0x758   : > { %6933 = vmatprep.mubr.bf16.mxu0 %v2350_v32 }
 0x759   : > { %6934 = vmatmul.mubr.bf16.vlgmr.msra.gmra.mxu0 %v2351_v29  ;;  %v2556_v29 = vsel %vm1548_vm0, %v9054_v26, 0 }
 0x75a   : > { %6950 = vmatpush3.bf16.xpose.msra.mxu0 %v2565_v8 }
 0x75b   : > { %7182 = vmatprep.subr.msk.bf16.mxu0 %vm1548_vm0, %v9049_v14  ;;  %v2553_v14 = vsel %vm1548_vm0, %v2510_v5, 0 }
 0x762   : > { %6952 = vmatpush3.bf16.xpose.msra.mxu0 %v2562_v3 }
 0x763   : > { %7183 = vmatprep.subr.msk.bf16.mxu0 %vm1548_vm0, %v2514_v49 }
 0x76a   : > { %6954 = vmatpush3.bf16.xpose.msra.mxu0 %v2559_v22 }
 0x76b   : > { %7184 = vmatprep.subr.msk.bf16.mxu0 %vm1548_vm0, %v9054_v26  ;;  %v2550_v26 = vsel %vm1548_vm0, %v2508_v10, 0 }
 0x772   : > { %6956 = vmatpush3.bf16.xpose.msra.mxu0 %v2556_v29 }
 0x773   : > { %7185 = vmatprep.subr.msk.bf16.mxu0 %vm1548_vm0, %v2510_v5 }
 0x776   : > { %v2299_v48 = vpop.xlane.xlu0 %2298 }
 0x77a   : > { %6958 = vmatpush3.bf16.xpose.msra.mxu0 %v2553_v14  ;;  %v2295_v63 = vpop.xlane.xlu0 %2294  ;;  %v2297_v42 = vpop.xlane.xlu1 %2296 }
 0x77b   : > { %7621 = vrcp.f32 %v2295_v63  ;;  %7186 = vmatprep.subr.msk.bf16.mxu0 %vm1548_vm0, %v2508_v10 }
 0x77c   : > { %7623 = vrcp.f32 %v2297_v42 }
 0x77d   : > { %7625 = vrcp.f32 %v2299_v48 }
 0x77e   : > { %v2301_v45 = vpop.xlane.xlu0 %2300  ;;  %v2307_v13 = vpop.xlane.xlu1 %2306 }
 0x77f   : > { %7627 = vrcp.f32 %v2301_v45 }
 0x782   : > { %6960 = vmatpush3.bf16.xpose.msra.mxu0 %v2550_v26  ;;  %v2303_v30 = vpop.xlane.xlu1 %2302 }
 0x786   : > { %v2315_v60 = vpop.xlane.xlu0 %2314  ;;  %v2309_v50 = vpop.xlane.xlu1 %2308 }
 0x787   : > { %7629 = vrcp.f32 %v2309_v50 }
 0x788   : > { %v7622_v23 = vpop.eup %7621  ;;  %7631 = vrcp.f32 %v2303_v30 }
 0x789   : > { %v7624_v17 = vpop.eup %7623  ;;  %v2327_v38 = vmul.f32 %v7622_v23, %v9064_v15  ;;  %7633 = vrcp.f32 %v2307_v13 }
 0x78a   : > { %v7626_v32 = vpop.eup %7625  ;;  %v2311_v8 = vpop.xlane.xlu0 %2310  ;;  %v2329_v49 = vmul.f32 %v7624_v17, %v9060_v59 }
 0x78b   : > { %v2305_v3 = vpop.xlane.xlu1 %2304  ;;  %v2331_v5 = vmul.f32 %v7626_v32, %v9057_v52 }
 0x78c   : > { %v7628_v22 = vpop.eup %7627  ;;  %7635 = vrcp.f32 %v2305_v3  ;;  %v2352_v29 = vpack.c.bf16 %v2329_v49, %v2327_v38 }
 0x78d   : > { %v2333_v10 = vmul.f32 %v7628_v22, %v9070_v6  ;;  %7637 = vrcp.f32 %v2311_v8 }
 0x78e   : > { %6937 = vmatprep.mubr.bf16.mxu0 %v2352_v29  ;;  %v2317_v48 = vpop.xlane.xlu0 %2316 }
 0x78f   : > { %v2313_v14 = vpop.xlane.xlu1 %2312  ;;  %v2353_v63 = vpack.c.bf16 %v2333_v10, %v2331_v5 }
 0x790   : > { %7639 = vrcp.f32 %v2313_v14 }
 0x791   : > { %7641 = vrcp.f32 %v2317_v48  ;;  %6938 = vmatmul.mubr.bf16.gmra.mxu0 %v2353_v63 }
 0x792   : > { %v2506_v15 = vpop.permute.xlu0 %2505  ;;  %7643 = vrcp.f32 %v2315_v60 }
 0x793   : > { %v2504_v42 = vpop.permute.xlu1 %2503  ;;  %7187 = vmatprep.subr.msk.bf16.mxu0 %vm1548_vm0, %v2506_v15  ;;  %v2547_v59 = vsel %vm1548_vm0, %v2506_v15, 0 }
 0x794   : > { %6962 = vmatpush3.bf16.xpose.msra.mxu0 %v2547_v59  ;;  %v7630_v52 = vpop.eup %7629  ;;  %v2544_v8 = vsel %vm1548_vm0, %v2504_v42, 0 }
 0x795   : > { %7188 = vmatprep.subr.msk.bf16.mxu0 %vm1548_vm0, %v2504_v42  ;;  %v7632_v13 = vpop.eup %7631  ;;  %v2341_v50 = vmul.f32 %v7630_v52, %v9082_v7 }
 0x796   : > { %v2488_v6 = vpop.permute.xlu0 %2487  ;;  %v7634_v26 = vpop.eup %7633  ;;  %v2335_v38 = vmul.f32 %v7632_v13, %v9079_v57 }
 0x797   : > { %v2490_v45 = vpop.permute.xlu1 %2489  ;;  %v2339_v3 = vmul.f32 %v7634_v26, %v9075_v37 }
 0x799   : > { %v7636_v30 = vpop.eup %7635  ;;  %v2355_v29 = vpack.c.bf16 %v2341_v50, %v2339_v3 }
 0x79a   : > { %v2492_v23 = vpop.permute.xlu0 %2491  ;;  %v2337_v60 = vmul.f32 %v7636_v30, %v9088_v9  ;;  %v7638_v32 = vpop.eup %7637 }
 0x79b   : > { %v2494_v17 = vpop.permute.xlu1 %2493  ;;  %v2343_v7 = vmul.f32 %v7638_v32, %v9090_v24 }
 0x79c   : > { %6964 = vmatpush3.bf16.xpose.msra.mxu0 %v2544_v8  ;;  %v2354_v49 = vpack.c.bf16 %v2337_v60, %v2335_v38 }
 0x79d   : > { %v7640_v22 = vpop.eup %7639 }
 0x79e   : > { %v7642_v5 = vpop.eup %7641  ;;  %6941 = vmatprep.mubr.bf16.mxu0 %v2354_v49  ;;  %v2496_v10 = vpop.permute.xlu0 %2495  ;;  %v2345_v14 = vmul.f32 %v7640_v22, %v9096_v53 }
 0x79f   : > { %v2498_v48 = vpop.permute.xlu1 %2497  ;;  %6942 = vmatmul.mubr.bf16.gmra.mxu0 %v2355_v29  ;;  %v7644_v57 = vpop.eup %7643  ;;  %v2349_v63 = vmul.f32 %v7642_v5, %v9094_v54 }
 0x7a0   : > { %v2356_v9 = vpack.c.bf16 %v2345_v14, %v2343_v7  ;;  %v2347_v42 = vmul.f32 %v7644_v57, %v9084_v61 }
 0x7a2   : > { %6945 = vmatprep.mubr.bf16.mxu0 %v2356_v9  ;;  %v2500_v15 = vpop.permute.xlu0 %2499  ;;  %v2357_v59 = vpack.c.bf16 %v2349_v63, %v2347_v42  ;;  %v9223_v42 = vld [vmem:[%s11389_s3] ss:$0 sm:$0xff] }
 0x7a3   : > { %v2502_v37 = vpop.permute.xlu1 %2501 }
 0x7a6   : > { %v2863_v52 = vpop.permute.xlu0 %2862 }
 0x7a7   : > { %6946 = vmatmul.mubr.bf16.gmra.mxu0 %v2357_v59  ;;  %6981 = vmatprep.subr.bf16.mxu1 %v2863_v52  ;;  %v2861_v13 = vpop.permute.xlu1 %2860 }
 0x7a8   : > { %6965 = vmatprep.mubr.msk.bf16.mxu0 %vm1548_vm0, %v2488_v6  ;;  %6982 = vmatpush3.bf16.msra.mxu1 %v2863_v52 }
 0x7a9   : > { %6983 = vmatprep.subr.bf16.mxu1 %v2861_v13 }
 0x7aa   : > { %v2859_v24 = vpop.permute.xlu0 %2858 }
 0x7ab   : > { %v2853_v54 = vpop.permute.xlu1 %2852 }
 0x7ac   : > { %6984 = vmatpush3.bf16.msra.mxu1 %v2861_v13 }
 0x7ad   : > { %6985 = vmatprep.subr.bf16.mxu1 %v2859_v24 }
 0x7ae   : > { %v2857_v53 = vpop.permute.xlu0 %2856 }
 0x7af   : > { %6966 = vmatmul.mubr.msk.bf16.vlgmr.msra.gmra.mxu0 %vm1548_vm0, %v2490_v45 }
 0x7b0   : > { %6969 = vmatprep.mubr.msk.bf16.mxu0 %vm1548_vm0, %v2492_v23  ;;  %6986 = vmatpush3.bf16.msra.mxu1 %v2859_v24 }
 0x7b1   : > { %6987 = vmatprep.subr.bf16.mxu1 %v2857_v53 }
 0x7b2   : > { %v2855_v61 = vpop.permute.xlu0 %2854 }
 0x7b4   : > { %6988 = vmatpush3.bf16.msra.mxu1 %v2857_v53 }
 0x7b5   : > { %6989 = vmatprep.subr.bf16.mxu1 %v2855_v61 }
 0x7b7   : > { %6970 = vmatmul.mubr.msk.bf16.gmra.mxu0 %vm1548_vm0, %v2494_v17 }
 0x7b8   : > { %6973 = vmatprep.mubr.msk.bf16.mxu0 %vm1548_vm0, %v2496_v10  ;;  %6990 = vmatpush3.bf16.msra.mxu1 %v2855_v61 }
 0x7b9   : > { %6991 = vmatprep.subr.bf16.mxu1 %v2853_v54 }
 0x7bc   : > { %6992 = vmatpush3.bf16.msra.mxu1 %v2853_v54 }
 0x7bf   : > { %6974 = vmatmul.mubr.msk.bf16.gmra.mxu0 %vm1548_vm0, %v2498_v48 }
 0x7c0   : > { %6977 = vmatprep.mubr.msk.bf16.mxu0 %vm1548_vm0, %v2500_v15 }
 0x7c7   : > { %6978 = vmatmul.mubr.msk.bf16.gmra.mxu0 %vm1548_vm0, %v2502_v37 }
 0x819   : > { %v9178_v6 = vpop.f32.mrf.mxu0 }
 0x81b   : > { %v9180_v45 = vpop.f32.mrf.mxu0 }
 0x81d   : > { %v9182_v26 = vpop.f32.mrf.mxu0 }
 0x81f   : > { %v9186_v50 = vpop.f32.mrf.mxu0 }
 0x851   : > { %v9188_v23 = vpop.f32.mrf.mxu0 }
 0x853   : > { %v9190_v17 = vpop.f32.mrf.mxu0 }
 0x855   : > { %v9192_v38 = vpop.f32.mrf.mxu0 }
 0x857   : > { %v9196_v32 = vpop.f32.mrf.mxu0 }
 0x85f   : > { %v9198_v8 = vpop.f32.mrf.mxu0 }
 0x861   : > { %v9200_v3 = vpop.f32.mrf.mxu0 }
 0x863   : > { %v9202_v49 = vpop.f32.mrf.mxu0 }
 0x865   : > { %v9206_v29 = vpop.f32.mrf.mxu0 }
 0x867   : > { %v9210_v10 = vpop.f32.mrf.mxu0 }
 0x868   : > { %11406 = vst [vmem:[#allocation29_spill] sm:$0xff] %v9210_v10 }
 0x869   : > { %v9212_v48 = vpop.f32.mrf.mxu0 }
 0x86a   : > { %11407 = vst [vmem:[#allocation30_spill] sm:$0xff] %v9212_v48 }
 0x86b   : > { %v9214_v7 = vpop.f32.mrf.mxu0 }
 0x86d   : > { %v9218_v57 = vpop.f32.mrf.mxu0 }
 0x86e   : > { %11408 = vst [vmem:[#allocation31_spill] sm:$0xff] %v9218_v57 }
 0x86f   : > { %v6967_v63 = vpop.f32.mrf.mxu0 }
 0x870   : > { %v2666_v15 = vmul.f32 0.17677669, %v6967_v63 }
 0x871   : > { %v2601_v37 = vpop.f32.mrf.mxu0 }
 0x872   : > { %v9226_v59 = vadd.f32 %v9223_v42, %v2666_v15  ;;  %v2664_v52 = vmul.f32 0.17677669, %v2601_v37 }
 0x873   : > { %v6968_v13 = vpop.f32.mrf.mxu0 }
 0x874   : > { %2700 = vmax.xlane.f32.xlu0 %v9226_v59  ;;  %v9230_v53 = vadd.f32 %v9223_v42, %v2664_v52  ;;  %v2667_v61 = vmul.f32 0.17677669, %v6968_v13 }
 0x875   : > { %v2604_v24 = vpop.f32.mrf.mxu0 }
 0x876   : > { %v2665_v54 = vmul.f32 0.17677669, %v2604_v24  ;;  %v9237_v15 = vadd.f32 %v9223_v42, %v2667_v61 }
 0x877   : > { %v6971_v14 = vpop.f32.mrf.mxu0 }
 0x878   : > { %v9233_v9 = vadd.f32 %v9223_v42, %v2665_v54  ;;  %2696 = vmax.xlane.f32.xlu0 %v9230_v53 }
 0x879   : > { %v2617_v63 = vpop.f32.mrf.mxu0 }
 0x87a   : > { %2698 = vmax.xlane.f32.xlu1 %v9233_v9 }
 0x87b   : > { %v6972_v37 = vpop.f32.mrf.mxu0 }
 0x87c   : > { %v2671_v5 = vmul.f32 0.17677669, %v6972_v37  ;;  %2702 = vmax.xlane.f32.xlu0 %v9237_v15 }
 0x87d   : > { %v2620_v52 = vpop.f32.mrf.mxu0 }
 0x87e   : > { %v9242_v13 = vadd.f32 %v9223_v42, %v2671_v5  ;;  %v2669_v24 = vmul.f32 0.17677669, %v2620_v52  ;;  %v2668_v52 = vmul.f32 0.17677669, %v2617_v63 }
 0x87f   : > { %v6975_v22 = vpop.f32.mrf.mxu0 }
 0x880   : > { %2710 = vmax.xlane.f32.xlu1 %v9242_v13  ;;  %v9246_v60 = vadd.f32 %v9223_v42, %v2669_v24  ;;  %v2674_v24 = vmul.f32 0.17677669, %v6975_v22 }
 0x881   : > { %v2633_v54 = vpop.f32.mrf.mxu0 }
 0x882   : > { %v9272_v21 = vadd.f32 %v9223_v42, %v2674_v24 }
 0x883   : > { %v6976_v61 = vpop.f32.mrf.mxu0 }
 0x884   : > { %v2675_v30 = vmul.f32 0.17677669, %v6976_v61  ;;  %2706 = vmax.xlane.f32.xlu1 %v9246_v60 }
 0x885   : > { %v2636_v4 = vpop.f32.mrf.mxu0 }
 0x886   : > { %v9250_v37 = vadd.f32 %v9223_v42, %v2675_v30  ;;  %v2673_v25 = vmul.f32 0.17677669, %v2636_v4  ;;  %v2670_v30 = vmul.f32 0.17677669, %v6971_v14 }
 0x887   : > { %v6979_v61 = vpop.f32.mrf.mxu0 }
 0x888   : > { %2718 = vmax.xlane.f32.xlu1 %v9250_v37  ;;  %v9254_v5 = vadd.f32 %v9223_v42, %v2673_v25  ;;  %v9264_v4 = vadd.f32 %v9223_v42, %v2670_v30  ;;  %v9268_v25 = vadd.f32 %v9223_v42, %v2668_v52  ;;  %v2678_v14 = vmul.f32 0.17677669, %v6979_v61 }
 0x889   : > { %v2649_v2 = vpop.f32.mrf.mxu0 }
 0x88a   : > { %v9280_v30 = vadd.f32 %v9223_v42, %v2678_v14  ;;  %v2676_v22 = vmul.f32 0.17677669, %v2649_v2  ;;  %v2849_v14 = vpop.permute.xlu1 %2848 }
 0x88b   : > { %v6980_v63 = vpop.f32.mrf.mxu0 }
 0x88c   : > { %2714 = vmax.xlane.f32.xlu1 %v9254_v5  ;;  %v2679_v52 = vmul.f32 0.17677669, %v6980_v63 }
 0x88d   : > { %v2652_v36 = vpop.f32.mrf.mxu0 }
 0x88e   : > { %v9287_v24 = vadd.f32 %v9223_v42, %v2679_v52 }
 0x892   : > { %2850 = vrot.lane.b32.xlu0 %v8603_v12, %s8042_s25 }
 0x89d   : > { %2997 = vrot.lane.b32.xlu1 %v8566_v1, %s8043_s18  ;;  %v2672_v1 = vmul.f32 0.17677669, %v2633_v54  ;;  %v9284_v54 = vadd.f32 %v9223_v42, %v2676_v22 }
 0x8a1   : > { %2993 = vrot.lane.b32.xlu1 %v8631_v35, %s8043_s18  ;;  %v9276_v35 = vadd.f32 %v9223_v42, %v2672_v1  ;;  %v2677_v1 = vmul.f32 0.17677669, %v2652_v36 }
 0x8a3   : > { %v9292_v61 = vadd.f32 %v9223_v42, %v2677_v1 }
 0x8b1   : > { %2708 = vmax.xlane.f32.xlu0 %v9264_v4 }
 0x8b5   : > { %2704 = vmax.xlane.f32.xlu0 %v9268_v25 }
 0x8b9   : > { %2716 = vmax.xlane.f32.xlu0 %v9272_v21 }
 0x8bd   : > { %2712 = vmax.xlane.f32.xlu0 %v9276_v35 }
 0x8c1   : > { %2724 = vmax.xlane.f32.xlu0 %v9280_v30 }
 0x8c5   : > { %2720 = vmax.xlane.f32.xlu0 %v9284_v54  ;;  %2726 = vmax.xlane.f32.xlu1 %v9287_v24 }
 0x8c9   : > { %2722 = vmax.xlane.f32.xlu1 %v9292_v61 }
 0x8db   : > { %2999 = vrot.lane.b32.xlu0 %v8592_v16, %s8043_s18 }
 0x8df   : > { %2995 = vrot.lane.b32.xlu0 %v8619_v28, %s8043_s18 }
 0x8e3   : > { %2991 = vrot.lane.b32.xlu0 %v8641_v55, %s8043_s18 }
 0x8fd   : > { %v2701_v2 = vpop.xlane.xlu0 %2700 }
 0x8fe   : > { %v2730_v36 = vsub.f32 %v9226_v59, %v2701_v2 }
 0x900   : > { %v2748_v63 = vmul.f32 1.442695, %v2730_v36 }
 0x901   : > { %v2697_v22 = vpop.xlane.xlu0 %2696 }
 0x902   : > { %7645 = vpow2.f32 %v2748_v63  ;;  %v2728_v52 = vsub.f32 %v9230_v53, %v2697_v22 }
 0x903   : > { %v2699_v1 = vpop.xlane.xlu1 %2698 }
 0x904   : > { %v2744_v39 = vmul.f32 1.442695, %v2728_v52  ;;  %v2729_v16 = vsub.f32 %v9233_v9, %v2699_v1 }
 0x905   : > { %v2703_v43 = vpop.xlane.xlu0 %2702 }
 0x906   : > { %7647 = vpow2.f32 %v2744_v39  ;;  %v2731_v28 = vsub.f32 %v9237_v15, %v2703_v43  ;;  %v2746_v55 = vmul.f32 1.442695, %v2729_v16 }
 0x908   : > { %v2750_v48 = vmul.f32 1.442695, %v2731_v28 }
 0x909   : > { %v2851_v57 = vpop.permute.xlu0 %2850 }
 0x90a   : > { %7649 = vpow2.f32 %v2750_v48  ;;  %6993 = vmatprep.subr.bf16.mxu1 %v2851_v57  ;;  %v2711_v48 = vpop.xlane.xlu1 %2710 }
 0x90b   : > { %6994 = vmatpush3.bf16.msra.mxu1 %v2851_v57  ;;  %7651 = vpow2.f32 %v2746_v55  ;;  %v2735_v63 = vsub.f32 %v9242_v13, %v2711_v48 }
 0x90c   : > { %6995 = vmatprep.subr.bf16.mxu1 %v2849_v14 }
 0x90d   : > { %v2758_v55 = vmul.f32 1.442695, %v2735_v63 }
 0x90e   : > { %v2707_v57 = vpop.xlane.xlu1 %2706 }
 0x90f   : > { %v9305_v59 = vpop.eup %7645  ;;  %6996 = vmatpush3.bf16.msra.mxu1 %v2849_v14  ;;  %v2733_v15 = vsub.f32 %v9246_v60, %v2707_v57 }
 0x910   : > { %2780 = vadd.xlane.f32.xlu1 %v9305_v59 }
 0x911   : > { %v2754_v22 = vmul.f32 1.442695, %v2733_v15 }
 0x912   : > { %v2719_v9 = vpop.xlane.xlu1 %2718 }
 0x913   : > { %v9308_v53 = vpop.eup %7647 }
 0x914   : > { %2776 = vadd.xlane.f32.xlu1 %v9308_v53 }
 0x916   : > { %v2715_v52 = vpop.xlane.xlu1 %2714 }
 0x917   : > { %v9311_v39 = vpop.eup %7649 }
 0x918   : > { %2782 = vadd.xlane.f32.xlu1 %v9311_v39  ;;  %v9314_v43 = vpop.eup %7651 }
 0x91a   : > { %v9324_v60 = vpop.permute.xlu1 %2997 }
 0x91c   : > { %2778 = vadd.xlane.f32.xlu1 %v9314_v43 }
 0x92d   : > { %2989 = vrot.lane.b32.xlu1 %v8651_v58, %s8043_s18 }
 0x93a   : > { %v2709_v2 = vpop.xlane.xlu0 %2708 }
 0x93b   : > { %v2734_v36 = vsub.f32 %v9264_v4, %v2709_v2  ;;  %v2739_v4 = vsub.f32 %v9250_v37, %v2719_v9 }
 0x93d   : > { %v2756_v14 = vmul.f32 1.442695, %v2734_v36  ;;  %v2766_v2 = vmul.f32 1.442695, %v2739_v4  ;;  %v9329_v36 = vpop.permute.xlu1 %2993 }
 0x93e   : > { %v2705_v1 = vpop.xlane.xlu0 %2704 }
 0x93f   : > { %7653 = vpow2.f32 %v2756_v14  ;;  %v2732_v16 = vsub.f32 %v9268_v25, %v2705_v1  ;;  %v2737_v25 = vsub.f32 %v9254_v5, %v2715_v52 }
 0x940   : > { %7655 = vpow2.f32 %v2754_v22 }
 0x941   : > { %v2752_v28 = vmul.f32 1.442695, %v2732_v16  ;;  %v2762_v37 = vmul.f32 1.442695, %v2737_v25 }
 0x942   : > { %v2717_v58 = vpop.xlane.xlu0 %2716 }
 0x943   : > { %7657 = vpow2.f32 %v2752_v28  ;;  %v2738_v10 = vsub.f32 %v9272_v21, %v2717_v58 }
 0x944   : > { %7659 = vpow2.f32 %v2758_v55 }
 0x945   : > { %v2764_v57 = vmul.f32 1.442695, %v2738_v10 }
 0x946   : > { %v2713_v13 = vpop.xlane.xlu0 %2712 }
 0x947   : > { %7661 = vpow2.f32 %v2764_v57  ;;  %v2736_v48 = vsub.f32 %v9276_v35, %v2713_v13 }
 0x949   : > { %v2760_v15 = vmul.f32 1.442695, %v2736_v48 }
 0x94a   : > { %v2725_v14 = vpop.xlane.xlu0 %2724 }
 0x94b   : > { %7663 = vpow2.f32 %v2760_v15  ;;  %v2742_v21 = vsub.f32 %v9280_v30, %v2725_v14 }
 0x94c   : > { %v9332_v63 = vpop.eup %7653  ;;  %7665 = vpow2.f32 %v2766_v2 }
 0x94d   : > { %v2772_v10 = vmul.f32 1.442695, %v2742_v21  ;;  %2788 = vadd.xlane.f32.xlu0 %v9332_v63  ;;  %v9335_v35 = vpop.eup %7655  ;;  %v3044_v21 = vsel %vm1548_vm0, %v9324_v60, 0 }
 0x94e   : > { %v2721_v9 = vpop.xlane.xlu0 %2720  ;;  %v2727_v22 = vpop.xlane.xlu1 %2726 }
 0x94f   : > { %7667 = vpow2.f32 %v2772_v10  ;;  %v2740_v5 = vsub.f32 %v9284_v54, %v2721_v9  ;;  %v2743_v52 = vsub.f32 %v9287_v24, %v2727_v22 }
 0x950   : > { %v9339_v1 = vpop.eup %7657  ;;  %7669 = vpow2.f32 %v2762_v37 }
 0x951   : > { %v2768_v16 = vmul.f32 1.442695, %v2740_v5  ;;  %2784 = vadd.xlane.f32.xlu0 %v9339_v1  ;;  %2786 = vadd.xlane.f32.xlu1 %v9335_v35  ;;  %v2774_v30 = vmul.f32 1.442695, %v2743_v52  ;;  %v9343_v58 = vpop.eup %7659 }
 0x952   : > { %v3000_v28 = vpop.permute.xlu0 %2999  ;;  %v2723_v55 = vpop.xlane.xlu1 %2722 }
 0x953   : > { %7671 = vpow2.f32 %v2768_v16  ;;  %v2741_v57 = vsub.f32 %v9292_v61, %v2723_v55  ;;  %7189 = vmatprep.subr.msk.bf16.mxu1 %vm1548_vm0, %v3000_v28  ;;  %v3047_v14 = vsel %vm1548_vm0, %v3000_v28, 0 }
 0x954   : > { %v9347_v54 = vpop.eup %7661  ;;  %7673 = vpow2.f32 %v2774_v30 }
 0x955   : > { %v2770_v24 = vmul.f32 1.442695, %v2741_v57  ;;  %2790 = vadd.xlane.f32.xlu0 %v9343_v58  ;;  %2796 = vadd.xlane.f32.xlu1 %v9347_v54 }
 0x957   : > { %7675 = vpow2.f32 %v2770_v24 }
 0x958   : > { %v9351_v4 = vpop.eup %7663 }
 0x959   : > { %2792 = vadd.xlane.f32.xlu1 %v9351_v4  ;;  %v9354_v13 = vpop.eup %7665 }
 0x95c   : > { %v9356_v48 = vpop.eup %7667 }
 0x95d   : > { %2804 = vadd.xlane.f32.xlu0 %v9356_v48  ;;  %2798 = vadd.xlane.f32.xlu1 %v9354_v13  ;;  %v9360_v61 = vpop.eup %7669 }
 0x960   : > { %v9362_v15 = vpop.eup %7671 }
 0x961   : > { %2800 = vadd.xlane.f32.xlu0 %v9362_v15  ;;  %2794 = vadd.xlane.f32.xlu1 %v9360_v61  ;;  %v9366_v2 = vpop.eup %7673 }
 0x964   : > { %v9368_v25 = vpop.eup %7675 }
 0x965   : > { %2806 = vadd.xlane.f32.xlu0 %v9366_v2  ;;  %2802 = vadd.xlane.f32.xlu1 %v9368_v25 }
 0x976   : > { %2985 = vrot.lane.b32.xlu1 %v8671_v20, %s8043_s18 }
 0x97a   : > { %2971 = vrot.lane.b32.xlu1 %v8479_v56, %s8043_s18 }
 0x97b   : > { %2987 = vrot.lane.b32.xlu0 %v8661_v51, %s8043_s18 }
 0x97e   : > { %2975 = vrot.lane.b32.xlu1 %v8507_v47, %s8043_s18 }
 0x97f   : > { %2969 = vrot.lane.b32.xlu0 %v8469_v19, %s8043_s18 }
 0x982   : > { %2979 = vrot.lane.b32.xlu1 %v8533_v27, %s8043_s18 }
 0x983   : > { %2973 = vrot.lane.b32.xlu0 %v8495_v33, %s8043_s18 }
 0x986   : > { %2983 = vrot.lane.b32.xlu1 %v8584_v18, %s8043_s18 }
 0x987   : > { %2977 = vrot.lane.b32.xlu0 %v8516_v44, %s8043_s18 }
 0x98a   : > { %3342 = vrot.lane.b32.xlu1 %v8541_v31, %s8043_s18 }
 0x98b   : > { %2981 = vrot.lane.b32.xlu0 %v8560_v62, %s8043_s18 }
 0x98f   : > { %3344 = vrot.lane.b32.xlu0 %v8536_v11, %s8043_s18 }
 0x993   : > { %3340 = vrot.lane.b32.xlu0 %v8546_v40, %s8043_s18 }
 0x997   : > { %3338 = vrot.lane.b32.xlu0 %v8563_v0, %s8043_s18 }
 0x999   : > { %v2781_v19 = vpop.xlane.xlu1 %2780 }
 0x99d   : > { %v2777_v56 = vpop.xlane.xlu1 %2776 }
 0x9a1   : > { %v2783_v33 = vpop.xlane.xlu1 %2782 }
 0x9a2   : > { %7677 = vrcp.f32 %v2783_v33 }
 0x9a3   : > { %7679 = vrcp.f32 %v2777_v56 }
 0x9a4   : > { %7681 = vrcp.f32 %v2781_v19 }
 0x9a5   : > { %v2779_v47 = vpop.xlane.xlu1 %2778 }
 0x9a6   : > { %7683 = vrcp.f32 %v2779_v47 }
 0x9a9   : > { %v2990_v10 = vpop.permute.xlu1 %2989 }
 0x9af   : > { %v7678_v44 = vpop.eup %7677 }
 0x9b0   : > { %v7680_v27 = vpop.eup %7679  ;;  %v2815_v11 = vmul.f32 %v7678_v44, %v9311_v39  ;;  %v2996_v39 = vpop.permute.xlu0 %2995 }
 0x9b1   : > { %v7682_v31 = vpop.eup %7681  ;;  %v2809_v18 = vmul.f32 %v7680_v27, %v9308_v53  ;;  %v3041_v53 = vsel %vm1548_vm0, %v2996_v39, 0 }
 0x9b2   : > { %v2813_v0 = vmul.f32 %v7682_v31, %v9305_v59  ;;  %v3038_v59 = vsel %vm1548_vm0, %v9329_v36, 0 }
 0x9b3   : > { %v7684_v62 = vpop.eup %7683 }
 0x9b4   : > { %v2811_v40 = vmul.f32 %v7684_v62, %v9314_v43  ;;  %v2841_v20 = vpack.c.bf16 %v2815_v11, %v2813_v0  ;;  %v2992_v43 = vpop.permute.xlu0 %2991 }
 0x9b6   : > { %v2840_v51 = vpack.c.bf16 %v2811_v40, %v2809_v18 }
 0x9b8   : > { %6997 = vmatprep.mubr.bf16.mxu1 %v2840_v51 }
 0x9b9   : > { %6998 = vmatmul.mubr.bf16.vlgmr.msra.gmra.mxu1 %v2841_v20 }
 0x9ba   : > { %7014 = vmatpush3.bf16.xpose.msra.mxu1 %v3047_v14 }
 0x9bb   : > { %7190 = vmatprep.subr.msk.bf16.mxu1 %vm1548_vm0, %v9324_v60  ;;  %v3035_v60 = vsel %vm1548_vm0, %v2992_v43, 0 }
 0x9c2   : > { %7016 = vmatpush3.bf16.xpose.msra.mxu1 %v3044_v21 }
 0x9c3   : > { %7191 = vmatprep.subr.msk.bf16.mxu1 %vm1548_vm0, %v2996_v39 }
 0x9ca   : > { %7018 = vmatpush3.bf16.xpose.msra.mxu1 %v3041_v53 }
 0x9cb   : > { %7192 = vmatprep.subr.msk.bf16.mxu1 %vm1548_vm0, %v9329_v36  ;;  %v3032_v36 = vsel %vm1548_vm0, %v2990_v10, 0 }
 0x9d2   : > { %7020 = vmatpush3.bf16.xpose.msra.mxu1 %v3038_v59 }
 0x9d3   : > { %7193 = vmatprep.subr.msk.bf16.mxu1 %vm1548_vm0, %v2992_v43 }
 0x9d6   : > { %v2789_v37 = vpop.xlane.xlu0 %2788 }
 0x9da   : > { %7022 = vmatpush3.bf16.xpose.msra.mxu1 %v3035_v60  ;;  %v2785_v9 = vpop.xlane.xlu0 %2784  ;;  %v2787_v22 = vpop.xlane.xlu1 %2786 }
 0x9db   : > { %7685 = vrcp.f32 %v2785_v9  ;;  %7194 = vmatprep.subr.msk.bf16.mxu1 %vm1548_vm0, %v2990_v10 }
 0x9dc   : > { %7687 = vrcp.f32 %v2787_v22 }
 0x9dd   : > { %7689 = vrcp.f32 %v2789_v37 }
 0x9de   : > { %v2791_v5 = vpop.xlane.xlu0 %2790  ;;  %v2797_v52 = vpop.xlane.xlu1 %2796 }
 0x9df   : > { %7691 = vrcp.f32 %v2791_v5 }
 0x9e2   : > { %7024 = vmatpush3.bf16.xpose.msra.mxu1 %v3032_v36  ;;  %v2793_v16 = vpop.xlane.xlu1 %2792 }
 0x9e6   : > { %v2805_v30 = vpop.xlane.xlu0 %2804  ;;  %v2799_v28 = vpop.xlane.xlu1 %2798 }
 0x9e7   : > { %7693 = vrcp.f32 %v2799_v28 }
 0x9e8   : > { %v7686_v55 = vpop.eup %7685  ;;  %7695 = vrcp.f32 %v2793_v16 }
 0x9e9   : > { %v7688_v57 = vpop.eup %7687  ;;  %v2817_v24 = vmul.f32 %v7686_v55, %v9339_v1  ;;  %7697 = vrcp.f32 %v2797_v52 }
 0x9ea   : > { %v7690_v19 = vpop.eup %7689  ;;  %v2801_v56 = vpop.xlane.xlu0 %2800  ;;  %v2819_v47 = vmul.f32 %v7688_v57, %v9335_v35 }
 0x9eb   : > { %v2795_v33 = vpop.xlane.xlu1 %2794  ;;  %v2821_v31 = vmul.f32 %v7690_v19, %v9332_v63 }
 0x9ec   : > { %v7692_v44 = vpop.eup %7691  ;;  %7699 = vrcp.f32 %v2795_v33  ;;  %v2842_v27 = vpack.c.bf16 %v2819_v47, %v2817_v24 }
 0x9ed   : > { %v2823_v62 = vmul.f32 %v7692_v44, %v9343_v58  ;;  %7701 = vrcp.f32 %v2801_v56 }
 0x9ee   : > { %7001 = vmatprep.mubr.bf16.mxu1 %v2842_v27  ;;  %v2807_v11 = vpop.xlane.xlu0 %2806 }
 0x9ef   : > { %v2803_v18 = vpop.xlane.xlu1 %2802  ;;  %v2843_v40 = vpack.c.bf16 %v2823_v62, %v2821_v31 }
 0x9f0   : > { %7703 = vrcp.f32 %v2803_v18 }
 0x9f1   : > { %7705 = vrcp.f32 %v2807_v11  ;;  %7002 = vmatmul.mubr.bf16.gmra.mxu1 %v2843_v40 }
 0x9f2   : > { %v2988_v1 = vpop.permute.xlu0 %2987  ;;  %7707 = vrcp.f32 %v2805_v30 }
 0x9f3   : > { %v2986_v0 = vpop.permute.xlu1 %2985  ;;  %7195 = vmatprep.subr.msk.bf16.mxu1 %vm1548_vm0, %v2988_v1  ;;  %v3029_v35 = vsel %vm1548_vm0, %v2988_v1, 0 }
 0x9f4   : > { %7026 = vmatpush3.bf16.xpose.msra.mxu1 %v3029_v35  ;;  %v7694_v63 = vpop.eup %7693  ;;  %v3026_v60 = vsel %vm1548_vm0, %v2986_v0, 0 }
 0x9f5   : > { %7196 = vmatprep.subr.msk.bf16.mxu1 %vm1548_vm0, %v2986_v0  ;;  %v7696_v20 = vpop.eup %7695  ;;  %v2831_v39 = vmul.f32 %v7694_v63, %v9354_v13 }
 0x9f6   : > { %v2970_v58 = vpop.permute.xlu0 %2969  ;;  %v7698_v14 = vpop.eup %7697  ;;  %v2825_v43 = vmul.f32 %v7696_v20, %v9351_v4 }
 0x9f7   : > { %v2972_v51 = vpop.permute.xlu1 %2971  ;;  %v2829_v9 = vmul.f32 %v7698_v14, %v9347_v54 }
 0x9f9   : > { %v7700_v21 = vpop.eup %7699  ;;  %v2845_v52 = vpack.c.bf16 %v2831_v39, %v2829_v9 }
 0x9fa   : > { %v2974_v53 = vpop.permute.xlu0 %2973  ;;  %v2827_v10 = vmul.f32 %v7700_v21, %v9360_v61  ;;  %v7702_v37 = vpop.eup %7701 }
 0x9fb   : > { %v2976_v59 = vpop.permute.xlu1 %2975  ;;  %v2833_v13 = vmul.f32 %v7702_v37, %v9362_v15 }
 0x9fc   : > { %7028 = vmatpush3.bf16.xpose.msra.mxu1 %v3026_v60  ;;  %v2844_v22 = vpack.c.bf16 %v2827_v10, %v2825_v43 }
 0x9fd   : > { %v7704_v5 = vpop.eup %7703 }
 0x9fe   : > { %v7706_v36 = vpop.eup %7705  ;;  %7005 = vmatprep.mubr.bf16.mxu1 %v2844_v22  ;;  %v2978_v16 = vpop.permute.xlu0 %2977  ;;  %v2835_v28 = vmul.f32 %v7704_v5, %v9368_v25 }
 0x9ff   : > { %v2980_v30 = vpop.permute.xlu1 %2979  ;;  %7006 = vmatmul.mubr.bf16.gmra.mxu1 %v2845_v52  ;;  %v7708_v4 = vpop.eup %7707  ;;  %v2839_v55 = vmul.f32 %v7706_v36, %v9366_v2 }
 0xa00   : > { %v2846_v61 = vpack.c.bf16 %v2835_v28, %v2833_v13  ;;  %v2837_v24 = vmul.f32 %v7708_v4, %v9356_v48  ;;  %v11409_v48 = vmov 0  }
 0xa02   : > { %7009 = vmatprep.mubr.bf16.mxu1 %v2846_v61  ;;  %v2982_v57 = vpop.permute.xlu0 %2981  ;;  %v2847_v19 = vpack.c.bf16 %v2839_v55, %v2837_v24 }
 0xa03   : > { %v2984_v54 = vpop.permute.xlu1 %2983 }
 0xa06   : > { %v3345_v56 = vpop.permute.xlu0 %3344 }
 0xa07   : > { %7010 = vmatmul.mubr.bf16.gmra.mxu1 %v2847_v19  ;;  %7045 = vmatprep.subr.bf16.mxu0 %v3345_v56  ;;  %v3343_v33 = vpop.permute.xlu1 %3342 }
 0xa08   : > { %7029 = vmatprep.mubr.msk.bf16.mxu1 %vm1548_vm0, %v2970_v58  ;;  %7046 = vmatpush3.bf16.msra.mxu0 %v3345_v56 }
 0xa09   : > { %7047 = vmatprep.subr.bf16.mxu0 %v3343_v33 }
 0xa0a   : > { %v3341_v15 = vpop.permute.xlu0 %3340 }
 0xa0c   : > { %7048 = vmatpush3.bf16.msra.mxu0 %v3343_v33 }
 0xa0d   : > { %7049 = vmatprep.subr.bf16.mxu0 %v3341_v15 }
 0xa0e   : > { %v3339_v2 = vpop.permute.xlu0 %3338 }
 0xa0f   : > { %7030 = vmatmul.mubr.msk.bf16.vlgmr.msra.gmra.mxu1 %vm1548_vm0, %v2972_v51 }
 0xa10   : > { %7033 = vmatprep.mubr.msk.bf16.mxu1 %vm1548_vm0, %v2974_v53  ;;  %7050 = vmatpush3.bf16.msra.mxu0 %v3341_v15 }
 0xa11   : > { %7051 = vmatprep.subr.bf16.mxu0 %v3339_v2 }
 0xa14   : > { %7052 = vmatpush3.bf16.msra.mxu0 %v3339_v2 }
 0xa17   : > { %7034 = vmatmul.mubr.msk.bf16.gmra.mxu1 %vm1548_vm0, %v2976_v59 }
 0xa18   : > { %7037 = vmatprep.mubr.msk.bf16.mxu1 %vm1548_vm0, %v2978_v16 }
 0xa1f   : > { %7038 = vmatmul.mubr.msk.bf16.gmra.mxu1 %vm1548_vm0, %v2980_v30 }
 0xa20   : > { %7041 = vmatprep.mubr.msk.bf16.mxu1 %vm1548_vm0, %v2982_v57 }
 0xa27   : > { %7042 = vmatmul.mubr.msk.bf16.gmra.mxu1 %vm1548_vm0, %v2984_v54 }
 0xa28   : > { %4362 = vmatprep.mubr.bf16.mxu1 %v11409_v48 }
 0xa79   : > { %v9444_v25 = vpop.f32.mrf.mxu1 }
 0xa7b   : > { %v9446_v47 = vpop.f32.mrf.mxu1 }
 0xa7d   : > { %v9448_v44 = vpop.f32.mrf.mxu1 }
 0xa7f   : > { %v9452_v31 = vpop.f32.mrf.mxu1 }
 0xab1   : > { %v9456_v11 = vpop.f32.mrf.mxu1 }
 0xab3   : > { %v9458_v18 = vpop.f32.mrf.mxu1 }
 0xab5   : > { %v9460_v40 = vpop.f32.mrf.mxu1 }
 0xab7   : > { %v9464_v0 = vpop.f32.mrf.mxu1 }
 0xabf   : > { %v9468_v63 = vpop.f32.mrf.mxu1 }
 0xac1   : > { %v9470_v58 = vpop.f32.mrf.mxu1 }
 0xac3   : > { %v9472_v51 = vpop.f32.mrf.mxu1 }
 0xac5   : > { %v9476_v14 = vpop.f32.mrf.mxu1 }
 0xac7   : > { %v9480_v39 = vpop.f32.mrf.mxu1 }
 0xac9   : > { %v9482_v53 = vpop.f32.mrf.mxu1 }
 0xacb   : > { %v9484_v59 = vpop.f32.mrf.mxu1 }
 0xacd   : > { %v9488_v10 = vpop.f32.mrf.mxu1 }
 0xacf   : > { %v7031_v60 = vpop.f32.mrf.mxu1 }
 0xad0   : > { %v3148_v9 = vmul.f32 0.17677669, %v7031_v60 }
 0xad1   : > { %v3083_v22 = vpop.f32.mrf.mxu1 }
 0xad2   : > { %v9493_v5 = vadd.f32 %v9223_v42, %v3148_v9  ;;  %v3146_v52 = vmul.f32 0.17677669, %v3083_v22 }
 0xad3   : > { %v7032_v36 = vpop.f32.mrf.mxu1 }
 0xad4   : > { %3182 = vmax.xlane.f32.xlu0 %v9493_v5  ;;  %v9497_v30 = vadd.f32 %v9223_v42, %v3146_v52  ;;  %v3149_v13 = vmul.f32 0.17677669, %v7032_v36 }
 0xad5   : > { %v3086_v16 = vpop.f32.mrf.mxu1 }
 0xad6   : > { %v3147_v28 = vmul.f32 0.17677669, %v3086_v16  ;;  %v9504_v57 = vadd.f32 %v9223_v42, %v3149_v13 }
 0xad7   : > { %v7035_v4 = vpop.f32.mrf.mxu1 }
 0xad8   : > { %v9500_v61 = vadd.f32 %v9223_v42, %v3147_v28  ;;  %3178 = vmax.xlane.f32.xlu0 %v9497_v30  ;;  %v3152_v54 = vmul.f32 0.17677669, %v7035_v4 }
 0xad9   : > { %v3099_v55 = vpop.f32.mrf.mxu1 }
 0xada   : > { %3180 = vmax.xlane.f32.xlu1 %v9500_v61  ;;  %v9509_v33 = vadd.f32 %v9223_v42, %v3152_v54  ;;  %v3150_v15 = vmul.f32 0.17677669, %v3099_v55 }
 0xadb   : > { %v7036_v24 = vpop.f32.mrf.mxu1 }
 0xadc   : > { %v3153_v19 = vmul.f32 0.17677669, %v7036_v24  ;;  %3184 = vmax.xlane.f32.xlu0 %v9504_v57  ;;  %v9517_v52 = vadd.f32 %v9223_v42, %v3150_v15 }
 0xadd   : > { %v3102_v56 = vpop.f32.mrf.mxu1 }
 0xade   : > { %v9512_v2 = vadd.f32 %v9223_v42, %v3153_v19  ;;  %v3151_v60 = vmul.f32 0.17677669, %v3102_v56 }
 0xadf   : > { %v7039_v9 = vpop.f32.mrf.mxu1 }
 0xae0   : > { %3190 = vmax.xlane.f32.xlu0 %v9509_v33  ;;  %3192 = vmax.xlane.f32.xlu1 %v9512_v2  ;;  %v9520_v36 = vadd.f32 %v9223_v42, %v3151_v60  ;;  %v3156_v16 = vmul.f32 0.17677669, %v7039_v9 }
 0xae1   : > { %v3115_v22 = vpop.f32.mrf.mxu1 }
 0xae2   : > { %v9525_v55 = vadd.f32 %v9223_v42, %v3156_v16  ;;  %v3154_v54 = vmul.f32 0.17677669, %v3115_v22 }
 0xae3   : > { %v7040_v13 = vpop.f32.mrf.mxu1 }
 0xae4   : > { %v3157_v28 = vmul.f32 0.17677669, %v7040_v13  ;;  %3186 = vmax.xlane.f32.xlu0 %v9517_v52  ;;  %3188 = vmax.xlane.f32.xlu1 %v9520_v36  ;;  %v9533_v15 = vadd.f32 %v9223_v42, %v3154_v54 }
 0xae5   : > { %v3118_v4 = vpop.f32.mrf.mxu1 }
 0xae6   : > { %v9528_v24 = vadd.f32 %v9223_v42, %v3157_v28  ;;  %v3155_v19 = vmul.f32 0.17677669, %v3118_v4 }
 0xae7   : > { %v7043_v56 = vpop.f32.mrf.mxu1 }
 0xae8   : > { %3198 = vmax.xlane.f32.xlu0 %v9525_v55  ;;  %3200 = vmax.xlane.f32.xlu1 %v9528_v24  ;;  %v9536_v60 = vadd.f32 %v9223_v42, %v3155_v19  ;;  %v3160_v9 = vmul.f32 0.17677669, %v7043_v56 }
 0xae9   : > { %v3131_v13 = vpop.f32.mrf.mxu1 }
 0xaea   : > { %v9541_v22 = vadd.f32 %v9223_v42, %v3160_v9  ;;  %v3158_v16 = vmul.f32 0.17677669, %v3131_v13 }
 0xaeb   : > { %v7044_v4 = vpop.f32.mrf.mxu1 }
 0xaec   : > { %3194 = vmax.xlane.f32.xlu0 %v9533_v15  ;;  %3196 = vmax.xlane.f32.xlu1 %v9536_v60  ;;  %v9545_v28 = vadd.f32 %v9223_v42, %v3158_v16  ;;  %v3161_v54 = vmul.f32 0.17677669, %v7044_v4 }
 0xaed   : > { %v3134_v19 = vpop.f32.mrf.mxu1 }
 0xaee   : > { %v9553_v56 = vadd.f32 %v9223_v42, %v3161_v54  ;;  %v3159_v9 = vmul.f32 0.17677669, %v3134_v19 }
 0xaf0   : > { %3206 = vmax.xlane.f32.xlu0 %v9541_v22  ;;  %v9557_v13 = vadd.f32 %v9223_v42, %v3159_v9 }
 0xaf4   : > { %3202 = vmax.xlane.f32.xlu0 %v9545_v28 }
 0xafd   : > { %3334 = vrot.lane.b32.xlu1 %v8590_v46, %s8043_s18 }
 0xb0a   : > { %3336 = vrot.lane.b32.xlu0 %v8572_v41, %s8043_s18 }
 0xb21   : > { %3208 = vmax.xlane.f32.xlu1 %v9553_v56 }
 0xb25   : > { %3204 = vmax.xlane.f32.xlu1 %v9557_v13 }
 0xb5d   : > { %v3183_v16 = vpop.xlane.xlu0 %3182 }
 0xb5e   : > { %v3212_v46 = vsub.f32 %v9493_v5, %v3183_v16 }
 0xb60   : > { %v3230_v37 = vmul.f32 1.442695, %v3212_v46 }
 0xb61   : > { %v3179_v43 = vpop.xlane.xlu0 %3178 }
 0xb62   : > { %7709 = vpow2.f32 %v3230_v37  ;;  %v3210_v41 = vsub.f32 %v9497_v30, %v3179_v43 }
 0xb63   : > { %v3181_v4 = vpop.xlane.xlu1 %3180 }
 0xb64   : > { %v3226_v21 = vmul.f32 1.442695, %v3210_v41  ;;  %v3211_v54 = vsub.f32 %v9500_v61, %v3181_v4 }
 0xb65   : > { %v3185_v19 = vpop.xlane.xlu0 %3184 }
 0xb66   : > { %7711 = vpow2.f32 %v3226_v21  ;;  %v3213_v20 = vsub.f32 %v9504_v57, %v3185_v19  ;;  %v3228_v9 = vmul.f32 1.442695, %v3211_v54 }
 0xb68   : > { %v3232_v42 = vmul.f32 1.442695, %v3213_v20 }
 0xb69   : > { %v3191_v35 = vpop.xlane.xlu0 %3190  ;;  %v3193_v1 = vpop.xlane.xlu1 %3192 }
 0xb6a   : > { %7713 = vpow2.f32 %v3232_v42  ;;  %v3216_v5 = vsub.f32 %v9509_v33, %v3191_v35  ;;  %v3217_v16 = vsub.f32 %v9512_v2, %v3193_v1 }
 0xb6b   : > { %7715 = vpow2.f32 %v3228_v9 }
 0xb6c   : > { %v3238_v37 = vmul.f32 1.442695, %v3216_v5  ;;  %v3240_v43 = vmul.f32 1.442695, %v3217_v16 }
 0xb6d   : > { %v3187_v30 = vpop.xlane.xlu0 %3186  ;;  %v3189_v46 = vpop.xlane.xlu1 %3188 }
 0xb6e   : > { %7717 = vpow2.f32 %v3238_v37  ;;  %v3214_v61 = vsub.f32 %v9517_v52, %v3187_v30  ;;  %v3215_v21 = vsub.f32 %v9520_v36, %v3189_v46 }
 0xb6f   : > { %v9568_v57 = vpop.eup %7709  ;;  %7719 = vpow2.f32 %v3240_v43 }
 0xb70   : > { %v3234_v20 = vmul.f32 1.442695, %v3214_v61  ;;  %3262 = vadd.xlane.f32.xlu1 %v9568_v57  ;;  %v3236_v35 = vmul.f32 1.442695, %v3215_v21 }
 0xb71   : > { %v3199_v41 = vpop.xlane.xlu0 %3198  ;;  %v3201_v52 = vpop.xlane.xlu1 %3200 }
 0xb72   : > { %7721 = vpow2.f32 %v3234_v20  ;;  %v3221_v46 = vsub.f32 %v9528_v24, %v3201_v52 }
 0xb73   : > { %v9571_v1 = vpop.eup %7711  ;;  %7723 = vpow2.f32 %v3236_v35  ;;  %v3220_v35 = vsub.f32 %v9525_v55, %v3199_v41 }
 0xb74   : > { %3258 = vadd.xlane.f32.xlu1 %v9571_v1  ;;  %v3248_v20 = vmul.f32 1.442695, %v3221_v46  ;;  %v11412_v46 = vpack.i.bf16 %v9448_v44, %v9444_v25 }
 0xb75   : > { %v3195_v33 = vpop.xlane.xlu0 %3194  ;;  %v3197_v19 = vpop.xlane.xlu1 %3196 }
 0xb76   : > { %v3218_v30 = vsub.f32 %v9533_v15, %v3195_v33  ;;  %v3219_v21 = vsub.f32 %v9536_v60, %v3197_v19  ;;  %v11410_v19 = vpack.i.bf16 %v9182_v26, %v9178_v6 }
 0xb77   : > { %v9574_v2 = vpop.eup %7713 }
 0xb78   : > { %3264 = vadd.xlane.f32.xlu1 %v9574_v2  ;;  %v9577_v4 = vpop.eup %7715  ;;  %v3242_v61 = vmul.f32 1.442695, %v3218_v30  ;;  %v11411_v30 = vpack.i.bf16 %v9452_v31, %v9446_v47 }
 0xb79   : > { %v3207_v36 = vpop.xlane.xlu0 %3206  ;;  %v3335_v43 = vpop.permute.xlu1 %3334 }
 0xb7a   : > { %7725 = vpow2.f32 %v3242_v61 }
 0xb7b   : > { %v9579_v54 = vpop.eup %7717  ;;  %7727 = vpow2.f32 %v3248_v20 }
 0xb7c   : > { %3270 = vadd.xlane.f32.xlu0 %v9579_v54  ;;  %3260 = vadd.xlane.f32.xlu1 %v9577_v4  ;;  %v9583_v9 = vpop.eup %7719 }
 0xb7d   : > { %v3203_v42 = vpop.xlane.xlu0 %3202 }
 0xb7f   : > { %v9585_v5 = vpop.eup %7721 }
 0xb80   : > { %3266 = vadd.xlane.f32.xlu1 %v9585_v5  ;;  %3272 = vadd.xlane.f32.xlu0 %v9583_v9  ;;  %v9589_v37 = vpop.eup %7723 }
 0xb81   : > { %v3337_v16 = vpop.permute.xlu0 %3336 }
 0xb82   : > { %7053 = vmatprep.subr.bf16.mxu0 %v3337_v16 }
 0xb83   : > { %7054 = vmatpush3.bf16.msra.mxu0 %v3337_v16  ;;  %v3244_v16 = vmul.f32 1.442695, %v3219_v21 }
 0xb84   : > { %3268 = vadd.xlane.f32.xlu0 %v9589_v37  ;;  %7055 = vmatprep.subr.bf16.mxu0 %v3335_v43 }
 0xb85   : > { %7729 = vpow2.f32 %v3244_v16 }
 0xb87   : > { %7056 = vmatpush3.bf16.msra.mxu0 %v3335_v43  ;;  %v3222_v43 = vsub.f32 %v9545_v28, %v3203_v42  ;;  %v9604_v41 = vpop.eup %7725  ;;  %v7277_v42 = vpack.i.bf16 %v9186_v50, %v9180_v45 }
 0xb88   : > { %v9607_v28 = vpop.eup %7727 }
 0xb89   : > { %v3250_v62 = vmul.f32 1.442695, %v3222_v43 }
 0xb91   : > { %3330 = vrot.lane.b32.xlu1 %v8613_v34, %s8043_s18  ;;  %v3246_v34 = vmul.f32 1.442695, %v3220_v35 }
 0xb93   : > { %7731 = vpow2.f32 %v3246_v34 }
 0xb94   : > { %7733 = vpow2.f32 %v3250_v62 }
 0xb9a   : > { %3332 = vrot.lane.b32.xlu0 %v8603_v12, %s8043_s18  ;;  %v3224_v12 = vsub.f32 %v9541_v22, %v3207_v36  ;;  %v9609_v22 = vpop.eup %7729 }
 0xb9c   : > { %v3254_v52 = vmul.f32 1.442695, %v3224_v12 }
 0xbaa   : > { %v3209_v27 = vpop.xlane.xlu1 %3208 }
 0xbab   : > { %v3225_v24 = vsub.f32 %v9553_v56, %v3209_v27  ;;  %v9613_v27 = vpop.eup %7731 }
 0xbac   : > { %v9616_v62 = vpop.eup %7733 }
 0xbad   : > { %v3256_v55 = vmul.f32 1.442695, %v3225_v24 }
 0xbae   : > { %v3205_v15 = vpop.xlane.xlu1 %3204 }
 0xbaf   : > { %v3223_v60 = vsub.f32 %v9557_v13, %v3205_v15 }
 0xbb1   : > { %v3252_v33 = vmul.f32 1.442695, %v3223_v60 }
 0xbb3   : > { %7735 = vpow2.f32 %v3252_v33 }
 0xbb4   : > { %7737 = vpow2.f32 %v3254_v52 }
 0xbb5   : > { %3274 = vadd.xlane.f32.xlu1 %v9604_v41  ;;  %7739 = vpow2.f32 %v3256_v55 }
 0xbb9   : > { %3280 = vadd.xlane.f32.xlu1 %v9607_v28  ;;  %3276 = vadd.xlane.f32.xlu0 %v9609_v22 }
 0xbbd   : > { %3278 = vadd.xlane.f32.xlu0 %v9613_v27 }
 0xbc0   : > { %v9618_v56 = vpop.eup %7735 }
 0xbc1   : > { %3282 = vadd.xlane.f32.xlu0 %v9616_v62  ;;  %3284 = vadd.xlane.f32.xlu1 %v9618_v56  ;;  %v9622_v13 = vpop.eup %7737 }
 0xbc2   : > { %v9624_v36 = vpop.eup %7739 }
 0xbc5   : > { %3286 = vadd.xlane.f32.xlu0 %v9622_v13  ;;  %3288 = vadd.xlane.f32.xlu1 %v9624_v36 }
 0xbd6   : > { %7283 = vrot.lane.b32.xlu1 %v11410_v19, %s8043_s18 }
 0xbda   : > { %7288 = vrot.lane.b32.xlu1 %v11411_v30, %s8042_s25 }
 0xbdb   : > { %7278 = vrot.lane.b32.xlu0 %v7277_v42, %s8043_s18 }
 0xbde   : > { %7293 = vrot.lane.b32.xlu1 %v11412_v46, %s8042_s25 }
 0xbf9   : > { %v3263_v61 = vpop.xlane.xlu1 %3262 }
 0xbfd   : > { %v3259_v21 = vpop.xlane.xlu1 %3258 }
 0xc01   : > { %v3265_v20 = vpop.xlane.xlu1 %3264 }
 0xc02   : > { %7741 = vrcp.f32 %v3265_v20 }
 0xc03   : > { %7743 = vrcp.f32 %v3259_v21 }
 0xc04   : > { %7745 = vrcp.f32 %v3263_v61 }
 0xc05   : > { %v3271_v6 = vpop.xlane.xlu0 %3270  ;;  %v3261_v26 = vpop.xlane.xlu1 %3260 }
 0xc06   : > { %7747 = vrcp.f32 %v3261_v26 }
 0xc09   : > { %v3273_v45 = vpop.xlane.xlu0 %3272  ;;  %v3267_v50 = vpop.xlane.xlu1 %3266 }
 0xc0a   : > { %7749 = vrcp.f32 %v3273_v45 }
 0xc0b   : > { %7751 = vrcp.f32 %v3267_v50 }
 0xc0c   : > { %7753 = vrcp.f32 %v3271_v6 }
 0xc0d   : > { %v3269_v47 = vpop.xlane.xlu0 %3268  ;;  %v3331_v16 = vpop.permute.xlu1 %3330 }
 0xc0e   : > { %7755 = vrcp.f32 %v3269_v47 }
 0xc0f   : > { %v7742_v31 = vpop.eup %7741 }
 0xc10   : > { %v7744_v25 = vpop.eup %7743  ;;  %v3297_v34 = vmul.f32 %v7742_v31, %v9574_v2 }
 0xc11   : > { %v3333_v35 = vpop.permute.xlu0 %3332  ;;  %v7746_v44 = vpop.eup %7745  ;;  %v3291_v12 = vmul.f32 %v7744_v25, %v9571_v1 }
 0xc12   : > { %7057 = vmatprep.subr.bf16.mxu0 %v3333_v35  ;;  %v3295_v24 = vmul.f32 %v7746_v44, %v9568_v57 }
 0xc13   : > { %7058 = vmatpush3.bf16.msra.mxu0 %v3333_v35  ;;  %v7748_v43 = vpop.eup %7747 }
 0xc14   : > { %7059 = vmatprep.subr.bf16.mxu0 %v3331_v16  ;;  %v3293_v15 = vmul.f32 %v7748_v43, %v9577_v4  ;;  %v3323_v52 = vpack.c.bf16 %v3297_v34, %v3295_v24 }
 0xc16   : > { %v3322_v60 = vpack.c.bf16 %v3293_v15, %v3291_v12 }
 0xc17   : > { %7060 = vmatpush3.bf16.msra.mxu0 %v3331_v16  ;;  %v7750_v33 = vpop.eup %7749 }
 0xc18   : > { %v7752_v55 = vpop.eup %7751  ;;  %7061 = vmatprep.mubr.bf16.mxu0 %v3322_v60  ;;  %v3305_v2 = vmul.f32 %v7750_v33, %v9583_v9 }
 0xc19   : > { %v7754_v19 = vpop.eup %7753  ;;  %v3299_v30 = vmul.f32 %v7752_v55, %v9585_v5  ;;  %v7430_v55 = vld [vmem:[%s8208_s4 + $0x30] sm:$0xff]  }
 0xc1a   : > { %7062 = vmatmul.mubr.bf16.vlgmr.msra.gmra.mxu0 %v3323_v52  ;;  %v3303_v4 = vmul.f32 %v7754_v19, %v9579_v54  ;;  %v7429_v52 = vld [vmem:[%s8208_s4 + $0x38] sm:$0xff]   ;;  %v7435_v19 = vld [vmem:[%s8208_s4 + $0x8] sm:$0xff]  }
 0xc1b   : > { %v7756_v42 = vpop.eup %7755  ;;  %7077 = vmatprep.subr.bf16.mxu0 %v7429_v52 }
 0xc1c   : > { %v3301_v46 = vmul.f32 %v7756_v42, %v9589_v37  ;;  %v3325_v57 = vpack.c.bf16 %v3305_v2, %v3303_v4  ;;  %7078 = vmatpush3.bf16.msra.mxu0 %v7429_v52  ;;  %v7436_v42 = vld [vmem:[%s8208_s4] sm:$0xff]  }
 0xc1d   : > { %7079 = vmatprep.subr.bf16.mxu0 %v7430_v55 }
 0xc1e   : > { %v3324_v1 = vpack.c.bf16 %v3301_v46, %v3299_v30 }
 0xc20   : > { %7065 = vmatprep.mubr.bf16.mxu0 %v3324_v1  ;;  %7080 = vmatpush3.bf16.msra.mxu0 %v7430_v55  ;;  %v11428_v55 = vld [vmem:[#allocation14_spill] sm:$0xff] }
 0xc22   : > { %7066 = vmatmul.mubr.bf16.gmra.mxu0 %v3325_v57 }
 0xc3e   : > { %v3275_v61 = vpop.xlane.xlu1 %3274 }
 0xc3f   : > { %7757 = vrcp.f32 %v3275_v61 }
 0xc42   : > { %v3277_v21 = vpop.xlane.xlu0 %3276  ;;  %v3281_v20 = vpop.xlane.xlu1 %3280 }
 0xc43   : > { %7759 = vrcp.f32 %v3277_v21 }
 0xc44   : > { %7761 = vrcp.f32 %v3281_v20  ;;  %v7307_v20 = vpack.i.bf16 %v9196_v32, %v9190_v17  ;;  %v11418_v32 = vpack.i.bf16 %v9472_v51, %v9468_v63  ;;  %v11420_v63 = vld [vmem:[#allocation29_spill] sm:$0xff] }
 0xc45   : > { %v11421_v51 = vpack.i.bf16 %v9214_v7, %v11420_v63 }
 0xc46   : > { %v3279_v6 = vpop.xlane.xlu0 %3278 }
 0xc47   : > { %7763 = vrcp.f32 %v3279_v6  ;;  %v11413_v6 = vpack.i.bf16 %v9192_v38, %v9188_v23  ;;  %v11416_v23 = vpack.i.bf16 %v9202_v49, %v9198_v8  ;;  %v11417_v38 = vpack.i.bf16 %v9206_v29, %v9200_v3 }
 0xc4a   : > { %v3283_v26 = vpop.xlane.xlu0 %3282  ;;  %v3285_v5 = vpop.xlane.xlu1 %3284 }
 0xc4b   : > { %7765 = vrcp.f32 %v3283_v26 }
 0xc4c   : > { %7767 = vrcp.f32 %v3285_v5  ;;  %v7758_v45 = vpop.eup %7757  ;;  %v11414_v5 = vpack.i.bf16 %v9460_v40, %v9456_v11  ;;  %v11419_v11 = vpack.i.bf16 %v9476_v14, %v9470_v58  ;;  %v11422_v58 = vld [vmem:[#allocation31_spill] sm:$0xff]  ;;  %v11423_v14 = vld [vmem:[#allocation30_spill] sm:$0xff] }
 0xc4d   : > { %v3307_v47 = vmul.f32 %v7758_v45, %v9604_v41  ;;  %v11415_v45 = vpack.i.bf16 %v9464_v0, %v9458_v18 }
 0xc4e   : > { %v3287_v37 = vpop.xlane.xlu0 %3286  ;;  %v3289_v9 = vpop.xlane.xlu1 %3288 }
 0xc4f   : > { %7769 = vrcp.f32 %v3287_v37 }
 0xc50   : > { %v7760_v54 = vpop.eup %7759  ;;  %7771 = vrcp.f32 %v3289_v9 }
 0xc51   : > { %v3309_v50 = vmul.f32 %v7760_v54, %v9609_v22  ;;  %v7762_v31 = vpop.eup %7761 }
 0xc52   : > { %v3313_v16 = vmul.f32 %v7762_v31, %v9607_v28  ;;  %v11425_v31 = vpack.i.bf16 %v9484_v59, %v9480_v39 }
 0xc53   : > { %v3326_v25 = vpack.c.bf16 %v3309_v50, %v3307_v47  ;;  %v11424_v47 = vpack.i.bf16 %v11422_v58, %v11423_v14  ;;  %v11433_v58 = vld [vmem:[#allocation20_spill] sm:$0xff] }
 0xc54   : > { %v7764_v35 = vpop.eup %7763 }
 0xc55   : > { %7069 = vmatprep.mubr.bf16.mxu0 %v3326_v25  ;;  %v3311_v44 = vmul.f32 %v7764_v35, %v9613_v27 }
 0xc57   : > { %v3327_v34 = vpack.c.bf16 %v3313_v16, %v3311_v44  ;;  %v11426_v44 = vpack.i.bf16 %v9488_v10, %v9482_v53  ;;  %v7284_v16 = vpop.permute.xlu1 %7283 }
 0xc58   : > { %v7766_v43 = vpop.eup %7765  ;;  %v7286_v39 = vunpack.i.h.bf16 %v7284_v16  ;;  %v7285_v59 = vunpack.i.l.bf16 %v7284_v16 }
 0xc59   : > { %v7768_v12 = vpop.eup %7767  ;;  %v3315_v15 = vmul.f32 %v7766_v43, %v9616_v62  ;;  %7070 = vmatmul.mubr.bf16.gmra.mxu0 %v3327_v34  ;;  %v7431_v62 = vld [vmem:[%s8208_s4 + $0x28] sm:$0xff]   ;;  %v7279_v34 = vpop.permute.xlu0 %7278 }
 0xc5a   : > { %v3317_v22 = vmul.f32 %v7768_v12, %v9618_v56  ;;  %7081 = vmatprep.subr.bf16.mxu0 %v7431_v62  ;;  %v7432_v56 = vld [vmem:[%s8208_s4 + $0x20] sm:$0xff]  }
 0xc5b   : > { %7082 = vmatpush3.bf16.msra.mxu0 %v7431_v62  ;;  %v7289_v43 = vpop.permute.xlu1 %7288 }
 0xc5c   : > { %v7770_v41 = vpop.eup %7769  ;;  %v3328_v24 = vpack.c.bf16 %v3317_v22, %v3315_v15  ;;  %7083 = vmatprep.subr.bf16.mxu0 %v7432_v56  ;;  %v7281_v15 = vunpack.i.h.bf16 %v7279_v34  ;;  %v7280_v22 = vunpack.i.l.bf16 %v7279_v34 }
 0xc5d   : > { %v7772_v60 = vpop.eup %7771  ;;  %v3319_v33 = vmul.f32 %v7770_v41, %v9622_v13  ;;  %v7433_v13 = vld [vmem:[%s8208_s4 + $0x18] sm:$0xff]  }
 0xc5e   : > { %7073 = vmatprep.mubr.bf16.mxu0 %v3328_v24  ;;  %v3321_v28 = vmul.f32 %v7772_v60, %v9624_v36  ;;  %v7434_v36 = vld [vmem:[%s8208_s4 + $0x10] sm:$0xff]   ;;  %v7291_v60 = vunpack.i.h.bf16 %v7289_v43  ;;  %v3643_v62 = vsel %vm1548_vm0, %v11428_v55, %v7280_v22 }
 0xc5f   : > { %7084 = vmatpush3.bf16.msra.mxu0 %v7432_v56  ;;  %v7294_v12 = vpop.permute.xlu1 %7293  ;;  %v11429_v56 = vld [vmem:[#allocation15_spill] sm:$0xff] }
 0xc60   : > { %v3329_v27 = vpack.c.bf16 %v3321_v28, %v3319_v33  ;;  %7085 = vmatprep.subr.bf16.mxu0 %v7433_v13  ;;  %v7296_v41 = vunpack.i.h.bf16 %v7294_v12  ;;  %v7295_v24 = vunpack.i.l.bf16 %v7294_v12  ;;  %v7290_v33 = vunpack.i.l.bf16 %v7289_v43 }
 0xc62   : > { %7074 = vmatmul.mubr.bf16.gmra.mxu0 %v3329_v27  ;;  %v11427_v27 = vld [vmem:[#allocation16_spill] sm:$0xff] }
 0xc63   : > { %7086 = vmatpush3.bf16.msra.mxu0 %v7433_v13  ;;  %v3644_v52 = vsel %vm1548_vm0, %v11427_v27, %v7281_v15  ;;  %v3646_v13 = vsel %vm1548_vm0, %v11429_v56, %v7286_v39 }
 0xc64   : > { %7087 = vmatprep.subr.bf16.mxu0 %v7434_v36 }
 0xc67   : > { %7088 = vmatpush3.bf16.msra.mxu0 %v7434_v36  ;;  %v11430_v36 = vld [vmem:[#allocation13_spill] sm:$0xff] }
 0xc68   : > { %7089 = vmatprep.subr.bf16.mxu0 %v7435_v19 }
 0xc6b   : > { %7090 = vmatpush3.bf16.msra.mxu0 %v7435_v19  ;;  %v3645_v19 = vsel %vm1548_vm0, %v11430_v36, %v7285_v59 }
 0xc6c   : > { %7091 = vmatprep.subr.bf16.mxu0 %v7436_v42 }
 0xc6f   : > { %7092 = vmatpush3.bf16.msra.mxu0 %v7436_v42 }
 0xcda   : > { %v7063_v30 = vpop.f32.mrf.mxu0 }
 0xcdc   : > { %v3388_v46 = vpop.f32.mrf.mxu0 }
 0xcde   : > { %v7064_v2 = vpop.f32.mrf.mxu0 }
 0xcdf   : > { %v7302_v1 = vpack.i.bf16 %v7064_v2, %v7063_v30  ;;  %v3662_v30 = vsel %vm3659_vm1, %v3645_v19, %v7295_v24 }
 0xce0   : > { %v3391_v4 = vpop.f32.mrf.mxu0 }
 0xce1   : > { %v7297_v57 = vpack.i.bf16 %v3391_v4, %v3388_v46  ;;  %7303 = vrot.lane.b32.xlu1 %v7302_v1, %s8041_s16  ;;  %v3663_v46 = vsel %vm3659_vm1, %v3646_v13, %v7296_v41  ;;  %v3661_v4 = vsel %vm3659_vm1, %v3644_v52, %v7291_v60 }
 0xce2   : > { %v7067_v61 = vpop.f32.mrf.mxu0 }
 0xce3   : > { %7298 = vrot.lane.b32.xlu0 %v7297_v57, %s8041_s16  ;;  %v3660_v57 = vsel %vm3659_vm1, %v3643_v62, %v7290_v33 }
 0xce4   : > { %v3404_v21 = vpop.f32.mrf.mxu0 }
 0xce5   : > { %7313 = vrot.lane.b32.xlu1 %v11413_v6, %s8043_s18 }
 0xce6   : > { %v7068_v26 = vpop.f32.mrf.mxu0 }
 0xce7   : > { %7308 = vrot.lane.b32.xlu0 %v7307_v20, %s8043_s18  ;;  %v7332_v9 = vpack.i.bf16 %v7068_v26, %v7067_v61 }
 0xce8   : > { %v3407_v37 = vpop.f32.mrf.mxu0 }
 0xce9   : > { %7323 = vrot.lane.b32.xlu1 %v11414_v5, %s8042_s25  ;;  %v7327_v17 = vpack.i.bf16 %v3407_v37, %v3404_v21 }
 0xceb   : > { %7318 = vrot.lane.b32.xlu0 %v11415_v45, %s8042_s25 }
 0xced   : > { %7333 = vrot.lane.b32.xlu1 %v7332_v9, %s8041_s16 }
 0xcef   : > { %7328 = vrot.lane.b32.xlu0 %v7327_v17, %s8041_s16 }
 0xcf1   : > { %7343 = vrot.lane.b32.xlu1 %v11416_v23, %s8043_s18 }
 0xcf3   : > { %7338 = vrot.lane.b32.xlu0 %v11417_v38, %s8043_s18 }
 0xcf5   : > { %7353 = vrot.lane.b32.xlu1 %v11418_v32, %s8042_s25 }
 0xcf7   : > { %7348 = vrot.lane.b32.xlu0 %v11419_v11, %s8042_s25 }
 0xd19   : > { %v7071_v18 = vpop.f32.mrf.mxu0 }
 0xd1b   : > { %v3420_v40 = vpop.f32.mrf.mxu0 }
 0xd1d   : > { %v7072_v0 = vpop.f32.mrf.mxu0 }
 0xd1e   : > { %v7362_v8 = vpack.i.bf16 %v7072_v0, %v7071_v18 }
 0xd1f   : > { %v3423_v49 = vpop.f32.mrf.mxu0 }
 0xd20   : > { %v7357_v54 = vpack.i.bf16 %v3423_v49, %v3420_v40  ;;  %7363 = vrot.lane.b32.xlu1 %v7362_v8, %s8041_s16 }
 0xd22   : > { %v7075_v3 = vpop.f32.mrf.mxu0  ;;  %7358 = vrot.lane.b32.xlu0 %v7357_v54, %s8041_s16 }
 0xd24   : > { %v3436_v29 = vpop.f32.mrf.mxu0  ;;  %7373 = vrot.lane.b32.xlu1 %v11421_v51, %s8043_s18  ;;  %v11432_v51 = vld [vmem:[#allocation17_spill] sm:$0xff] }
 0xd26   : > { %v7076_v50 = vpop.f32.mrf.mxu0  ;;  %7368 = vrot.lane.b32.xlu0 %v11424_v47, %s8043_s18  ;;  %v11434_v47 = vld [vmem:[#allocation18_spill] sm:$0xff] }
 0xd27   : > { %v7392_v25 = vpack.i.bf16 %v7076_v50, %v7075_v3 }
 0xd28   : > { %7383 = vrot.lane.b32.xlu1 %v11425_v31, %s8042_s25  ;;  %v3439_v35 = vpop.f32.mrf.mxu0 }
 0xd29   : > { %v7387_v7 = vpack.i.bf16 %v3439_v35, %v3436_v29  ;;  %v11431_v29 = vld [vmem:[#allocation19_spill] sm:$0xff] }
 0xd2a   : > { %7378 = vrot.lane.b32.xlu0 %v11426_v44, %s8042_s25 }
 0xd2c   : > { %7393 = vrot.lane.b32.xlu1 %v7392_v25, %s8041_s16 }
 0xd2e   : > { %7388 = vrot.lane.b32.xlu0 %v7387_v7, %s8041_s16 }
 0xd53   : > { %v7304_v28 = vpop.permute.xlu1 %7303 }
 0xd54   : > { %v7306_v53 = vunpack.i.h.bf16 %v7304_v28  ;;  %v7305_v10 = vunpack.i.l.bf16 %v7304_v28 }
 0xd55   : > { %v7299_v42 = vpop.permute.xlu0 %7298 }
 0xd56   : > { %v7301_v2 = vunpack.i.h.bf16 %v7299_v42  ;;  %v7300_v1 = vunpack.i.l.bf16 %v7299_v42  ;;  %v3679_v61 = vsel %vm3676_vm2, %v3662_v30, %v7305_v10  ;;  %v3680_v21 = vsel %vm3676_vm2, %v3663_v46, %v7306_v53  ;;  %v11435_v30 = vld [vmem:[#allocation23_spill] sm:$0xff] }
 0xd57   : > { %v7314_v20 = vpop.permute.xlu1 %7313  ;;  %v3694_v9 = vpack.c.bf16 %v3680_v21, %v3679_v61  ;;  %v11438_v61 = vld [vmem:[#allocation22_spill] sm:$0xff] }
 0xd58   : > { %v3677_v6 = vsel %vm3676_vm2, %v3660_v57, %v7300_v1  ;;  %v3678_v26 = vsel %vm3676_vm2, %v3661_v4, %v7301_v2  ;;  %v7316_v17 = vunpack.i.h.bf16 %v7314_v20  ;;  %v7315_v23 = vunpack.i.l.bf16 %v7314_v20  ;;  %v11436_v2 = vld [vmem:[#allocation21_spill] sm:$0xff]  ;;  %v11437_v4 = vld [vmem:[#allocation24_spill] sm:$0xff] }
 0xd59   : > { %v7309_v5 = vpop.permute.xlu0 %7308  ;;  %v3693_v37 = vpack.c.bf16 %v3678_v26, %v3677_v6 }
 0xd5a   : > { %v7311_v38 = vunpack.i.h.bf16 %v7309_v5  ;;  %v7310_v32 = vunpack.i.l.bf16 %v7309_v5  ;;  %v3650_v63 = vsel %vm1548_vm0, %v11431_v29, %v7316_v17  ;;  %v3649_v50 = vsel %vm1548_vm0, %v11432_v51, %v7315_v23 }
 0xd5b   : > { %v7324_v45 = vpop.permute.xlu1 %7323  ;;  %7093 = vmatprep.mubr.bf16.mxu0 %v3693_v37 }
 0xd5c   : > { %7094 = vmatmul.mubr.bf16.vlgmr.msra.gmra.mxu0 %v3694_v9  ;;  %v7326_v18 = vunpack.i.h.bf16 %v7324_v45  ;;  %v7325_v40 = vunpack.i.l.bf16 %v7324_v45  ;;  %v3648_v14 = vsel %vm1548_vm0, %v11433_v58, %v7311_v38  ;;  %v3647_v31 = vsel %vm1548_vm0, %v11434_v47, %v7310_v32 }
 0xd5d   : > { %v7319_v11 = vpop.permute.xlu0 %7318 }
 0xd5e   : > { %v7321_v0 = vunpack.i.h.bf16 %v7319_v11  ;;  %v7320_v8 = vunpack.i.l.bf16 %v7319_v11  ;;  %v3666_v25 = vsel %vm3659_vm1, %v3649_v50, %v7325_v40  ;;  %v3667_v44 = vsel %vm3659_vm1, %v3650_v63, %v7326_v18 }
 0xd5f   : > { %v7334_v49 = vpop.permute.xlu1 %7333 }
 0xd60   : > { %v7336_v54 = vunpack.i.h.bf16 %v7334_v49  ;;  %v7335_v3 = vunpack.i.l.bf16 %v7334_v49  ;;  %v3664_v43 = vsel %vm3659_vm1, %v3647_v31, %v7320_v8  ;;  %v3665_v34 = vsel %vm3659_vm1, %v3648_v14, %v7321_v0 }
 0xd61   : > { %v7329_v35 = vpop.permute.xlu0 %7328 }
 0xd62   : > { %v7331_v7 = vunpack.i.h.bf16 %v7329_v35  ;;  %v7330_v16 = vunpack.i.l.bf16 %v7329_v35  ;;  %v3683_v12 = vsel %vm3676_vm2, %v3666_v25, %v7335_v3  ;;  %v3684_v15 = vsel %vm3676_vm2, %v3667_v44, %v7336_v54  ;;  %v11439_v25 = vld [vmem:[#allocation27_spill] sm:$0xff] }
 0xd63   : > { %v3696_v41 = vpack.c.bf16 %v3684_v15, %v3683_v12  ;;  %v7344_v24 = vpop.permute.xlu1 %7343  ;;  %v11442_v12 = vld [vmem:[#allocation26_spill] sm:$0xff] }
 0xd64   : > { %v3681_v22 = vsel %vm3676_vm2, %v3664_v43, %v7330_v16  ;;  %v3682_v39 = vsel %vm3676_vm2, %v3665_v34, %v7331_v7  ;;  %v7346_v53 = vunpack.i.h.bf16 %v7344_v24  ;;  %v7345_v10 = vunpack.i.l.bf16 %v7344_v24  ;;  %v11440_v7 = vld [vmem:[#allocation25_spill] sm:$0xff]  ;;  %v11441_v43 = vld [vmem:[#allocation28_spill] sm:$0xff] }
 0xd65   : > { %v3695_v59 = vpack.c.bf16 %v3682_v39, %v3681_v22  ;;  %v7339_v60 = vpop.permute.xlu0 %7338 }
 0xd66   : > { %v7341_v27 = vunpack.i.h.bf16 %v7339_v60  ;;  %v7340_v52 = vunpack.i.l.bf16 %v7339_v60  ;;  %v3654_v46 = vsel %vm1548_vm0, %v11435_v30, %v7346_v53  ;;  %v3653_v1 = vsel %vm1548_vm0, %v11436_v2, %v7345_v10  ;;  %v7966_v30 = vld [vmem:[#allocation2 + $0x30] sm:$0xff] }
 0xd67   : > { %7097 = vmatprep.mubr.bf16.mxu0 %v3695_v59  ;;  %v7354_v33 = vpop.permute.xlu1 %7353 }
 0xd68   : > { %7098 = vmatmul.mubr.bf16.gmra.mxu0 %v3696_v41  ;;  %v7356_v55 = vunpack.i.h.bf16 %v7354_v33  ;;  %v7355_v62 = vunpack.i.l.bf16 %v7354_v33  ;;  %v3652_v57 = vsel %vm1548_vm0, %v11437_v4, %v7341_v27  ;;  %v3651_v21 = vsel %vm1548_vm0, %v11438_v61, %v7340_v52  ;;  %v7967_v4 = vld [vmem:[#allocation2 + $0x58] sm:$0xff] }
 0xd69   : > { %v7349_v28 = vpop.permute.xlu0 %7348 }
 0xd6a   : > { %v7351_v56 = vunpack.i.h.bf16 %v7349_v28  ;;  %v7350_v13 = vunpack.i.l.bf16 %v7349_v28  ;;  %v3670_v6 = vsel %vm3659_vm1, %v3653_v1, %v7355_v62  ;;  %v3671_v26 = vsel %vm3659_vm1, %v3654_v46, %v7356_v55 }
 0xd6c   : > { %v3668_v9 = vsel %vm3659_vm1, %v3651_v21, %v7350_v13  ;;  %v3669_v45 = vsel %vm3659_vm1, %v3652_v57, %v7351_v56  ;;  %v9792_v56 = vld [vmem:[%s11443_s23] ss:$0 sm:$0xff] }
 0xd6d   : > { %v7968_v21 = vld [vmem:[#allocation2] sm:$0xff] }
 0xd92   : > { %v7364_v36 = vpop.permute.xlu1 %7363 }
 0xd93   : > { %v7366_v19 = vunpack.i.h.bf16 %v7364_v36  ;;  %v7365_v42 = vunpack.i.l.bf16 %v7364_v36 }
 0xd94   : > { %v7359_v20 = vpop.permute.xlu0 %7358 }
 0xd95   : > { %v7361_v5 = vunpack.i.h.bf16 %v7359_v20  ;;  %v7360_v37 = vunpack.i.l.bf16 %v7359_v20  ;;  %v3687_v23 = vsel %vm3676_vm2, %v3670_v6, %v7365_v42  ;;  %v3688_v38 = vsel %vm3676_vm2, %v3671_v26, %v7366_v19  ;;  %v7969_v26 = vld [vmem:[#allocation2 + $0x18] sm:$0xff] }
 0xd96   : > { %v7374_v17 = vpop.permute.xlu1 %7373  ;;  %v3698_v0 = vpack.c.bf16 %v3688_v38, %v3687_v23  ;;  %v7970_v23 = vld [vmem:[#allocation2 + $0x50] sm:$0xff] }
 0xd97   : > { %v3685_v32 = vsel %vm3676_vm2, %v3668_v9, %v7360_v37  ;;  %v3686_v11 = vsel %vm3676_vm2, %v3669_v45, %v7361_v5  ;;  %v7376_v49 = vunpack.i.h.bf16 %v7374_v17  ;;  %v7375_v54 = vunpack.i.l.bf16 %v7374_v17 }
 0xd98   : > { %v7369_v18 = vpop.permute.xlu0 %7368  ;;  %v3697_v40 = vpack.c.bf16 %v3686_v11, %v3685_v32 }
 0xd99   : > { %v7371_v3 = vunpack.i.h.bf16 %v7369_v18  ;;  %v7370_v29 = vunpack.i.l.bf16 %v7369_v18  ;;  %v3658_v44 = vsel %vm1548_vm0, %v11439_v25, %v7376_v49  ;;  %v3657_v16 = vsel %vm1548_vm0, %v11440_v7, %v7375_v54  ;;  %v7971_v18 = vld [vmem:[#allocation2 + $0x8] sm:$0xff]  ;;  %v7975_v25 = vld [vmem:[#allocation2 + $0x10] sm:$0xff] }
 0xd9a   : > { %v7384_v8 = vpop.permute.xlu1 %7383  ;;  %7101 = vmatprep.mubr.bf16.mxu0 %v3697_v40  ;;  %v7973_v54 = vld [vmem:[#allocation2 + $0x48] sm:$0xff] }
 0xd9b   : > { %7102 = vmatmul.mubr.bf16.gmra.mxu0 %v3698_v0  ;;  %v7386_v51 = vunpack.i.h.bf16 %v7384_v8  ;;  %v7385_v50 = vunpack.i.l.bf16 %v7384_v8  ;;  %v3656_v34 = vsel %vm1548_vm0, %v11441_v43, %v7371_v3  ;;  %v3655_v15 = vsel %vm1548_vm0, %v11442_v12, %v7370_v29  ;;  %v7972_v8 = vld [vmem:[#allocation2 + $0x68] sm:$0xff]  ;;  %v7977_v12 = vld [vmem:[#allocation2 + $0x38] sm:$0xff] }
 0xd9c   : > { %v7379_v63 = vpop.permute.xlu0 %7378 }
 0xd9d   : > { %v7381_v58 = vunpack.i.h.bf16 %v7379_v63  ;;  %v7380_v14 = vunpack.i.l.bf16 %v7379_v63  ;;  %v3674_v39 = vsel %vm3659_vm1, %v3657_v16, %v7385_v50  ;;  %v3675_v59 = vsel %vm3659_vm1, %v3658_v44, %v7386_v51  ;;  %v7976_v16 = vld [vmem:[#allocation2 + $0x20] sm:$0xff] }
 0xd9e   : > { %v7394_v47 = vpop.permute.xlu1 %7393 }
 0xd9f   : > { %v7396_v31 = vunpack.i.h.bf16 %v7394_v47  ;;  %v7395_v35 = vunpack.i.l.bf16 %v7394_v47  ;;  %v3672_v60 = vsel %vm3659_vm1, %v3655_v15, %v7380_v14  ;;  %v3673_v33 = vsel %vm3659_vm1, %v3656_v34, %v7381_v58  ;;  %v7974_v14 = vld [vmem:[#allocation2 + $0x40] sm:$0xff] }
 0xda0   : > { %v7389_v22 = vpop.permute.xlu0 %7388 }
 0xda1   : > { %v7391_v41 = vunpack.i.h.bf16 %v7389_v22  ;;  %v7390_v24 = vunpack.i.l.bf16 %v7389_v22  ;;  %v3691_v28 = vsel %vm3676_vm2, %v3674_v39, %v7395_v35  ;;  %v3692_v53 = vsel %vm3676_vm2, %v3675_v59, %v7396_v31 }
 0xda2   : > { %v3700_v55 = vpack.c.bf16 %v3692_v53, %v3691_v28  ;;  %v7979_v53 = vld [vmem:[#allocation2 + $0x78] sm:$0xff] }
 0xda3   : > { %v3689_v10 = vsel %vm3676_vm2, %v3672_v60, %v7390_v24  ;;  %v3690_v27 = vsel %vm3676_vm2, %v3673_v33, %v7391_v41  ;;  %v7978_v24 = vld [vmem:[#allocation2 + $0x60] sm:$0xff] }
 0xda4   : > { %v3699_v52 = vpack.c.bf16 %v3690_v27, %v3689_v10 }
 0xda6   : > { %7105 = vmatprep.mubr.bf16.mxu0 %v3699_v52  ;;  %v7980_v52 = vld [vmem:[#allocation2 + $0x70] sm:$0xff] }
 0xda7   : > { %7106 = vmatmul.mubr.bf16.gmra.mxu0 %v3700_v55 }
 0xda8   : > { %4475 = vmatprep.mubr.bf16.mxu0 %v11409_v48 }
 0xe1c   : > { %v7095_v62 = vpop.f32.mrf.mxu0 }
 0xe1d   : > { %v3815_v42 = vadd.f32 %v7095_v62, %v9792_v56  ;;  %v7981_v62 = vld [vmem:[#allocation2 + $0x28] sm:$0xff] }
 0xe1e   : > { %v3806_v13 = vpop.f32.mrf.mxu0 }
 0xe1f   : > { %v3807_v36 = vadd.f32 %v9792_v56, %v3806_v13  ;;  %v9800_v57 = vadd.f32 %v7967_v4, %v3815_v42  ;;  %v7440_v42 = vld [vmem:[%s8232_s29 + $0xe8] ss:$16 sps:$4 sm:$0xff]  }
 0xe20   : > { %v7096_v19 = vpop.f32.mrf.mxu0 }
 0xe21   : > { %v9796_v46 = vadd.f32 %v7966_v30, %v3807_v36  ;;  %v3818_v61 = vadd.f32 %v7096_v19, %v9792_v56  ;;  %v7437_v36 = vld [vmem:[%s8232_s29 + $0xe0] ss:$16 sps:$4 sm:$0xff]   ;;  %v7439_v19 = vld [vmem:[%s8232_s29 + $0xe4] ss:$16 sps:$4 sm:$0xff]   ;;  %v7442_v30 = vld [vmem:[%s8232_s29 + $0xec] ss:$16 sps:$4 sm:$0xff]  }
 0xe22   : > { %v3809_v2 = vpop.f32.mrf.mxu0  ;;  %4330 = vmatprep.subr.bf16.mxu1 %v7439_v19  ;;  %4443 = vmatprep.subr.bf16.mxu0 %v7442_v30  ;;  %v7475_v19 = vld [vmem:[%s8232_s29 + $0x24] ss:$16 sps:$4 sm:$0xff]   ;;  %v7473_v30 = vld [vmem:[%s8232_s29 + $0x20] ss:$16 sps:$4 sm:$0xff]  }
 0xe23   : > { %v3810_v1 = vadd.f32 %v9792_v56, %v3809_v2  ;;  %3887 = vadd.xlane.f32.xlu0 %v9796_v46  ;;  %v9807_v5 = vadd.f32 %v7969_v26, %v3818_v61  ;;  %4331 = vmatpush1.bf16.msra.mxu1 %v7437_v36  ;;  %v7470_v36 = vld [vmem:[%s8232_s29 + $0x48] ss:$16 sps:$4 sm:$0xff]  }
 0xe24   : > { %4444 = vmatpush1.bf16.msra.mxu0 %v7440_v42  ;;  %v7478_v42 = vld [vmem:[%s8232_s29 + $0x2c] ss:$16 sps:$4 sm:$0xff]  }
 0xe25   : > { %v9803_v20 = vadd.f32 %v7968_v21, %v3810_v1 }
 0xe27   : > { %3889 = vadd.xlane.f32.xlu1 %v9803_v20  ;;  %3891 = vadd.xlane.f32.xlu0 %v9800_v57 }
 0xe28   : > { %v7099_v6 = vpop.f32.mrf.mxu0 }
 0xe29   : > { %v3831_v17 = vadd.f32 %v7099_v6, %v9792_v56 }
 0xe2a   : > { %v3822_v37 = vpop.f32.mrf.mxu0 }
 0xe2b   : > { %v3823_v9 = vadd.f32 %v9792_v56, %v3822_v37  ;;  %3893 = vadd.xlane.f32.xlu0 %v9807_v5  ;;  %v9816_v40 = vadd.f32 %v7971_v18, %v3831_v17 }
 0xe2c   : > { %v7100_v45 = vpop.f32.mrf.mxu0 }
 0xe2d   : > { %v9812_v38 = vadd.f32 %v7970_v23, %v3823_v9  ;;  %v3834_v0 = vadd.f32 %v7100_v45, %v9792_v56 }
 0xe2e   : > { %v3825_v32 = vpop.f32.mrf.mxu0 }
 0xe2f   : > { %v3826_v11 = vadd.f32 %v9792_v56, %v3825_v32  ;;  %3895 = vadd.xlane.f32.xlu0 %v9812_v38  ;;  %v9823_v3 = vadd.f32 %v7973_v54, %v3834_v0 }
 0xe31   : > { %v9819_v49 = vadd.f32 %v7972_v8, %v3826_v11 }
 0xe33   : > { %3897 = vadd.xlane.f32.xlu1 %v9819_v49  ;;  %3899 = vadd.xlane.f32.xlu0 %v9816_v40 }
 0xe37   : > { %3901 = vadd.xlane.f32.xlu1 %v9823_v3 }
 0xe5b   : > { %v7103_v29 = vpop.f32.mrf.mxu0 }
 0xe5c   : > { %v3847_v58 = vadd.f32 %v7103_v29, %v9792_v56 }
 0xe5d   : > { %v3838_v63 = vpop.f32.mrf.mxu0 }
 0xe5e   : > { %v3839_v51 = vadd.f32 %v9792_v56, %v3838_v63  ;;  %v9832_v44 = vadd.f32 %v7975_v25, %v3847_v58  ;;  %v7445_v63 = vld [vmem:[%s8232_s29 + $0xc4] ss:$16 sps:$4 sm:$0xff]  }
 0xe5f   : > { %v7104_v50 = vpop.f32.mrf.mxu0  ;;  %4332 = vmatprep.subr.bf16.mxu1 %v7445_v63 }
 0xe60   : > { %v9828_v47 = vadd.f32 %v7974_v14, %v3839_v51  ;;  %v3850_v7 = vadd.f32 %v7104_v50, %v9792_v56  ;;  %v7448_v51 = vld [vmem:[%s8232_s29 + $0xcc] ss:$16 sps:$4 sm:$0xff]   ;;  %v7446_v14 = vld [vmem:[%s8232_s29 + $0xc8] ss:$16 sps:$4 sm:$0xff]  }
 0xe61   : > { %v3841_v31 = vpop.f32.mrf.mxu0  ;;  %4445 = vmatprep.subr.bf16.mxu0 %v7448_v51 }
 0xe62   : > { %v3842_v35 = vadd.f32 %v9792_v56, %v3841_v31  ;;  %3903 = vadd.xlane.f32.xlu0 %v9828_v47  ;;  %v9839_v15 = vadd.f32 %v7977_v12, %v3850_v7  ;;  %4446 = vmatpush1.bf16.msra.mxu0 %v7446_v14  ;;  %v7454_v7 = vld [vmem:[%s8232_s29 + $0xac] ss:$16 sps:$4 sm:$0xff]   ;;  %v7452_v12 = vld [vmem:[%s8232_s29 + $0xa8] ss:$16 sps:$4 sm:$0xff]  }
 0xe63   : > { %4447 = vmatprep.subr.bf16.mxu0 %v7454_v7 }
 0xe64   : > { %v9835_v43 = vadd.f32 %v7976_v16, %v3842_v35 }
 0xe66   : > { %3905 = vadd.xlane.f32.xlu1 %v9835_v43  ;;  %3907 = vadd.xlane.f32.xlu0 %v9832_v44 }
 0xe67   : > { %v7107_v34 = vpop.f32.mrf.mxu0  ;;  %4448 = vmatpush1.bf16.msra.mxu0 %v7452_v12 }
 0xe68   : > { %v3863_v41 = vadd.f32 %v7107_v34, %v9792_v56  ;;  %v7449_v34 = vld [vmem:[%s8232_s29 + $0xa0] ss:$16 sps:$4 sm:$0xff]  }
 0xe69   : > { %v3854_v22 = vpop.f32.mrf.mxu0 }
 0xe6a   : > { %v3855_v39 = vadd.f32 %v9792_v56, %v3854_v22  ;;  %3909 = vadd.xlane.f32.xlu1 %v9839_v15  ;;  %v9848_v10 = vadd.f32 %v7979_v53, %v3863_v41  ;;  %v7458_v41 = vld [vmem:[%s8232_s29 + $0x88] ss:$16 sps:$4 sm:$0xff]  }
 0xe6b   : > { %v7108_v59 = vpop.f32.mrf.mxu0  ;;  %v7464_v53 = vld [vmem:[%s8232_s29 + $0x68] ss:$16 sps:$4 sm:$0xff]  }
 0xe6c   : > { %v9844_v60 = vadd.f32 %v7978_v24, %v3855_v39  ;;  %v3866_v27 = vadd.f32 %v7108_v59, %v9792_v56  ;;  %v7457_v39 = vld [vmem:[%s8232_s29 + $0x84] ss:$16 sps:$4 sm:$0xff]   ;;  %v7460_v59 = vld [vmem:[%s8232_s29 + $0x8c] ss:$16 sps:$4 sm:$0xff]  }
 0xe6d   : > { %v3857_v33 = vpop.f32.mrf.mxu0  ;;  %4449 = vmatprep.subr.bf16.mxu0 %v7460_v59  ;;  %v7463_v24 = vld [vmem:[%s8232_s29 + $0x64] ss:$16 sps:$4 sm:$0xff]  }
 0xe6e   : > { %v3858_v28 = vadd.f32 %v9792_v56, %v3857_v33  ;;  %3911 = vadd.xlane.f32.xlu0 %v9844_v60  ;;  %v9855_v13 = vadd.f32 %v7981_v62, %v3866_v27  ;;  %4450 = vmatpush1.bf16.msra.mxu0 %v7458_v41  ;;  %v7466_v33 = vld [vmem:[%s8232_s29 + $0x6c] ss:$16 sps:$4 sm:$0xff]   ;;  %v7469_v27 = vld [vmem:[%s8232_s29 + $0x44] ss:$16 sps:$4 sm:$0xff]   ;;  %v7467_v62 = vld [vmem:[%s8232_s29 + $0x40] ss:$16 sps:$4 sm:$0xff]  }
 0xe6f   : > { %4451 = vmatprep.subr.bf16.mxu0 %v7466_v33 }
 0xe70   : > { %v9851_v55 = vadd.f32 %v7980_v52, %v3858_v28  ;;  %v7461_v28 = vld [vmem:[%s8232_s29 + $0x60] ss:$16 sps:$4 sm:$0xff]   ;;  %v7472_v52 = vld [vmem:[%s8232_s29 + $0x4c] ss:$16 sps:$4 sm:$0xff]  }
 0xe72   : > { %3913 = vadd.xlane.f32.xlu1 %v9851_v55  ;;  %3915 = vadd.xlane.f32.xlu0 %v9848_v10 }
 0xe73   : > { %4452 = vmatpush1.bf16.msra.mxu0 %v7464_v53 }
 0xe74   : > { %4453 = vmatprep.subr.bf16.mxu0 %v7472_v52 }
 0xe76   : > { %3917 = vadd.xlane.f32.xlu1 %v9855_v13 }
 0xe77   : > { %4454 = vmatpush1.bf16.msra.mxu0 %v7470_v36 }
 0xe78   : > { %4455 = vmatprep.subr.bf16.mxu0 %v7478_v42 }
 0xeac   : > { %v3888_v56 = vpop.xlane.xlu0 %3887 }
 0xead   : > { %v3920_v2 = vmul.f32 0.0078125, %v3888_v56  ;;  %v7476_v56 = vld [vmem:[%s8232_s29 + $0x28] ss:$16 sps:$4 sm:$0xff]  }
 0xeae   : > { %4456 = vmatpush1.bf16.msra.mxu0 %v7476_v56 }
 0xeaf   : > { %v9863_v1 = vsub.f32 %v9796_v46, %v3920_v2  ;;  %v7479_v2 = vld [vmem:[%s8232_s29] ss:$16 sps:$4 sm:$0xff]  }
 0xeb0   : > { %v3890_v4 = vpop.xlane.xlu1 %3889  ;;  %v3892_v61 = vpop.xlane.xlu0 %3891 }
 0xeb1   : > { %v3921_v21 = vmul.f32 0.0078125, %v3890_v4  ;;  %v3922_v6 = vmul.f32 0.0078125, %v3892_v61  ;;  %v3952_v26 = vmul.f32 %v9863_v1, %v9863_v1  ;;  %v7481_v4 = vld [vmem:[%s8232_s29 + $0x4] ss:$16 sps:$4 sm:$0xff]   ;;  %v7482_v61 = vld [vmem:[%s8232_s29 + $0x8] ss:$16 sps:$4 sm:$0xff]  }
 0xeb3   : > { %v9868_v37 = vsub.f32 %v9803_v20, %v3921_v21  ;;  %v9871_v9 = vsub.f32 %v9800_v57, %v3922_v6  ;;  %3968 = vadd.xlane.f32.xlu0 %v3952_v26  ;;  %v7484_v21 = vld [vmem:[%s8232_s29 + $0xc] ss:$16 sps:$4 sm:$0xff]  }
 0xeb4   : > { %v3894_v45 = vpop.xlane.xlu0 %3893  ;;  %4457 = vmatprep.subr.bf16.mxu0 %v7484_v21 }
 0xeb5   : > { %v3923_v17 = vmul.f32 0.0078125, %v3894_v45  ;;  %v3953_v46 = vmul.f32 %v9868_v37, %v9868_v37  ;;  %v3954_v23 = vmul.f32 %v9871_v9, %v9871_v9  ;;  %4458 = vmatpush1.bf16.msra.mxu0 %v7482_v61 }
 0xeb7   : > { %v9878_v32 = vsub.f32 %v9807_v5, %v3923_v17  ;;  %3970 = vadd.xlane.f32.xlu1 %v3953_v46  ;;  %3972 = vadd.xlane.f32.xlu0 %v3954_v23 }
 0xeb8   : > { %v3896_v20 = vpop.xlane.xlu0 %3895 }
 0xeb9   : > { %v3924_v57 = vmul.f32 0.0078125, %v3896_v20  ;;  %v3955_v11 = vmul.f32 %v9878_v32, %v9878_v32 }
 0xebb   : > { %v9883_v18 = vsub.f32 %v9812_v38, %v3924_v57  ;;  %3974 = vadd.xlane.f32.xlu1 %v3955_v11  ;;  %v7443_v38 = vld [vmem:[%s8232_s29 + $0xc0] ss:$16 sps:$4 sm:$0xff]  }
 0xebc   : > { %v3898_v0 = vpop.xlane.xlu1 %3897  ;;  %v3900_v8 = vpop.xlane.xlu0 %3899  ;;  %4333 = vmatpush1.bf16.msra.mxu1 %v7443_v38 }
 0xebd   : > { %v3925_v54 = vmul.f32 0.0078125, %v3898_v0  ;;  %v3926_v29 = vmul.f32 0.0078125, %v3900_v8  ;;  %v3956_v5 = vmul.f32 %v9883_v18, %v9883_v18 }
 0xebf   : > { %v9890_v50 = vsub.f32 %v9819_v49, %v3925_v54  ;;  %v9893_v58 = vsub.f32 %v9816_v40, %v3926_v29  ;;  %3976 = vadd.xlane.f32.xlu0 %v3956_v5  ;;  %v7451_v40 = vld [vmem:[%s8232_s29 + $0xa4] ss:$16 sps:$4 sm:$0xff]  }
 0xec0   : > { %v3902_v31 = vpop.xlane.xlu1 %3901  ;;  %4334 = vmatprep.subr.bf16.mxu1 %v7451_v40 }
 0xec1   : > { %v3927_v35 = vmul.f32 0.0078125, %v3902_v31  ;;  %v3957_v25 = vmul.f32 %v9890_v50, %v9890_v50  ;;  %v3958_v49 = vmul.f32 %v9893_v58, %v9893_v58  ;;  %4335 = vmatpush1.bf16.msra.mxu1 %v7449_v34 }
 0xec2   : > { %4336 = vmatprep.subr.bf16.mxu1 %v7457_v39 }
 0xec3   : > { %v9904_v16 = vsub.f32 %v9823_v3, %v3927_v35  ;;  %3978 = vadd.xlane.f32.xlu1 %v3957_v25  ;;  %3980 = vadd.xlane.f32.xlu0 %v3958_v49  ;;  %v7455_v3 = vld [vmem:[%s8232_s29 + $0x80] ss:$16 sps:$4 sm:$0xff]  }
 0xec5   : > { %v3959_v22 = vmul.f32 %v9904_v16, %v9904_v16  ;;  %4337 = vmatpush1.bf16.msra.mxu1 %v7455_v3 }
 0xec6   : > { %4338 = vmatprep.subr.bf16.mxu1 %v7463_v24 }
 0xec7   : > { %3982 = vadd.xlane.f32.xlu1 %v3959_v22 }
 0xec9   : > { %4339 = vmatpush1.bf16.msra.mxu1 %v7461_v28 }
 0xeca   : > { %4340 = vmatprep.subr.bf16.mxu1 %v7469_v27 }
 0xecd   : > { %4341 = vmatpush1.bf16.msra.mxu1 %v7467_v62 }
 0xece   : > { %4342 = vmatprep.subr.bf16.mxu1 %v7475_v19 }
 0xed1   : > { %4343 = vmatpush1.bf16.msra.mxu1 %v7473_v30 }
 0xed2   : > { %4344 = vmatprep.subr.bf16.mxu1 %v7481_v4 }
 0xed5   : > { %4345 = vmatpush1.bf16.msra.mxu1 %v7479_v2 }
 0xeeb   : > { %v3904_v6 = vpop.xlane.xlu0 %3903 }
 0xeec   : > { %v3928_v26 = vmul.f32 0.0078125, %v3904_v6  ;;  %v9976_v6 = vld [vmem:[%s11444_s0] ss:$0 sm:$0xff] }
 0xeee   : > { %v9931_v45 = vsub.f32 %v9828_v47, %v3928_v26 }
 0xeef   : > { %v3906_v17 = vpop.xlane.xlu1 %3905  ;;  %v3908_v46 = vpop.xlane.xlu0 %3907 }
 0xef0   : > { %v3929_v23 = vmul.f32 0.0078125, %v3906_v17  ;;  %v3930_v20 = vmul.f32 0.0078125, %v3908_v46  ;;  %v3960_v57 = vmul.f32 %v9931_v45, %v9931_v45 }
 0xef2   : > { %v9936_v11 = vsub.f32 %v9835_v43, %v3929_v23  ;;  %v9939_v0 = vsub.f32 %v9832_v44, %v3930_v20  ;;  %3984 = vadd.xlane.f32.xlu0 %v3960_v57 }
 0xef3   : > { %v3910_v8 = vpop.xlane.xlu1 %3909 }
 0xef4   : > { %v3931_v54 = vmul.f32 0.0078125, %v3910_v8  ;;  %v3961_v47 = vmul.f32 %v9936_v11, %v9936_v11  ;;  %v3962_v29 = vmul.f32 %v9939_v0, %v9939_v0 }
 0xef6   : > { %v9946_v5 = vsub.f32 %v9839_v15, %v3931_v54  ;;  %3986 = vadd.xlane.f32.xlu1 %v3961_v47  ;;  %3988 = vadd.xlane.f32.xlu0 %v3962_v29 }
 0xef7   : > { %v3912_v63 = vpop.xlane.xlu0 %3911 }
 0xef8   : > { %v3932_v43 = vmul.f32 0.0078125, %v3912_v63  ;;  %v3963_v44 = vmul.f32 %v9946_v5, %v9946_v5 }
 0xefa   : > { %v9951_v51 = vsub.f32 %v9844_v60, %v3932_v43  ;;  %3990 = vadd.xlane.f32.xlu1 %v3963_v44 }
 0xefb   : > { %v3914_v38 = vpop.xlane.xlu1 %3913  ;;  %v3916_v14 = vpop.xlane.xlu0 %3915 }
 0xefc   : > { %v3933_v31 = vmul.f32 0.0078125, %v3914_v38  ;;  %v3934_v35 = vmul.f32 0.0078125, %v3916_v14  ;;  %v3964_v25 = vmul.f32 %v9951_v51, %v9951_v51 }
 0xefe   : > { %v9956_v15 = vsub.f32 %v9851_v55, %v3933_v31  ;;  %v9959_v49 = vsub.f32 %v9848_v10, %v3934_v35  ;;  %3992 = vadd.xlane.f32.xlu0 %v3964_v25 }
 0xeff   : > { %v3918_v40 = vpop.xlane.xlu1 %3917 }
 0xf00   : > { %v3935_v7 = vmul.f32 0.0078125, %v3918_v40  ;;  %v3965_v60 = vmul.f32 %v9956_v15, %v9956_v15  ;;  %v3966_v34 = vmul.f32 %v9959_v49, %v9959_v49 }
 0xf02   : > { %v9966_v12 = vsub.f32 %v9855_v13, %v3935_v7  ;;  %3994 = vadd.xlane.f32.xlu1 %v3965_v60  ;;  %3996 = vadd.xlane.f32.xlu0 %v3966_v34 }
 0xf04   : > { %v3967_v55 = vmul.f32 %v9966_v12, %v9966_v12 }
 0xf06   : > { %3998 = vadd.xlane.f32.xlu1 %v3967_v55 }
 0xf3c   : > { %v3969_v10 = vpop.xlane.xlu0 %3968 }
 0xf3d   : > { %v4000_v22 = vmul.f32 0.0078125, %v3969_v10 }
 0xf3f   : > { %v4016_v39 = vadd.f32 1e-12, %v4000_v22 }
 0xf40   : > { %v3971_v59 = vpop.xlane.xlu1 %3970  ;;  %v3973_v3 = vpop.xlane.xlu0 %3972 }
 0xf41   : > { %7773 = vrsqrt.f32 %v4016_v39  ;;  %v4001_v41 = vmul.f32 0.0078125, %v3971_v59  ;;  %v4002_v24 = vmul.f32 0.0078125, %v3973_v3 }
 0xf43   : > { %v4017_v33 = vadd.f32 1e-12, %v4001_v41  ;;  %v4018_v28 = vadd.f32 1e-12, %v4002_v24 }
 0xf44   : > { %v3975_v53 = vpop.xlane.xlu1 %3974 }
 0xf45   : > { %7775 = vrsqrt.f32 %v4017_v33  ;;  %v4003_v13 = vmul.f32 0.0078125, %v3975_v53 }
 0xf46   : > { %7777 = vrsqrt.f32 %v4018_v28 }
 0xf47   : > { %v4019_v27 = vadd.f32 1e-12, %v4003_v13 }
 0xf48   : > { %v3977_v52 = vpop.xlane.xlu0 %3976 }
 0xf49   : > { %7779 = vrsqrt.f32 %v4019_v27  ;;  %v4004_v62 = vmul.f32 0.0078125, %v3977_v52 }
 0xf4b   : > { %v4020_v36 = vadd.f32 1e-12, %v4004_v62 }
 0xf4c   : > { %v3979_v19 = vpop.xlane.xlu1 %3978  ;;  %v3981_v42 = vpop.xlane.xlu0 %3980 }
 0xf4d   : > { %v4005_v30 = vmul.f32 0.0078125, %v3979_v19  ;;  %v4006_v2 = vmul.f32 0.0078125, %v3981_v42  ;;  %7781 = vrsqrt.f32 %v4020_v36 }
 0xf4e   : > { %v7774_v56 = vpop.eup %7773 }
 0xf4f   : > { %v4048_v4 = vmul.f32 %v7774_v56, %v9863_v1  ;;  %v4021_v61 = vadd.f32 1e-12, %v4005_v30  ;;  %v4022_v46 = vadd.f32 1e-12, %v4006_v2  ;;  %v9985_v1 = vld [vmem:[%s11445_s5] ss:$0 sm:$0xff] }
 0xf50   : > { %v3983_v21 = vpop.xlane.xlu1 %3982 }
 0xf51   : > { %7783 = vrsqrt.f32 %v4021_v61  ;;  %v4007_v26 = vmul.f32 0.0078125, %v3983_v21  ;;  %v4070_v57 = vmul.f32 %v9976_v6, %v4048_v4 }
 0xf52   : > { %v7776_v17 = vpop.eup %7775 }
 0xf53   : > { %v4049_v23 = vmul.f32 %v7776_v17, %v9868_v37  ;;  %v4023_v20 = vadd.f32 1e-12, %v4007_v26  ;;  %v7778_v8 = vpop.eup %7777  ;;  %v9989_v29 = vadd.f32 %v9985_v1, %v4070_v57 }
 0xf54   : > { %v4050_v63 = vmul.f32 %v7778_v8, %v9871_v9 }
 0xf55   : > { %7785 = vrsqrt.f32 %v4023_v20  ;;  %v4071_v54 = vmul.f32 %v9976_v6, %v4049_v23  ;;  %11446 = vst [vmem:[#allocation29_spill] sm:$0xff] %v9989_v29 }
 0xf56   : > { %v7780_v47 = vpop.eup %7779  ;;  %7787 = vrsqrt.f32 %v4022_v46  ;;  %v4072_v14 = vmul.f32 %v9976_v6, %v4050_v63 }
 0xf57   : > { %v9992_v37 = vadd.f32 %v9985_v1, %v4071_v54  ;;  %v4051_v43 = vmul.f32 %v7780_v47, %v9878_v32 }
 0xf58   : > { %v10006_v32 = vadd.f32 %v9985_v1, %v4072_v14 }
 0xf59   : > { %11447 = vst [vmem:[#allocation31_spill] sm:$0xff] %v9992_v37  ;;  %v4108_v44 = vpack.c.bf16 %v9992_v37, %v9989_v29  ;;  %v4073_v38 = vmul.f32 %v9976_v6, %v4051_v43 }
 0xf5a   : > { %v7782_v31 = vpop.eup %7781  ;;  %11449 = vst [vmem:[#allocation16_spill] sm:$0xff] %v10006_v32 }
 0xf5b   : > { %4363 = vmatmul.mubr.bf16.vlgmr.msra.gmra.mxu1 %v4108_v44  ;;  %4476 = vmatmul.mubr.bf16.vlgmr.msra.gmra.mxu0 %v4108_v44  ;;  %v10003_v35 = vadd.f32 %v9985_v1, %v4073_v38  ;;  %v4052_v25 = vmul.f32 %v7782_v31, %v9883_v18 }
 0xf5c   : > { %4372 = vmatprep.mubr.bf16.mxu1 %v11409_v48  ;;  %4485 = vmatprep.mubr.bf16.mxu0 %v11409_v48 }
 0xf5d   : > { %11448 = vst [vmem:[#allocation30_spill] sm:$0xff] %v10003_v35  ;;  %v4109_v7 = vpack.c.bf16 %v10003_v35, %v10006_v32  ;;  %v4074_v10 = vmul.f32 %v9976_v6, %v4052_v25 }
 0xf5e   : > { %v7784_v9 = vpop.eup %7783 }
 0xf5f   : > { %v4053_v40 = vmul.f32 %v7784_v9, %v9890_v50  ;;  %v10021_v50 = vadd.f32 %v9985_v1, %v4074_v10 }
 0xf61   : > { %v4075_v60 = vmul.f32 %v9976_v6, %v4053_v40  ;;  %11451 = vst [vmem:[#allocation15_spill] sm:$0xff] %v10021_v50 }
 0xf62   : > { %v7786_v34 = vpop.eup %7785 }
 0xf63   : > { %v7788_v55 = vpop.eup %7787  ;;  %4373 = vmatmul.mubr.bf16.gmra.mxu1 %v4109_v7  ;;  %4486 = vmatmul.mubr.bf16.gmra.mxu0 %v4109_v7  ;;  %v10017_v22 = vadd.f32 %v9985_v1, %v4075_v60  ;;  %v4055_v18 = vmul.f32 %v7786_v34, %v9904_v16 }
 0xf64   : > { %4382 = vmatprep.mubr.bf16.mxu1 %v11409_v48  ;;  %4495 = vmatprep.mubr.bf16.mxu0 %v11409_v48  ;;  %v4054_v39 = vmul.f32 %v7788_v55, %v9893_v58 }
 0xf65   : > { %11450 = vst [vmem:[#allocation14_spill] sm:$0xff] %v10017_v22  ;;  %v4110_v59 = vpack.c.bf16 %v10017_v22, %v10021_v50  ;;  %v4077_v3 = vmul.f32 %v9976_v6, %v4055_v18 }
 0xf66   : > { %v4076_v41 = vmul.f32 %v9976_v6, %v4054_v39 }
 0xf67   : > { %v10031_v16 = vadd.f32 %v9985_v1, %v4077_v3 }
 0xf68   : > { %v10034_v24 = vadd.f32 %v9985_v1, %v4076_v41 }
 0xf69   : > { %11452 = vst [vmem:[#allocation13_spill] sm:$0xff] %v10031_v16 }
 0xf6a   : > { %11453 = vst [vmem:[#allocation19_spill] sm:$0xff] %v10034_v24  ;;  %v4111_v58 = vpack.c.bf16 %v10031_v16, %v10034_v24 }
 0xf6b   : > { %4383 = vmatmul.mubr.bf16.gmra.mxu1 %v4110_v59  ;;  %4496 = vmatmul.mubr.bf16.gmra.mxu0 %v4110_v59 }
 0xf6c   : > { %4392 = vmatprep.mubr.bf16.mxu1 %v11409_v48  ;;  %4505 = vmatprep.mubr.bf16.mxu0 %v11409_v48 }
 0xf73   : > { %4393 = vmatmul.mubr.bf16.gmra.mxu1 %v4111_v58  ;;  %4506 = vmatmul.mubr.bf16.gmra.mxu0 %v4111_v58 }
 0xf74   : > { %4402 = vmatprep.mubr.bf16.mxu1 %v11409_v48  ;;  %4515 = vmatprep.mubr.bf16.mxu0 %v11409_v48 }
 0xf7b   : > { %v3985_v33 = vpop.xlane.xlu0 %3984 }
 0xf7c   : > { %v4008_v28 = vmul.f32 0.0078125, %v3985_v33 }
 0xf7e   : > { %v4024_v53 = vadd.f32 1e-12, %v4008_v28 }
 0xf7f   : > { %v3987_v13 = vpop.xlane.xlu1 %3986  ;;  %v3989_v27 = vpop.xlane.xlu0 %3988 }
 0xf80   : > { %7789 = vrsqrt.f32 %v4024_v53  ;;  %v4009_v52 = vmul.f32 0.0078125, %v3987_v13  ;;  %v4010_v62 = vmul.f32 0.0078125, %v3989_v27  ;;  %v10078_v53 = vld [vmem:[%s8242_s20 + $0xf8] sm:$0xff]  }
 0xf81   : > { %v7486_v13 = vld [vmem:[%s8242_s20 + $0x38] sm:$0xff]   ;;  %6707 = vmatprep.subr.bf16.mxu0 %v10078_v53 }
 0xf82   : > { %v4025_v36 = vadd.f32 1e-12, %v4009_v52  ;;  %v4026_v19 = vadd.f32 1e-12, %v4010_v62  ;;  %v10082_v27 = vld [vmem:[%s8242_s20 + $0xb8] sm:$0xff]  }
 0xf83   : > { %v3991_v42 = vpop.xlane.xlu1 %3990  ;;  %6708 = vmatpush3.bf16.msra.mxu0 %v10082_v27 }
 0xf84   : > { %7791 = vrsqrt.f32 %v4025_v36  ;;  %v4011_v30 = vmul.f32 0.0078125, %v3991_v42  ;;  %v10095_v42 = vld [vmem:[%s8242_s20 + $0xf0] sm:$0xff]  }
 0xf85   : > { %7793 = vrsqrt.f32 %v4026_v19  ;;  %v7489_v19 = vld [vmem:[%s8242_s20 + $0x70] sm:$0xff]   ;;  %11460 = vst [vmem:[#allocation22_spill] sm:$0xff] %v10095_v42  ;;  %6709 = vmatprep.subr.bf16.mxu0 %v10095_v42 }
 0xf86   : > { %v4027_v56 = vadd.f32 1e-12, %v4011_v30  ;;  %v7491_v30 = vld [vmem:[%s8242_s20 + $0x30] sm:$0xff]  }
 0xf87   : > { %v3993_v2 = vpop.xlane.xlu0 %3992 }
 0xf88   : > { %7795 = vrsqrt.f32 %v4027_v56  ;;  %v4012_v4 = vmul.f32 0.0078125, %v3993_v2  ;;  %v10100_v56 = vld [vmem:[%s8242_s20 + $0xb0] sm:$0xff]  }
 0xf89   : > { %11461 = vst [vmem:[#allocation27_spill] sm:$0xff] %v10100_v56  ;;  %6710 = vmatpush3.bf16.msra.mxu0 %v10100_v56 }
 0xf8a   : > { %v4028_v61 = vadd.f32 1e-12, %v4012_v4  ;;  %v7493_v4 = vld [vmem:[%s8242_s20 + $0x68] sm:$0xff]  }
 0xf8b   : > { %v3995_v21 = vpop.xlane.xlu1 %3994  ;;  %v3997_v26 = vpop.xlane.xlu0 %3996 }
 0xf8c   : > { %v4013_v17 = vmul.f32 0.0078125, %v3995_v21  ;;  %v4014_v23 = vmul.f32 0.0078125, %v3997_v26  ;;  %7797 = vrsqrt.f32 %v4028_v61  ;;  %v10114_v61 = vld [vmem:[%s8242_s20 + $0xe8] sm:$0xff]  }
 0xf8d   : > { %v7790_v46 = vpop.eup %7789  ;;  %11464 = vst [vmem:[#allocation26_spill] sm:$0xff] %v10114_v61  ;;  %v7495_v21 = vld [vmem:[%s8242_s20 + $0x28] sm:$0xff]   ;;  %6711 = vmatprep.subr.bf16.mxu0 %v10114_v61 }
 0xf8e   : > { %v4029_v20 = vadd.f32 1e-12, %v4013_v17  ;;  %v4056_v57 = vmul.f32 %v7790_v46, %v9931_v45  ;;  %v4030_v63 = vadd.f32 1e-12, %v4014_v23  ;;  %v10120_v26 = vld [vmem:[%s8242_s20 + $0xa8] sm:$0xff]   ;;  %v10126_v17 = vld [vmem:[%s8242_s20 + $0xe0] sm:$0xff]  }
 0xf8f   : > { %v3999_v8 = vpop.xlane.xlu1 %3998  ;;  %11465 = vst [vmem:[#allocation32_spill] sm:$0xff] %v10120_v26  ;;  %6712 = vmatpush3.bf16.msra.mxu0 %v10120_v26  ;;  %11466 = vst [vmem:[#allocation33_spill] sm:$0xff] %v10126_v17  ;;  %v7499_v46 = vld [vmem:[%s8242_s20 + $0x20] sm:$0xff]  }
 0xf90   : > { %7799 = vrsqrt.f32 %v4029_v20  ;;  %v4015_v54 = vmul.f32 0.0078125, %v3999_v8  ;;  %v4078_v38 = vmul.f32 %v9976_v6, %v4056_v57  ;;  %v10130_v23 = vld [vmem:[%s8242_s20 + $0xa0] sm:$0xff]   ;;  %6713 = vmatprep.subr.bf16.mxu0 %v10126_v17  ;;  %v7501_v20 = vld [vmem:[%s8242_s20 + $0x58] sm:$0xff]  }
 0xf91   : > { %v7792_v47 = vpop.eup %7791  ;;  %11467 = vst [vmem:[#allocation34_spill] sm:$0xff] %v10130_v23  ;;  %v10136_v57 = vld [vmem:[%s8242_s20 + $0xd8] sm:$0xff]  }
 0xf92   : > { %v4031_v43 = vadd.f32 1e-12, %v4015_v54  ;;  %v4057_v44 = vmul.f32 %v7792_v47, %v9936_v11  ;;  %v7794_v14 = vpop.eup %7793  ;;  %v10045_v25 = vadd.f32 %v9985_v1, %v4078_v38  ;;  %11468 = vst [vmem:[#allocation35_spill] sm:$0xff] %v10136_v57  ;;  %v7503_v8 = vld [vmem:[%s8242_s20 + $0x18] sm:$0xff]   ;;  %v7505_v47 = vld [vmem:[%s8242_s20 + $0x50] sm:$0xff]   ;;  %v7509_v38 = vld [vmem:[%s8242_s20 + $0x48] sm:$0xff]  }
 0xf93   : > { %v4058_v40 = vmul.f32 %v7794_v14, %v9939_v0  ;;  %6714 = vmatpush3.bf16.msra.mxu0 %v10130_v23  ;;  %v10140_v54 = vld [vmem:[%s8242_s20 + $0x98] sm:$0xff]   ;;  %v10156_v14 = vld [vmem:[%s8242_s20 + $0xc8] sm:$0xff]  }
 0xf94   : > { %7801 = vrsqrt.f32 %v4031_v43  ;;  %v4079_v31 = vmul.f32 %v9976_v6, %v4057_v44  ;;  %11454 = vst [vmem:[#allocation17_spill] sm:$0xff] %v10045_v25  ;;  %11469 = vst [vmem:[#allocation36_spill] sm:$0xff] %v10140_v54  ;;  %6715 = vmatprep.subr.bf16.mxu0 %v10136_v57  ;;  %v7507_v43 = vld [vmem:[%s8242_s20 + $0x10] sm:$0xff]  }
 0xf95   : > { %v7796_v9 = vpop.eup %7795  ;;  %7803 = vrsqrt.f32 %v4030_v63  ;;  %v4080_v34 = vmul.f32 %v9976_v6, %v4058_v40  ;;  %v10146_v63 = vld [vmem:[%s8242_s20 + $0xd0] sm:$0xff]   ;;  %11472 = vst [vmem:[#allocation39_spill] sm:$0xff] %v10156_v14  ;;  %v7513_v40 = vld [vmem:[%s8242_s20 + $0x40] sm:$0xff]  }
 0xf96   : > { %v10048_v45 = vadd.f32 %v9985_v1, %v4079_v31  ;;  %v4059_v7 = vmul.f32 %v7796_v9, %v9946_v5  ;;  %11470 = vst [vmem:[#allocation37_spill] sm:$0xff] %v10146_v63  ;;  %v10150_v44 = vld [vmem:[%s8242_s20 + $0x90] sm:$0xff]   ;;  %v7511_v31 = vld [vmem:[%s8242_s20 + $0x8] sm:$0xff]  }
 0xf97   : > { %v10062_v5 = vadd.f32 %v9985_v1, %v4080_v34  ;;  %6716 = vmatpush3.bf16.msra.mxu0 %v10140_v54  ;;  %11471 = vst [vmem:[#allocation38_spill] sm:$0xff] %v10150_v44  ;;  %v10160_v9 = vld [vmem:[%s8242_s20 + $0x88] sm:$0xff]   ;;  %v4148_v34 = vld [vmem:[%s11473_s11] sm:$0xf] }
 0xf98   : > { %11455 = vst [vmem:[#allocation20_spill] sm:$0xff] %v10048_v45  ;;  %v4112_v11 = vpack.c.bf16 %v10048_v45, %v10045_v25  ;;  %v4081_v60 = vmul.f32 %v9976_v6, %v4059_v7  ;;  %6717 = vmatprep.subr.bf16.mxu0 %v10146_v63  ;;  %11474 = vst [vmem:[#allocation40_spill] sm:$0xff] %v10160_v9  ;;  %v10166_v7 = vld [vmem:[%s8242_s20 + $0xc0] sm:$0xff]  }
 0xf99   : > { %v7798_v55 = vpop.eup %7797  ;;  %11457 = vst [vmem:[#allocation23_spill] sm:$0xff] %v10062_v5  ;;  %11475 = vst [vmem:[#allocation41_spill] sm:$0xff] %v10166_v7 }
 0xf9a   : > { %4403 = vmatmul.mubr.bf16.gmra.mxu1 %v4112_v11  ;;  %4516 = vmatmul.mubr.bf16.gmra.mxu0 %v4112_v11  ;;  %v10059_v10 = vadd.f32 %v9985_v1, %v4081_v60  ;;  %v4060_v18 = vmul.f32 %v7798_v55, %v9951_v51  ;;  %v7485_v51 = vld [vmem:[%s8242_s20 + $0x78] sm:$0xff]   ;;  %v7515_v11 = vld [vmem:[%s8242_s20] sm:$0xff]  }
 0xf9b   : > { %4412 = vmatprep.mubr.bf16.mxu1 %v11409_v48  ;;  %4525 = vmatprep.mubr.bf16.mxu0 %v11409_v48  ;;  %v10170_v60 = vld [vmem:[%s8242_s20 + $0x80] sm:$0xff]  }
 0xf9c   : > { %11456 = vst [vmem:[#allocation18_spill] sm:$0xff] %v10059_v10  ;;  %v4113_v59 = vpack.c.bf16 %v10059_v10, %v10062_v5  ;;  %v4082_v33 = vmul.f32 %v9976_v6, %v4060_v18  ;;  %6643 = vmatprep.subr.bf16.mxu1 %v7485_v51  ;;  %6718 = vmatpush3.bf16.msra.mxu0 %v10150_v44  ;;  %11476 = vst [vmem:[#allocation42_spill] sm:$0xff] %v10170_v60  ;;  %v11477_v55 = vld [vmem:[#allocation12_spill] sm:$0xff] }
 0xf9d   : > { %v7800_v0 = vpop.eup %7799  ;;  %6644 = vmatpush3.bf16.msra.mxu1 %v7486_v13  ;;  %6719 = vmatprep.subr.bf16.mxu0 %v10156_v14 }
 0xf9e   : > { %v4061_v39 = vmul.f32 %v7800_v0, %v9956_v15  ;;  %v10085_v52 = vadd.f32 %v9985_v1, %v4082_v33  ;;  %6645 = vmatprep.subr.bf16.mxu1 %v7489_v19  ;;  %v11478_v0 = vsub.s32 0, %v11477_v55 }
 0xfa0   : > { %v4083_v3 = vmul.f32 %v9976_v6, %v4061_v39  ;;  %11459 = vst [vmem:[#allocation24_spill] sm:$0xff] %v10085_v52  ;;  %6720 = vmatpush3.bf16.msra.mxu0 %v10160_v9  ;;  %v10178_v18 = vrot.slane %v4148_v34, %v11478_v0  ;;  %v11479_v39 = vsub.s32 2, %v11477_v55 }
 0xfa1   : > { %v7802_v41 = vpop.eup %7801  ;;  %6646 = vmatpush3.bf16.msra.mxu1 %v7491_v30  ;;  %6721 = vmatprep.subr.bf16.mxu0 %v10166_v7 }
 0xfa2   : > { %v7804_v58 = vpop.eup %7803  ;;  %4413 = vmatmul.mubr.bf16.gmra.mxu1 %v4113_v59  ;;  %4526 = vmatmul.mubr.bf16.gmra.mxu0 %v4113_v59  ;;  %v10074_v15 = vadd.f32 %v9985_v1, %v4083_v3  ;;  %v4063_v28 = vmul.f32 %v7802_v41, %v9966_v12  ;;  %v10182_v59 = vrot.slane %v4148_v34, %v11479_v39 }
 0xfa3   : > { %4422 = vmatprep.mubr.bf16.mxu1 %v11409_v48  ;;  %4535 = vmatprep.mubr.bf16.mxu0 %v11409_v48  ;;  %v4062_v62 = vmul.f32 %v7804_v58, %v9959_v49 }
 0xfa4   : > { %11458 = vst [vmem:[#allocation21_spill] sm:$0xff] %v10074_v15  ;;  %v4114_v12 = vpack.c.bf16 %v10074_v15, %v10085_v52  ;;  %v4085_v36 = vmul.f32 %v9976_v6, %v4063_v28  ;;  %6647 = vmatprep.subr.bf16.mxu1 %v7493_v4  ;;  %6722 = vmatpush3.bf16.msra.mxu0 %v10170_v60 }
 0xfa5   : > { %v4084_v49 = vmul.f32 %v9976_v6, %v4062_v62  ;;  %6648 = vmatpush3.bf16.msra.mxu1 %v7495_v21 }
 0xfa6   : > { %v10105_v2 = vadd.f32 %v9985_v1, %v4085_v36 }
 0xfa7   : > { %v10110_v6 = vadd.f32 %v9985_v1, %v4084_v49  ;;  %v7497_v1 = vld [vmem:[%s8242_s20 + $0x60] sm:$0xff]  }
 0xfa8   : > { %11462 = vst [vmem:[#allocation25_spill] sm:$0xff] %v10105_v2  ;;  %6649 = vmatprep.subr.bf16.mxu1 %v7497_v1 }
 0xfa9   : > { %11463 = vst [vmem:[#allocation28_spill] sm:$0xff] %v10110_v6  ;;  %6650 = vmatpush3.bf16.msra.mxu1 %v7499_v46 }
 0xfaa   : > { %4423 = vmatmul.mubr.bf16.gmra.mxu1 %v4114_v12  ;;  %4536 = vmatmul.mubr.bf16.gmra.mxu0 %v4114_v12 }
 0xfab   : > { %4432 = vmatprep.mubr.bf16.mxu1 %v11409_v48  ;;  %4545 = vmatprep.mubr.bf16.mxu0 %v11409_v48  ;;  %v4115_v48 = vpack.c.bf16 %v10105_v2, %v10110_v6 }
 0xfac   : > { %6651 = vmatprep.subr.bf16.mxu1 %v7501_v20  ;;  %v11480_v20 = vsub.s32 1, %v11477_v55 }
 0xfad   : > { %6652 = vmatpush3.bf16.msra.mxu1 %v7503_v8 }
 0xfae   : > { %6653 = vmatprep.subr.bf16.mxu1 %v7505_v47  ;;  %v10195_v8 = vrot.slane %v4148_v34, %v11480_v20 }
 0xfb1   : > { %6654 = vmatpush3.bf16.msra.mxu1 %v7507_v43 }
 0xfb2   : > { %4433 = vmatmul.mubr.bf16.gmra.mxu1 %v4115_v48  ;;  %4546 = vmatmul.mubr.bf16.gmra.mxu0 %v4115_v48 }
 0xfb3   : > { %6655 = vmatprep.subr.bf16.mxu1 %v7509_v38 }
 0xfb5   : > { %6656 = vmatpush3.bf16.msra.mxu1 %v7511_v31 }
 0xfb6   : > { %6657 = vmatprep.subr.bf16.mxu1 %v7513_v40 }
 0xfb9   : > { %6658 = vmatpush3.bf16.msra.mxu1 %v7515_v11 }
 0xfba   : > { %7149 = vmatprep.subr.bf16.mxu1 %v10078_v53  ;;  %v4164_v53 = vsub.s32 3, %v11477_v55 }
 0xfbc   : > { %v10199_v11 = vrot.slane %v4148_v34, %v4164_v53 }
0x101b   : > { %v4364_v3 = vpop.f32.mrf.mxu1  ;;  %v4477_v41 = vpop.f32.mrf.mxu0 }
0x101c   : > { %v4365_v58 = vadd.f32 %v4364_v3, %v10178_v18  ;;  %v4478_v33 = vadd.f32 %v4477_v41, %v10182_v59 }
0x101d   : > { %v4366_v51 = vpop.f32.mrf.mxu1  ;;  %v4479_v28 = vpop.f32.mrf.mxu0 }
0x101e   : > { %v4620_v13 = vmul.f32 0.044715, %v4365_v58  ;;  %v4622_v62 = vmul.f32 0.044715, %v4478_v33  ;;  %v10204_v55 = vadd.f32 %v4366_v51, %v10195_v8 }
0x101f   : > { %v4368_v12 = vpop.f32.mrf.mxu1  ;;  %v4481_v36 = vpop.f32.mrf.mxu0 }
0x1020   : > { %v4684_v19 = vmul.f32 %v4620_v13, %v4365_v58  ;;  %v4686_v49 = vmul.f32 %v4622_v62, %v4478_v33  ;;  %v10188_v30 = vadd.f32 %v4368_v12, %v10178_v18  ;;  %v10191_v4 = vadd.f32 %v4481_v36, %v10182_v59 }
0x1021   : > { %v4370_v48 = vpop.f32.mrf.mxu1  ;;  %v4483_v21 = vpop.f32.mrf.mxu0 }
0x1022   : > { %v4748_v1 = vmul.f32 %v4684_v19, %v4365_v58  ;;  %v4750_v46 = vmul.f32 %v4686_v49, %v4478_v33  ;;  %v4624_v47 = vmul.f32 0.044715, %v10188_v30  ;;  %v4626_v43 = vmul.f32 0.044715, %v10191_v4 }
0x1023   : > { %v4374_v38 = vpop.f32.mrf.mxu1  ;;  %v4487_v31 = vpop.f32.mrf.mxu0  ;;  %v10214_v49 = vadd.f32 %v4479_v28, %v10199_v11  ;;  %v10229_v28 = vadd.f32 %v4483_v21, %v10199_v11  ;;  %v10289_v37 = vmul.f32 0.5, %v10188_v30 }
0x1024   : > { %v4812_v40 = vadd.f32 %v4748_v1, %v4365_v58  ;;  %v4688_v0 = vmul.f32 %v4624_v47, %v10188_v30  ;;  %v4814_v39 = vadd.f32 %v4750_v46, %v4478_v33  ;;  %v4690_v3 = vmul.f32 %v4626_v43, %v10191_v4 }
0x1025   : > { %v4376_v41 = vpop.f32.mrf.mxu1  ;;  %v4489_v13 = vpop.f32.mrf.mxu0  ;;  %v10208_v36 = vadd.f32 %v4374_v38, %v10178_v18  ;;  %v10211_v19 = vadd.f32 %v4487_v31, %v10182_v59  ;;  %v10216_v1 = vmul.f32 0.5, %v4365_v58  ;;  %v4621_v38 = vmul.f32 0.044715, %v10204_v55 }
0x1026   : > { %v4876_v62 = vmul.f32 0.7978846, %v4812_v40  ;;  %v4752_v12 = vmul.f32 %v4688_v0, %v10188_v30  ;;  %v4878_v46 = vmul.f32 0.7978846, %v4814_v39  ;;  %v4754_v51 = vmul.f32 %v4690_v3, %v10191_v4 }
0x1027   : > { %v4378_v34 = vpop.f32.mrf.mxu1  ;;  %v4491_v53 = vpop.f32.mrf.mxu0  ;;  %v4628_v20 = vmul.f32 0.044715, %v10208_v36  ;;  %v10220_v40 = vmul.f32 0.5, %v4478_v33  ;;  %v10224_v31 = vadd.f32 %v4370_v48, %v10195_v8  ;;  %v4630_v0 = vmul.f32 0.044715, %v10211_v19 }
0x1028   : > { %7805 = vtanh.f32 %v4876_v62  ;;  %v4816_v58 = vadd.f32 %v4752_v12, %v10188_v30  ;;  %v4623_v33 = vmul.f32 0.044715, %v10214_v49  ;;  %v10235_v15 = vadd.f32 %v4378_v34, %v10178_v18 }
0x1029   : > { %v4380_v47 = vpop.f32.mrf.mxu1  ;;  %v4493_v43 = vpop.f32.mrf.mxu0  ;;  %v4692_v39 = vmul.f32 %v4628_v20, %v10208_v36  ;;  %v4694_v6 = vmul.f32 %v4630_v0, %v10211_v19  ;;  %v10238_v48 = vmul.f32 0.5, %v10204_v55  ;;  %7807 = vtanh.f32 %v4878_v46 }
0x102a   : > { %v4818_v62 = vadd.f32 %v4754_v51, %v10191_v4  ;;  %v10242_v21 = vadd.f32 %v4376_v41, %v10195_v8  ;;  %v10245_v12 = vadd.f32 %v4491_v53, %v10182_v59  ;;  %v4625_v20 = vmul.f32 0.044715, %v10224_v31 }
0x102b   : > { %v4384_v3 = vpop.f32.mrf.mxu1  ;;  %v4497_v2 = vpop.f32.mrf.mxu0  ;;  %v4756_v52 = vmul.f32 %v4692_v39, %v10208_v36  ;;  %v4632_v0 = vmul.f32 0.044715, %v10235_v15  ;;  %v10251_v10 = vmul.f32 0.5, %v10214_v49  ;;  %v4880_v5 = vmul.f32 0.7978846, %v4816_v58 }
0x102c   : > { %v4627_v46 = vmul.f32 0.044715, %v10229_v28  ;;  %v4634_v51 = vmul.f32 0.044715, %v10245_v12  ;;  %v4758_v53 = vmul.f32 %v4694_v6, %v10211_v19  ;;  %v10259_v45 = vadd.f32 %v4489_v13, %v10199_v11 }
0x102d   : > { %v4386_v34 = vpop.f32.mrf.mxu1  ;;  %v10255_v41 = vpop.f32.mrf.mxu0  ;;  %v4696_v39 = vmul.f32 %v4632_v0, %v10235_v15  ;;  %v10263_v25 = vadd.f32 %v4384_v3, %v10178_v18  ;;  %v4685_v16 = vmul.f32 %v4621_v38, %v10204_v55  ;;  %v4882_v24 = vmul.f32 0.7978846, %v4818_v62 }
0x102e   : > { %v4629_v58 = vmul.f32 0.044715, %v10242_v21  ;;  %v10268_v22 = vadd.f32 %v4380_v47, %v10195_v8  ;;  %v4687_v50 = vmul.f32 %v4623_v33, %v10214_v49  ;;  %v4689_v6 = vmul.f32 %v4625_v20, %v10224_v31 }
0x102f   : > { %11481 = vst [vmem:[#allocation12_spill] sm:$0xff] %v10263_v25  ;;  %v4820_v13 = vadd.f32 %v4756_v52, %v10208_v36  ;;  %v10274_v35 = vadd.f32 %v4493_v43, %v10199_v11  ;;  %v4388_v0 = vpop.f32.mrf.mxu1  ;;  %7809 = vtanh.f32 %v4880_v5  ;;  %v4698_v3 = vmul.f32 %v4634_v51, %v10245_v12  ;;  %v4501_v47 = vpop.f32.mrf.mxu0 }
0x1030   : > { %v4636_v38 = vmul.f32 0.044715, %v10263_v25  ;;  %v10279_v62 = vadd.f32 %v4497_v2, %v10182_v59  ;;  %v4691_v32 = vmul.f32 %v4627_v46, %v10229_v28  ;;  %v4822_v33 = vadd.f32 %v4758_v53, %v10211_v19 }
0x1031   : > { %v4631_v20 = vmul.f32 0.044715, %v10259_v45  ;;  %v4760_v52 = vmul.f32 %v4696_v39, %v10235_v15  ;;  %7811 = vtanh.f32 %v4882_v24  ;;  %v4693_v43 = vmul.f32 %v4629_v58, %v10242_v21  ;;  %v4390_v29 = vpop.f32.mrf.mxu1  ;;  %v4503_v7 = vpop.f32.mrf.mxu0 }
0x1032   : > { %11482 = vst [vmem:[#allocation43_spill] sm:$0xff] %v10279_v62  ;;  %v4633_v5 = vmul.f32 0.044715, %v10268_v22  ;;  %v4638_v51 = vmul.f32 0.044715, %v10279_v62  ;;  %v10292_v2 = vmul.f32 0.5, %v10191_v4  ;;  %v10296_v60 = vmul.f32 %v4685_v16, %v10204_v55 }
0x1033   : > { %v4884_v46 = vmul.f32 0.7978846, %v4820_v13  ;;  %v4635_v53 = vmul.f32 0.044715, %v10274_v35  ;;  %v10299_v24 = vmul.f32 %v4687_v50, %v10214_v49  ;;  %v4762_v39 = vmul.f32 %v4698_v3, %v10245_v12 }
0x1034   : > { %v4700_v58 = vmul.f32 %v4636_v38, %v10263_v25  ;;  %v10304_v9 = vmul.f32 %v4689_v6, %v10224_v31  ;;  %v4886_v4 = vmul.f32 0.7978846, %v4822_v33  ;;  %v4695_v13 = vmul.f32 %v4631_v20, %v10259_v45 }
0x1035   : > { %v7806_v30 = vpop.eup %7805  ;;  %v4824_v14 = vadd.f32 %v4760_v52, %v10235_v15  ;;  %v10309_v16 = vmul.f32 %v4691_v32, %v10229_v28  ;;  %v10312_v50 = vmul.f32 %v4693_v43, %v10242_v21  ;;  %v4697_v3 = vmul.f32 %v4633_v5, %v10268_v22  ;;  %v4394_v52 = vpop.f32.mrf.mxu1 }
0x1036   : > { %v4702_v38 = vmul.f32 %v4638_v51, %v10279_v62  ;;  %v7808_v44 = vpop.eup %7807  ;;  %7813 = vtanh.f32 %v4884_v46  ;;  %v4699_v6 = vmul.f32 %v4635_v53, %v10274_v35  ;;  %v10318_v33 = vadd.f32 %v4386_v34, %v10195_v8  ;;  %v4507_v51 = vpop.f32.mrf.mxu0 }
0x1037   : > { %v10321_v20 = vadd.f32 %v4388_v0, %v10178_v18  ;;  %v5004_v32 = vadd.f32 1.0, %v7806_v30  ;;  %v4826_v63 = vadd.f32 %v4762_v39, %v10245_v12  ;;  %v4764_v43 = vmul.f32 %v4700_v58, %v10263_v25 }
0x1038   : > { %v10326_v5 = vadd.f32 %v4501_v47, %v10182_v59  ;;  %7815 = vtanh.f32 %v4886_v4  ;;  %v10329_v46 = vmul.f32 %v4695_v13, %v10259_v45  ;;  %v4888_v53 = vmul.f32 0.7978846, %v4824_v14  ;;  %v4396_v13 = vpop.f32.mrf.mxu1  ;;  %v4509_v23 = vpop.f32.mrf.mxu0 }
0x1039   : > { %11483 = vst [vmem:[#allocation44_spill] sm:$0xff] %v10321_v20  ;;  %v4640_v34 = vmul.f32 0.044715, %v10321_v20  ;;  %v5006_v54 = vadd.f32 1.0, %v7808_v44  ;;  %v4766_v0 = vmul.f32 %v4702_v38, %v10279_v62  ;;  %v10335_v30 = vadd.f32 %v10255_v41, %v10199_v11 }
0x103a   : > { %11484 = vst [vmem:[#allocation45_spill] sm:$0xff] %v10326_v5  ;;  %v4642_v39 = vmul.f32 0.044715, %v10326_v5  ;;  %v10339_v47 = vmul.f32 %v4697_v3, %v10268_v22  ;;  %v4637_v58 = vmul.f32 0.044715, %v10318_v33  ;;  %v10344_v14 = vadd.f32 %v4394_v52, %v10178_v18 }
0x103b   : > { %v4704_v4 = vmul.f32 %v4640_v34, %v10321_v20  ;;  %v10347_v44 = vmul.f32 %v5004_v32, %v10216_v1  ;;  %v4890_v38 = vmul.f32 0.7978846, %v4826_v63  ;;  %v10350_v41 = vmul.f32 %v4699_v6, %v10274_v35 }
0x103c   : > { %11485 = vst [vmem:[#allocation46_spill] sm:$0xff] %v10344_v14  ;;  %v4828_v57 = vadd.f32 %v4764_v43, %v10263_v25  ;;  %v7810_v3 = vpop.eup %7809  ;;  %v4706_v26 = vmul.f32 %v4642_v39, %v10326_v5  ;;  %v4644_v34 = vmul.f32 0.044715, %v10344_v14  ;;  %v10357_v52 = vadd.f32 %v4507_v51, %v10182_v59  ;;  %v4398_v51 = vpop.f32.mrf.mxu1 }
0x103d   : > { %v4768_v17 = vmul.f32 %v4704_v4, %v10321_v20  ;;  %v10360_v1 = vmul.f32 %v5006_v54, %v10220_v40  ;;  %7817 = vtanh.f32 %v4888_v53  ;;  %v4830_v63 = vadd.f32 %v4766_v0, %v10279_v62  ;;  %v4511_v53 = vpop.f32.mrf.mxu0 }
0x103e   : > { %11486 = vst [vmem:[#allocation47_spill] sm:$0xff] %v10357_v52  ;;  %v4639_v6 = vmul.f32 0.044715, %v10335_v30  ;;  %v7812_v32 = vpop.eup %7811  ;;  %v4701_v43 = vmul.f32 %v4637_v58, %v10318_v33  ;;  %v10366_v4 = vadd.f32 %v4390_v29, %v10195_v8  ;;  %v4708_v39 = vmul.f32 %v4644_v34, %v10344_v14 }
0x103f   : > { %v4646_v25 = vmul.f32 0.044715, %v10357_v52  ;;  %v5008_v61 = vadd.f32 1.0, %v7810_v3  ;;  %7819 = vtanh.f32 %v4890_v38  ;;  %v4892_v54 = vmul.f32 0.7978846, %v4828_v57 }
0x1040   : > { %v10371_v40 = vadd.f32 %v4503_v7, %v10199_v11  ;;  %v4832_v0 = vadd.f32 %v4768_v17, %v10321_v20  ;;  %v4770_v62 = vmul.f32 %v4706_v26, %v10326_v5  ;;  %v4772_v58 = vmul.f32 %v4708_v39, %v10344_v14 }
0x1041   : > { %v4710_v29 = vmul.f32 %v4646_v25, %v10357_v52  ;;  %v5010_v56 = vadd.f32 1.0, %v7812_v32  ;;  %v4894_v34 = vmul.f32 0.7978846, %v4830_v63  ;;  %v4703_v42 = vmul.f32 %v4639_v6, %v10335_v30 }
0x1042   : > { %v10379_v3 = vadd.f32 %v4398_v51, %v10178_v18  ;;  %v10382_v57 = vmul.f32 %v4701_v43, %v10318_v33  ;;  %v4641_v7 = vmul.f32 0.044715, %v10366_v4  ;;  %v10387_v26 = vadd.f32 %v4511_v53, %v10182_v59 }
0x1043   : > { %v4774_v17 = vmul.f32 %v4710_v29, %v10357_v52  ;;  %v10389_v38 = vpop.eup %7813  ;;  %v10392_v25 = vmul.f32 %v5008_v61, %v10289_v37  ;;  %7821 = vtanh.f32 %v4892_v54  ;;  %v10395_v63 = vadd.f32 %v4396_v13, %v10195_v8 }
0x1044   : > { %v4648_v6 = vmul.f32 0.044715, %v10379_v3  ;;  %v4896_v32 = vmul.f32 0.7978846, %v4832_v0  ;;  %v4834_v43 = vadd.f32 %v4770_v62, %v10326_v5  ;;  %v4643_v39 = vmul.f32 0.044715, %v10371_v40 }
0x1045   : > { %v4836_v51 = vadd.f32 %v4772_v58, %v10344_v14  ;;  %v10401_v53 = vpop.eup %7815  ;;  %v10404_v29 = vmul.f32 %v5010_v56, %v10292_v2  ;;  %7823 = vtanh.f32 %v4894_v34  ;;  %v10407_v37 = vmul.f32 %v4703_v42, %v10335_v30  ;;  %v4400_v58 = vpop.f32.mrf.mxu1 }
0x1046   : > { %v4813_v61 = vadd.f32 %v10296_v60, %v10204_v55  ;;  %v4705_v13 = vmul.f32 %v4641_v7, %v10366_v4  ;;  %v4838_v62 = vadd.f32 %v4774_v17, %v10357_v52  ;;  %v10414_v54 = vadd.f32 %v4509_v23, %v10199_v11  ;;  %v4513_v14 = vpop.f32.mrf.mxu0 }
0x1047   : > { %v4650_v0 = vmul.f32 0.044715, %v10387_v26  ;;  %v4645_v56 = vmul.f32 0.044715, %v10395_v63  ;;  %v4712_v2 = vmul.f32 %v4648_v6, %v10379_v3  ;;  %v4817_v42 = vadd.f32 %v10304_v9, %v10224_v31 }
0x1048   : > { %v4877_v34 = vmul.f32 0.7978846, %v4813_v61  ;;  %7825 = vtanh.f32 %v4896_v32  ;;  %v4898_v60 = vmul.f32 0.7978846, %v4834_v43  ;;  %v4707_v55 = vmul.f32 %v4643_v39, %v10371_v40 }
0x1049   : > { %v4900_v7 = vmul.f32 0.7978846, %v4836_v51  ;;  %v10423_v23 = vadd.f32 %v4400_v58, %v10195_v8  ;;  %v10426_v17 = vadd.f32 %v4513_v14, %v10199_v11  ;;  %v4881_v52 = vmul.f32 0.7978846, %v4817_v42 }
0x104a   : > { %7827 = vtanh.f32 %v4877_v34  ;;  %v7818_v5 = vpop.eup %7817  ;;  %v4902_v20 = vmul.f32 0.7978846, %v4838_v62  ;;  %v4714_v6 = vmul.f32 %v4650_v0, %v10387_v26  ;;  %v4815_v9 = vadd.f32 %v10299_v24, %v10214_v49 }
0x104b   : > { %v4819_v32 = vadd.f32 %v10309_v16, %v10229_v28  ;;  %v4709_v43 = vmul.f32 %v4645_v56, %v10395_v63  ;;  %v4647_v39 = vmul.f32 0.044715, %v10414_v54  ;;  %v4776_v51 = vmul.f32 %v4712_v2, %v10379_v3 }
0x104c   : > { %7829 = vtanh.f32 %v4881_v52  ;;  %v10436_v14 = vpop.eup %7819  ;;  %v4879_v61 = vmul.f32 0.7978846, %v4815_v9  ;;  %v4821_v0 = vadd.f32 %v10312_v50, %v10242_v21  ;;  %v4649_v49 = vmul.f32 0.044715, %v10423_v23 }
0x104d   : > { %7831 = vtanh.f32 %v4898_v60  ;;  %v4883_v62 = vmul.f32 0.7978846, %v4819_v32  ;;  %v4651_v24 = vmul.f32 0.044715, %v10426_v17  ;;  %v4825_v16 = vadd.f32 %v10339_v47, %v10268_v22 }
0x104e   : > { %7833 = vtanh.f32 %v4900_v7  ;;  %v4778_v58 = vmul.f32 %v4714_v6, %v10387_v26  ;;  %v4885_v52 = vmul.f32 0.7978846, %v4821_v0  ;;  %v4823_v56 = vadd.f32 %v10329_v46, %v10259_v45 }
0x104f   : > { %7835 = vtanh.f32 %v4902_v20  ;;  %v4840_v2 = vadd.f32 %v4776_v51, %v10379_v3  ;;  %v4889_v42 = vmul.f32 0.7978846, %v4825_v16  ;;  %v4827_v50 = vadd.f32 %v10350_v41, %v10274_v35 }
0x1050   : > { %7837 = vtanh.f32 %v4879_v61  ;;  %v10450_v34 = vpop.eup %7821  ;;  %v4769_v60 = vmul.f32 %v4705_v13, %v10366_v4  ;;  %v4711_v47 = vmul.f32 %v4647_v39, %v10414_v54  ;;  %v4887_v20 = vmul.f32 0.7978846, %v4823_v56 }
0x1051   : > { %7839 = vtanh.f32 %v4883_v62  ;;  %v4713_v7 = vmul.f32 %v4649_v49, %v10423_v23  ;;  %v4715_v6 = vmul.f32 %v4651_v24, %v10426_v17  ;;  %v4891_v46 = vmul.f32 0.7978846, %v4827_v50 }
0x1052   : > { %7841 = vtanh.f32 %v4885_v52  ;;  %v10456_v9 = vpop.eup %7823  ;;  %v5132_v32 = vpack.c.bf16 %v10392_v25, %v10347_v44  ;;  %v5134_v41 = vpack.c.bf16 %v10404_v29, %v10360_v1  ;;  %v4771_v13 = vmul.f32 %v4707_v55, %v10371_v40  ;;  %v11490_v1 = vld [vmem:[#allocation26_spill] sm:$0xff] }
0x1053   : > { %7843 = vtanh.f32 %v4889_v42  ;;  %v10464_v39 = vmul.f32 %v4709_v43, %v10395_v63  ;;  %v4904_v51 = vmul.f32 0.7978846, %v4840_v2  ;;  %v4842_v61 = vadd.f32 %v4778_v58, %v10387_v26 }
0x1054   : > { %7845 = vtanh.f32 %v4887_v20  ;;  %v10468_v62 = vmul.f32 %v4711_v47, %v10414_v54  ;;  %v4561_v0 = vmul.f32 0.5, %v10224_v31  ;;  %v4829_v49 = vadd.f32 %v10382_v57, %v10318_v33 }
0x1055   : > { %7847 = vtanh.f32 %v4891_v46  ;;  %v10473_v24 = vpop.eup %7825  ;;  %v10476_v55 = vmul.f32 %v4713_v7, %v10423_v23  ;;  %v10479_v43 = vmul.f32 %v4715_v6, %v10426_v17  ;;  %v4563_v16 = vmul.f32 0.5, %v10229_v28 }
0x1056   : > { %v4833_v58 = vadd.f32 %v4769_v60, %v10366_v4  ;;  %v5016_v56 = vadd.f32 1.0, %v7818_v5  ;;  %v4893_v2 = vmul.f32 0.7978846, %v4829_v49  ;;  %v4831_v31 = vadd.f32 %v10407_v37, %v10335_v30 }
0x1057   : > { %v7828_v52 = vpop.eup %7827  ;;  %v4835_v57 = vadd.f32 %v4771_v13, %v10371_v40  ;;  %7849 = vtanh.f32 %v4904_v51  ;;  %v4906_v42 = vmul.f32 0.7978846, %v4842_v61  ;;  %v4568_v6 = vmul.f32 0.5, %v10235_v15 }
0x1058   : > { %v5005_v50 = vadd.f32 1.0, %v7828_v52  ;;  %v4897_v47 = vmul.f32 0.7978846, %v4833_v58  ;;  %7851 = vtanh.f32 %v4893_v2  ;;  %v4895_v28 = vmul.f32 0.7978846, %v4831_v31 }
0x1059   : > { %v7830_v7 = vpop.eup %7829  ;;  %v4899_v46 = vmul.f32 0.7978846, %v4835_v57  ;;  %v4565_v49 = vmul.f32 0.5, %v10242_v21  ;;  %v5012_v37 = vadd.f32 1.0, %v10389_v38  ;;  %v4564_v51 = vmul.f32 0.5, %v10208_v36 }
0x105a   : > { %v4404_v20 = vpop.f32.mrf.mxu1  ;;  %v10487_v60 = vpop.eup %7831  ;;  %v5009_v5 = vadd.f32 1.0, %v7830_v7  ;;  %7853 = vtanh.f32 %v4897_v47  ;;  %v10494_v61 = vmul.f32 %v5016_v56, %v4568_v6  ;;  %v5014_v58 = vadd.f32 1.0, %v10401_v53 }
0x105b   : > { %v10491_v13 = vpop.eup %7833  ;;  %7855 = vtanh.f32 %v4895_v28  ;;  %v5069_v2 = vmul.f32 %v5005_v50, %v10238_v48  ;;  %v5018_v21 = vadd.f32 1.0, %v10436_v14  ;;  %v4517_v38 = vpop.f32.mrf.mxu0  ;;  %v4569_v36 = vmul.f32 0.5, %v10268_v22 }
0x105c   : > { %v10497_v15 = vpop.f32.mrf.mxu1  ;;  %v10499_v52 = vpop.eup %7835  ;;  %v5073_v31 = vmul.f32 %v5009_v5, %v4561_v0  ;;  %7857 = vtanh.f32 %v4899_v46  ;;  %v4567_v56 = vmul.f32 0.5, %v10259_v45  ;;  %v4566_v53 = vmul.f32 0.5, %v10211_v19 }
0x105d   : > { %v7838_v57 = vpop.eup %7837  ;;  %7859 = vtanh.f32 %v4906_v42  ;;  %v10506_v28 = vmul.f32 %v5012_v37, %v4564_v51  ;;  %v4570_v48 = vmul.f32 0.5, %v10245_v12  ;;  %v4571_v14 = vmul.f32 0.5, %v10274_v35  ;;  %v10522_v51 = vpop.f32.mrf.mxu0 }
0x105e   : > { %v7840_v47 = vpop.eup %7839  ;;  %v5133_v7 = vpack.c.bf16 %v5073_v31, %v5069_v2  ;;  %v5007_v6 = vadd.f32 1.0, %v7838_v57  ;;  %v10510_v46 = vmul.f32 %v5014_v58, %v4566_v53  ;;  %v10513_v42 = vmul.f32 0.5, %v10318_v33  ;;  %v10515_v22 = vpop.f32.mrf.mxu1 }
0x105f   : > { %v7842_v0 = vpop.eup %7841  ;;  %v5011_v50 = vadd.f32 1.0, %v7840_v47  ;;  %v5136_v5 = vpack.c.bf16 %v10494_v61, %v10506_v28  ;;  %v10519_v37 = vmul.f32 %v5018_v21, %v4570_v48  ;;  %v4577_v12 = vmul.f32 0.5, %v10366_v4 }
0x1060   : > { %v7844_v45 = vpop.eup %7843  ;;  %5459 = vmatprep.mubr.bf16.mxu1 %v5133_v7  ;;  %v5013_v19 = vadd.f32 1.0, %v7842_v0  ;;  %v5071_v58 = vmul.f32 %v5007_v6, %v10251_v10  ;;  %v10529_v31 = vmul.f32 0.5, %v10335_v30  ;;  %v10532_v21 = vadd.f32 %v4404_v20, %v10178_v18  ;;  %v10540_v53 = vpop.f32.mrf.mxu1  ;;  %v11487_v30 = vld [vmem:[#allocation22_spill] sm:$0xff] }
0x1061   : > { %v7846_v35 = vpop.eup %7845  ;;  %v5075_v2 = vmul.f32 %v5011_v50, %v4563_v16  ;;  %5460 = vmatmul.mubr.bf16.vlgmr.msra.gmra.mxu1 %v5132_v32  ;;  %v5017_v33 = vadd.f32 1.0, %v7844_v45  ;;  %v10535_v4 = vadd.f32 %v4517_v38, %v10182_v59  ;;  %v4837_v10 = vadd.f32 %v10464_v39, %v10395_v63  ;;  %v10548_v39 = vpop.f32.mrf.mxu0 }
0x1062   : > { %v7848_v57 = vpop.eup %7847  ;;  %v5015_v61 = vadd.f32 1.0, %v7846_v35  ;;  %7157 = vmatpush3.bf16.msra.mxu1 %v10082_v27  ;;  %v5077_v44 = vmul.f32 %v5013_v19, %v4565_v49  ;;  %v5138_v20 = vpack.c.bf16 %v10519_v37, %v10510_v46  ;;  %v4579_v47 = vmul.f32 0.5, %v10371_v40  ;;  %v11488_v40 = vld [vmem:[#allocation44_spill] sm:$0xff]  ;;  %v11489_v46 = vld [vmem:[#allocation27_spill] sm:$0xff]  ;;  %v10562_v37 = vpop.f32.mrf.mxu1 }
0x1063   : > { %v5135_v16 = vpack.c.bf16 %v5075_v2, %v5071_v58  ;;  %v5081_v25 = vmul.f32 %v5017_v33, %v4569_v36  ;;  %v5019_v32 = vadd.f32 1.0, %v7848_v57  ;;  %7150 = vmatprep.subr.bf16.mxu1 %v11487_v30  ;;  %v4841_v38 = vadd.f32 %v10476_v55, %v10423_v23  ;;  %v11491_v35 = vld [vmem:[#allocation12_spill] sm:$0xff]  ;;  %v10568_v33 = vpop.f32.mrf.mxu0 }
0x1064   : > { %v4901_v7 = vmul.f32 0.7978846, %v4837_v10  ;;  %v10550_v27 = vpop.eup %7849  ;;  %v5079_v36 = vmul.f32 %v5015_v61, %v4567_v56  ;;  %v5024_v28 = vadd.f32 1.0, %v10473_v24  ;;  %v4576_v0 = vmul.f32 0.5, %v11488_v40  ;;  %v11494_v40 = vld [vmem:[#allocation45_spill] sm:$0xff] }
0x1065   : > { %5556 = vmatprep.mubr.bf16.mxu0 %v5135_v16  ;;  %v5137_v49 = vpack.c.bf16 %v5081_v25, %v5077_v44  ;;  %v5083_v6 = vmul.f32 %v5019_v32, %v4571_v14  ;;  %v7852_v48 = vpop.eup %7851  ;;  %v4652_v55 = vmul.f32 0.044715, %v10532_v21  ;;  %v4905_v50 = vmul.f32 0.7978846, %v4841_v38 }
0x1066   : > { %5557 = vmatmul.mubr.bf16.vlgmr.msra.gmra.mxu0 %v5134_v41  ;;  %7861 = vtanh.f32 %v4901_v7  ;;  %7158 = vmatpush3.bf16.msra.mxu1 %v11489_v46  ;;  %v5021_v56 = vadd.f32 1.0, %v7852_v48  ;;  %v4654_v14 = vmul.f32 0.044715, %v10535_v4  ;;  %v4839_v24 = vadd.f32 %v10468_v62, %v10414_v54  ;;  %v11492_v7 = vld [vmem:[#allocation32_spill] sm:$0xff]  ;;  %v11495_v46 = vld [vmem:[#allocation43_spill] sm:$0xff] }
0x1067   : > { %v7854_v45 = vpop.eup %7853  ;;  %5467 = vmatprep.mubr.bf16.mxu1 %v5137_v49  ;;  %v5139_v19 = vpack.c.bf16 %v5083_v6, %v5079_v36  ;;  %7151 = vmatprep.subr.bf16.mxu1 %v11490_v1  ;;  %v4572_v58 = vmul.f32 0.5, %v11491_v35  ;;  %7863 = vtanh.f32 %v4905_v50  ;;  %v4843_v2 = vadd.f32 %v10479_v43, %v10426_v17  ;;  %v11497_v1 = vld [vmem:[#allocation35_spill] sm:$0xff] }
0x1068   : > { %v7856_v29 = vpop.eup %7855  ;;  %v5025_v41 = vadd.f32 1.0, %v7854_v45  ;;  %v5020_v62 = vadd.f32 1.0, %v10450_v34  ;;  %v5088_v10 = vmul.f32 %v5024_v28, %v4576_v0  ;;  %v4903_v16 = vmul.f32 0.7978846, %v4839_v24  ;;  %v11493_v34 = vld [vmem:[#allocation33_spill] sm:$0xff] }
0x1069   : > { %v7858_v57 = vpop.eup %7857  ;;  %5564 = vmatprep.mubr.bf16.mxu0 %v5139_v19  ;;  %5468 = vmatmul.mubr.bf16.gmra.mxu1 %v5136_v5  ;;  %v5023_v61 = vadd.f32 1.0, %v7856_v29  ;;  %v5085_v25 = vmul.f32 %v5021_v56, %v10513_v42  ;;  %v4907_v38 = vmul.f32 0.7978846, %v4843_v2  ;;  %v5026_v43 = vadd.f32 1.0, %v10487_v60  ;;  %v10576_v5 = vpop.f32.mrf.mxu1 }
0x106a   : > { %v7860_v44 = vpop.eup %7859  ;;  %v5089_v32 = vmul.f32 %v5025_v41, %v4577_v12  ;;  %v5027_v30 = vadd.f32 1.0, %v7858_v57  ;;  %7159 = vmatpush3.bf16.msra.mxu1 %v11492_v7  ;;  %v4716_v49 = vmul.f32 %v4652_v55, %v10532_v21  ;;  %v4718_v36 = vmul.f32 %v4654_v14, %v10535_v4  ;;  %v10580_v12 = vpop.f32.mrf.mxu0  ;;  %v11496_v14 = vld [vmem:[#allocation34_spill] sm:$0xff] }
0x106b   : > { %7865 = vtanh.f32 %v4903_v16  ;;  %7152 = vmatprep.subr.bf16.mxu1 %v11493_v34  ;;  %v5087_v28 = vmul.f32 %v5023_v61, %v10529_v31  ;;  %v5084_v48 = vmul.f32 %v5020_v62, %v4572_v58  ;;  %v4578_v0 = vmul.f32 0.5, %v11494_v40  ;;  %v10585_v56 = vpop.f32.mrf.mxu1  ;;  %v11498_v62 = vld [vmem:[#allocation36_spill] sm:$0xff]  ;;  %v11502_v40 = vld [vmem:[#allocation38_spill] sm:$0xff] }
0x106c   : > { %v5141_v6 = vpack.c.bf16 %v5089_v32, %v5085_v25  ;;  %v5091_v42 = vmul.f32 %v5027_v30, %v4579_v47  ;;  %7867 = vtanh.f32 %v4907_v38  ;;  %v5022_v60 = vadd.f32 1.0, %v10456_v9  ;;  %v10590_v24 = vpop.f32.mrf.mxu0  ;;  %v11499_v32 = vld [vmem:[#allocation37_spill] sm:$0xff]  ;;  %v11500_v30 = vld [vmem:[#allocation46_spill] sm:$0xff] }
0x106d   : > { %v5140_v50 = vpack.c.bf16 %v5088_v10, %v5084_v48  ;;  %v4574_v45 = vmul.f32 0.5, %v11495_v46  ;;  %v5090_v19 = vmul.f32 %v5026_v43, %v4578_v0  ;;  %v4780_v31 = vmul.f32 %v4716_v49, %v10532_v21  ;;  %v10601_v61 = vpop.f32.mrf.mxu1 }
0x106e   : > { %5565 = vmatmul.mubr.bf16.gmra.mxu0 %v5138_v20  ;;  %5475 = vmatprep.mubr.bf16.mxu1 %v5141_v6  ;;  %v5143_v55 = vpack.c.bf16 %v5091_v42, %v5087_v28  ;;  %v4782_v47 = vmul.f32 %v4718_v36, %v10535_v4  ;;  %v10595_v20 = vadd.f32 %v10515_v22, %v10178_v18  ;;  %v4581_v29 = vmul.f32 0.5, %v10395_v63  ;;  %v4531_v25 = vpop.f32.mrf.mxu0  ;;  %v11501_v36 = vld [vmem:[#allocation47_spill] sm:$0xff] }
0x106f   : > { %7160 = vmatpush3.bf16.msra.mxu1 %v11496_v14  ;;  %v5086_v9 = vmul.f32 %v5022_v60, %v4574_v45  ;;  %v4585_v58 = vmul.f32 0.5, %v10423_v23  ;;  %v5028_v2 = vadd.f32 1.0, %v10491_v13  ;;  %v5032_v57 = vadd.f32 1.0, %v10550_v27 }
0x1070   : > { %5572 = vmatprep.mubr.bf16.mxu0 %v5143_v55  ;;  %7153 = vmatprep.subr.bf16.mxu1 %v11497_v1  ;;  %v4844_v10 = vadd.f32 %v4780_v31, %v10532_v21  ;;  %v10606_v16 = vadd.f32 %v4782_v47, %v10535_v4  ;;  %v4583_v63 = vmul.f32 0.5, %v10414_v54  ;;  %v4580_v13 = vmul.f32 0.5, %v11500_v30 }
0x1071   : > { %5476 = vmatmul.mubr.bf16.gmra.mxu1 %v5140_v50  ;;  %v5142_v35 = vpack.c.bf16 %v5090_v19, %v5086_v9  ;;  %v4584_v27 = vmul.f32 0.5, %v10379_v3  ;;  %v4656_v38 = vmul.f32 0.044715, %v10595_v20  ;;  %v10615_v7 = vadd.f32 %v10548_v39, %v10182_v59  ;;  %v4424_v3 = vpop.f32.mrf.mxu1  ;;  %v11503_v50 = vld [vmem:[#allocation39_spill] sm:$0xff] }
0x1072   : > { %v4587_v49 = vmul.f32 0.5, %v10426_v17  ;;  %v4582_v54 = vmul.f32 0.5, %v11501_v36  ;;  %v4586_v34 = vmul.f32 0.5, %v10387_v26  ;;  %v5092_v6 = vmul.f32 %v5028_v2, %v4580_v13  ;;  %v10630_v26 = vpop.f32.mrf.mxu0  ;;  %v11507_v36 = vld [vmem:[#allocation42_spill] sm:$0xff] }
0x1073   : > { %v7862_v41 = vpop.eup %7861  ;;  %7161 = vmatpush3.bf16.msra.mxu1 %v11498_v62  ;;  %v5096_v28 = vmul.f32 %v5032_v57, %v4584_v27  ;;  %v5030_v42 = vadd.f32 1.0, %v10499_v52  ;;  %v5034_v48 = vadd.f32 1.0, %v7860_v44  ;;  %v10624_v55 = vadd.f32 %v10497_v15, %v10195_v8  ;;  %v11505_v57 = vld [vmem:[#allocation41_spill] sm:$0xff] }
0x1074   : > { %v5029_v22 = vadd.f32 1.0, %v7862_v41  ;;  %7154 = vmatprep.subr.bf16.mxu1 %v11499_v32  ;;  %v7864_v23 = vpop.eup %7863  ;;  %v10628_v17 = vadd.f32 %v10562_v37, %v10178_v18  ;;  %v10635_v46 = vadd.f32 %v10522_v51, %v10199_v11  ;;  %v4720_v45 = vmul.f32 %v4656_v38, %v10595_v20  ;;  %v11504_v41 = vld [vmem:[#allocation40_spill] sm:$0xff] }
0x1075   : > { %v5033_v43 = vadd.f32 1.0, %v7864_v23  ;;  %v4658_v19 = vmul.f32 0.044715, %v10615_v7  ;;  %v10641_v37 = vadd.f32 %v10540_v53, %v10195_v8  ;;  %v10645_v31 = vadd.f32 %v10580_v12, %v10182_v59  ;;  %v4537_v12 = vpop.f32.mrf.mxu0 }
0x1076   : > { %5573 = vmatmul.mubr.bf16.gmra.mxu0 %v5142_v35  ;;  %v5093_v60 = vmul.f32 %v5029_v22, %v4581_v29  ;;  %v5144_v47 = vpack.c.bf16 %v5096_v28, %v5092_v6  ;;  %v5094_v1 = vmul.f32 %v5030_v42, %v4582_v54  ;;  %v5098_v9 = vmul.f32 %v5034_v48, %v4586_v34  ;;  %v10651_v29 = vpop.f32.mrf.mxu1 }
0x1077   : > { %7162 = vmatpush3.bf16.msra.mxu1 %v11502_v40  ;;  %v5097_v39 = vmul.f32 %v5033_v43, %v4585_v58  ;;  %v10649_v51 = vadd.f32 %v10568_v33, %v10199_v11  ;;  %v4653_v53 = vmul.f32 0.044715, %v10624_v55  ;;  %v4660_v2 = vmul.f32 0.044715, %v10628_v17  ;;  %v4539_v28 = vpop.f32.mrf.mxu0 }
0x1078   : > { %v7866_v0 = vpop.eup %7865  ;;  %7155 = vmatprep.subr.bf16.mxu1 %v11503_v50  ;;  %v4655_v62 = vmul.f32 0.044715, %v10635_v46  ;;  %v4784_v33 = vmul.f32 %v4720_v45, %v10595_v20  ;;  %v4722_v22 = vmul.f32 %v4658_v19, %v10615_v7  ;;  %v10662_v32 = vadd.f32 %v10585_v56, %v10178_v18 }
0x1079   : > { %v7868_v52 = vpop.eup %7867  ;;  %v5031_v44 = vadd.f32 1.0, %v7866_v0  ;;  %v5145_v15 = vpack.c.bf16 %v5097_v39, %v5093_v60  ;;  %v4657_v23 = vmul.f32 0.044715, %v10641_v37  ;;  %v4662_v30 = vmul.f32 0.044715, %v10645_v31 }
0x107a   : > { %v5035_v14 = vadd.f32 1.0, %v7868_v52  ;;  %v10667_v13 = vadd.f32 %v4531_v25, %v10182_v59  ;;  %v4908_v27 = vmul.f32 0.7978846, %v4844_v10  ;;  %v5146_v38 = vpack.c.bf16 %v5098_v9, %v5094_v1 }
0x107b   : > { %7163 = vmatpush3.bf16.msra.mxu1 %v11504_v41  ;;  %5483 = vmatprep.mubr.bf16.mxu1 %v5145_v15  ;;  %v5095_v35 = vmul.f32 %v5031_v44, %v4583_v63  ;;  %v4659_v43 = vmul.f32 0.044715, %v10649_v51  ;;  %v4910_v54 = vmul.f32 0.7978846, %v10606_v16  ;;  %v4717_v56 = vmul.f32 %v4653_v53, %v10624_v55 }
0x107c   : > { %v5099_v58 = vmul.f32 %v5035_v14, %v4587_v49  ;;  %7156 = vmatprep.subr.bf16.mxu1 %v11505_v57  ;;  %5484 = vmatmul.mubr.bf16.gmra.mxu1 %v5144_v47  ;;  %11506 = vst [vmem:[#allocation22_spill] sm:$0xff] %v10667_v13  ;;  %v4428_v49 = vpop.f32.mrf.mxu1  ;;  %v4724_v34 = vmul.f32 %v4660_v2, %v10628_v17  ;;  %v4664_v48 = vmul.f32 0.044715, %v10662_v32  ;;  %7869 = vtanh.f32 %v4908_v27 }
0x107d   : > { %v10675_v6 = vadd.f32 %v4424_v3, %v10178_v18  ;;  %v4719_v10 = vmul.f32 %v4655_v62, %v10635_v46  ;;  %v4848_v25 = vadd.f32 %v4784_v33, %v10595_v20  ;;  %v4786_v42 = vmul.f32 %v4722_v22, %v10615_v7 }
0x107e   : > { %v5147_v63 = vpack.c.bf16 %v5099_v58, %v5095_v35  ;;  %v4721_v16 = vmul.f32 %v4657_v23, %v10641_v37  ;;  %v4726_v40 = vmul.f32 %v4662_v30, %v10645_v31  ;;  %v10685_v0 = vadd.f32 %v10576_v5, %v10195_v8  ;;  %v10690_v50 = vpop.f32.mrf.mxu1  ;;  %v4541_v5 = vpop.f32.mrf.mxu0 }
0x107f   : > { %7164 = vmatpush3.bf16.msra.mxu1 %v11507_v36  ;;  %11508 = vst [vmem:[#allocation44_spill] sm:$0xff] %v10675_v6  ;;  %v4666_v3 = vmul.f32 0.044715, %v10667_v13  ;;  %v4723_v60 = vmul.f32 %v4659_v43, %v10649_v51  ;;  %v4668_v39 = vmul.f32 0.044715, %v10675_v6  ;;  %7871 = vtanh.f32 %v4910_v54 }
0x1080   : > { %5580 = vmatprep.mubr.bf16.mxu0 %v5147_v63  ;;  %v10693_v52 = vmul.f32 %v4717_v56, %v10624_v55  ;;  %v4788_v44 = vmul.f32 %v4724_v34, %v10628_v17  ;;  %v10698_v45 = vadd.f32 %v10590_v24, %v10199_v11  ;;  %v10701_v19 = vmul.f32 %v4719_v10, %v10635_v46  ;;  %v4434_v57 = vpop.f32.mrf.mxu1  ;;  %v4543_v23 = vpop.f32.mrf.mxu0 }
0x1081   : > { %5581 = vmatmul.mubr.bf16.gmra.mxu0 %v5146_v38  ;;  %v4912_v15 = vmul.f32 0.7978846, %v4848_v25  ;;  %v4850_v14 = vadd.f32 %v4786_v42, %v10615_v7  ;;  %v4728_v47 = vmul.f32 %v4664_v48, %v10662_v32  ;;  %v10706_v1 = vmul.f32 %v4721_v16, %v10641_v37 }
0x1082   : > { %v4790_v9 = vmul.f32 %v4726_v40, %v10645_v31  ;;  %v4661_v41 = vmul.f32 0.044715, %v10685_v0  ;;  %v4730_v35 = vmul.f32 %v4666_v3, %v10667_v13  ;;  %v10712_v24 = vmul.f32 %v4723_v60, %v10649_v51  ;;  %v4547_v48 = vpop.f32.mrf.mxu0 }
0x1083   : > { %v10716_v58 = vadd.f32 %v10601_v61, %v10195_v8  ;;  %v4732_v53 = vmul.f32 %v4668_v39, %v10675_v6  ;;  %v10720_v2 = vadd.f32 %v4537_v12, %v10182_v59  ;;  %v4852_v62 = vadd.f32 %v4788_v44, %v10628_v17 }
0x1084   : > { %v4663_v33 = vmul.f32 0.044715, %v10698_v45  ;;  %v10726_v22 = vadd.f32 %v10630_v26, %v10199_v11  ;;  %v10729_v63 = vadd.f32 %v4428_v49, %v10178_v18  ;;  %7873 = vtanh.f32 %v4912_v15 }
0x1085   : > { %11509 = vst [vmem:[#allocation27_spill] sm:$0xff] %v10720_v2  ;;  %v4914_v61 = vmul.f32 0.7978846, %v4850_v14  ;;  %v4792_v30 = vmul.f32 %v4728_v47, %v10662_v32  ;;  %v10734_v12 = vadd.f32 %v10651_v29, %v10195_v8  ;;  %v4854_v27 = vadd.f32 %v4790_v9, %v10645_v31  ;;  %v4436_v29 = vpop.f32.mrf.mxu1 }
0x1086   : > { %11510 = vst [vmem:[#allocation26_spill] sm:$0xff] %v10729_v63  ;;  %v4725_v38 = vmul.f32 %v4661_v41, %v10685_v0  ;;  %v4794_v43 = vmul.f32 %v4730_v35, %v10667_v13  ;;  %v10740_v26 = vadd.f32 %v4541_v5, %v10182_v59  ;;  %v4665_v49 = vmul.f32 0.044715, %v10716_v58 }
0x1087   : > { %v4796_v36 = vmul.f32 %v4732_v53, %v10675_v6  ;;  %v4670_v54 = vmul.f32 0.044715, %v10720_v2  ;;  %v10746_v56 = vadd.f32 %v4539_v28, %v10199_v11  ;;  %v4916_v34 = vmul.f32 0.7978846, %v4852_v62  ;;  %v4438_v9 = vpop.f32.mrf.mxu1  ;;  %v4549_v62 = vpop.f32.mrf.mxu0 }
0x1088   : > { %11511 = vst [vmem:[#allocation12_spill] sm:$0xff] %v10740_v26  ;;  %v4727_v10 = vmul.f32 %v4663_v33, %v10698_v45  ;;  %v4667_v25 = vmul.f32 0.044715, %v10726_v22  ;;  %v4672_v42 = vmul.f32 0.044715, %v10729_v63  ;;  %7875 = vtanh.f32 %v4914_v61 }
0x1089   : > { %v4856_v16 = vadd.f32 %v4792_v30, %v10662_v32  ;;  %v4669_v40 = vmul.f32 0.044715, %v10734_v12  ;;  %v10754_v3 = vadd.f32 %v4434_v57, %v10178_v18  ;;  %v4918_v60 = vmul.f32 0.7978846, %v4854_v27  ;;  %v10765_v41 = vpop.eup %7869 }
0x108a   : > { %v10757_v28 = vmul.f32 %v4725_v38, %v10685_v0  ;;  %v4858_v39 = vadd.f32 %v4794_v43, %v10667_v13  ;;  %v4674_v44 = vmul.f32 0.044715, %v10740_v26  ;;  %v4729_v5 = vmul.f32 %v4665_v49, %v10716_v58 }
0x108b   : > { %v4860_v15 = vadd.f32 %v4796_v36, %v10675_v6  ;;  %v4734_v14 = vmul.f32 %v4670_v54, %v10720_v2  ;;  %v4671_v47 = vmul.f32 0.044715, %v10746_v56  ;;  %7877 = vtanh.f32 %v4916_v34 }
0x108c   : > { %v10768_v35 = vmul.f32 %v4727_v10, %v10698_v45  ;;  %v4731_v53 = vmul.f32 %v4667_v25, %v10726_v22  ;;  %v4736_v57 = vmul.f32 %v4672_v42, %v10729_v63  ;;  %v10772_v33 = vpop.eup %7871  ;;  %v4920_v61 = vmul.f32 0.7978846, %v4856_v16 }
0x108d   : > { %v4733_v30 = vmul.f32 %v4669_v40, %v10734_v12  ;;  %v10777_v27 = vadd.f32 %v10690_v50, %v10195_v8  ;;  %v4676_v38 = vmul.f32 0.044715, %v10754_v3  ;;  %7879 = vtanh.f32 %v4918_v60 }
0x108e   : > { %v4922_v43 = vmul.f32 0.7978846, %v4858_v39  ;;  %v4738_v49 = vmul.f32 %v4674_v44, %v10740_v26  ;;  %v10782_v36 = vadd.f32 %v4438_v9, %v10178_v18  ;;  %v10785_v54 = vmul.f32 %v4729_v5, %v10716_v58  ;;  %v4551_v18 = vpop.f32.mrf.mxu0 }
0x108f   : > { %v4924_v34 = vmul.f32 0.7978846, %v4860_v15  ;;  %v4798_v10 = vmul.f32 %v4734_v14, %v10720_v2  ;;  %v4735_v25 = vmul.f32 %v4671_v47, %v10746_v56  ;;  %v10790_v50 = vmul.f32 %v4731_v53, %v10726_v22  ;;  %v4440_v53 = vpop.f32.mrf.mxu1 }
0x1090   : > { %v4800_v42 = vmul.f32 %v4736_v57, %v10729_v63  ;;  %v10794_v16 = vadd.f32 %v4543_v23, %v10199_v11  ;;  %v10797_v40 = vadd.f32 %v4547_v48, %v10182_v59  ;;  %7881 = vtanh.f32 %v4920_v61 }
0x1091   : > { %v10800_v60 = vmul.f32 %v4733_v30, %v10734_v12  ;;  %v4673_v39 = vmul.f32 0.044715, %v10777_v27  ;;  %v4740_v44 = vmul.f32 %v4676_v38, %v10754_v3  ;;  %v10804_v5 = vpop.eup %7873  ;;  %7883 = vtanh.f32 %v4922_v43 }
0x1092   : > { %v4802_v15 = vmul.f32 %v4738_v49, %v10740_v26  ;;  %v10808_v23 = vadd.f32 %v4436_v29, %v10195_v8  ;;  %v4680_v48 = vmul.f32 0.044715, %v10782_v36  ;;  %7885 = vtanh.f32 %v4924_v34 }
0x1093   : > { %v4862_v14 = vadd.f32 %v4798_v10, %v10720_v2  ;;  %v10813_v47 = vmul.f32 %v4735_v25, %v10746_v56  ;;  %v10816_v9 = vadd.f32 %v4551_v18, %v10182_v59  ;;  %v4864_v57 = vadd.f32 %v4800_v42, %v10729_v63  ;;  %v4553_v18 = vpop.f32.mrf.mxu0 }
0x1094   : > { %v4675_v61 = vmul.f32 0.044715, %v10794_v16  ;;  %v4678_v30 = vmul.f32 0.044715, %v10797_v40  ;;  %v10822_v29 = vadd.f32 %v4549_v62, %v10199_v11  ;;  %v4737_v38 = vmul.f32 %v4673_v39, %v10777_v27 }
0x1095   : > { %v4804_v43 = vmul.f32 %v4740_v44, %v10754_v3  ;;  %v4845_v49 = vadd.f32 %v10693_v52, %v10624_v55  ;;  %v4849_v59 = vadd.f32 %v10706_v1, %v10641_v37  ;;  %v10830_v34 = vpop.eup %7875  ;;  %v4866_v10 = vadd.f32 %v4802_v15, %v10740_v26 }
0x1096   : > { %v4677_v25 = vmul.f32 0.044715, %v10808_v23  ;;  %v4744_v42 = vmul.f32 %v4680_v48, %v10782_v36  ;;  %v10836_v62 = vadd.f32 %v4440_v53, %v10195_v8  ;;  %v4682_v39 = vmul.f32 0.044715, %v10816_v9 }
0x1097   : > { %v4909_v44 = vmul.f32 0.7978846, %v4845_v49  ;;  %v4913_v2 = vmul.f32 0.7978846, %v4849_v59  ;;  %v4847_v52 = vadd.f32 %v10701_v19, %v10635_v46  ;;  %v4928_v1 = vmul.f32 0.7978846, %v4864_v57 }
0x1098   : > { %v4739_v6 = vmul.f32 %v4675_v61, %v10794_v16  ;;  %v4742_v15 = vmul.f32 %v4678_v30, %v10797_v40  ;;  %v4679_v26 = vmul.f32 0.044715, %v10822_v29  ;;  %v10844_v63 = vpop.eup %7877  ;;  %v4868_v8 = vadd.f32 %v4804_v43, %v10754_v3 }
0x1099   : > { %v10848_v48 = vadd.f32 %v4553_v18, %v10199_v11  ;;  %v4851_v53 = vadd.f32 %v10712_v24, %v10649_v51  ;;  %v4911_v49 = vmul.f32 0.7978846, %v4847_v52  ;;  %v4930_v59 = vmul.f32 0.7978846, %v4866_v10 }
0x109a   : > { %v4741_v19 = vmul.f32 %v4677_v25, %v10808_v23  ;;  %v4681_v57 = vmul.f32 0.044715, %v10836_v62  ;;  %7887 = vtanh.f32 %v4909_v44  ;;  %v10854_v61 = vpop.eup %7879  ;;  %v4808_v30 = vmul.f32 %v4744_v42, %v10782_v36 }
0x109b   : > { %v4746_v13 = vmul.f32 %v4682_v39, %v10816_v9  ;;  %7889 = vtanh.f32 %v4913_v2  ;;  %v4915_v43 = vmul.f32 0.7978846, %v4851_v53  ;;  %v10858_v11 = vmul.f32 0.7978846, %v4862_v14 }
0x109c   : > { %7891 = vtanh.f32 %v4928_v1  ;;  %v4801_v24 = vmul.f32 %v4737_v38, %v10777_v27  ;;  %v4743_v10 = vmul.f32 %v4679_v26, %v10822_v29  ;;  %v10863_v25 = vmul.f32 %v4739_v6, %v10794_v16 }
0x109d   : > { %v4932_v18 = vmul.f32 0.7978846, %v4868_v8  ;;  %v4683_v44 = vmul.f32 0.044715, %v10848_v48  ;;  %7893 = vtanh.f32 %v4911_v49  ;;  %v10866_v52 = vpop.eup %7881  ;;  %v10869_v42 = vmul.f32 %v4742_v15, %v10797_v40 }
0x109e   : > { %v10872_v2 = vmul.f32 %v4741_v19, %v10808_v23  ;;  %v4745_v14 = vmul.f32 %v4681_v57, %v10836_v62  ;;  %7895 = vtanh.f32 %v4915_v43  ;;  %v10875_v38 = vpop.eup %7883  ;;  %v4872_v6 = vadd.f32 %v4808_v30, %v10782_v36 }
0x109f   : > { %7897 = vtanh.f32 %v4930_v59  ;;  %v4810_v26 = vmul.f32 %v4746_v13, %v10816_v9  ;;  %v4853_v39 = vadd.f32 %v10757_v28, %v10685_v0  ;;  %v10881_v1 = vpop.eup %7885  ;;  %v10884_v15 = vmul.f32 %v4743_v10, %v10822_v29 }
0x10a0   : > { %v4589_v8 = vmul.f32 0.5, %v10624_v55  ;;  %v4593_v53 = vmul.f32 0.5, %v10641_v37  ;;  %v4857_v49 = vadd.f32 %v10785_v54, %v10716_v58  ;;  %7899 = vtanh.f32 %v4932_v18 }
0x10a1   : > { %v4747_v59 = vmul.f32 %v4683_v44, %v10848_v48  ;;  %v4917_v19 = vmul.f32 0.7978846, %v4853_v39  ;;  %v4855_v13 = vadd.f32 %v10768_v35, %v10698_v45  ;;  %v4809_v28 = vmul.f32 %v4745_v14, %v10836_v62 }
0x10a2   : > { %v5040_v57 = vadd.f32 1.0, %v10804_v5  ;;  %v4921_v30 = vmul.f32 0.7978846, %v4857_v49  ;;  %v4859_v55 = vadd.f32 %v10790_v50, %v10726_v22  ;;  %v4936_v43 = vmul.f32 0.7978846, %v4872_v6 }
0x10a3   : > { %v10898_v37 = vadd.f32 %v4810_v26, %v10816_v9  ;;  %7901 = vtanh.f32 %v4917_v19  ;;  %v4919_v54 = vmul.f32 0.7978846, %v4855_v13  ;;  %v4592_v10 = vmul.f32 0.5, %v10595_v20 }
0x10a4   : > { %v5036_v18 = vadd.f32 1.0, %v10765_v41  ;;  %7903 = vtanh.f32 %v4921_v30  ;;  %v4923_v35 = vmul.f32 0.7978846, %v4859_v55  ;;  %v10903_v44 = vmul.f32 %v4747_v59, %v10848_v48 }
0x10a5   : > { %v4591_v5 = vmul.f32 0.5, %v10635_v46  ;;  %v4588_v14 = vmul.f32 0.5, %v10532_v21  ;;  %7905 = vtanh.f32 %v4919_v54  ;;  %v5104_v50 = vmul.f32 %v5040_v57, %v4592_v10 }
0x10a6   : > { %v5038_v6 = vadd.f32 1.0, %v10772_v33  ;;  %v5042_v26 = vadd.f32 1.0, %v10830_v34  ;;  %7907 = vtanh.f32 %v4923_v35  ;;  %v4595_v20 = vmul.f32 0.5, %v10649_v51 }
0x10a7   : > { %v7888_v39 = vpop.eup %7887  ;;  %7909 = vtanh.f32 %v4936_v43  ;;  %v4861_v41 = vadd.f32 %v10800_v60, %v10734_v12  ;;  %v4865_v49 = vadd.f32 %v4801_v24, %v10777_v27  ;;  %v5100_v19 = vmul.f32 %v5036_v18, %v4588_v14 }
0x10a8   : > { %v7890_v59 = vpop.eup %7889  ;;  %v5037_v46 = vadd.f32 1.0, %v7888_v39  ;;  %v4590_v21 = vmul.f32 0.5, %v10535_v4  ;;  %v4594_v13 = vmul.f32 0.5, %v10615_v7  ;;  %v4597_v57 = vmul.f32 0.5, %v10685_v0 }
0x10a9   : > { %v10915_v33 = vpop.eup %7891  ;;  %v5041_v34 = vadd.f32 1.0, %v7890_v59  ;;  %v4925_v30 = vmul.f32 0.7978846, %v4861_v41  ;;  %v4929_v55 = vmul.f32 0.7978846, %v4865_v49  ;;  %v5148_v43 = vpack.c.bf16 %v5104_v50, %v5100_v19 }
0x10aa   : > { %v7894_v51 = vpop.eup %7893  ;;  %v5102_v54 = vmul.f32 %v5038_v6, %v4590_v21  ;;  %v5106_v60 = vmul.f32 %v5042_v26, %v4594_v13  ;;  %v4601_v24 = vmul.f32 0.5, %v10716_v58  ;;  %v5101_v35 = vmul.f32 %v5037_v46, %v4589_v8 }
0x10ab   : > { %v7896_v10 = vpop.eup %7895  ;;  %v5105_v18 = vmul.f32 %v5041_v34, %v4593_v53  ;;  %v5039_v14 = vadd.f32 1.0, %v7894_v51  ;;  %7911 = vtanh.f32 %v4925_v30  ;;  %v4599_v39 = vmul.f32 0.5, %v10698_v45 }
0x10ac   : > { %v10919_v4 = vpop.eup %7897  ;;  %v5043_v7 = vadd.f32 1.0, %v7896_v10  ;;  %v5044_v0 = vadd.f32 1.0, %v10844_v63  ;;  %7913 = vtanh.f32 %v4929_v55  ;;  %v4603_v50 = vmul.f32 0.5, %v10726_v22 }
0x10ad   : > { %v5149_v41 = vpack.c.bf16 %v5105_v18, %v5101_v35  ;;  %v5048_v6 = vadd.f32 1.0, %v10866_v52  ;;  %v4869_v58 = vadd.f32 %v10872_v2, %v10808_v23  ;;  %v10927_v8 = vpop.eup %7899  ;;  %v5103_v53 = vmul.f32 %v5039_v14, %v4591_v5 }
0x10ae   : > { %v5107_v26 = vmul.f32 %v5043_v7, %v4595_v20  ;;  %v4596_v49 = vmul.f32 0.5, %v10628_v17  ;;  %v4873_v59 = vadd.f32 %v4809_v28, %v10836_v62  ;;  %v5150_v45 = vpack.c.bf16 %v5106_v60, %v5102_v54 }
0x10af   : > { %5491 = vmatprep.mubr.bf16.mxu1 %v5149_v41  ;;  %v4600_v63 = vmul.f32 0.5, %v10662_v32  ;;  %v5046_v46 = vadd.f32 1.0, %v10854_v61  ;;  %v4933_v22 = vmul.f32 0.7978846, %v4869_v58  ;;  %v4598_v2 = vmul.f32 0.5, %v10645_v31 }
0x10b0   : > { %v7902_v19 = vpop.eup %7901  ;;  %v5151_v52 = vpack.c.bf16 %v5107_v26, %v5103_v53  ;;  %5492 = vmatmul.mubr.bf16.gmra.mxu1 %v5148_v43  ;;  %v5108_v21 = vmul.f32 %v5044_v0, %v4596_v49  ;;  %v4937_v13 = vmul.f32 0.7978846, %v4873_v59  ;;  %v5050_v17 = vadd.f32 1.0, %v10875_v38  ;;  %v11512_v43 = vld [vmem:[#allocation22_spill] sm:$0xff] }
0x10b1   : > { %v7904_v5 = vpop.eup %7903  ;;  %v5045_v20 = vadd.f32 1.0, %v7902_v19  ;;  %v5112_v34 = vmul.f32 %v5048_v6, %v4600_v63  ;;  %7915 = vtanh.f32 %v4933_v22  ;;  %v4863_v32 = vadd.f32 %v10813_v47, %v10746_v56  ;;  %v11513_v59 = vld [vmem:[#allocation26_spill] sm:$0xff]  ;;  %v11514_v22 = vld [vmem:[#allocation44_spill] sm:$0xff] }
0x10b2   : > { %v7906_v28 = vpop.eup %7905  ;;  %5588 = vmatprep.mubr.bf16.mxu0 %v5151_v52  ;;  %v5049_v30 = vadd.f32 1.0, %v7904_v5  ;;  %7917 = vtanh.f32 %v4937_v13  ;;  %v4867_v61 = vadd.f32 %v10863_v25, %v10794_v16  ;;  %v4602_v54 = vmul.f32 0.5, %v11512_v43 }
0x10b3   : > { %v7908_v55 = vpop.eup %7907  ;;  %5589 = vmatmul.mubr.bf16.gmra.mxu0 %v5150_v45  ;;  %v5109_v31 = vmul.f32 %v5045_v20, %v4597_v57  ;;  %v5047_v51 = vadd.f32 1.0, %v7906_v28  ;;  %v5110_v60 = vmul.f32 %v5046_v46, %v4598_v2  ;;  %v4927_v18 = vmul.f32 0.7978846, %v4863_v32 }
0x10b4   : > { %v7910_v10 = vpop.eup %7909  ;;  %v5113_v38 = vmul.f32 %v5049_v30, %v4601_v24  ;;  %v5051_v35 = vadd.f32 1.0, %v7908_v55  ;;  %v4931_v14 = vmul.f32 0.7978846, %v4867_v61  ;;  %v5152_v7 = vpack.c.bf16 %v5112_v34, %v5108_v21 }
0x10b5   : > { %v5114_v0 = vmul.f32 %v5050_v17, %v4602_v54  ;;  %v4871_v47 = vadd.f32 %v10884_v15, %v10822_v29  ;;  %v4875_v25 = vadd.f32 %v10903_v44, %v10848_v48  ;;  %v5111_v6 = vmul.f32 %v5047_v51, %v4599_v39 }
0x10b6   : > { %v5153_v41 = vpack.c.bf16 %v5113_v38, %v5109_v31  ;;  %v5115_v57 = vmul.f32 %v5051_v35, %v4603_v50  ;;  %7919 = vtanh.f32 %v4927_v18  ;;  %v5056_v58 = vadd.f32 1.0, %v10915_v33 }
0x10b7   : > { %7921 = vtanh.f32 %v4931_v14  ;;  %v4935_v53 = vmul.f32 0.7978846, %v4871_v47  ;;  %v4939_v24 = vmul.f32 0.7978846, %v4875_v25  ;;  %v4870_v49 = vadd.f32 %v10869_v42, %v10797_v40 }
0x10b8   : > { %v7912_v26 = vpop.eup %7911  ;;  %7923 = vtanh.f32 %v10858_v11  ;;  %5499 = vmatprep.mubr.bf16.mxu1 %v5153_v41  ;;  %v5155_v15 = vpack.c.bf16 %v5115_v57, %v5111_v6  ;;  %v4608_v45 = vmul.f32 0.5, %v11513_v59  ;;  %v5154_v39 = vpack.c.bf16 %v5114_v0, %v5110_v60  ;;  %v11515_v6 = vld [vmem:[#allocation12_spill] sm:$0xff] }
0x10b9   : > { %v7914_v44 = vpop.eup %7913  ;;  %5500 = vmatmul.mubr.bf16.gmra.mxu1 %v5152_v7  ;;  %v5053_v50 = vadd.f32 1.0, %v7912_v26  ;;  %v5052_v63 = vadd.f32 1.0, %v10881_v1  ;;  %7925 = vtanh.f32 %v4935_v53  ;;  %v4605_v33 = vmul.f32 0.5, %v10734_v12 }
0x10ba   : > { %5596 = vmatprep.mubr.bf16.mxu0 %v5155_v15  ;;  %v4609_v46 = vmul.f32 0.5, %v10777_v27  ;;  %v5057_v11 = vadd.f32 1.0, %v7914_v44  ;;  %7927 = vtanh.f32 %v4939_v24  ;;  %v4938_v42 = vmul.f32 0.7978846, %v10898_v37  ;;  %v11516_v24 = vld [vmem:[#allocation27_spill] sm:$0xff] }
0x10bb   : > { %5597 = vmatmul.mubr.bf16.gmra.mxu0 %v5154_v39  ;;  %v4604_v19 = vmul.f32 0.5, %v11514_v22  ;;  %v5120_v52 = vmul.f32 %v5056_v58, %v4608_v45  ;;  %v5117_v21 = vmul.f32 %v5053_v50, %v4605_v33  ;;  %v4934_v13 = vmul.f32 0.7978846, %v4870_v49 }
0x10bc   : > { %v5121_v2 = vmul.f32 %v5057_v11, %v4609_v46  ;;  %7929 = vtanh.f32 %v4938_v42  ;;  %v5064_v28 = vadd.f32 1.0, %v7910_v10  ;;  %v4613_v27 = vmul.f32 0.5, %v10808_v23 }
0x10bd   : > { %v5116_v5 = vmul.f32 %v5052_v63, %v4604_v19  ;;  %v4617_v37 = vmul.f32 0.5, %v10836_v62  ;;  %7931 = vtanh.f32 %v4934_v13  ;;  %v4616_v32 = vmul.f32 0.5, %v10782_v36 }
0x10be   : > { %v7916_v20 = vpop.eup %7915  ;;  %v5157_v1 = vpack.c.bf16 %v5121_v2, %v5117_v21  ;;  %v5060_v61 = vadd.f32 1.0, %v10927_v8  ;;  %v4612_v43 = vmul.f32 0.5, %v10754_v3  ;;  %v4607_v62 = vmul.f32 0.5, %v10746_v56 }
0x10bf   : > { %v7918_v34 = vpop.eup %7917  ;;  %v5156_v17 = vpack.c.bf16 %v5120_v52, %v5116_v5  ;;  %v5061_v12 = vadd.f32 1.0, %v7916_v20  ;;  %v5128_v54 = vmul.f32 %v5064_v28, %v4616_v32  ;;  %v4611_v18 = vmul.f32 0.5, %v10794_v16  ;;  %v10973_v52 = vld [vmem:[%s841_s19] ss:$0 sm:$0xff] }
0x10c0   : > { %5507 = vmatprep.mubr.bf16.mxu1 %v5157_v1  ;;  %v5065_v30 = vadd.f32 1.0, %v7918_v34  ;;  %v5124_v23 = vmul.f32 %v5060_v61, %v4612_v43  ;;  %v5058_v8 = vadd.f32 1.0, %v10919_v4  ;;  %v4610_v57 = vmul.f32 0.5, %v11515_v6  ;;  %v11517_v61 = vld [vmem:[#allocation29_spill] sm:$0xff] }
0x10c1   : > { %5508 = vmatmul.mubr.bf16.gmra.mxu1 %v5156_v17  ;;  %v5125_v55 = vmul.f32 %v5061_v12, %v4613_v27  ;;  %v4619_v53 = vmul.f32 0.5, %v10848_v48  ;;  %v4606_v16 = vmul.f32 0.5, %v11516_v24  ;;  %v4615_v15 = vmul.f32 0.5, %v10822_v29 }
0x10c2   : > { %v5129_v31 = vmul.f32 %v5065_v30, %v4617_v37  ;;  %v5160_v0 = vpack.c.bf16 %v5128_v54, %v5124_v23  ;;  %v5122_v26 = vmul.f32 %v5058_v8, %v4610_v57  ;;  %v4618_v33 = vmul.f32 0.5, %v10816_v9  ;;  %v11518_v23 = vld [vmem:[#allocation31_spill] sm:$0xff] }
0x10c3   : > { %v7920_v51 = vpop.eup %7919  ;;  %v4614_v46 = vmul.f32 0.5, %v10797_v40 }
0x10c4   : > { %v7922_v60 = vpop.eup %7921  ;;  %v5161_v10 = vpack.c.bf16 %v5129_v31, %v5125_v55  ;;  %v5055_v38 = vadd.f32 1.0, %v7920_v51 }
0x10c5   : > { %v7924_v35 = vpop.eup %7923  ;;  %v5059_v14 = vadd.f32 1.0, %v7922_v60 }
0x10c6   : > { %v7926_v7 = vpop.eup %7925  ;;  %5515 = vmatprep.mubr.bf16.mxu1 %v5161_v10  ;;  %v5119_v47 = vmul.f32 %v5055_v38, %v4607_v62  ;;  %v5054_v41 = vadd.f32 1.0, %v7924_v35 }
0x10c7   : > { %v7928_v36 = vpop.eup %7927  ;;  %v5123_v25 = vmul.f32 %v5059_v14, %v4611_v18  ;;  %v5063_v56 = vadd.f32 1.0, %v7926_v7 }
0x10c8   : > { %v5067_v3 = vadd.f32 1.0, %v7928_v36  ;;  %v5118_v59 = vmul.f32 %v5054_v41, %v4606_v16 }
0x10c9   : > { %5516 = vmatmul.mubr.bf16.gmra.mxu1 %v5160_v0  ;;  %v5159_v58 = vpack.c.bf16 %v5123_v25, %v5119_v47  ;;  %v7930_v49 = vpop.eup %7929  ;;  %v5127_v44 = vmul.f32 %v5063_v56, %v4615_v15 }
0x10ca   : > { %v5131_v4 = vmul.f32 %v5067_v3, %v4619_v53  ;;  %v7932_v45 = vpop.eup %7931  ;;  %v5158_v39 = vpack.c.bf16 %v5122_v26, %v5118_v59  ;;  %v5066_v50 = vadd.f32 1.0, %v7930_v49  ;;  %v11519_v3 = vld [vmem:[#allocation16_spill] sm:$0xff]  ;;  %v11520_v49 = vld [vmem:[#allocation30_spill] sm:$0xff] }
0x10cb   : > { %5604 = vmatprep.mubr.bf16.mxu1 %v5159_v58  ;;  %v5062_v48 = vadd.f32 1.0, %v7932_v45 }
0x10cc   : > { %v5163_v63 = vpack.c.bf16 %v5131_v4, %v5127_v44  ;;  %v5130_v11 = vmul.f32 %v5066_v50, %v4618_v33 }
0x10cd   : > { %v5126_v42 = vmul.f32 %v5062_v48, %v4614_v46 }
0x10cf   : > { %v5162_v22 = vpack.c.bf16 %v5130_v11, %v5126_v42 }
0x10d1   : > { %5605 = vmatmul.mubr.bf16.vlgmr.msra.gmra.mxu1 %v5158_v39 }
0x10d2   : > { %5612 = vmatprep.mubr.bf16.mxu1 %v5163_v63  ;;  %v11521_v63 = vld [vmem:[#allocation15_spill] sm:$0xff] }
0x10d9   : > { %5613 = vmatmul.mubr.bf16.gmra.mxu1 %v5162_v22 }
0x1121   : > { %v6659_v29 = vpop.f32.mrf.mxu1 }
0x1123   : > { %v6660_v19 = vpop.f32.mrf.mxu1 }
0x1124   : > { %v6661_v21 = vadd.f32 %v6660_v19, %v6659_v29  ;;  %v11522_v29 = vld [vmem:[#allocation14_spill] sm:$0xff] }
0x1125   : > { %v6662_v2 = vpop.f32.mrf.mxu1 }
0x1126   : > { %v6723_v13 = vpop.f32.mrf.mxu0  ;;  %v5462_v9 = vadd.f32 %v6661_v21, %v10973_v52 }
0x1127   : > { %v6663_v5 = vpop.f32.mrf.mxu1 }
0x1128   : > { %v6724_v20 = vpop.f32.mrf.mxu0  ;;  %v6664_v40 = vadd.f32 %v6663_v5, %v6662_v2 }
0x1129   : > { %v6725_v1 = vadd.f32 %v6724_v20, %v6723_v13  ;;  %v6665_v34 = vpop.f32.mrf.mxu1 }
0x112a   : > { %v6726_v17 = vpop.f32.mrf.mxu0  ;;  %v5465_v28 = vadd.f32 %v6664_v40, %v10973_v52 }
0x112b   : > { %v5559_v12 = vadd.f32 %v6725_v1, %v5462_v9  ;;  %v6666_v27 = vpop.f32.mrf.mxu1 }
0x112c   : > { %v6727_v37 = vpop.f32.mrf.mxu0  ;;  %v6667_v30 = vadd.f32 %v6666_v27, %v6665_v34 }
0x112d   : > { %v6728_v32 = vadd.f32 %v6727_v37, %v6726_v17  ;;  %v10978_v55 = vadd.f32 %v5559_v12, %v11517_v61  ;;  %v6668_v31 = vpop.f32.mrf.mxu1  ;;  %v11523_v12 = vld [vmem:[#allocation19_spill] sm:$0xff]  ;;  %v11524_v37 = vld [vmem:[#allocation13_spill] sm:$0xff] }
0x112e   : > { %v6729_v51 = vpop.f32.mrf.mxu0  ;;  %v5470_v54 = vadd.f32 %v6667_v30, %v10973_v52 }
0x112f   : > { %v5562_v43 = vadd.f32 %v6728_v32, %v5465_v28  ;;  %5639 = vadd.xlane.f32.xlu0 %v10978_v55  ;;  %v6669_v60 = vpop.f32.mrf.mxu1 }
0x1130   : > { %v6730_v10 = vpop.f32.mrf.mxu0  ;;  %v6670_v38 = vadd.f32 %v6669_v60, %v6668_v31 }
0x1131   : > { %v6731_v35 = vadd.f32 %v6730_v10, %v6729_v51  ;;  %v10983_v62 = vadd.f32 %v5562_v43, %v11518_v23  ;;  %v6671_v18 = vpop.f32.mrf.mxu1 }
0x1132   : > { %v6732_v14 = vpop.f32.mrf.mxu0  ;;  %v5473_v36 = vadd.f32 %v6670_v38, %v10973_v52 }
0x1133   : > { %v5567_v7 = vadd.f32 %v6731_v35, %v5470_v54  ;;  %5641 = vadd.xlane.f32.xlu1 %v10983_v62  ;;  %v6672_v8 = vpop.f32.mrf.mxu1 }
0x1134   : > { %v6733_v0 = vpop.f32.mrf.mxu0  ;;  %v6673_v47 = vadd.f32 %v6672_v8, %v6671_v18 }
0x1135   : > { %v6734_v25 = vadd.f32 %v6733_v0, %v6732_v14  ;;  %v10988_v41 = vadd.f32 %v5567_v7, %v11519_v3  ;;  %v6674_v6 = vpop.f32.mrf.mxu1  ;;  %v11525_v0 = vld [vmem:[#allocation17_spill] sm:$0xff] }
0x1136   : > { %v6735_v57 = vpop.f32.mrf.mxu0  ;;  %v5478_v53 = vadd.f32 %v6673_v47, %v10973_v52 }
0x1137   : > { %v5570_v58 = vadd.f32 %v6734_v25, %v5473_v36  ;;  %5643 = vadd.xlane.f32.xlu0 %v10988_v41  ;;  %v6675_v56 = vpop.f32.mrf.mxu1 }
0x1138   : > { %v6736_v24 = vpop.f32.mrf.mxu0  ;;  %v6676_v16 = vadd.f32 %v6675_v56, %v6674_v6 }
0x1139   : > { %v6737_v26 = vadd.f32 %v6736_v24, %v6735_v57  ;;  %v10993_v15 = vadd.f32 %v5570_v58, %v11520_v49 }
0x113a   : > { %v6738_v4 = vpop.f32.mrf.mxu0  ;;  %v5481_v45 = vadd.f32 %v6676_v16, %v10973_v52  ;;  %v11526_v16 = vld [vmem:[#allocation20_spill] sm:$0xff] }
0x113b   : > { %v5575_v59 = vadd.f32 %v6737_v26, %v5478_v53  ;;  %5645 = vadd.xlane.f32.xlu1 %v10993_v15 }
0x113c   : > { %v6739_v44 = vpop.f32.mrf.mxu0  ;;  %v6677_v50 = vpop.f32.mrf.mxu1 }
0x113d   : > { %v6740_v39 = vadd.f32 %v6739_v44, %v6738_v4  ;;  %v10998_v33 = vadd.f32 %v5575_v59, %v11521_v63 }
0x113e   : > { %v6678_v46 = vpop.f32.mrf.mxu1 }
0x113f   : > { %v5578_v48 = vadd.f32 %v6740_v39, %v5481_v45  ;;  %5647 = vadd.xlane.f32.xlu0 %v10998_v33  ;;  %v6679_v11 = vadd.f32 %v6678_v46, %v6677_v50 }
0x1140   : > { %v6680_v22 = vpop.f32.mrf.mxu1 }
0x1141   : > { %v6741_v42 = vpop.f32.mrf.mxu0  ;;  %v11002_v19 = vadd.f32 %v5578_v48, %v11522_v29  ;;  %v5486_v21 = vadd.f32 %v6679_v11, %v10973_v52  ;;  %v11527_v48 = vld [vmem:[#allocation23_spill] sm:$0xff]  ;;  %v11528_v29 = vld [vmem:[#allocation18_spill] sm:$0xff] }
0x1142   : > { %v6681_v13 = vpop.f32.mrf.mxu1 }
0x1143   : > { %v6742_v2 = vpop.f32.mrf.mxu0  ;;  %5649 = vadd.xlane.f32.xlu1 %v11002_v19  ;;  %v6682_v5 = vadd.f32 %v6681_v13, %v6680_v22 }
0x1144   : > { %v6743_v9 = vadd.f32 %v6742_v2, %v6741_v42 }
0x1145   : > { %v6744_v20 = vpop.f32.mrf.mxu0  ;;  %v5489_v1 = vadd.f32 %v6682_v5, %v10973_v52 }
0x1146   : > { %v5583_v40 = vadd.f32 %v6743_v9, %v5486_v21 }
0x1147   : > { %v6745_v34 = vpop.f32.mrf.mxu0 }
0x1148   : > { %v6746_v17 = vadd.f32 %v6745_v34, %v6744_v20  ;;  %v11008_v28 = vadd.f32 %v5583_v40, %v11523_v12 }
0x114a   : > { %v5586_v27 = vadd.f32 %v6746_v17, %v5489_v1  ;;  %5651 = vadd.xlane.f32.xlu0 %v11008_v28 }
0x114c   : > { %v11012_v30 = vadd.f32 %v5586_v27, %v11524_v37 }
0x114e   : > { %5653 = vadd.xlane.f32.xlu1 %v11012_v30 }
0x1170   : > { %v6683_v32 = vpop.f32.mrf.mxu1 }
0x1172   : > { %v6684_v61 = vpop.f32.mrf.mxu1 }
0x1173   : > { %v6747_v31 = vpop.f32.mrf.mxu0  ;;  %v6685_v51 = vadd.f32 %v6684_v61, %v6683_v32 }
0x1174   : > { %v6686_v43 = vpop.f32.mrf.mxu1 }
0x1175   : > { %v5494_v54 = vadd.f32 %v6685_v51, %v10973_v52  ;;  %v6748_v60 = vpop.f32.mrf.mxu0 }
0x1176   : > { %v6749_v10 = vadd.f32 %v6748_v60, %v6747_v31  ;;  %v6687_v38 = vpop.f32.mrf.mxu1 }
0x1177   : > { %v6750_v35 = vpop.f32.mrf.mxu0  ;;  %v6688_v23 = vadd.f32 %v6687_v38, %v6686_v43 }
0x1178   : > { %v5591_v18 = vadd.f32 %v6749_v10, %v5494_v54  ;;  %v11529_v54 = vld [vmem:[#allocation24_spill] sm:$0xff] }
0x1179   : > { %v5497_v14 = vadd.f32 %v6688_v23, %v10973_v52  ;;  %v6751_v7 = vpop.f32.mrf.mxu0  ;;  %v6689_v36 = vpop.f32.mrf.mxu1 }
0x117a   : > { %v6752_v8 = vadd.f32 %v6751_v7, %v6750_v35  ;;  %v11018_v47 = vadd.f32 %v5591_v18, %v11525_v0  ;;  %v11530_v7 = vld [vmem:[#allocation21_spill] sm:$0xff] }
0x117b   : > { %v6753_v25 = vpop.f32.mrf.mxu0  ;;  %v6690_v3 = vpop.f32.mrf.mxu1 }
0x117c   : > { %v5594_v6 = vadd.f32 %v6752_v8, %v5497_v14  ;;  %v6691_v57 = vadd.f32 %v6690_v3, %v6689_v36  ;;  %5655 = vadd.xlane.f32.xlu0 %v11018_v47 }
0x117d   : > { %v6754_v58 = vpop.f32.mrf.mxu0  ;;  %v6692_v53 = vpop.f32.mrf.mxu1 }
0x117e   : > { %v5502_v56 = vadd.f32 %v6691_v57, %v10973_v52  ;;  %v6755_v24 = vadd.f32 %v6754_v58, %v6753_v25  ;;  %v11023_v26 = vadd.f32 %v5594_v6, %v11526_v16  ;;  %v11531_v57 = vld [vmem:[#allocation28_spill] sm:$0xff] }
0x117f   : > { %v6756_v49 = vpop.f32.mrf.mxu0  ;;  %v6693_v4 = vpop.f32.mrf.mxu1 }
0x1180   : > { %v5599_v59 = vadd.f32 %v6755_v24, %v5502_v56  ;;  %v6694_v45 = vadd.f32 %v6693_v4, %v6692_v53  ;;  %5657 = vadd.xlane.f32.xlu1 %v11023_v26  ;;  %v11532_v56 = vld [vmem:[#allocation25_spill] sm:$0xff] }
0x1181   : > { %v6757_v44 = vpop.f32.mrf.mxu0  ;;  %v6695_v39 = vpop.f32.mrf.mxu1 }
0x1182   : > { %v5505_v50 = vadd.f32 %v6694_v45, %v10973_v52  ;;  %v6758_v63 = vadd.f32 %v6757_v44, %v6756_v49  ;;  %v11028_v46 = vadd.f32 %v5599_v59, %v11527_v48 }
0x1183   : > { %v6696_v11 = vpop.f32.mrf.mxu1 }
0x1184   : > { %v5602_v42 = vadd.f32 %v6758_v63, %v5505_v50  ;;  %5659 = vadd.xlane.f32.xlu0 %v11028_v46  ;;  %v6697_v40 = vadd.f32 %v6696_v11, %v6695_v39 }
0x1185   : > { %v6698_v22 = vpop.f32.mrf.mxu1 }
0x1186   : > { %v11032_v21 = vadd.f32 %v5602_v42, %v11528_v29  ;;  %v5510_v17 = vadd.f32 %v6697_v40, %v10973_v52 }
0x1187   : > { %v6699_v2 = vpop.f32.mrf.mxu1 }
0x1188   : > { %5661 = vadd.xlane.f32.xlu1 %v11032_v21  ;;  %v6700_v12 = vadd.f32 %v6699_v2, %v6698_v22 }
0x1189   : > { %v6701_v13 = vpop.f32.mrf.mxu1 }
0x118a   : > { %v5513_v31 = vadd.f32 %v6700_v12, %v10973_v52 }
0x118b   : > { %v6702_v9 = vpop.f32.mrf.mxu1 }
0x118c   : > { %v6703_v51 = vadd.f32 %v6702_v9, %v6701_v13 }
0x118d   : > { %v6704_v5 = vpop.f32.mrf.mxu1 }
0x118e   : > { %v5518_v23 = vadd.f32 %v6703_v51, %v10973_v52 }
0x118f   : > { %v6705_v20 = vpop.f32.mrf.mxu1 }
0x1190   : > { %v6706_v18 = vadd.f32 %v6705_v20, %v6704_v5 }
0x1191   : > { %v6759_v1 = vpop.f32.mrf.mxu1 }
0x1192   : > { %v5521_v3 = vadd.f32 %v6706_v18, %v10973_v52 }
0x1193   : > { %v6760_v34 = vpop.f32.mrf.mxu1 }
0x1194   : > { %v6761_v27 = vadd.f32 %v6760_v34, %v6759_v1 }
0x1195   : > { %v6762_v37 = vpop.f32.mrf.mxu1 }
0x1196   : > { %v5607_v32 = vadd.f32 %v6761_v27, %v5510_v17 }
0x1197   : > { %v6763_v61 = vpop.f32.mrf.mxu1 }
0x1198   : > { %v6764_v43 = vadd.f32 %v6763_v61, %v6762_v37  ;;  %v11038_v60 = vadd.f32 %v5607_v32, %v11529_v54 }
0x1199   : > { %v6765_v10 = vpop.f32.mrf.mxu1 }
0x119a   : > { %v5610_v38 = vadd.f32 %v6764_v43, %v5513_v31  ;;  %5663 = vadd.xlane.f32.xlu0 %v11038_v60 }
0x119b   : > { %v6766_v35 = vpop.f32.mrf.mxu1 }
0x119c   : > { %v6767_v14 = vadd.f32 %v6766_v35, %v6765_v10  ;;  %v11043_v36 = vadd.f32 %v5610_v38, %v11530_v7 }
0x119d   : > { %v6768_v8 = vpop.f32.mrf.mxu1 }
0x119e   : > { %v5615_v0 = vadd.f32 %v6767_v14, %v5518_v23  ;;  %5665 = vadd.xlane.f32.xlu1 %v11043_v36 }
0x119f   : > { %v6769_v25 = vpop.f32.mrf.mxu1 }
0x11a0   : > { %v6770_v6 = vadd.f32 %v6769_v25, %v6768_v8  ;;  %v11048_v58 = vadd.f32 %v5615_v0, %v11531_v57 }
0x11a2   : > { %v5618_v53 = vadd.f32 %v6770_v6, %v5521_v3  ;;  %5667 = vadd.xlane.f32.xlu0 %v11048_v58 }
0x11a4   : > { %v11052_v24 = vadd.f32 %v5618_v53, %v11532_v56 }
0x11a6   : > { %5669 = vadd.xlane.f32.xlu1 %v11052_v24 }
0x11b8   : > { %v5640_v16 = vpop.xlane.xlu0 %5639 }
0x11b9   : > { %v5671_v49 = vmul.f32 0.0078125, %v5640_v16 }
0x11bb   : > { %v11056_v4 = vsub.f32 %v10978_v55, %v5671_v49 }
0x11bc   : > { %v5642_v59 = vpop.xlane.xlu1 %5641 }
0x11bd   : > { %v5672_v45 = vmul.f32 0.0078125, %v5642_v59  ;;  %v5703_v52 = vmul.f32 %v11056_v4, %v11056_v4 }
0x11bf   : > { %v11061_v44 = vsub.f32 %v10983_v62, %v5672_v45  ;;  %5719 = vadd.xlane.f32.xlu0 %v5703_v52 }
0x11c0   : > { %v5644_v39 = vpop.xlane.xlu0 %5643 }
0x11c1   : > { %v5673_v50 = vmul.f32 0.0078125, %v5644_v39  ;;  %v5704_v63 = vmul.f32 %v11061_v44, %v11061_v44 }
0x11c3   : > { %v11066_v48 = vsub.f32 %v10988_v41, %v5673_v50  ;;  %5721 = vadd.xlane.f32.xlu1 %v5704_v63 }
0x11c4   : > { %v5646_v55 = vpop.xlane.xlu1 %5645 }
0x11c5   : > { %v5674_v11 = vmul.f32 0.0078125, %v5646_v55  ;;  %v5705_v42 = vmul.f32 %v11066_v48, %v11066_v48 }
0x11c7   : > { %v11071_v22 = vsub.f32 %v10993_v15, %v5674_v11  ;;  %5723 = vadd.xlane.f32.xlu0 %v5705_v42 }
0x11c8   : > { %v5648_v62 = vpop.xlane.xlu0 %5647 }
0x11c9   : > { %v5675_v29 = vmul.f32 0.0078125, %v5648_v62  ;;  %v5706_v2 = vmul.f32 %v11071_v22, %v11071_v22 }
0x11cb   : > { %v11076_v13 = vsub.f32 %v10998_v33, %v5675_v29  ;;  %5725 = vadd.xlane.f32.xlu1 %v5706_v2 }
0x11cc   : > { %v5650_v41 = vpop.xlane.xlu1 %5649 }
0x11cd   : > { %v5676_v9 = vmul.f32 0.0078125, %v5650_v41  ;;  %v5707_v5 = vmul.f32 %v11076_v13, %v11076_v13 }
0x11cf   : > { %v11081_v20 = vsub.f32 %v11002_v19, %v5676_v9  ;;  %5727 = vadd.xlane.f32.xlu0 %v5707_v5  ;;  %v11140_v9 = vld [vmem:[%s844_s6] ss:$0 sm:$0xff] }
0x11d1   : > { %v5708_v15 = vmul.f32 %v11081_v20, %v11081_v20 }
0x11d3   : > { %v5652_v40 = vpop.xlane.xlu0 %5651  ;;  %5729 = vadd.xlane.f32.xlu1 %v5708_v15 }
0x11d4   : > { %v5677_v1 = vmul.f32 0.0078125, %v5652_v40  ;;  %v11148_v40 = vld [vmem:[%s847_s10] ss:$0 sm:$0xff]  ;;  %s11533_s10 = sld [smem:[#allocation3_spill]] }
0x11d6   : > { %v11086_v34 = vsub.f32 %v11008_v28, %v5677_v1 }
0x11d7   : > { %v5654_v33 = vpop.xlane.xlu1 %5653 }
0x11d8   : > { %v5678_v17 = vmul.f32 0.0078125, %v5654_v33  ;;  %v5709_v12 = vmul.f32 %v11086_v34, %v11086_v34 }
0x11da   : > { %v11091_v27 = vsub.f32 %v11012_v30, %v5678_v17  ;;  %5731 = vadd.xlane.f32.xlu0 %v5709_v12  ;;  %p6458_p8 = scmp.ne.s32.totalorder %s11533_s10, 1 }
0x11db   : > { %s11534_s16 = sld [smem:[#allocation57_spill]] (!%p6458_p8) }
0x11dc   : > { %v5710_v19 = vmul.f32 %v11091_v27, %v11091_v27  ;;  %s11535_s29 = sld [smem:[#allocation59_spill]] (!%p6458_p8) }
0x11dd   : > { %s11536_s11 = sld [smem:[#allocation58_spill]] (!%p6458_p8) }
0x11de   : > { %5733 = vadd.xlane.f32.xlu1 %v5710_v19  ;;  %s11537_s19 = sld [smem:[#allocation60_spill]] (!%p6458_p8) }
0x1205   : > { %v5656_v37 = vpop.xlane.xlu0 %5655 }
0x1206   : > { %v5679_v32 = vmul.f32 0.0078125, %v5656_v37 }
0x1208   : > { %v11096_v61 = vsub.f32 %v11018_v47, %v5679_v32 }
0x1209   : > { %v5658_v28 = vpop.xlane.xlu1 %5657 }
0x120a   : > { %v5680_v31 = vmul.f32 0.0078125, %v5658_v28  ;;  %v5711_v51 = vmul.f32 %v11096_v61, %v11096_v61 }
0x120c   : > { %v11101_v43 = vsub.f32 %v11023_v26, %v5680_v31  ;;  %5735 = vadd.xlane.f32.xlu0 %v5711_v51 }
0x120d   : > { %v5660_v30 = vpop.xlane.xlu0 %5659 }
0x120e   : > { %v5681_v54 = vmul.f32 0.0078125, %v5660_v30  ;;  %v5712_v10 = vmul.f32 %v11101_v43, %v11101_v43 }
0x1210   : > { %v11106_v38 = vsub.f32 %v11028_v46, %v5681_v54  ;;  %5737 = vadd.xlane.f32.xlu1 %v5712_v10 }
0x1211   : > { %v5662_v47 = vpop.xlane.xlu1 %5661 }
0x1212   : > { %v5682_v35 = vmul.f32 0.0078125, %v5662_v47  ;;  %v5713_v23 = vmul.f32 %v11106_v38, %v11106_v38 }
0x1214   : > { %v11111_v18 = vsub.f32 %v11032_v21, %v5682_v35  ;;  %5739 = vadd.xlane.f32.xlu0 %v5713_v23 }
0x1216   : > { %v5714_v26 = vmul.f32 %v11111_v18, %v11111_v18 }
0x1218   : > { %5741 = vadd.xlane.f32.xlu1 %v5714_v26 }
0x1223   : > { %v5664_v14 = vpop.xlane.xlu0 %5663 }
0x1224   : > { %v5683_v7 = vmul.f32 0.0078125, %v5664_v14 }
0x1226   : > { %v11116_v8 = vsub.f32 %v11038_v60, %v5683_v7 }
0x1227   : > { %v5666_v46 = vpop.xlane.xlu1 %5665 }
0x1228   : > { %v5684_v0 = vmul.f32 0.0078125, %v5666_v46  ;;  %v5715_v25 = vmul.f32 %v11116_v8, %v11116_v8 }
0x122a   : > { %v11121_v3 = vsub.f32 %v11043_v36, %v5684_v0  ;;  %5743 = vadd.xlane.f32.xlu0 %v5715_v25 }
0x122b   : > { %v5668_v21 = vpop.xlane.xlu0 %5667 }
0x122c   : > { %v5685_v6 = vmul.f32 0.0078125, %v5668_v21  ;;  %v5716_v57 = vmul.f32 %v11121_v3, %v11121_v3 }
0x122e   : > { %v11126_v53 = vsub.f32 %v11048_v58, %v5685_v6  ;;  %5745 = vadd.xlane.f32.xlu1 %v5716_v57 }
0x122f   : > { %v5670_v60 = vpop.xlane.xlu1 %5669 }
0x1230   : > { %v5686_v56 = vmul.f32 0.0078125, %v5670_v60  ;;  %v5717_v16 = vmul.f32 %v11126_v53, %v11126_v53 }
0x1232   : > { %v11131_v49 = vsub.f32 %v11052_v24, %v5686_v56  ;;  %5747 = vadd.xlane.f32.xlu0 %v5717_v16 }
0x1234   : > { %v5718_v36 = vmul.f32 %v11131_v49, %v11131_v49 }
0x1236   : > { %5749 = vadd.xlane.f32.xlu1 %v5718_v36 }
0x1248   : > { %v5720_v59 = vpop.xlane.xlu0 %5719 }
0x1249   : > { %v5751_v45 = vmul.f32 0.0078125, %v5720_v59 }
0x124b   : > { %v5767_v52 = vadd.f32 1e-12, %v5751_v45 }
0x124c   : > { %v5722_v39 = vpop.xlane.xlu1 %5721 }
0x124d   : > { %7933 = vrsqrt.f32 %v5767_v52  ;;  %v5752_v58 = vmul.f32 0.0078125, %v5722_v39 }
0x124f   : > { %v5768_v50 = vadd.f32 1e-12, %v5752_v58 }
0x1250   : > { %v5724_v63 = vpop.xlane.xlu0 %5723 }
0x1251   : > { %7935 = vrsqrt.f32 %v5768_v50  ;;  %v5753_v55 = vmul.f32 0.0078125, %v5724_v63 }
0x1253   : > { %v5769_v11 = vadd.f32 1e-12, %v5753_v55 }
0x1254   : > { %v5726_v24 = vpop.xlane.xlu1 %5725 }
0x1255   : > { %7937 = vrsqrt.f32 %v5769_v11  ;;  %v5754_v42 = vmul.f32 0.0078125, %v5726_v24 }
0x1257   : > { %v5770_v62 = vadd.f32 1e-12, %v5754_v42 }
0x1258   : > { %v5728_v29 = vpop.xlane.xlu0 %5727 }
0x1259   : > { %7939 = vrsqrt.f32 %v5770_v62  ;;  %v5755_v2 = vmul.f32 0.0078125, %v5728_v29 }
0x125a   : > { %v7934_v41 = vpop.eup %7933 }
0x125b   : > { %v5799_v5 = vmul.f32 %v7934_v41, %v11056_v4  ;;  %v5771_v15 = vadd.f32 1e-12, %v5755_v2 }
0x125c   : > { %v5730_v1 = vpop.xlane.xlu1 %5729 }
0x125d   : > { %v5821_v33 = vmul.f32 %v11140_v9, %v5799_v5  ;;  %7941 = vrsqrt.f32 %v5771_v15  ;;  %v5756_v17 = vmul.f32 0.0078125, %v5730_v1 }
0x125e   : > { %v7936_v12 = vpop.eup %7935 }
0x125f   : > { %v11152_v19 = vadd.f32 %v11148_v40, %v5821_v33  ;;  %v5800_v37 = vmul.f32 %v7936_v12, %v11061_v44  ;;  %v5772_v32 = vadd.f32 1e-12, %v5756_v17 }
0x1261   : > { %5859 = vst [vmem:[#allocation2 + $0x30] sm:$0xff] %v11152_v19  ;;  %v5822_v4 = vmul.f32 %v11140_v9, %v5800_v37  ;;  %7943 = vrsqrt.f32 %v5772_v32 }
0x1262   : > { %v7938_v28 = vpop.eup %7937 }
0x1263   : > { %v5844_v31 = vadd.f32 %v11148_v40, %v5822_v4  ;;  %v5801_v51 = vmul.f32 %v7938_v28, %v11066_v48  ;;  %v5732_v30 = vpop.xlane.xlu0 %5731 }
0x1264   : > { %v5757_v54 = vmul.f32 0.0078125, %v5732_v30 }
0x1265   : > { %5860 = vst [vmem:[#allocation2] sm:$0xff] %v5844_v31  ;;  %v5823_v10 = vmul.f32 %v11140_v9, %v5801_v51 }
0x1266   : > { %v7940_v47 = vpop.eup %7939  ;;  %v5773_v35 = vadd.f32 1e-12, %v5757_v54 }
0x1267   : > { %v5845_v44 = vadd.f32 %v11148_v40, %v5823_v10  ;;  %v5802_v23 = vmul.f32 %v7940_v47, %v11071_v22  ;;  %v5734_v26 = vpop.xlane.xlu1 %5733 }
0x1268   : > { %7945 = vrsqrt.f32 %v5773_v35  ;;  %v5758_v14 = vmul.f32 0.0078125, %v5734_v26 }
0x1269   : > { %5861 = vst [vmem:[#allocation2 + $0x58] sm:$0xff] %v5845_v44  ;;  %v5824_v7 = vmul.f32 %v11140_v9, %v5802_v23 }
0x126a   : > { %v7942_v46 = vpop.eup %7941  ;;  %v5774_v0 = vadd.f32 1e-12, %v5758_v14 }
0x126b   : > { %v5846_v48 = vadd.f32 %v11148_v40, %v5824_v7  ;;  %v5803_v25 = vmul.f32 %v7942_v46, %v11076_v13 }
0x126c   : > { %7947 = vrsqrt.f32 %v5774_v0 }
0x126d   : > { %5862 = vst [vmem:[#allocation2 + $0x18] sm:$0xff] %v5846_v48  ;;  %v5825_v21 = vmul.f32 %v11140_v9, %v5803_v25 }
0x126e   : > { %v7944_v6 = vpop.eup %7943 }
0x126f   : > { %v5847_v57 = vadd.f32 %v11148_v40, %v5825_v21  ;;  %v5804_v22 = vmul.f32 %v7944_v6, %v11081_v20 }
0x1271   : > { %5863 = vst [vmem:[#allocation2 + $0x50] sm:$0xff] %v5847_v57  ;;  %v5826_v60 = vmul.f32 %v11140_v9, %v5804_v22 }
0x1273   : > { %v5848_v56 = vadd.f32 %v11148_v40, %v5826_v60 }
0x1275   : > { %v7946_v16 = vpop.eup %7945  ;;  %5864 = vst [vmem:[#allocation2 + $0x68] sm:$0xff] %v5848_v56 }
0x1276   : > { %v5805_v36 = vmul.f32 %v7946_v16, %v11086_v34 }
0x1278   : > { %v5827_v13 = vmul.f32 %v11140_v9, %v5805_v36 }
0x1279   : > { %v7948_v59 = vpop.eup %7947 }
0x127a   : > { %v5849_v45 = vadd.f32 %v11148_v40, %v5827_v13  ;;  %v5806_v52 = vmul.f32 %v7948_v59, %v11091_v27 }
0x127c   : > { %5865 = vst [vmem:[#allocation2 + $0x8] sm:$0xff] %v5849_v45  ;;  %v5828_v39 = vmul.f32 %v11140_v9, %v5806_v52 }
0x127e   : > { %v5850_v20 = vadd.f32 %v11148_v40, %v5828_v39 }
0x1280   : > { %5866 = vst [vmem:[#allocation2 + $0x48] sm:$0xff] %v5850_v20 }
0x1295   : > { %v5736_v58 = vpop.xlane.xlu0 %5735 }
0x1296   : > { %v5759_v50 = vmul.f32 0.0078125, %v5736_v58 }
0x1298   : > { %v5775_v63 = vadd.f32 1e-12, %v5759_v50 }
0x1299   : > { %v5738_v55 = vpop.xlane.xlu1 %5737 }
0x129a   : > { %7949 = vrsqrt.f32 %v5775_v63  ;;  %v5760_v11 = vmul.f32 0.0078125, %v5738_v55 }
0x129c   : > { %v5776_v34 = vadd.f32 1e-12, %v5760_v11 }
0x129d   : > { %v5740_v24 = vpop.xlane.xlu0 %5739 }
0x129e   : > { %7951 = vrsqrt.f32 %v5776_v34  ;;  %v5761_v42 = vmul.f32 0.0078125, %v5740_v24 }
0x12a0   : > { %v5777_v62 = vadd.f32 1e-12, %v5761_v42 }
0x12a1   : > { %v5742_v29 = vpop.xlane.xlu1 %5741 }
0x12a2   : > { %7953 = vrsqrt.f32 %v5777_v62  ;;  %v5762_v27 = vmul.f32 0.0078125, %v5742_v29 }
0x12a4   : > { %v5778_v2 = vadd.f32 1e-12, %v5762_v27 }
0x12a6   : > { %7955 = vrsqrt.f32 %v5778_v2 }
0x12a7   : > { %v7950_v41 = vpop.eup %7949 }
0x12a8   : > { %v5807_v5 = vmul.f32 %v7950_v41, %v11096_v61 }
0x12aa   : > { %v5829_v15 = vmul.f32 %v11140_v9, %v5807_v5 }
0x12ab   : > { %v7952_v1 = vpop.eup %7951 }
0x12ac   : > { %v5851_v33 = vadd.f32 %v11148_v40, %v5829_v15  ;;  %v5808_v17 = vmul.f32 %v7952_v1, %v11101_v43 }
0x12ae   : > { %5867 = vst [vmem:[#allocation2 + $0x40] sm:$0xff] %v5851_v33  ;;  %v5830_v12 = vmul.f32 %v11140_v9, %v5808_v17 }
0x12af   : > { %v7954_v37 = vpop.eup %7953 }
0x12b0   : > { %v5852_v32 = vadd.f32 %v11148_v40, %v5830_v12  ;;  %v5809_v4 = vmul.f32 %v7954_v37, %v11106_v38 }
0x12b2   : > { %5868 = vst [vmem:[#allocation2 + $0x20] sm:$0xff] %v5852_v32  ;;  %v5831_v28 = vmul.f32 %v11140_v9, %v5809_v4 }
0x12b3   : > { %v7956_v31 = vpop.eup %7955  ;;  %v5744_v61 = vpop.xlane.xlu0 %5743 }
0x12b4   : > { %v5853_v51 = vadd.f32 %v11148_v40, %v5831_v28  ;;  %v5810_v30 = vmul.f32 %v7956_v31, %v11111_v18  ;;  %v5763_v54 = vmul.f32 0.0078125, %v5744_v61 }
0x12b6   : > { %5869 = vst [vmem:[#allocation2 + $0x10] sm:$0xff] %v5853_v51  ;;  %v5832_v43 = vmul.f32 %v11140_v9, %v5810_v30  ;;  %v5779_v10 = vadd.f32 1e-12, %v5763_v54 }
0x12b7   : > { %v5746_v47 = vpop.xlane.xlu1 %5745 }
0x12b8   : > { %v5854_v35 = vadd.f32 %v11148_v40, %v5832_v43  ;;  %7957 = vrsqrt.f32 %v5779_v10  ;;  %v5764_v44 = vmul.f32 0.0078125, %v5746_v47 }
0x12ba   : > { %5870 = vst [vmem:[#allocation2 + $0x38] sm:$0xff] %v5854_v35  ;;  %v5780_v38 = vadd.f32 1e-12, %v5764_v44 }
0x12bb   : > { %v5748_v23 = vpop.xlane.xlu0 %5747 }
0x12bc   : > { %7959 = vrsqrt.f32 %v5780_v38  ;;  %v5765_v26 = vmul.f32 0.0078125, %v5748_v23 }
0x12be   : > { %v5781_v14 = vadd.f32 1e-12, %v5765_v26 }
0x12bf   : > { %v5750_v7 = vpop.xlane.xlu1 %5749 }
0x12c0   : > { %7961 = vrsqrt.f32 %v5781_v14  ;;  %v5766_v46 = vmul.f32 0.0078125, %v5750_v7 }
0x12c2   : > { %v5782_v18 = vadd.f32 1e-12, %v5766_v46 }
0x12c4   : > { %7963 = vrsqrt.f32 %v5782_v18 }
0x12c5   : > { %v7958_v0 = vpop.eup %7957 }
0x12c6   : > { %v5811_v48 = vmul.f32 %v7958_v0, %v11116_v8 }
0x12c8   : > { %v5833_v25 = vmul.f32 %v11140_v9, %v5811_v48 }
0x12c9   : > { %v7960_v21 = vpop.eup %7959 }
0x12ca   : > { %v5855_v6 = vadd.f32 %v11148_v40, %v5833_v25  ;;  %v5812_v57 = vmul.f32 %v7960_v21, %v11121_v3 }
0x12cc   : > { %5871 = vst [vmem:[#allocation2 + $0x60] sm:$0xff] %v5855_v6  ;;  %v5834_v22 = vmul.f32 %v11140_v9, %v5812_v57 }
0x12cd   : > { %v7962_v60 = vpop.eup %7961 }
0x12ce   : > { %v5856_v56 = vadd.f32 %v11148_v40, %v5834_v22  ;;  %v5813_v16 = vmul.f32 %v7962_v60, %v11126_v53 }
0x12d0   : > { %5872 = vst [vmem:[#allocation2 + $0x70] sm:$0xff] %v5856_v56  ;;  %v5835_v36 = vmul.f32 %v11140_v9, %v5813_v16 }
0x12d1   : > { %v7964_v13 = vpop.eup %7963 }
0x12d2   : > { %v5857_v8 = vadd.f32 %v11148_v40, %v5835_v36  ;;  %v5814_v59 = vmul.f32 %v7964_v13, %v11131_v49 }
0x12d4   : > { %5873 = vst [vmem:[#allocation2 + $0x78] sm:$0xff] %v5857_v8  ;;  %v5836_v45 = vmul.f32 %v11140_v9, %v5814_v59  ;;  %5878 = sbr.rel (%p6458_p8) target bundleno = 5268 (0x1494), region = 108 }
0x12d6   : > { %v5858_v3 = vadd.f32 %v11148_v40, %v5836_v45 }
0x12d8   : > { %5874 = vst [vmem:[#allocation2 + $0x28] sm:$0xff] %v5858_v3 }
0x12d9   : > { %v7982_v53 = vld [vmem:[%s11534_s16 + $0x38] sm:$0xff]   ;;  %v8044_v52 = vmov 0.0   ;;  %v7983_v49 = vld [vmem:[%s11534_s16 + $0x30] sm:$0xff]   ;;  %vm8045_vm3 = vmmov 0   ;;  %v7984_v9 = vld [vmem:[%s11534_s16 + $0x28] sm:$0xff]   ;;  %v5879_v34 = vpack.c.bf16 %v11152_v19, %v11152_v19 }
0x12da   : > { %7109 = vmatprep.subr.bf16.mxu0 %v8044_v52  ;;  %7129 = vmatprep.subr.bf16.mxu1 %v8044_v52  ;;  %v7990_v40 = vld [vmem:[%s11535_s29 + $0x38] sm:$0xff]   ;;  %v7985_v39 = vld [vmem:[%s11534_s16 + $0x20] sm:$0xff]   ;;  %v7991_v20 = vld [vmem:[%s11535_s29 + $0x30] sm:$0xff]  }
0x12db   : > { %7110 = vmatpush3.bf16.msra.mxu0 %v7982_v53  ;;  %7125 = vmatprep.mubr.msk.bf16.mxu0 %vm8045_vm3, %v8044_v52  ;;  %v7986_v58 = vld [vmem:[%s11534_s16 + $0x18] sm:$0xff]   ;;  %v7992_v50 = vld [vmem:[%s11535_s29 + $0x28] sm:$0xff]   ;;  %v7987_v63 = vld [vmem:[%s11534_s16 + $0x10] sm:$0xff]  }
0x12dc   : > { %7111 = vmatprep.subr.bf16.mxu0 %v8044_v52  ;;  %7145 = vmatprep.mubr.msk.bf16.mxu1 %vm8045_vm3, %v8044_v52  ;;  %v7988_v55 = vld [vmem:[%s11534_s16 + $0x8] sm:$0xff]   ;;  %v7989_v11 = vld [vmem:[%s11534_s16] sm:$0xff]   ;;  %v7994_v42 = vld [vmem:[%s11535_s29 + $0x18] sm:$0xff]  }
0x12dd   : > { %7130 = vmatpush3.bf16.msra.mxu1 %v7990_v40  ;;  %v7993_v24 = vld [vmem:[%s11535_s29 + $0x20] sm:$0xff]   ;;  %v7995_v62 = vld [vmem:[%s11535_s29 + $0x10] sm:$0xff]   ;;  %v7996_v19 = vld [vmem:[%s11535_s29 + $0x8] sm:$0xff]  }
0x12de   : > { %7131 = vmatprep.subr.bf16.mxu1 %v8044_v52  ;;  %v7997_v29 = vld [vmem:[%s11535_s29] sm:$0xff]  }
0x12df   : > { %7112 = vmatpush3.bf16.msra.mxu0 %v7983_v49  ;;  %v6459_v27 = vld [vmem:[%s11536_s11] ss:$0 sm:$0xff] }
0x12e0   : > { %7113 = vmatprep.subr.bf16.mxu0 %v8044_v52  ;;  %v6468_v12 = vld [vmem:[%s11537_s19] ss:$0 sm:$0xff] }
0x12e1   : > { %7132 = vmatpush3.bf16.msra.mxu1 %v7991_v20 }
0x12e2   : > { %7133 = vmatprep.subr.bf16.mxu1 %v8044_v52 }
0x12e3   : > { %7114 = vmatpush3.bf16.msra.mxu0 %v7984_v9 }
0x12e4   : > { %7115 = vmatprep.subr.bf16.mxu0 %v8044_v52 }
0x12e5   : > { %7134 = vmatpush3.bf16.msra.mxu1 %v7992_v50 }
0x12e6   : > { %7135 = vmatprep.subr.bf16.mxu1 %v8044_v52 }
0x12e7   : > { %7116 = vmatpush3.bf16.msra.mxu0 %v7985_v39 }
0x12e8   : > { %7117 = vmatprep.subr.bf16.mxu0 %v8044_v52 }
0x12e9   : > { %7136 = vmatpush3.bf16.msra.mxu1 %v7993_v24 }
0x12ea   : > { %7137 = vmatprep.subr.bf16.mxu1 %v8044_v52 }
0x12eb   : > { %7118 = vmatpush3.bf16.msra.mxu0 %v7986_v58 }
0x12ec   : > { %7119 = vmatprep.subr.bf16.mxu0 %v8044_v52 }
0x12ed   : > { %7138 = vmatpush3.bf16.msra.mxu1 %v7994_v42 }
0x12ee   : > { %7139 = vmatprep.subr.bf16.mxu1 %v8044_v52 }
0x12ef   : > { %7120 = vmatpush3.bf16.msra.mxu0 %v7987_v63 }
0x12f0   : > { %7121 = vmatprep.subr.bf16.mxu0 %v8044_v52 }
0x12f1   : > { %7140 = vmatpush3.bf16.msra.mxu1 %v7995_v62 }
0x12f2   : > { %7141 = vmatprep.subr.bf16.mxu1 %v8044_v52 }
0x12f3   : > { %7122 = vmatpush3.bf16.msra.mxu0 %v7988_v55 }
0x12f4   : > { %7123 = vmatprep.subr.bf16.mxu0 %v8044_v52 }
0x12f5   : > { %7142 = vmatpush3.bf16.msra.mxu1 %v7996_v19 }
0x12f6   : > { %7143 = vmatprep.subr.bf16.mxu1 %v8044_v52 }
0x12f7   : > { %7124 = vmatpush3.bf16.msra.mxu0 %v7989_v11 }
0x12f9   : > { %7144 = vmatpush3.bf16.msra.mxu1 %v7997_v29 }
0x12fa   : > { %7126 = vmatmul.mubr.bf16.vlgmr.msra.gmra.mxu0 %v5879_v34 }
0x13ba   : > { %v5985_v2 = vpop.f32.mrf.mxu0 }
0x13bb   : > { %v5986_v41 = vadd.f32 %v6459_v27, %v5985_v2 }
0x13bc   : > { %v7127_v5 = vpop.f32.mrf.mxu0 }
0x13bd   : > { %7998 = vtanh.f32 %v5986_v41 }
0x13be   : > { %v5988_v15 = vpop.f32.mrf.mxu0 }
0x13c0   : > { %v7128_v1 = vpop.f32.mrf.mxu0 }
0x13ca   : > { %v7999_v33 = vpop.eup %7998 }
0x13cb   : > { %v5992_v17 = vpack.c.bf16 %v7999_v33, %v7999_v33 }
0x13cd   : > { %7146 = vmatmul.mubr.bf16.vlgmr.msra.gmra.mxu1 %v5992_v17 }
0x148d   : > { %v6098_v37 = vpop.f32.mrf.mxu1 }
0x148e   : > { %v6099_v32 = vadd.f32 %v6468_v12, %v6098_v37 }
0x148f   : > { %v7147_v4 = vpop.f32.mrf.mxu1 }
0x1490   : > { %6104 = vst [vmem:[%s8259_s27] sm:$0xff] %v6099_v32 }
0x1491   : > { %v6101_v28 = vpop.f32.mrf.mxu1 }
0x1493   : > { %v7148_v31 = vpop.f32.mrf.mxu1 }
0x1494 PF: > { %s11538_s17 = sld [smem:[#allocation6_spill]] }
0x1495   : > { %s11539_s1 = sld [smem:[#allocation4_spill]] }
0x1496   : > { %s11540_s22 = sld [smem:[#allocation5_spill]] }
0x1497   : > { %s11541_s23 = sld [smem:[#allocation7_spill]] }
0x1498   : > { %s11542_s24 = sld [smem:[#allocation8_spill]] }
0x149a   : > { %s30_s2 = sadd.s32 1, %s11538_s17  }
0x149b   : > { %p27_p9 = scmp.ge.s32.totalorder %s30_s2, 6  }
0x149d   :  { %29 = sbr.rel (!%p27_p9) target bundleno = 15 (0xf), region = 177 }

</bundles_post_ra>
